<compile_context>
chip_gen: v7x
topology: tpu7x:2x2x1
jax: 0.10.0
libtpu: 0.0.40
codegen_flags: <defaults>
</compile_context>

<pallas_src>
import functools

import jax
import jax.numpy as jnp
from jax import lax
from jax.experimental import pallas as pl
from jax.experimental.pallas import tpu as pltpu


def _round_up(x, m):
    return (x + m - 1) // m * m


def _mm(a, b):
    # f32 weight folding at full precision (one-time prep, not on the hot path).
    return jnp.dot(a, b, precision=lax.Precision.HIGHEST)


# Canonical off-center tap order (branch_index, ky, kx), shared by the weight folding in
# prepare_params and the offset table in aspp_forward so they can never get out of sync.
_OFFCENTER_TAPS = tuple(
    (b, ky, kx) for b in range(3) for ky in range(3) for kx in range(3)
    if not (ky == 1 and kx == 1)
)


# ----------------------------------------------------------------------------
# Pallas kernel: whole fused ASPP for one (image, row-tile) grid step
# ----------------------------------------------------------------------------
def _aspp_kernel(x_ref, w_ref, s_ref, b_ref, o_ref, *, taps, th, w_img, pad):
    """Refs (leading batch dims squeezed away by pl.Squeezed()):
       x_ref: (Hp, Wp, Cin) bf16  -- spatially padded NHWC activation of ONE image (VMEM resident)
       w_ref: (T, Cin, Cp)  bf16  -- projection-folded per-tap weights
       s_ref: (1, Cp)       f32   -- BN scale (gamma / sqrt(var + eps))
       b_ref: (1, Cp)       f32   -- per-image bias: pooled-branch contribution * scale + shift
       o_ref: (th*W, Cp)    f32   -- resident output block; doubles as the f32 accumulator
    """
    i = pl.program_id(1)
    row0 = i * th + pad
    cin = x_ref.shape[-1]
    for t, (dy, dx) in enumerate(taps):
        # dx (and pad) are Python ints -> static sublane slice; only the row start is dynamic.
        patch = x_ref[pl.ds(row0 + dy, th), pl.ds(pad + dx, w_img), :]
        patch = patch.reshape(th * w_img, cin)
        contrib = jnp.dot(patch, w_ref[t], preferred_element_type=jnp.float32)
        if t == 0:
            o_ref[...] = contrib
        else:
            o_ref[...] += contrib
    # Fused BN affine (+ folded pooled-branch per-image bias) and ReLU epilogue.
    o_ref[...] = jnp.maximum(o_ref[...] * s_ref[...] + b_ref[...], 0.0)


def _pick_row_tile(h, w_img, n_batch):
    """Largest row tile th | h with (th*w) sublane-aligned and <= 1024 output rows; prefer >= 2
    grid steps when batch alone cannot feed both v7x TensorCores."""
    cands = [th for th in range(1, h + 1)
             if h % th == 0 and (th * w_img) % 8 == 0 and th * w_img <= 1024]
    if not cands:
        return h  # whole image: block dim == full array dim is always legal
    if n_batch < 2:
        multi = [th for th in cands if h // th >= 2]
        if multi:
            return max(multi)
    return max(cands)


def _aspp_pallas_call(x_pad, w_taps, scale_row, bias_img, taps, h, w_img, pad):
    n, hp, wp, cin = x_pad.shape
    t, cin2, cp = w_taps.shape
    assert cin == cin2 and t == len(taps)
    th = _pick_row_tile(h, w_img, n)
    tm = th * w_img
    hw = h * w_img
    grid = (n, h // th)

    # Explicit VMEM budget (double-buffered blocks), capped for v7x's 64 MiB/TC.
    # TODO(synk): at production spatial sizes the whole padded image no longer fits VMEM; stream
    # row blocks of x_pad with a manual pl.ANY + make_async_copy pipeline instead.
    needed = 2 * (hp * wp * cin * 2 + t * cin * cp * 2 + tm * cp * 4 + 2 * cp * 4)
    vmem_limit = int(min(max(needed + (4 << 20), 16 << 20), 40 << 20))

    kernel = functools.partial(_aspp_kernel, taps=tuple(taps), th=th, w_img=w_img, pad=pad)
    return pl.pallas_call(
        kernel,
        out_shape=jax.ShapeDtypeStruct((n, hw, cp), jnp.float32),
        grid_spec=pltpu.PrefetchScalarGridSpec(
            num_scalar_prefetch=0,
            grid=grid,
            in_specs=[
                pl.BlockSpec((pl.Squeezed(), hp, wp, cin), lambda b, i: (b, 0, 0, 0)),
                pl.BlockSpec((t, cin, cp), lambda b, i: (0, 0, 0)),
                pl.BlockSpec((1, cp), lambda b, i: (0, 0)),
                pl.BlockSpec((pl.Squeezed(), 1, cp), lambda b, i: (b, 0, 0)),
            ],
            out_specs=pl.BlockSpec((pl.Squeezed(), tm, cp), lambda b, i: (b, i, 0)),
        ),
        compiler_params=pltpu.CompilerParams(
            dimension_semantics=("parallel", "parallel"),
            vmem_limit_bytes=vmem_limit,
        ),
    )(x_pad, w_taps, scale_row, bias_img)


# ----------------------------------------------------------------------------
# Parameters (PyTorch layout) + one-time inference prep (weight folding)
# ----------------------------------------------------------------------------
def init_params(key, in_channels, out_channels=128):
    """Deterministic ASPP parameters in PyTorch layout (OIHW conv weights, BN running stats)."""
    ks = jax.random.split(key, 10)
    conv = lambda k, co, ci, kh, kw: 0.05 * jax.random.normal(k, (co, ci, kh, kw), jnp.float32)
    return {
        "aspp1_w": conv(ks[0], out_channels, in_channels, 1, 1),
        "aspp2_w": conv(ks[1], out_channels, in_channels, 3, 3),
        "aspp3_w": conv(ks[2], out_channels, in_channels, 3, 3),
        "aspp4_w": conv(ks[3], out_channels, in_channels, 3, 3),
        "pool_w": conv(ks[4], out_channels, in_channels, 1, 1),
        "proj_w": conv(ks[5], out_channels, 5 * out_channels, 1, 1),
        "bn_gamma": 1.0 + 0.1 * jax.random.normal(ks[6], (out_channels,), jnp.float32),
        "bn_beta": 0.1 * jax.random.normal(ks[7], (out_channels,), jnp.float32),
        "bn_mean": 0.1 * jax.random.normal(ks[8], (out_channels,), jnp.float32),
        "bn_var": jnp.abs(1.0 + 0.1 * jax.random.normal(ks[9], (out_channels,), jnp.float32)),
    }


def prepare_params(p, eps=1e-5):
    """Hoisted one-time prep: fold the 1x1 projection into every branch tap (everything before BN
    is linear), fold eval-mode BN into a per-channel affine, pre-cast folded weights to bf16."""
    C, cin = p["aspp1_w"].shape[0], p["aspp1_w"].shape[1]
    cp = _round_up(C, 128)

    proj = p["proj_w"][:, :, 0, 0]                                  # [C, 5C]
    wp_slices = [proj[:, k * C:(k + 1) * C].T for k in range(5)]    # per-branch [C, C]

    dil = [p["aspp2_w"], p["aspp3_w"], p["aspp4_w"]]                # each [C, Cin, 3, 3]

    # Center tap: 1x1 branch + the three dilated-conv center taps (all read the unshifted input).
    center = _mm(p["aspp1_w"][:, :, 0, 0].T, wp_slices[0])
    for b in range(3):
        center = center + _mm(dil[b][:, :, 1, 1].T, wp_slices[1 + b])
    tap_ws = [center]
    for (b, ky, kx) in _OFFCENTER_TAPS:
        tap_ws.append(_mm(dil[b][:, :, ky, kx].T, wp_slices[1 + b]))
    w_taps = jnp.stack(tap_ws, axis=0)                              # [25, Cin, C] f32
    if cp != C:
        w_taps = jnp.pad(w_taps, ((0, 0), (0, 0), (0, cp - C)))
    w_taps = w_taps.astype(jnp.bfloat16)

    scale = p["bn_gamma"] / jnp.sqrt(p["bn_var"] + eps)
    shift = p["bn_beta"] - p["bn_mean"] * scale
    w_pool_eff = _mm(p["pool_w"][:, :, 0, 0].T, wp_slices[4])       # [Cin, C] f32 (bias path)

    return {
        "w_taps": w_taps,            # [25, Cin, Cp] bf16
        "w_pool_eff": w_pool_eff,    # [Cin, C]      f32
        "bn_scale": scale,           # [C]           f32
        "bn_shift": shift,           # [C]           f32
    }


# ----------------------------------------------------------------------------
# Forward pass (mirrors ASPP.forward; eval-mode BN)
# ----------------------------------------------------------------------------
def aspp_forward(prepared, x_nchw, atrous_rates=(6, 12, 18)):
    n, cin, h, w = x_nchw.shape
    C = prepared["bn_scale"].shape[0]
    cp = prepared["w_taps"].shape[-1]
    pad = max(atrous_rates)

    x = jnp.transpose(x_nchw, (0, 2, 3, 1)).astype(jnp.float32)     # NCHW -> NHWC

    # Branch 5: global avg pool -> 1x1 conv -> bilinear upsample from 1x1 (exact broadcast),
    # folded through the projection + BN into a per-image bias applied before the ReLU.
    pooled = jnp.mean(x, axis=(1, 2))                               # [n, cin] (f32 mean)
    b5 = pooled @ prepared["w_pool_eff"]                            # [n, C]
    bias_img = b5 * prepared["bn_scale"] + prepared["bn_shift"]     # [n, C]
    if cp != C:
        bias_img = jnp.pad(bias_img, ((0, 0), (0, cp - C)))
        scale_row = jnp.pad(prepared["bn_scale"], (0, cp - C)).reshape(1, cp)
    else:
        scale_row = prepared["bn_scale"].reshape(1, cp)
    bias_img = bias_img.reshape(n, 1, cp)

    # Single spatially padded bf16 NHWC copy; every conv tap reads shifted windows of it inside
    # the kernel, so no im2col patches / branch outputs / concat buffer ever hit HBM.
    hp = _round_up(h + 2 * pad, 8)
    wpd = _round_up(w + 2 * pad, 8)
    x_pad = jnp.pad(x.astype(jnp.bfloat16),
                    ((0, 0), (pad, hp - h - pad), (pad, wpd - w - pad), (0, 0)))

    taps = [(0, 0)] + [((ky - 1) * atrous_rates[b], (kx - 1) * atrous_rates[b])
                       for (b, ky, kx) in _OFFCENTER_TAPS]

    out = _aspp_pallas_call(x_pad, prepared["w_taps"], scale_row, bias_img, taps, h, w, pad)
    out = out[:, :, :C].reshape(n, h, w, C)
    return jnp.transpose(out, (0, 3, 1, 2))                         # NHWC -> NCHW


# ----------------------------------------------------------------------------
# Straightforward f32 XLA reference (mirrors the PyTorch module; eval-mode BN)
# ----------------------------------------------------------------------------
def _reference_aspp(params, x_nchw, atrous_rates=(6, 12, 18), eps=1e-5):
    def conv(x, wgt, rate=1):
        p = rate * (wgt.shape[2] // 2)
        return lax.conv_general_dilated(
            x, wgt, window_strides=(1, 1), padding=[(p, p), (p, p)],
            rhs_dilation=(rate, rate), dimension_numbers=("NCHW", "OIHW", "NCHW"),
            precision=lax.Precision.HIGHEST)

    x1 = conv(x_nchw, params["aspp1_w"])
    x2 = conv(x_nchw, params["aspp2_w"], atrous_rates[0])
    x3 = conv(x_nchw, params["aspp3_w"], atrous_rates[1])
    x4 = conv(x_nchw, params["aspp4_w"], atrous_rates[2])
    pooled = jnp.mean(x_nchw, axis=(2, 3), keepdims=True)
    x5 = conv(pooled, params["pool_w"])
    x5 = jnp.broadcast_to(x5, x5.shape[:2] + x_nchw.shape[2:])
    cat = jnp.concatenate([x1, x2, x3, x4, x5], axis=1)
    y = conv(cat, params["proj_w"])
    scale = params["bn_gamma"] / jnp.sqrt(params["bn_var"] + eps)
    shift = params["bn_beta"] - params["bn_mean"] * scale
    y = y * scale[None, :, None, None] + shift[None, :, None, None]
    return jnp.maximum(y, 0.0)


if __name__ == "__main__":
    key = jax.random.PRNGKey(0)
    pkey, xkey = jax.random.split(key)
    in_channels, out_channels, H, W, batch = 128, 128, 16, 16, 2

    params = init_params(pkey, in_channels, out_channels)
    prepared = prepare_params(params)
    x = jax.random.normal(xkey, (batch, in_channels, H, W), jnp.float32)

    fwd = jax.jit(aspp_forward)
    out = jax.block_until_ready(fwd(prepared, x))

    assert out.shape == (batch, out_channels, H, W), out.shape
    assert bool(jnp.all(jnp.isfinite(out)))

    # Loose-tolerance check vs the f32 reference (kernel feeds bf16 operands to the MXU).
    ref = jax.block_until_ready(jax.jit(_reference_aspp)(params, x))
    max_err = float(jnp.max(jnp.abs(out - ref)))
    assert max_err < 0.1, f"max abs error vs reference: {max_err}"
    print("KERNEL_OK")
</pallas_src>

<mosaic_0001>
module attributes {stable_mosaic.version = 11 : i64} {
  func.func @_aspp_kernel(%arg0: i32, %arg1: i32, %arg2: memref<1x56x56x128xbf16, #tpu.memory_space<vmem>>, %arg3: memref<25x128x128xbf16, #tpu.memory_space<vmem>>, %arg4: memref<1x128xf32, #tpu.memory_space<vmem>>, %arg5: memref<1x1x128xf32, #tpu.memory_space<vmem>>, %arg6: memref<1x256x128xf32, #tpu.memory_space<vmem>>) attributes {dimension_semantics = [#tpu.dimension_semantics<parallel>, #tpu.dimension_semantics<parallel>], iteration_bounds = array<i64: 2, 1>, scalar_prefetch = 0 : i64, scratch_operands = 0 : i64, tpu.core_type = #tpu.core_type<tc>, window_params = [{transform_indices = @transform_0, window_bounds = array<i64: 1, 56, 56, 128>}, {pipeline_mode = #tpu.pipeline_mode<synchronous>, transform_indices = @transform_1, window_bounds = array<i64: 25, 128, 128>}, {pipeline_mode = #tpu.pipeline_mode<synchronous>, transform_indices = @transform_2, window_bounds = array<i64: 1, 128>}, {transform_indices = @transform_3, window_bounds = array<i64: 1, 1, 128>}, {transform_indices = @transform_4, window_bounds = array<i64: 1, 256, 128>}]} {
    %c16_i32 = arith.constant 16 : i32
    %0 = arith.muli %arg1, %c16_i32 : i32
    %c18_i32 = arith.constant 18 : i32
    %1 = arith.addi %0, %c18_i32 : i32
    %c0_i32 = arith.constant 0 : i32
    %2 = arith.addi %1, %c0_i32 : i32
    %c0 = arith.constant 0 : index
    %3 = arith.index_cast %2 : i32 to index
    %c18 = arith.constant 18 : index
    %c0_0 = arith.constant 0 : index
    %4 = vector.load %arg2[%c0, %3, %c18, %c0_0] : memref<1x56x56x128xbf16, #tpu.memory_space<vmem>>, vector<1x16x16x128xbf16>
    %5 = vector.shape_cast %4 : vector<1x16x16x128xbf16> to vector<16x16x128xbf16>
    %6 = vector.shape_cast %5 : vector<16x16x128xbf16> to vector<256x128xbf16>
    %c0_1 = arith.constant 0 : index
    %c0_2 = arith.constant 0 : index
    %c0_3 = arith.constant 0 : index
    %7 = vector.load %arg3[%c0_1, %c0_2, %c0_3] : memref<25x128x128xbf16, #tpu.memory_space<vmem>>, vector<1x128x128xbf16>
    %8 = vector.shape_cast %7 : vector<1x128x128xbf16> to vector<128x128xbf16>
    %cst = arith.constant dense<0.000000e+00> : vector<256x128xf32>
    %9 = tpu.matmul %6, %8, %cst {dimension_numbers = #tpu.dot_dimension_numbers<[1], [0], [0], [1], [0, 0, 1, 1], [], []>} : vector<256x128xbf16>, vector<128x128xbf16>, vector<256x128xf32> -> vector<256x128xf32>
    %c0_4 = arith.constant 0 : index
    %c0_5 = arith.constant 0 : index
    %c0_6 = arith.constant 0 : index
    %10 = vector.load %arg6[%c0_4, %c0_5, %c0_6] : memref<1x256x128xf32, #tpu.memory_space<vmem>>, vector<1x256x128xf32>
    %11 = vector.shape_cast %10 : vector<1x256x128xf32> to vector<256x128xf32>
    %12 = vector.shape_cast %9 : vector<256x128xf32> to vector<1x256x128xf32>
    tpu.vector_store %arg6[%c0_4, %c0_5, %c0_6], %12 {strides = array<i32>} : memref<1x256x128xf32, #tpu.memory_space<vmem>>, vector<1x256x128xf32>,
    %c-6_i32 = arith.constant -6 : i32
    %13 = arith.addi %1, %c-6_i32 : i32
    %c0_7 = arith.constant 0 : index
    %14 = arith.index_cast %13 : i32 to index
    %c12 = arith.constant 12 : index
    %c0_8 = arith.constant 0 : index
    %15 = vector.load %arg2[%c0_7, %14, %c12, %c0_8] : memref<1x56x56x128xbf16, #tpu.memory_space<vmem>>, vector<1x16x16x128xbf16>
    %16 = vector.shape_cast %15 : vector<1x16x16x128xbf16> to vector<16x16x128xbf16>
    %17 = vector.shape_cast %16 : vector<16x16x128xbf16> to vector<256x128xbf16>
    %c1 = arith.constant 1 : index
    %c0_9 = arith.constant 0 : index
    %c0_10 = arith.constant 0 : index
    %18 = vector.load %arg3[%c1, %c0_9, %c0_10] : memref<25x128x128xbf16, #tpu.memory_space<vmem>>, vector<1x128x128xbf16>
    %19 = vector.shape_cast %18 : vector<1x128x128xbf16> to vector<128x128xbf16>
    %cst_11 = arith.constant dense<0.000000e+00> : vector<256x128xf32>
    %20 = tpu.matmul %17, %19, %cst_11 {dimension_numbers = #tpu.dot_dimension_numbers<[1], [0], [0], [1], [0, 0, 1, 1], [], []>} : vector<256x128xbf16>, vector<128x128xbf16>, vector<256x128xf32> -> vector<256x128xf32>
    %c0_12 = arith.constant 0 : index
    %c0_13 = arith.constant 0 : index
    %c0_14 = arith.constant 0 : index
    %21 = vector.load %arg6[%c0_12, %c0_13, %c0_14] : memref<1x256x128xf32, #tpu.memory_space<vmem>>, vector<1x256x128xf32>
    %22 = vector.shape_cast %21 : vector<1x256x128xf32> to vector<256x128xf32>
    %23 = arith.addf %22, %20 : vector<256x128xf32>
    %c0_15 = arith.constant 0 : index
    %c0_16 = arith.constant 0 : index
    %c0_17 = arith.constant 0 : index
    %24 = vector.load %arg6[%c0_15, %c0_16, %c0_17] : memref<1x256x128xf32, #tpu.memory_space<vmem>>, vector<1x256x128xf32>
    %25 = vector.shape_cast %24 : vector<1x256x128xf32> to vector<256x128xf32>
    %26 = vector.shape_cast %23 : vector<256x128xf32> to vector<1x256x128xf32>
    tpu.vector_store %arg6[%c0_15, %c0_16, %c0_17], %26 {strides = array<i32>} : memref<1x256x128xf32, #tpu.memory_space<vmem>>, vector<1x256x128xf32>,
    %c-6_i32_18 = arith.constant -6 : i32
    %27 = arith.addi %1, %c-6_i32_18 : i32
    %c0_19 = arith.constant 0 : index
    %28 = arith.index_cast %27 : i32 to index
    %c18_20 = arith.constant 18 : index
    %c0_21 = arith.constant 0 : index
    %29 = vector.load %arg2[%c0_19, %28, %c18_20, %c0_21] : memref<1x56x56x128xbf16, #tpu.memory_space<vmem>>, vector<1x16x16x128xbf16>
    %30 = vector.shape_cast %29 : vector<1x16x16x128xbf16> to vector<16x16x128xbf16>
    %31 = vector.shape_cast %30 : vector<16x16x128xbf16> to vector<256x128xbf16>
    %c2 = arith.constant 2 : index
    %c0_22 = arith.constant 0 : index
    %c0_23 = arith.constant 0 : index
    %32 = vector.load %arg3[%c2, %c0_22, %c0_23] : memref<25x128x128xbf16, #tpu.memory_space<vmem>>, vector<1x128x128xbf16>
    %33 = vector.shape_cast %32 : vector<1x128x128xbf16> to vector<128x128xbf16>
    %cst_24 = arith.constant dense<0.000000e+00> : vector<256x128xf32>
    %34 = tpu.matmul %31, %33, %cst_24 {dimension_numbers = #tpu.dot_dimension_numbers<[1], [0], [0], [1], [0, 0, 1, 1], [], []>} : vector<256x128xbf16>, vector<128x128xbf16>, vector<256x128xf32> -> vector<256x128xf32>
    %c0_25 = arith.constant 0 : index
    %c0_26 = arith.constant 0 : index
    %c0_27 = arith.constant 0 : index
    %35 = vector.load %arg6[%c0_25, %c0_26, %c0_27] : memref<1x256x128xf32, #tpu.memory_space<vmem>>, vector<1x256x128xf32>
    %36 = vector.shape_cast %35 : vector<1x256x128xf32> to vector<256x128xf32>
    %37 = arith.addf %36, %34 : vector<256x128xf32>
    %c0_28 = arith.constant 0 : index
    %c0_29 = arith.constant 0 : index
    %c0_30 = arith.constant 0 : index
    %38 = vector.load %arg6[%c0_28, %c0_29, %c0_30] : memref<1x256x128xf32, #tpu.memory_space<vmem>>, vector<1x256x128xf32>
    %39 = vector.shape_cast %38 : vector<1x256x128xf32> to vector<256x128xf32>
    %40 = vector.shape_cast %37 : vector<256x128xf32> to vector<1x256x128xf32>
    tpu.vector_store %arg6[%c0_28, %c0_29, %c0_30], %40 {strides = array<i32>} : memref<1x256x128xf32, #tpu.memory_space<vmem>>, vector<1x256x128xf32>,
    %c-6_i32_31 = arith.constant -6 : i32
    %41 = arith.addi %1, %c-6_i32_31 : i32
    %c0_32 = arith.constant 0 : index
    %42 = arith.index_cast %41 : i32 to index
    %c24 = arith.constant 24 : index
    %c0_33 = arith.constant 0 : index
    %43 = vector.load %arg2[%c0_32, %42, %c24, %c0_33] : memref<1x56x56x128xbf16, #tpu.memory_space<vmem>>, vector<1x16x16x128xbf16>
    %44 = vector.shape_cast %43 : vector<1x16x16x128xbf16> to vector<16x16x128xbf16>
    %45 = vector.shape_cast %44 : vector<16x16x128xbf16> to vector<256x128xbf16>
    %c3 = arith.constant 3 : index
    %c0_34 = arith.constant 0 : index
    %c0_35 = arith.constant 0 : index
    %46 = vector.load %arg3[%c3, %c0_34, %c0_35] : memref<25x128x128xbf16, #tpu.memory_space<vmem>>, vector<1x128x128xbf16>
    %47 = vector.shape_cast %46 : vector<1x128x128xbf16> to vector<128x128xbf16>
    %cst_36 = arith.constant dense<0.000000e+00> : vector<256x128xf32>
    %48 = tpu.matmul %45, %47, %cst_36 {dimension_numbers = #tpu.dot_dimension_numbers<[1], [0], [0], [1], [0, 0, 1, 1], [], []>} : vector<256x128xbf16>, vector<128x128xbf16>, vector<256x128xf32> -> vector<256x128xf32>
    %c0_37 = arith.constant 0 : index
    %c0_38 = arith.constant 0 : index
    %c0_39 = arith.constant 0 : index
    %49 = vector.load %arg6[%c0_37, %c0_38, %c0_39] : memref<1x256x128xf32, #tpu.memory_space<vmem>>, vector<1x256x128xf32>
    %50 = vector.shape_cast %49 : vector<1x256x128xf32> to vector<256x128xf32>
    %51 = arith.addf %50, %48 : vector<256x128xf32>
    %c0_40 = arith.constant 0 : index
    %c0_41 = arith.constant 0 : index
    %c0_42 = arith.constant 0 : index
    %52 = vector.load %arg6[%c0_40, %c0_41, %c0_42] : memref<1x256x128xf32, #tpu.memory_space<vmem>>, vector<1x256x128xf32>
    %53 = vector.shape_cast %52 : vector<1x256x128xf32> to vector<256x128xf32>
    %54 = vector.shape_cast %51 : vector<256x128xf32> to vector<1x256x128xf32>
    tpu.vector_store %arg6[%c0_40, %c0_41, %c0_42], %54 {strides = array<i32>} : memref<1x256x128xf32, #tpu.memory_space<vmem>>, vector<1x256x128xf32>,
    %c0_i32_43 = arith.constant 0 : i32
    %55 = arith.addi %1, %c0_i32_43 : i32
    %c0_44 = arith.constant 0 : index
    %56 = arith.index_cast %55 : i32 to index
    %c12_45 = arith.constant 12 : index
    %c0_46 = arith.constant 0 : index
    %57 = vector.load %arg2[%c0_44, %56, %c12_45, %c0_46] : memref<1x56x56x128xbf16, #tpu.memory_space<vmem>>, vector<1x16x16x128xbf16>
    %58 = vector.shape_cast %57 : vector<1x16x16x128xbf16> to vector<16x16x128xbf16>
    %59 = vector.shape_cast %58 : vector<16x16x128xbf16> to vector<256x128xbf16>
    %c4 = arith.constant 4 : index
    %c0_47 = arith.constant 0 : index
    %c0_48 = arith.constant 0 : index
    %60 = vector.load %arg3[%c4, %c0_47, %c0_48] : memref<25x128x128xbf16, #tpu.memory_space<vmem>>, vector<1x128x128xbf16>
    %61 = vector.shape_cast %60 : vector<1x128x128xbf16> to vector<128x128xbf16>
    %cst_49 = arith.constant dense<0.000000e+00> : vector<256x128xf32>
    %62 = tpu.matmul %59, %61, %cst_49 {dimension_numbers = #tpu.dot_dimension_numbers<[1], [0], [0], [1], [0, 0, 1, 1], [], []>} : vector<256x128xbf16>, vector<128x128xbf16>, vector<256x128xf32> -> vector<256x128xf32>
    %c0_50 = arith.constant 0 : index
    %c0_51 = arith.constant 0 : index
    %c0_52 = arith.constant 0 : index
    %63 = vector.load %arg6[%c0_50, %c0_51, %c0_52] : memref<1x256x128xf32, #tpu.memory_space<vmem>>, vector<1x256x128xf32>
    %64 = vector.shape_cast %63 : vector<1x256x128xf32> to vector<256x128xf32>
    %65 = arith.addf %64, %62 : vector<256x128xf32>
    %c0_53 = arith.constant 0 : index
    %c0_54 = arith.constant 0 : index
    %c0_55 = arith.constant 0 : index
    %66 = vector.load %arg6[%c0_53, %c0_54, %c0_55] : memref<1x256x128xf32, #tpu.memory_space<vmem>>, vector<1x256x128xf32>
    %67 = vector.shape_cast %66 : vector<1x256x128xf32> to vector<256x128xf32>
    %68 = vector.shape_cast %65 : vector<256x128xf32> to vector<1x256x128xf32>
    tpu.vector_store %arg6[%c0_53, %c0_54, %c0_55], %68 {strides = array<i32>} : memref<1x256x128xf32, #tpu.memory_space<vmem>>, vector<1x256x128xf32>,
    %c0_i32_56 = arith.constant 0 : i32
    %69 = arith.addi %1, %c0_i32_56 : i32
    %c0_57 = arith.constant 0 : index
    %70 = arith.index_cast %69 : i32 to index
    %c24_58 = arith.constant 24 : index
    %c0_59 = arith.constant 0 : index
    %71 = vector.load %arg2[%c0_57, %70, %c24_58, %c0_59] : memref<1x56x56x128xbf16, #tpu.memory_space<vmem>>, vector<1x16x16x128xbf16>
    %72 = vector.shape_cast %71 : vector<1x16x16x128xbf16> to vector<16x16x128xbf16>
    %73 = vector.shape_cast %72 : vector<16x16x128xbf16> to vector<256x128xbf16>
    %c5 = arith.constant 5 : index
    %c0_60 = arith.constant 0 : index
    %c0_61 = arith.constant 0 : index
    %74 = vector.load %arg3[%c5, %c0_60, %c0_61] : memref<25x128x128xbf16, #tpu.memory_space<vmem>>, vector<1x128x128xbf16>
    %75 = vector.shape_cast %74 : vector<1x128x128xbf16> to vector<128x128xbf16>
    %cst_62 = arith.constant dense<0.000000e+00> : vector<256x128xf32>
    %76 = tpu.matmul %73, %75, %cst_62 {dimension_numbers = #tpu.dot_dimension_numbers<[1], [0], [0], [1], [0, 0, 1, 1], [], []>} : vector<256x128xbf16>, vector<128x128xbf16>, vector<256x128xf32> -> vector<256x128xf32>
    %c0_63 = arith.constant 0 : index
    %c0_64 = arith.constant 0 : index
    %c0_65 = arith.constant 0 : index
    %77 = vector.load %arg6[%c0_63, %c0_64, %c0_65] : memref<1x256x128xf32, #tpu.memory_space<vmem>>, vector<1x256x128xf32>
    %78 = vector.shape_cast %77 : vector<1x256x128xf32> to vector<256x128xf32>
    %79 = arith.addf %78, %76 : vector<256x128xf32>
    %c0_66 = arith.constant 0 : index
    %c0_67 = arith.constant 0 : index
    %c0_68 = arith.constant 0 : index
    %80 = vector.load %arg6[%c0_66, %c0_67, %c0_68] : memref<1x256x128xf32, #tpu.memory_space<vmem>>, vector<1x256x128xf32>
    %81 = vector.shape_cast %80 : vector<1x256x128xf32> to vector<256x128xf32>
    %82 = vector.shape_cast %79 : vector<256x128xf32> to vector<1x256x128xf32>
    tpu.vector_store %arg6[%c0_66, %c0_67, %c0_68], %82 {strides = array<i32>} : memref<1x256x128xf32, #tpu.memory_space<vmem>>, vector<1x256x128xf32>,
    %c6_i32 = arith.constant 6 : i32
    %83 = arith.addi %1, %c6_i32 : i32
    %c0_69 = arith.constant 0 : index
    %84 = arith.index_cast %83 : i32 to index
    %c12_70 = arith.constant 12 : index
    %c0_71 = arith.constant 0 : index
    %85 = vector.load %arg2[%c0_69, %84, %c12_70, %c0_71] : memref<1x56x56x128xbf16, #tpu.memory_space<vmem>>, vector<1x16x16x128xbf16>
    %86 = vector.shape_cast %85 : vector<1x16x16x128xbf16> to vector<16x16x128xbf16>
    %87 = vector.shape_cast %86 : vector<16x16x128xbf16> to vector<256x128xbf16>
    %c6 = arith.constant 6 : index
    %c0_72 = arith.constant 0 : index
    %c0_73 = arith.constant 0 : index
    %88 = vector.load %arg3[%c6, %c0_72, %c0_73] : memref<25x128x128xbf16, #tpu.memory_space<vmem>>, vector<1x128x128xbf16>
    %89 = vector.shape_cast %88 : vector<1x128x128xbf16> to vector<128x128xbf16>
    %cst_74 = arith.constant dense<0.000000e+00> : vector<256x128xf32>
    %90 = tpu.matmul %87, %89, %cst_74 {dimension_numbers = #tpu.dot_dimension_numbers<[1], [0], [0], [1], [0, 0, 1, 1], [], []>} : vector<256x128xbf16>, vector<128x128xbf16>, vector<256x128xf32> -> vector<256x128xf32>
    %c0_75 = arith.constant 0 : index
    %c0_76 = arith.constant 0 : index
    %c0_77 = arith.constant 0 : index
    %91 = vector.load %arg6[%c0_75, %c0_76, %c0_77] : memref<1x256x128xf32, #tpu.memory_space<vmem>>, vector<1x256x128xf32>
    %92 = vector.shape_cast %91 : vector<1x256x128xf32> to vector<256x128xf32>
    %93 = arith.addf %92, %90 : vector<256x128xf32>
    %c0_78 = arith.constant 0 : index
    %c0_79 = arith.constant 0 : index
    %c0_80 = arith.constant 0 : index
    %94 = vector.load %arg6[%c0_78, %c0_79, %c0_80] : memref<1x256x128xf32, #tpu.memory_space<vmem>>, vector<1x256x128xf32>
    %95 = vector.shape_cast %94 : vector<1x256x128xf32> to vector<256x128xf32>
    %96 = vector.shape_cast %93 : vector<256x128xf32> to vector<1x256x128xf32>
    tpu.vector_store %arg6[%c0_78, %c0_79, %c0_80], %96 {strides = array<i32>} : memref<1x256x128xf32, #tpu.memory_space<vmem>>, vector<1x256x128xf32>,
    %c6_i32_81 = arith.constant 6 : i32
    %97 = arith.addi %1, %c6_i32_81 : i32
    %c0_82 = arith.constant 0 : index
    %98 = arith.index_cast %97 : i32 to index
    %c18_83 = arith.constant 18 : index
    %c0_84 = arith.constant 0 : index
    %99 = vector.load %arg2[%c0_82, %98, %c18_83, %c0_84] : memref<1x56x56x128xbf16, #tpu.memory_space<vmem>>, vector<1x16x16x128xbf16>
    %100 = vector.shape_cast %99 : vector<1x16x16x128xbf16> to vector<16x16x128xbf16>
    %101 = vector.shape_cast %100 : vector<16x16x128xbf16> to vector<256x128xbf16>
    %c7 = arith.constant 7 : index
    %c0_85 = arith.constant 0 : index
    %c0_86 = arith.constant 0 : index
    %102 = vector.load %arg3[%c7, %c0_85, %c0_86] : memref<25x128x128xbf16, #tpu.memory_space<vmem>>, vector<1x128x128xbf16>
    %103 = vector.shape_cast %102 : vector<1x128x128xbf16> to vector<128x128xbf16>
    %cst_87 = arith.constant dense<0.000000e+00> : vector<256x128xf32>
    %104 = tpu.matmul %101, %103, %cst_87 {dimension_numbers = #tpu.dot_dimension_numbers<[1], [0], [0], [1], [0, 0, 1, 1], [], []>} : vector<256x128xbf16>, vector<128x128xbf16>, vector<256x128xf32> -> vector<256x128xf32>
    %c0_88 = arith.constant 0 : index
    %c0_89 = arith.constant 0 : index
    %c0_90 = arith.constant 0 : index
    %105 = vector.load %arg6[%c0_88, %c0_89, %c0_90] : memref<1x256x128xf32, #tpu.memory_space<vmem>>, vector<1x256x128xf32>
    %106 = vector.shape_cast %105 : vector<1x256x128xf32> to vector<256x128xf32>
    %107 = arith.addf %106, %104 : vector<256x128xf32>
    %c0_91 = arith.constant 0 : index
    %c0_92 = arith.constant 0 : index
    %c0_93 = arith.constant 0 : index
    %108 = vector.load %arg6[%c0_91, %c0_92, %c0_93] : memref<1x256x128xf32, #tpu.memory_space<vmem>>, vector<1x256x128xf32>
    %109 = vector.shape_cast %108 : vector<1x256x128xf32> to vector<256x128xf32>
    %110 = vector.shape_cast %107 : vector<256x128xf32> to vector<1x256x128xf32>
    tpu.vector_store %arg6[%c0_91, %c0_92, %c0_93], %110 {strides = array<i32>} : memref<1x256x128xf32, #tpu.memory_space<vmem>>, vector<1x256x128xf32>,
    %c6_i32_94 = arith.constant 6 : i32
    %111 = arith.addi %1, %c6_i32_94 : i32
    %c0_95 = arith.constant 0 : index
    %112 = arith.index_cast %111 : i32 to index
    %c24_96 = arith.constant 24 : index
    %c0_97 = arith.constant 0 : index
    %113 = vector.load %arg2[%c0_95, %112, %c24_96, %c0_97] : memref<1x56x56x128xbf16, #tpu.memory_space<vmem>>, vector<1x16x16x128xbf16>
    %114 = vector.shape_cast %113 : vector<1x16x16x128xbf16> to vector<16x16x128xbf16>
    %115 = vector.shape_cast %114 : vector<16x16x128xbf16> to vector<256x128xbf16>
    %c8 = arith.constant 8 : index
    %c0_98 = arith.constant 0 : index
    %c0_99 = arith.constant 0 : index
    %116 = vector.load %arg3[%c8, %c0_98, %c0_99] : memref<25x128x128xbf16, #tpu.memory_space<vmem>>, vector<1x128x128xbf16>
    %117 = vector.shape_cast %116 : vector<1x128x128xbf16> to vector<128x128xbf16>
    %cst_100 = arith.constant dense<0.000000e+00> : vector<256x128xf32>
    %118 = tpu.matmul %115, %117, %cst_100 {dimension_numbers = #tpu.dot_dimension_numbers<[1], [0], [0], [1], [0, 0, 1, 1], [], []>} : vector<256x128xbf16>, vector<128x128xbf16>, vector<256x128xf32> -> vector<256x128xf32>
    %c0_101 = arith.constant 0 : index
    %c0_102 = arith.constant 0 : index
    %c0_103 = arith.constant 0 : index
    %119 = vector.load %arg6[%c0_101, %c0_102, %c0_103] : memref<1x256x128xf32, #tpu.memory_space<vmem>>, vector<1x256x128xf32>
    %120 = vector.shape_cast %119 : vector<1x256x128xf32> to vector<256x128xf32>
    %121 = arith.addf %120, %118 : vector<256x128xf32>
    %c0_104 = arith.constant 0 : index
    %c0_105 = arith.constant 0 : index
    %c0_106 = arith.constant 0 : index
    %122 = vector.load %arg6[%c0_104, %c0_105, %c0_106] : memref<1x256x128xf32, #tpu.memory_space<vmem>>, vector<1x256x128xf32>
    %123 = vector.shape_cast %122 : vector<1x256x128xf32> to vector<256x128xf32>
    %124 = vector.shape_cast %121 : vector<256x128xf32> to vector<1x256x128xf32>
    tpu.vector_store %arg6[%c0_104, %c0_105, %c0_106], %124 {strides = array<i32>} : memref<1x256x128xf32, #tpu.memory_space<vmem>>, vector<1x256x128xf32>,
    %c-12_i32 = arith.constant -12 : i32
    %125 = arith.addi %1, %c-12_i32 : i32
    %c0_107 = arith.constant 0 : index
    %126 = arith.index_cast %125 : i32 to index
    %c6_108 = arith.constant 6 : index
    %c0_109 = arith.constant 0 : index
    %127 = vector.load %arg2[%c0_107, %126, %c6_108, %c0_109] : memref<1x56x56x128xbf16, #tpu.memory_space<vmem>>, vector<1x16x16x128xbf16>
    %128 = vector.shape_cast %127 : vector<1x16x16x128xbf16> to vector<16x16x128xbf16>
    %129 = vector.shape_cast %128 : vector<16x16x128xbf16> to vector<256x128xbf16>
    %c9 = arith.constant 9 : index
    %c0_110 = arith.constant 0 : index
    %c0_111 = arith.constant 0 : index
    %130 = vector.load %arg3[%c9, %c0_110, %c0_111] : memref<25x128x128xbf16, #tpu.memory_space<vmem>>, vector<1x128x128xbf16>
    %131 = vector.shape_cast %130 : vector<1x128x128xbf16> to vector<128x128xbf16>
    %cst_112 = arith.constant dense<0.000000e+00> : vector<256x128xf32>
    %132 = tpu.matmul %129, %131, %cst_112 {dimension_numbers = #tpu.dot_dimension_numbers<[1], [0], [0], [1], [0, 0, 1, 1], [], []>} : vector<256x128xbf16>, vector<128x128xbf16>, vector<256x128xf32> -> vector<256x128xf32>
    %c0_113 = arith.constant 0 : index
    %c0_114 = arith.constant 0 : index
    %c0_115 = arith.constant 0 : index
    %133 = vector.load %arg6[%c0_113, %c0_114, %c0_115] : memref<1x256x128xf32, #tpu.memory_space<vmem>>, vector<1x256x128xf32>
    %134 = vector.shape_cast %133 : vector<1x256x128xf32> to vector<256x128xf32>
    %135 = arith.addf %134, %132 : vector<256x128xf32>
    %c0_116 = arith.constant 0 : index
    %c0_117 = arith.constant 0 : index
    %c0_118 = arith.constant 0 : index
    %136 = vector.load %arg6[%c0_116, %c0_117, %c0_118] : memref<1x256x128xf32, #tpu.memory_space<vmem>>, vector<1x256x128xf32>
    %137 = vector.shape_cast %136 : vector<1x256x128xf32> to vector<256x128xf32>
    %138 = vector.shape_cast %135 : vector<256x128xf32> to vector<1x256x128xf32>
    tpu.vector_store %arg6[%c0_116, %c0_117, %c0_118], %138 {strides = array<i32>} : memref<1x256x128xf32, #tpu.memory_space<vmem>>, vector<1x256x128xf32>,
    %c-12_i32_119 = arith.constant -12 : i32
    %139 = arith.addi %1, %c-12_i32_119 : i32
    %c0_120 = arith.constant 0 : index
    %140 = arith.index_cast %139 : i32 to index
    %c18_121 = arith.constant 18 : index
    %c0_122 = arith.constant 0 : index
    %141 = vector.load %arg2[%c0_120, %140, %c18_121, %c0_122] : memref<1x56x56x128xbf16, #tpu.memory_space<vmem>>, vector<1x16x16x128xbf16>
    %142 = vector.shape_cast %141 : vector<1x16x16x128xbf16> to vector<16x16x128xbf16>
    %143 = vector.shape_cast %142 : vector<16x16x128xbf16> to vector<256x128xbf16>
    %c10 = arith.constant 10 : index
    %c0_123 = arith.constant 0 : index
    %c0_124 = arith.constant 0 : index
    %144 = vector.load %arg3[%c10, %c0_123, %c0_124] : memref<25x128x128xbf16, #tpu.memory_space<vmem>>, vector<1x128x128xbf16>
    %145 = vector.shape_cast %144 : vector<1x128x128xbf16> to vector<128x128xbf16>
    %cst_125 = arith.constant dense<0.000000e+00> : vector<256x128xf32>
    %146 = tpu.matmul %143, %145, %cst_125 {dimension_numbers = #tpu.dot_dimension_numbers<[1], [0], [0], [1], [0, 0, 1, 1], [], []>} : vector<256x128xbf16>, vector<128x128xbf16>, vector<256x128xf32> -> vector<256x128xf32>
    %c0_126 = arith.constant 0 : index
    %c0_127 = arith.constant 0 : index
    %c0_128 = arith.constant 0 : index
    %147 = vector.load %arg6[%c0_126, %c0_127, %c0_128] : memref<1x256x128xf32, #tpu.memory_space<vmem>>, vector<1x256x128xf32>
    %148 = vector.shape_cast %147 : vector<1x256x128xf32> to vector<256x128xf32>
    %149 = arith.addf %148, %146 : vector<256x128xf32>
    %c0_129 = arith.constant 0 : index
    %c0_130 = arith.constant 0 : index
    %c0_131 = arith.constant 0 : index
    %150 = vector.load %arg6[%c0_129, %c0_130, %c0_131] : memref<1x256x128xf32, #tpu.memory_space<vmem>>, vector<1x256x128xf32>
    %151 = vector.shape_cast %150 : vector<1x256x128xf32> to vector<256x128xf32>
    %152 = vector.shape_cast %149 : vector<256x128xf32> to vector<1x256x128xf32>
    tpu.vector_store %arg6[%c0_129, %c0_130, %c0_131], %152 {strides = array<i32>} : memref<1x256x128xf32, #tpu.memory_space<vmem>>, vector<1x256x128xf32>,
    %c-12_i32_132 = arith.constant -12 : i32
    %153 = arith.addi %1, %c-12_i32_132 : i32
    %c0_133 = arith.constant 0 : index
    %154 = arith.index_cast %153 : i32 to index
    %c30 = arith.constant 30 : index
    %c0_134 = arith.constant 0 : index
    %155 = vector.load %arg2[%c0_133, %154, %c30, %c0_134] : memref<1x56x56x128xbf16, #tpu.memory_space<vmem>>, vector<1x16x16x128xbf16>
    %156 = vector.shape_cast %155 : vector<1x16x16x128xbf16> to vector<16x16x128xbf16>
    %157 = vector.shape_cast %156 : vector<16x16x128xbf16> to vector<256x128xbf16>
    %c11 = arith.constant 11 : index
    %c0_135 = arith.constant 0 : index
    %c0_136 = arith.constant 0 : index
    %158 = vector.load %arg3[%c11, %c0_135, %c0_136] : memref<25x128x128xbf16, #tpu.memory_space<vmem>>, vector<1x128x128xbf16>
    %159 = vector.shape_cast %158 : vector<1x128x128xbf16> to vector<128x128xbf16>
    %cst_137 = arith.constant dense<0.000000e+00> : vector<256x128xf32>
    %160 = tpu.matmul %157, %159, %cst_137 {dimension_numbers = #tpu.dot_dimension_numbers<[1], [0], [0], [1], [0, 0, 1, 1], [], []>} : vector<256x128xbf16>, vector<128x128xbf16>, vector<256x128xf32> -> vector<256x128xf32>
    %c0_138 = arith.constant 0 : index
    %c0_139 = arith.constant 0 : index
    %c0_140 = arith.constant 0 : index
    %161 = vector.load %arg6[%c0_138, %c0_139, %c0_140] : memref<1x256x128xf32, #tpu.memory_space<vmem>>, vector<1x256x128xf32>
    %162 = vector.shape_cast %161 : vector<1x256x128xf32> to vector<256x128xf32>
    %163 = arith.addf %162, %160 : vector<256x128xf32>
    %c0_141 = arith.constant 0 : index
    %c0_142 = arith.constant 0 : index
    %c0_143 = arith.constant 0 : index
    %164 = vector.load %arg6[%c0_141, %c0_142, %c0_143] : memref<1x256x128xf32, #tpu.memory_space<vmem>>, vector<1x256x128xf32>
    %165 = vector.shape_cast %164 : vector<1x256x128xf32> to vector<256x128xf32>
    %166 = vector.shape_cast %163 : vector<256x128xf32> to vector<1x256x128xf32>
    tpu.vector_store %arg6[%c0_141, %c0_142, %c0_143], %166 {strides = array<i32>} : memref<1x256x128xf32, #tpu.memory_space<vmem>>, vector<1x256x128xf32>,
    %c0_i32_144 = arith.constant 0 : i32
    %167 = arith.addi %1, %c0_i32_144 : i32
    %c0_145 = arith.constant 0 : index
    %168 = arith.index_cast %167 : i32 to index
    %c6_146 = arith.constant 6 : index
    %c0_147 = arith.constant 0 : index
    %169 = vector.load %arg2[%c0_145, %168, %c6_146, %c0_147] : memref<1x56x56x128xbf16, #tpu.memory_space<vmem>>, vector<1x16x16x128xbf16>
    %170 = vector.shape_cast %169 : vector<1x16x16x128xbf16> to vector<16x16x128xbf16>
    %171 = vector.shape_cast %170 : vector<16x16x128xbf16> to vector<256x128xbf16>
    %c12_148 = arith.constant 12 : index
    %c0_149 = arith.constant 0 : index
    %c0_150 = arith.constant 0 : index
    %172 = vector.load %arg3[%c12_148, %c0_149, %c0_150] : memref<25x128x128xbf16, #tpu.memory_space<vmem>>, vector<1x128x128xbf16>
    %173 = vector.shape_cast %172 : vector<1x128x128xbf16> to vector<128x128xbf16>
    %cst_151 = arith.constant dense<0.000000e+00> : vector<256x128xf32>
    %174 = tpu.matmul %171, %173, %cst_151 {dimension_numbers = #tpu.dot_dimension_numbers<[1], [0], [0], [1], [0, 0, 1, 1], [], []>} : vector<256x128xbf16>, vector<128x128xbf16>, vector<256x128xf32> -> vector<256x128xf32>
    %c0_152 = arith.constant 0 : index
    %c0_153 = arith.constant 0 : index
    %c0_154 = arith.constant 0 : index
    %175 = vector.load %arg6[%c0_152, %c0_153, %c0_154] : memref<1x256x128xf32, #tpu.memory_space<vmem>>, vector<1x256x128xf32>
    %176 = vector.shape_cast %175 : vector<1x256x128xf32> to vector<256x128xf32>
    %177 = arith.addf %176, %174 : vector<256x128xf32>
    %c0_155 = arith.constant 0 : index
    %c0_156 = arith.constant 0 : index
    %c0_157 = arith.constant 0 : index
    %178 = vector.load %arg6[%c0_155, %c0_156, %c0_157] : memref<1x256x128xf32, #tpu.memory_space<vmem>>, vector<1x256x128xf32>
    %179 = vector.shape_cast %178 : vector<1x256x128xf32> to vector<256x128xf32>
    %180 = vector.shape_cast %177 : vector<256x128xf32> to vector<1x256x128xf32>
    tpu.vector_store %arg6[%c0_155, %c0_156, %c0_157], %180 {strides = array<i32>} : memref<1x256x128xf32, #tpu.memory_space<vmem>>, vector<1x256x128xf32>,
    %c0_i32_158 = arith.constant 0 : i32
    %181 = arith.addi %1, %c0_i32_158 : i32
    %c0_159 = arith.constant 0 : index
    %182 = arith.index_cast %181 : i32 to index
    %c30_160 = arith.constant 30 : index
    %c0_161 = arith.constant 0 : index
    %183 = vector.load %arg2[%c0_159, %182, %c30_160, %c0_161] : memref<1x56x56x128xbf16, #tpu.memory_space<vmem>>, vector<1x16x16x128xbf16>
    %184 = vector.shape_cast %183 : vector<1x16x16x128xbf16> to vector<16x16x128xbf16>
    %185 = vector.shape_cast %184 : vector<16x16x128xbf16> to vector<256x128xbf16>
    %c13 = arith.constant 13 : index
    %c0_162 = arith.constant 0 : index
    %c0_163 = arith.constant 0 : index
    %186 = vector.load %arg3[%c13, %c0_162, %c0_163] : memref<25x128x128xbf16, #tpu.memory_space<vmem>>, vector<1x128x128xbf16>
    %187 = vector.shape_cast %186 : vector<1x128x128xbf16> to vector<128x128xbf16>
    %cst_164 = arith.constant dense<0.000000e+00> : vector<256x128xf32>
    %188 = tpu.matmul %185, %187, %cst_164 {dimension_numbers = #tpu.dot_dimension_numbers<[1], [0], [0], [1], [0, 0, 1, 1], [], []>} : vector<256x128xbf16>, vector<128x128xbf16>, vector<256x128xf32> -> vector<256x128xf32>
    %c0_165 = arith.constant 0 : index
    %c0_166 = arith.constant 0 : index
    %c0_167 = arith.constant 0 : index
    %189 = vector.load %arg6[%c0_165, %c0_166, %c0_167] : memref<1x256x128xf32, #tpu.memory_space<vmem>>, vector<1x256x128xf32>
    %190 = vector.shape_cast %189 : vector<1x256x128xf32> to vector<256x128xf32>
    %191 = arith.addf %190, %188 : vector<256x128xf32>
    %c0_168 = arith.constant 0 : index
    %c0_169 = arith.constant 0 : index
    %c0_170 = arith.constant 0 : index
    %192 = vector.load %arg6[%c0_168, %c0_169, %c0_170] : memref<1x256x128xf32, #tpu.memory_space<vmem>>, vector<1x256x128xf32>
    %193 = vector.shape_cast %192 : vector<1x256x128xf32> to vector<256x128xf32>
    %194 = vector.shape_cast %191 : vector<256x128xf32> to vector<1x256x128xf32>
    tpu.vector_store %arg6[%c0_168, %c0_169, %c0_170], %194 {strides = array<i32>} : memref<1x256x128xf32, #tpu.memory_space<vmem>>, vector<1x256x128xf32>,
    %c12_i32 = arith.constant 12 : i32
    %195 = arith.addi %1, %c12_i32 : i32
    %c0_171 = arith.constant 0 : index
    %196 = arith.index_cast %195 : i32 to index
    %c6_172 = arith.constant 6 : index
    %c0_173 = arith.constant 0 : index
    %197 = vector.load %arg2[%c0_171, %196, %c6_172, %c0_173] : memref<1x56x56x128xbf16, #tpu.memory_space<vmem>>, vector<1x16x16x128xbf16>
    %198 = vector.shape_cast %197 : vector<1x16x16x128xbf16> to vector<16x16x128xbf16>
    %199 = vector.shape_cast %198 : vector<16x16x128xbf16> to vector<256x128xbf16>
    %c14 = arith.constant 14 : index
    %c0_174 = arith.constant 0 : index
    %c0_175 = arith.constant 0 : index
    %200 = vector.load %arg3[%c14, %c0_174, %c0_175] : memref<25x128x128xbf16, #tpu.memory_space<vmem>>, vector<1x128x128xbf16>
    %201 = vector.shape_cast %200 : vector<1x128x128xbf16> to vector<128x128xbf16>
    %cst_176 = arith.constant dense<0.000000e+00> : vector<256x128xf32>
    %202 = tpu.matmul %199, %201, %cst_176 {dimension_numbers = #tpu.dot_dimension_numbers<[1], [0], [0], [1], [0, 0, 1, 1], [], []>} : vector<256x128xbf16>, vector<128x128xbf16>, vector<256x128xf32> -> vector<256x128xf32>
    %c0_177 = arith.constant 0 : index
    %c0_178 = arith.constant 0 : index
    %c0_179 = arith.constant 0 : index
    %203 = vector.load %arg6[%c0_177, %c0_178, %c0_179] : memref<1x256x128xf32, #tpu.memory_space<vmem>>, vector<1x256x128xf32>
    %204 = vector.shape_cast %203 : vector<1x256x128xf32> to vector<256x128xf32>
    %205 = arith.addf %204, %202 : vector<256x128xf32>
    %c0_180 = arith.constant 0 : index
    %c0_181 = arith.constant 0 : index
    %c0_182 = arith.constant 0 : index
    %206 = vector.load %arg6[%c0_180, %c0_181, %c0_182] : memref<1x256x128xf32, #tpu.memory_space<vmem>>, vector<1x256x128xf32>
    %207 = vector.shape_cast %206 : vector<1x256x128xf32> to vector<256x128xf32>
    %208 = vector.shape_cast %205 : vector<256x128xf32> to vector<1x256x128xf32>
    tpu.vector_store %arg6[%c0_180, %c0_181, %c0_182], %208 {strides = array<i32>} : memref<1x256x128xf32, #tpu.memory_space<vmem>>, vector<1x256x128xf32>,
    %c12_i32_183 = arith.constant 12 : i32
    %209 = arith.addi %1, %c12_i32_183 : i32
    %c0_184 = arith.constant 0 : index
    %210 = arith.index_cast %209 : i32 to index
    %c18_185 = arith.constant 18 : index
    %c0_186 = arith.constant 0 : index
    %211 = vector.load %arg2[%c0_184, %210, %c18_185, %c0_186] : memref<1x56x56x128xbf16, #tpu.memory_space<vmem>>, vector<1x16x16x128xbf16>
    %212 = vector.shape_cast %211 : vector<1x16x16x128xbf16> to vector<16x16x128xbf16>
    %213 = vector.shape_cast %212 : vector<16x16x128xbf16> to vector<256x128xbf16>
    %c15 = arith.constant 15 : index
    %c0_187 = arith.constant 0 : index
    %c0_188 = arith.constant 0 : index
    %214 = vector.load %arg3[%c15, %c0_187, %c0_188] : memref<25x128x128xbf16, #tpu.memory_space<vmem>>, vector<1x128x128xbf16>
    %215 = vector.shape_cast %214 : vector<1x128x128xbf16> to vector<128x128xbf16>
    %cst_189 = arith.constant dense<0.000000e+00> : vector<256x128xf32>
    %216 = tpu.matmul %213, %215, %cst_189 {dimension_numbers = #tpu.dot_dimension_numbers<[1], [0], [0], [1], [0, 0, 1, 1], [], []>} : vector<256x128xbf16>, vector<128x128xbf16>, vector<256x128xf32> -> vector<256x128xf32>
    %c0_190 = arith.constant 0 : index
    %c0_191 = arith.constant 0 : index
    %c0_192 = arith.constant 0 : index
    %217 = vector.load %arg6[%c0_190, %c0_191, %c0_192] : memref<1x256x128xf32, #tpu.memory_space<vmem>>, vector<1x256x128xf32>
    %218 = vector.shape_cast %217 : vector<1x256x128xf32> to vector<256x128xf32>
    %219 = arith.addf %218, %216 : vector<256x128xf32>
    %c0_193 = arith.constant 0 : index
    %c0_194 = arith.constant 0 : index
    %c0_195 = arith.constant 0 : index
    %220 = vector.load %arg6[%c0_193, %c0_194, %c0_195] : memref<1x256x128xf32, #tpu.memory_space<vmem>>, vector<1x256x128xf32>
    %221 = vector.shape_cast %220 : vector<1x256x128xf32> to vector<256x128xf32>
    %222 = vector.shape_cast %219 : vector<256x128xf32> to vector<1x256x128xf32>
    tpu.vector_store %arg6[%c0_193, %c0_194, %c0_195], %222 {strides = array<i32>} : memref<1x256x128xf32, #tpu.memory_space<vmem>>, vector<1x256x128xf32>,
    %c12_i32_196 = arith.constant 12 : i32
    %223 = arith.addi %1, %c12_i32_196 : i32
    %c0_197 = arith.constant 0 : index
    %224 = arith.index_cast %223 : i32 to index
    %c30_198 = arith.constant 30 : index
    %c0_199 = arith.constant 0 : index
    %225 = vector.load %arg2[%c0_197, %224, %c30_198, %c0_199] : memref<1x56x56x128xbf16, #tpu.memory_space<vmem>>, vector<1x16x16x128xbf16>
    %226 = vector.shape_cast %225 : vector<1x16x16x128xbf16> to vector<16x16x128xbf16>
    %227 = vector.shape_cast %226 : vector<16x16x128xbf16> to vector<256x128xbf16>
    %c16 = arith.constant 16 : index
    %c0_200 = arith.constant 0 : index
    %c0_201 = arith.constant 0 : index
    %228 = vector.load %arg3[%c16, %c0_200, %c0_201] : memref<25x128x128xbf16, #tpu.memory_space<vmem>>, vector<1x128x128xbf16>
    %229 = vector.shape_cast %228 : vector<1x128x128xbf16> to vector<128x128xbf16>
    %cst_202 = arith.constant dense<0.000000e+00> : vector<256x128xf32>
    %230 = tpu.matmul %227, %229, %cst_202 {dimension_numbers = #tpu.dot_dimension_numbers<[1], [0], [0], [1], [0, 0, 1, 1], [], []>} : vector<256x128xbf16>, vector<128x128xbf16>, vector<256x128xf32> -> vector<256x128xf32>
    %c0_203 = arith.constant 0 : index
    %c0_204 = arith.constant 0 : index
    %c0_205 = arith.constant 0 : index
    %231 = vector.load %arg6[%c0_203, %c0_204, %c0_205] : memref<1x256x128xf32, #tpu.memory_space<vmem>>, vector<1x256x128xf32>
    %232 = vector.shape_cast %231 : vector<1x256x128xf32> to vector<256x128xf32>
    %233 = arith.addf %232, %230 : vector<256x128xf32>
    %c0_206 = arith.constant 0 : index
    %c0_207 = arith.constant 0 : index
    %c0_208 = arith.constant 0 : index
    %234 = vector.load %arg6[%c0_206, %c0_207, %c0_208] : memref<1x256x128xf32, #tpu.memory_space<vmem>>, vector<1x256x128xf32>
    %235 = vector.shape_cast %234 : vector<1x256x128xf32> to vector<256x128xf32>
    %236 = vector.shape_cast %233 : vector<256x128xf32> to vector<1x256x128xf32>
    tpu.vector_store %arg6[%c0_206, %c0_207, %c0_208], %236 {strides = array<i32>} : memref<1x256x128xf32, #tpu.memory_space<vmem>>, vector<1x256x128xf32>,
    %c-18_i32 = arith.constant -18 : i32
    %237 = arith.addi %1, %c-18_i32 : i32
    %c0_209 = arith.constant 0 : index
    %238 = arith.index_cast %237 : i32 to index
    %c0_210 = arith.constant 0 : index
    %c0_211 = arith.constant 0 : index
    %239 = vector.load %arg2[%c0_209, %238, %c0_210, %c0_211] : memref<1x56x56x128xbf16, #tpu.memory_space<vmem>>, vector<1x16x16x128xbf16>
    %240 = vector.shape_cast %239 : vector<1x16x16x128xbf16> to vector<16x16x128xbf16>
    %241 = vector.shape_cast %240 : vector<16x16x128xbf16> to vector<256x128xbf16>
    %c17 = arith.constant 17 : index
    %c0_212 = arith.constant 0 : index
    %c0_213 = arith.constant 0 : index
    %242 = vector.load %arg3[%c17, %c0_212, %c0_213] : memref<25x128x128xbf16, #tpu.memory_space<vmem>>, vector<1x128x128xbf16>
    %243 = vector.shape_cast %242 : vector<1x128x128xbf16> to vector<128x128xbf16>
    %cst_214 = arith.constant dense<0.000000e+00> : vector<256x128xf32>
    %244 = tpu.matmul %241, %243, %cst_214 {dimension_numbers = #tpu.dot_dimension_numbers<[1], [0], [0], [1], [0, 0, 1, 1], [], []>} : vector<256x128xbf16>, vector<128x128xbf16>, vector<256x128xf32> -> vector<256x128xf32>
    %c0_215 = arith.constant 0 : index
    %c0_216 = arith.constant 0 : index
    %c0_217 = arith.constant 0 : index
    %245 = vector.load %arg6[%c0_215, %c0_216, %c0_217] : memref<1x256x128xf32, #tpu.memory_space<vmem>>, vector<1x256x128xf32>
    %246 = vector.shape_cast %245 : vector<1x256x128xf32> to vector<256x128xf32>
    %247 = arith.addf %246, %244 : vector<256x128xf32>
    %c0_218 = arith.constant 0 : index
    %c0_219 = arith.constant 0 : index
    %c0_220 = arith.constant 0 : index
    %248 = vector.load %arg6[%c0_218, %c0_219, %c0_220] : memref<1x256x128xf32, #tpu.memory_space<vmem>>, vector<1x256x128xf32>
    %249 = vector.shape_cast %248 : vector<1x256x128xf32> to vector<256x128xf32>
    %250 = vector.shape_cast %247 : vector<256x128xf32> to vector<1x256x128xf32>
    tpu.vector_store %arg6[%c0_218, %c0_219, %c0_220], %250 {strides = array<i32>} : memref<1x256x128xf32, #tpu.memory_space<vmem>>, vector<1x256x128xf32>,
    %c-18_i32_221 = arith.constant -18 : i32
    %251 = arith.addi %1, %c-18_i32_221 : i32
    %c0_222 = arith.constant 0 : index
    %252 = arith.index_cast %251 : i32 to index
    %c18_223 = arith.constant 18 : index
    %c0_224 = arith.constant 0 : index
    %253 = vector.load %arg2[%c0_222, %252, %c18_223, %c0_224] : memref<1x56x56x128xbf16, #tpu.memory_space<vmem>>, vector<1x16x16x128xbf16>
    %254 = vector.shape_cast %253 : vector<1x16x16x128xbf16> to vector<16x16x128xbf16>
    %255 = vector.shape_cast %254 : vector<16x16x128xbf16> to vector<256x128xbf16>
    %c18_225 = arith.constant 18 : index
    %c0_226 = arith.constant 0 : index
    %c0_227 = arith.constant 0 : index
    %256 = vector.load %arg3[%c18_225, %c0_226, %c0_227] : memref<25x128x128xbf16, #tpu.memory_space<vmem>>, vector<1x128x128xbf16>
    %257 = vector.shape_cast %256 : vector<1x128x128xbf16> to vector<128x128xbf16>
    %cst_228 = arith.constant dense<0.000000e+00> : vector<256x128xf32>
    %258 = tpu.matmul %255, %257, %cst_228 {dimension_numbers = #tpu.dot_dimension_numbers<[1], [0], [0], [1], [0, 0, 1, 1], [], []>} : vector<256x128xbf16>, vector<128x128xbf16>, vector<256x128xf32> -> vector<256x128xf32>
    %c0_229 = arith.constant 0 : index
    %c0_230 = arith.constant 0 : index
    %c0_231 = arith.constant 0 : index
    %259 = vector.load %arg6[%c0_229, %c0_230, %c0_231] : memref<1x256x128xf32, #tpu.memory_space<vmem>>, vector<1x256x128xf32>
    %260 = vector.shape_cast %259 : vector<1x256x128xf32> to vector<256x128xf32>
    %261 = arith.addf %260, %258 : vector<256x128xf32>
    %c0_232 = arith.constant 0 : index
    %c0_233 = arith.constant 0 : index
    %c0_234 = arith.constant 0 : index
    %262 = vector.load %arg6[%c0_232, %c0_233, %c0_234] : memref<1x256x128xf32, #tpu.memory_space<vmem>>, vector<1x256x128xf32>
    %263 = vector.shape_cast %262 : vector<1x256x128xf32> to vector<256x128xf32>
    %264 = vector.shape_cast %261 : vector<256x128xf32> to vector<1x256x128xf32>
    tpu.vector_store %arg6[%c0_232, %c0_233, %c0_234], %264 {strides = array<i32>} : memref<1x256x128xf32, #tpu.memory_space<vmem>>, vector<1x256x128xf32>,
    %c-18_i32_235 = arith.constant -18 : i32
    %265 = arith.addi %1, %c-18_i32_235 : i32
    %c0_236 = arith.constant 0 : index
    %266 = arith.index_cast %265 : i32 to index
    %c36 = arith.constant 36 : index
    %c0_237 = arith.constant 0 : index
    %267 = vector.load %arg2[%c0_236, %266, %c36, %c0_237] : memref<1x56x56x128xbf16, #tpu.memory_space<vmem>>, vector<1x16x16x128xbf16>
    %268 = vector.shape_cast %267 : vector<1x16x16x128xbf16> to vector<16x16x128xbf16>
    %269 = vector.shape_cast %268 : vector<16x16x128xbf16> to vector<256x128xbf16>
    %c19 = arith.constant 19 : index
    %c0_238 = arith.constant 0 : index
    %c0_239 = arith.constant 0 : index
    %270 = vector.load %arg3[%c19, %c0_238, %c0_239] : memref<25x128x128xbf16, #tpu.memory_space<vmem>>, vector<1x128x128xbf16>
    %271 = vector.shape_cast %270 : vector<1x128x128xbf16> to vector<128x128xbf16>
    %cst_240 = arith.constant dense<0.000000e+00> : vector<256x128xf32>
    %272 = tpu.matmul %269, %271, %cst_240 {dimension_numbers = #tpu.dot_dimension_numbers<[1], [0], [0], [1], [0, 0, 1, 1], [], []>} : vector<256x128xbf16>, vector<128x128xbf16>, vector<256x128xf32> -> vector<256x128xf32>
    %c0_241 = arith.constant 0 : index
    %c0_242 = arith.constant 0 : index
    %c0_243 = arith.constant 0 : index
    %273 = vector.load %arg6[%c0_241, %c0_242, %c0_243] : memref<1x256x128xf32, #tpu.memory_space<vmem>>, vector<1x256x128xf32>
    %274 = vector.shape_cast %273 : vector<1x256x128xf32> to vector<256x128xf32>
    %275 = arith.addf %274, %272 : vector<256x128xf32>
    %c0_244 = arith.constant 0 : index
    %c0_245 = arith.constant 0 : index
    %c0_246 = arith.constant 0 : index
    %276 = vector.load %arg6[%c0_244, %c0_245, %c0_246] : memref<1x256x128xf32, #tpu.memory_space<vmem>>, vector<1x256x128xf32>
    %277 = vector.shape_cast %276 : vector<1x256x128xf32> to vector<256x128xf32>
    %278 = vector.shape_cast %275 : vector<256x128xf32> to vector<1x256x128xf32>
    tpu.vector_store %arg6[%c0_244, %c0_245, %c0_246], %278 {strides = array<i32>} : memref<1x256x128xf32, #tpu.memory_space<vmem>>, vector<1x256x128xf32>,
    %c0_i32_247 = arith.constant 0 : i32
    %279 = arith.addi %1, %c0_i32_247 : i32
    %c0_248 = arith.constant 0 : index
    %280 = arith.index_cast %279 : i32 to index
    %c0_249 = arith.constant 0 : index
    %c0_250 = arith.constant 0 : index
    %281 = vector.load %arg2[%c0_248, %280, %c0_249, %c0_250] : memref<1x56x56x128xbf16, #tpu.memory_space<vmem>>, vector<1x16x16x128xbf16>
    %282 = vector.shape_cast %281 : vector<1x16x16x128xbf16> to vector<16x16x128xbf16>
    %283 = vector.shape_cast %282 : vector<16x16x128xbf16> to vector<256x128xbf16>
    %c20 = arith.constant 20 : index
    %c0_251 = arith.constant 0 : index
    %c0_252 = arith.constant 0 : index
    %284 = vector.load %arg3[%c20, %c0_251, %c0_252] : memref<25x128x128xbf16, #tpu.memory_space<vmem>>, vector<1x128x128xbf16>
    %285 = vector.shape_cast %284 : vector<1x128x128xbf16> to vector<128x128xbf16>
    %cst_253 = arith.constant dense<0.000000e+00> : vector<256x128xf32>
    %286 = tpu.matmul %283, %285, %cst_253 {dimension_numbers = #tpu.dot_dimension_numbers<[1], [0], [0], [1], [0, 0, 1, 1], [], []>} : vector<256x128xbf16>, vector<128x128xbf16>, vector<256x128xf32> -> vector<256x128xf32>
    %c0_254 = arith.constant 0 : index
    %c0_255 = arith.constant 0 : index
    %c0_256 = arith.constant 0 : index
    %287 = vector.load %arg6[%c0_254, %c0_255, %c0_256] : memref<1x256x128xf32, #tpu.memory_space<vmem>>, vector<1x256x128xf32>
    %288 = vector.shape_cast %287 : vector<1x256x128xf32> to vector<256x128xf32>
    %289 = arith.addf %288, %286 : vector<256x128xf32>
    %c0_257 = arith.constant 0 : index
    %c0_258 = arith.constant 0 : index
    %c0_259 = arith.constant 0 : index
    %290 = vector.load %arg6[%c0_257, %c0_258, %c0_259] : memref<1x256x128xf32, #tpu.memory_space<vmem>>, vector<1x256x128xf32>
    %291 = vector.shape_cast %290 : vector<1x256x128xf32> to vector<256x128xf32>
    %292 = vector.shape_cast %289 : vector<256x128xf32> to vector<1x256x128xf32>
    tpu.vector_store %arg6[%c0_257, %c0_258, %c0_259], %292 {strides = array<i32>} : memref<1x256x128xf32, #tpu.memory_space<vmem>>, vector<1x256x128xf32>,
    %c0_i32_260 = arith.constant 0 : i32
    %293 = arith.addi %1, %c0_i32_260 : i32
    %c0_261 = arith.constant 0 : index
    %294 = arith.index_cast %293 : i32 to index
    %c36_262 = arith.constant 36 : index
    %c0_263 = arith.constant 0 : index
    %295 = vector.load %arg2[%c0_261, %294, %c36_262, %c0_263] : memref<1x56x56x128xbf16, #tpu.memory_space<vmem>>, vector<1x16x16x128xbf16>
    %296 = vector.shape_cast %295 : vector<1x16x16x128xbf16> to vector<16x16x128xbf16>
    %297 = vector.shape_cast %296 : vector<16x16x128xbf16> to vector<256x128xbf16>
    %c21 = arith.constant 21 : index
    %c0_264 = arith.constant 0 : index
    %c0_265 = arith.constant 0 : index
    %298 = vector.load %arg3[%c21, %c0_264, %c0_265] : memref<25x128x128xbf16, #tpu.memory_space<vmem>>, vector<1x128x128xbf16>
    %299 = vector.shape_cast %298 : vector<1x128x128xbf16> to vector<128x128xbf16>
    %cst_266 = arith.constant dense<0.000000e+00> : vector<256x128xf32>
    %300 = tpu.matmul %297, %299, %cst_266 {dimension_numbers = #tpu.dot_dimension_numbers<[1], [0], [0], [1], [0, 0, 1, 1], [], []>} : vector<256x128xbf16>, vector<128x128xbf16>, vector<256x128xf32> -> vector<256x128xf32>
    %c0_267 = arith.constant 0 : index
    %c0_268 = arith.constant 0 : index
    %c0_269 = arith.constant 0 : index
    %301 = vector.load %arg6[%c0_267, %c0_268, %c0_269] : memref<1x256x128xf32, #tpu.memory_space<vmem>>, vector<1x256x128xf32>
    %302 = vector.shape_cast %301 : vector<1x256x128xf32> to vector<256x128xf32>
    %303 = arith.addf %302, %300 : vector<256x128xf32>
    %c0_270 = arith.constant 0 : index
    %c0_271 = arith.constant 0 : index
    %c0_272 = arith.constant 0 : index
    %304 = vector.load %arg6[%c0_270, %c0_271, %c0_272] : memref<1x256x128xf32, #tpu.memory_space<vmem>>, vector<1x256x128xf32>
    %305 = vector.shape_cast %304 : vector<1x256x128xf32> to vector<256x128xf32>
    %306 = vector.shape_cast %303 : vector<256x128xf32> to vector<1x256x128xf32>
    tpu.vector_store %arg6[%c0_270, %c0_271, %c0_272], %306 {strides = array<i32>} : memref<1x256x128xf32, #tpu.memory_space<vmem>>, vector<1x256x128xf32>,
    %c18_i32_273 = arith.constant 18 : i32
    %307 = arith.addi %1, %c18_i32_273 : i32
    %c0_274 = arith.constant 0 : index
    %308 = arith.index_cast %307 : i32 to index
    %c0_275 = arith.constant 0 : index
    %c0_276 = arith.constant 0 : index
    %309 = vector.load %arg2[%c0_274, %308, %c0_275, %c0_276] : memref<1x56x56x128xbf16, #tpu.memory_space<vmem>>, vector<1x16x16x128xbf16>
    %310 = vector.shape_cast %309 : vector<1x16x16x128xbf16> to vector<16x16x128xbf16>
    %311 = vector.shape_cast %310 : vector<16x16x128xbf16> to vector<256x128xbf16>
    %c22 = arith.constant 22 : index
    %c0_277 = arith.constant 0 : index
    %c0_278 = arith.constant 0 : index
    %312 = vector.load %arg3[%c22, %c0_277, %c0_278] : memref<25x128x128xbf16, #tpu.memory_space<vmem>>, vector<1x128x128xbf16>
    %313 = vector.shape_cast %312 : vector<1x128x128xbf16> to vector<128x128xbf16>
    %cst_279 = arith.constant dense<0.000000e+00> : vector<256x128xf32>
    %314 = tpu.matmul %311, %313, %cst_279 {dimension_numbers = #tpu.dot_dimension_numbers<[1], [0], [0], [1], [0, 0, 1, 1], [], []>} : vector<256x128xbf16>, vector<128x128xbf16>, vector<256x128xf32> -> vector<256x128xf32>
    %c0_280 = arith.constant 0 : index
    %c0_281 = arith.constant 0 : index
    %c0_282 = arith.constant 0 : index
    %315 = vector.load %arg6[%c0_280, %c0_281, %c0_282] : memref<1x256x128xf32, #tpu.memory_space<vmem>>, vector<1x256x128xf32>
    %316 = vector.shape_cast %315 : vector<1x256x128xf32> to vector<256x128xf32>
    %317 = arith.addf %316, %314 : vector<256x128xf32>
    %c0_283 = arith.constant 0 : index
    %c0_284 = arith.constant 0 : index
    %c0_285 = arith.constant 0 : index
    %318 = vector.load %arg6[%c0_283, %c0_284, %c0_285] : memref<1x256x128xf32, #tpu.memory_space<vmem>>, vector<1x256x128xf32>
    %319 = vector.shape_cast %318 : vector<1x256x128xf32> to vector<256x128xf32>
    %320 = vector.shape_cast %317 : vector<256x128xf32> to vector<1x256x128xf32>
    tpu.vector_store %arg6[%c0_283, %c0_284, %c0_285], %320 {strides = array<i32>} : memref<1x256x128xf32, #tpu.memory_space<vmem>>, vector<1x256x128xf32>,
    %c18_i32_286 = arith.constant 18 : i32
    %321 = arith.addi %1, %c18_i32_286 : i32
    %c0_287 = arith.constant 0 : index
    %322 = arith.index_cast %321 : i32 to index
    %c18_288 = arith.constant 18 : index
    %c0_289 = arith.constant 0 : index
    %323 = vector.load %arg2[%c0_287, %322, %c18_288, %c0_289] : memref<1x56x56x128xbf16, #tpu.memory_space<vmem>>, vector<1x16x16x128xbf16>
    %324 = vector.shape_cast %323 : vector<1x16x16x128xbf16> to vector<16x16x128xbf16>
    %325 = vector.shape_cast %324 : vector<16x16x128xbf16> to vector<256x128xbf16>
    %c23 = arith.constant 23 : index
    %c0_290 = arith.constant 0 : index
    %c0_291 = arith.constant 0 : index
    %326 = vector.load %arg3[%c23, %c0_290, %c0_291] : memref<25x128x128xbf16, #tpu.memory_space<vmem>>, vector<1x128x128xbf16>
    %327 = vector.shape_cast %326 : vector<1x128x128xbf16> to vector<128x128xbf16>
    %cst_292 = arith.constant dense<0.000000e+00> : vector<256x128xf32>
    %328 = tpu.matmul %325, %327, %cst_292 {dimension_numbers = #tpu.dot_dimension_numbers<[1], [0], [0], [1], [0, 0, 1, 1], [], []>} : vector<256x128xbf16>, vector<128x128xbf16>, vector<256x128xf32> -> vector<256x128xf32>
    %c0_293 = arith.constant 0 : index
    %c0_294 = arith.constant 0 : index
    %c0_295 = arith.constant 0 : index
    %329 = vector.load %arg6[%c0_293, %c0_294, %c0_295] : memref<1x256x128xf32, #tpu.memory_space<vmem>>, vector<1x256x128xf32>
    %330 = vector.shape_cast %329 : vector<1x256x128xf32> to vector<256x128xf32>
    %331 = arith.addf %330, %328 : vector<256x128xf32>
    %c0_296 = arith.constant 0 : index
    %c0_297 = arith.constant 0 : index
    %c0_298 = arith.constant 0 : index
    %332 = vector.load %arg6[%c0_296, %c0_297, %c0_298] : memref<1x256x128xf32, #tpu.memory_space<vmem>>, vector<1x256x128xf32>
    %333 = vector.shape_cast %332 : vector<1x256x128xf32> to vector<256x128xf32>
    %334 = vector.shape_cast %331 : vector<256x128xf32> to vector<1x256x128xf32>
    tpu.vector_store %arg6[%c0_296, %c0_297, %c0_298], %334 {strides = array<i32>} : memref<1x256x128xf32, #tpu.memory_space<vmem>>, vector<1x256x128xf32>,
    %c18_i32_299 = arith.constant 18 : i32
    %335 = arith.addi %1, %c18_i32_299 : i32
    %c0_300 = arith.constant 0 : index
    %336 = arith.index_cast %335 : i32 to index
    %c36_301 = arith.constant 36 : index
    %c0_302 = arith.constant 0 : index
    %337 = vector.load %arg2[%c0_300, %336, %c36_301, %c0_302] : memref<1x56x56x128xbf16, #tpu.memory_space<vmem>>, vector<1x16x16x128xbf16>
    %338 = vector.shape_cast %337 : vector<1x16x16x128xbf16> to vector<16x16x128xbf16>
    %339 = vector.shape_cast %338 : vector<16x16x128xbf16> to vector<256x128xbf16>
    %c24_303 = arith.constant 24 : index
    %c0_304 = arith.constant 0 : index
    %c0_305 = arith.constant 0 : index
    %340 = vector.load %arg3[%c24_303, %c0_304, %c0_305] : memref<25x128x128xbf16, #tpu.memory_space<vmem>>, vector<1x128x128xbf16>
    %341 = vector.shape_cast %340 : vector<1x128x128xbf16> to vector<128x128xbf16>
    %cst_306 = arith.constant dense<0.000000e+00> : vector<256x128xf32>
    %342 = tpu.matmul %339, %341, %cst_306 {dimension_numbers = #tpu.dot_dimension_numbers<[1], [0], [0], [1], [0, 0, 1, 1], [], []>} : vector<256x128xbf16>, vector<128x128xbf16>, vector<256x128xf32> -> vector<256x128xf32>
    %c0_307 = arith.constant 0 : index
    %c0_308 = arith.constant 0 : index
    %c0_309 = arith.constant 0 : index
    %343 = vector.load %arg6[%c0_307, %c0_308, %c0_309] : memref<1x256x128xf32, #tpu.memory_space<vmem>>, vector<1x256x128xf32>
    %344 = vector.shape_cast %343 : vector<1x256x128xf32> to vector<256x128xf32>
    %345 = arith.addf %344, %342 : vector<256x128xf32>
    %c0_310 = arith.constant 0 : index
    %c0_311 = arith.constant 0 : index
    %c0_312 = arith.constant 0 : index
    %346 = vector.load %arg6[%c0_310, %c0_311, %c0_312] : memref<1x256x128xf32, #tpu.memory_space<vmem>>, vector<1x256x128xf32>
    %347 = vector.shape_cast %346 : vector<1x256x128xf32> to vector<256x128xf32>
    %348 = vector.shape_cast %345 : vector<256x128xf32> to vector<1x256x128xf32>
    tpu.vector_store %arg6[%c0_310, %c0_311, %c0_312], %348 {strides = array<i32>} : memref<1x256x128xf32, #tpu.memory_space<vmem>>, vector<1x256x128xf32>,
    %c0_313 = arith.constant 0 : index
    %c0_314 = arith.constant 0 : index
    %c0_315 = arith.constant 0 : index
    %349 = vector.load %arg6[%c0_313, %c0_314, %c0_315] : memref<1x256x128xf32, #tpu.memory_space<vmem>>, vector<1x256x128xf32>
    %350 = vector.shape_cast %349 : vector<1x256x128xf32> to vector<256x128xf32>
    %c0_316 = arith.constant 0 : index
    %c0_317 = arith.constant 0 : index
    %351 = vector.load %arg4[%c0_316, %c0_317] : memref<1x128xf32, #tpu.memory_space<vmem>>, vector<1x128xf32>
    %352 = vector.broadcast %351 : vector<1x128xf32> to vector<256x128xf32>
    %353 = arith.mulf %350, %352 : vector<256x128xf32>
    %c0_318 = arith.constant 0 : index
    %c0_319 = arith.constant 0 : index
    %c0_320 = arith.constant 0 : index
    %354 = vector.load %arg5[%c0_318, %c0_319, %c0_320] : memref<1x1x128xf32, #tpu.memory_space<vmem>>, vector<1x1x128xf32>
    %355 = vector.shape_cast %354 : vector<1x1x128xf32> to vector<1x128xf32>
    %356 = vector.broadcast %355 : vector<1x128xf32> to vector<256x128xf32>
    %357 = arith.addf %353, %356 : vector<256x128xf32>
    %cst_321 = arith.constant 0.000000e+00 : f32
    %358 = vector.broadcast %cst_321 : f32 to vector<256x128xf32>
    %359 = arith.maximumf %357, %358 : vector<256x128xf32>
    %c0_322 = arith.constant 0 : index
    %c0_323 = arith.constant 0 : index
    %c0_324 = arith.constant 0 : index
    %360 = vector.load %arg6[%c0_322, %c0_323, %c0_324] : memref<1x256x128xf32, #tpu.memory_space<vmem>>, vector<1x256x128xf32>
    %361 = vector.shape_cast %360 : vector<1x256x128xf32> to vector<256x128xf32>
    %362 = vector.shape_cast %359 : vector<256x128xf32> to vector<1x256x128xf32>
    tpu.vector_store %arg6[%c0_322, %c0_323, %c0_324], %362 {strides = array<i32>} : memref<1x256x128xf32, #tpu.memory_space<vmem>>, vector<1x256x128xf32>,
    return
  }
  func.func @transform_0(%arg0: i32, %arg1: i32) -> (i32, i32, i32, i32) {
    %c0_i32 = arith.constant 0 : i32
    %c0_i32_0 = arith.constant 0 : i32
    %c0_i32_1 = arith.constant 0 : i32
    %c0_i32_2 = arith.constant 0 : i32
    return %arg0, %c0_i32, %c0_i32_0, %c0_i32_1 : i32, i32, i32, i32
  }
  func.func @transform_1(%arg0: i32, %arg1: i32) -> (i32, i32, i32) {
    %c0_i32 = arith.constant 0 : i32
    %c0_i32_0 = arith.constant 0 : i32
    %c0_i32_1 = arith.constant 0 : i32
    %c0_i32_2 = arith.constant 0 : i32
    return %c0_i32, %c0_i32_0, %c0_i32_1 : i32, i32, i32
  }
  func.func @transform_2(%arg0: i32, %arg1: i32) -> (i32, i32) {
    %c0_i32 = arith.constant 0 : i32
    %c0_i32_0 = arith.constant 0 : i32
    %c0_i32_1 = arith.constant 0 : i32
    return %c0_i32, %c0_i32_0 : i32, i32
  }
  func.func @transform_3(%arg0: i32, %arg1: i32) -> (i32, i32, i32) {
    %c0_i32 = arith.constant 0 : i32
    %c0_i32_0 = arith.constant 0 : i32
    %c0_i32_1 = arith.constant 0 : i32
    return %arg0, %c0_i32, %c0_i32_0 : i32, i32, i32
  }
  func.func @transform_4(%arg0: i32, %arg1: i32) -> (i32, i32, i32) {
    %c0_i32 = arith.constant 0 : i32
    %c0_i32_0 = arith.constant 0 : i32
    return %arg0, %arg1, %c0_i32 : i32, i32, i32
  }
}

</mosaic_0001>

<bundles_post_ra>
// kernel: aspp_forward.1
= control target key start
LH: loop header
LB: loop body
LE: loop exit
PB: predicated region body
PF: predicated region fallthrough
CT: control target
= control target key end

     0   :  { %9 = vsyncpa [#allocation3], 0  ;;  %s24526_s0 = inlined_call_operand.vmem [shape: bf16[2,56,56,128], index: 0, kind: input, shape index: {}]   ;;  %s24527_s1 = inlined_call_operand.vmem [shape: bf16[25,128,128], index: 1, kind: input, shape index: {}]   ;;  %s24528_s2 = inlined_call_operand.vmem [shape: f32[1,128], index: 2, kind: input, shape index: {}]   ;;  %s24529_s3 = inlined_call_operand.vmem [shape: f32[2,1,128], index: 3, kind: input, shape index: {}]   ;;  %s24530_s4 = inlined_call_operand.hbm [shape: f32[2,256,128], index: 4, kind: output, shape index: {}]  }
   0x1   :  { %11 = vsyncpa [#allocation3 + $0x1], 0  ;;  %s19879_s15 = smov 0   ;;  %s19881_s16 = smov 0  }
   0x2   :  { %s19883_s17 = smov 0   ;;  %s19885_s18 = smov 0  }
   0x3   :  { %s19887_s19 = smov 0   ;;  %s19889_s20 = smov 0  }
   0x4 LB: > { %s14482_s21 = sadd.s32 4294967295, %s19849_s20   ;;  %s14483_s22 = sadd.s32 4294967294, %s19849_s20   ;;  %s19849_s20 = sphi %s19889_s20, %s17_s20   ;;  %s19845_s19 = sphi %s19887_s19, %s24635_s19   ;;  %s19841_s18 = sphi %s19885_s18, %s24634_s18   ;;  %s19837_s17 = sphi %s19883_s17, %s24633_s17   ;;  %s19833_s16 = sphi %s19881_s16, %s24632_s16   ;;  %s19829_s15 = sphi %s19879_s15, %s24631_s15  }
   0x5   : > { %s29_s23 = sadd.s32 1, %s19845_s19  ;;  %s132_s24 = sadd.s32 1, %s19837_s17 }
   0x6   : > { %p31_p0 = scmp.ge.s32.totalorder %s29_s23, 2  ;;  %p142_p1 = scmp.ne.s32.totalorder %s19837_s17, %s19833_s16 }
   0x7   : > { %p143_p2 = scmp.eq.s32.totalorder %s14482_s21, 1  ;;  %p148_p3 = scmp.ne.s32.totalorder %s19833_s16, %s19829_s15 }
   0x8   : > { %s24637_s23 = smov (%p31_p0, %s29_s23), 0  ;;  %p149_p5 = scmp.eq.s32.totalorder %s14483_s22, 1 }
   0x9   : > { %p19919_p4 = por %p143_p2, %p142_p1  ;;  %s127_s26 = ssub.s32 %s19845_s19, %s24637_s23 }
   0xa   : > { %p14486_p6 = scmp.ge.s32.totalorder %s19849_s20, 1  ;;  %p130_p7 = scmp.eq.s32.totalorder %s127_s26, 0 }
   0xb   : > { %p19926_p8 = por %p149_p5, %p148_p3  ;;  %p187_p9 = scmp.lt.s32.totalorder %s19849_s20, 3 }
   0xc   : > { %s19932_s28 = scalar_select %p130_p7, %s19837_s17, %s132_s24  }
   0xd   : > { %p188_p10 = pnand %p14486_p6, %p187_p9 }
   0xe   : > { %v19467_v0 = vld [vmem:[%s24527_s1] sm:$0xff] (!%p188_p10)   ;;  %p216_p11 = scmp.lt.s32.totalorder (!%p188_p10), %s19841_s18, 1  ;;  %v19469_v2 = vld [vmem:[%s24527_s1 + $0x8] sm:$0xff] (!%p188_p10)   ;;  %v19471_v4 = vld [vmem:[%s24527_s1 + $0x10] sm:$0xff] (!%p188_p10)   ;;  %vm327_vm0 = vcmask (!%p188_p10), 1042432   ;;  %vm328_vm1 = vcmask (!%p188_p10), 1046532  }
   0xf   : > { %191 = sbr.rel (%p188_p10) target bundleno = 1080 (0x438), region = 36  ;;  %v19468_v1 = vld [vmem:[%s24527_s1 + $0x300] sm:$0xff] (!%p188_p10)   ;;  %17361 = vmatprep.subr.bf16.mxu1 (!%p188_p10), %v19467_v0  ;;  %v19470_v3 = vld [vmem:[%s24527_s1 + $0x308] sm:$0xff] (!%p188_p10)   ;;  %v19472_v5 = vld [vmem:[%s24527_s1 + $0x310] sm:$0xff] (!%p188_p10)   ;;  %vm5194_vm2 = vcmask (!%p188_p10), 1040384   ;;  %vm5195_vm3 = vcmask (!%p188_p10), 1044484  }
  0x10   : > { %17937 = vmatprep.subr.bf16.mxu0 (!%p188_p10), %v19468_v1  ;;  %17362 = vmatpush3.bf16.msra.mxu1 (!%p188_p10), %v19467_v0  ;;  %v19473_v6 = vld [vmem:[%s24527_s1 + $0x18] sm:$0xff] (!%p188_p10)   ;;  %v19475_v8 = vld [vmem:[%s24527_s1 + $0x20] sm:$0xff] (!%p188_p10)   ;;  %v19477_v10 = vld [vmem:[%s24527_s1 + $0x28] sm:$0xff] (!%p188_p10)   ;;  %vm863_vm6 = vcmask (!%p188_p10), 1041408   ;;  %vm864_vm7 = vcmask (!%p188_p10), 1045508   ;;  %s213_s29 = sand.u32 (!%p188_p10), 1, %s19833_s16  }
  0x11   : > { %17938 = vmatpush3.bf16.msra.mxu0 (!%p188_p10), %v19468_v1  ;;  %17363 = vmatprep.subr.bf16.mxu1 (!%p188_p10), %v19469_v2  ;;  %v19474_v7 = vld [vmem:[%s24527_s1 + $0x318] sm:$0xff] (!%p188_p10)   ;;  %v19476_v9 = vld [vmem:[%s24527_s1 + $0x320] sm:$0xff] (!%p188_p10)   ;;  %v19478_v14 = vld [vmem:[%s24527_s1 + $0x328] sm:$0xff] (!%p188_p10)   ;;  %s14487_s6 = sshll.u32 (!%p188_p10), %s213_s29, 8  ;;  %s16760_s7 = sshll.u32 (!%p188_p10), %s19841_s18, 12 }
  0x12   : > { %17939 = vmatprep.subr.bf16.mxu0 (!%p188_p10), %v19470_v3  ;;  %vm19983_vm4 = vmor (!%p188_p10), %vm327_vm0, %vm328_vm1  ;;  %v19479_v24 = vld [vmem:[%s24527_s1 + $0x30] sm:$0xff] (!%p188_p10)   ;;  %v19481_v37 = vld [vmem:[%s24527_s1 + $0x38] sm:$0xff] (!%p188_p10)   ;;  %s24471_s12 = scalar_lea.hbm (!%p188_p10), %s24530_s4, %s16760_s7  ;;  %s19851_s14 = smov (!%p188_p10), [#allocation2]  }
  0x13   : > { %vm19989_vm5 = vmor (!%p188_p10), %vm5194_vm2, %vm5195_vm3  ;;  %v19480_v30 = vld [vmem:[%s24527_s1 + $0x330] sm:$0xff] (!%p188_p10)   ;;  %v19482_v43 = vld [vmem:[%s24527_s1 + $0x338] sm:$0xff] (!%p188_p10)   ;;  %s19775_s22 = sshll.u32 (!%p188_p10), %s19851_s14, 4  ;;  %s19776_s22 = int_to_ptr.vmem [resolvable:$false] %s19775_s22 }
  0x14   : > { %17364 = vmatpush3.bf16.msra.mxu1 (!%p188_p10), %v19469_v2  ;;  %v19483_v55 = vld [vmem:[%s24527_s1 + $0x40] sm:$0xff] (!%p188_p10)   ;;  %vm20305_vm8 = vmor (!%p188_p10), %vm863_vm6, %vm864_vm7 }
  0x15   : > { %17940 = vmatpush3.bf16.msra.mxu0 (!%p188_p10), %v19470_v3  ;;  %17365 = vmatprep.subr.bf16.mxu1 (!%p188_p10), %v19471_v4  ;;  %v19484_v2 = vld [vmem:[%s24527_s1 + $0x340] sm:$0xff] (!%p188_p10)  }
  0x16   : > { %s19954_s21 = scalar_select %p216_p11, %s19841_s18, 1  ;;  %17941 = vmatprep.subr.bf16.mxu0 %v19472_v5 }
  0x17   : > { %s24480_s18 = scalar_lea.sflag [#allocation3], %s213_s29 }
  0x18   : > { %s19409_s30 = smul.u32 1568, %s19954_s21  ;;  %17366 = vmatpush3.bf16.msra.mxu1 %v19471_v4  ;;  %s223_s26 = scalar_lea.vmem %s24529_s3, %s19954_s21 }
  0x19   : > { %17942 = vmatpush3.bf16.msra.mxu0 %v19472_v5  ;;  %17367 = vmatprep.subr.bf16.mxu1 %v19473_v6  ;;  %s24373_s21 = scalar_lea.vmem [#allocation2], %s14487_s6 }
  0x1a   : > { %17943 = vmatprep.subr.bf16.mxu0 %v19474_v7  ;;  %s19972_s11 = scalar_lea.vmem %s24526_s0, %s19409_s30  ;;  %s14374_s8 = sshll.u32 %s24373_s21, 4  ;;  %s24473_s8 = int_to_ptr.vmem [resolvable:$true] %s14374_s8 }
  0x1b   : > { %v14489_v11 = vld [vmem:[%s19972_s11 + $0x200] sm:$0xe]  ;;  %v14490_v12 = vld [vmem:[%s19972_s11 + $0x204] sm:$0xf]  ;;  %v14491_v13 = vld [vmem:[%s19972_s11 + $0x208] sm:$0x1]  ;;  %p19778_p1 = scmp.lt.s32.totalorder %s24473_s8, %s19776_s22 }
  0x1c   : > { %17368 = vmatpush3.bf16.msra.mxu1 %v19473_v6  ;;  %v14537_v16 = vrot.slane %v14489_v11, 9  ;;  %v332_v17 = vrot.slane %v14490_v12, 5  ;;  %v335_v18 = vrot.slane %v14491_v13, 5  ;;  %v15625_v19 = vld [vmem:[%s19972_s11 + $0x1f8] sm:$0x8]  ;;  %s19771_s13 = scalar_lea.vmem %s24473_s8, 4096 }
  0x1d   : > { %17944 = vmatpush3.bf16.msra.mxu0 %v19474_v7  ;;  %17369 = vmatprep.subr.bf16.mxu1 %v19475_v8  ;;  %v15626_v21 = vld [vmem:[%s19972_s11 + $0x1fc] sm:$0xf]  ;;  %v15627_v22 = vld [vmem:[%s19972_s11 + $0x200] sm:$0x7]  ;;  %v15673_v23 = vrot.slane %v15625_v19, 11  ;;  %p19772_p12 = scmp.ne.s32.totalorder %s24473_s8, %s19771_s13 }
  0x1e   : > { %17945 = vmatprep.subr.bf16.mxu0 %v19476_v9  ;;  %v333_v25 = vsel %vm19983_vm4, %v14537_v16, %v332_v17  ;;  %v334_v26 = vrot.slane %v332_v17, 4  ;;  %v6981_v27 = vrot.slane %v15626_v21, 7  ;;  %v6984_v28 = vrot.slane %v15627_v22, 7  ;;  %v14492_v29 = vld [vmem:[%s19972_s11 + $0x21c] sm:$0xe] }
  0x1f   : > { %v14493_v31 = vld [vmem:[%s19972_s11 + $0x220] sm:$0xf]  ;;  %v14494_v32 = vld [vmem:[%s19972_s11 + $0x224] sm:$0x1]  ;;  %v14538_v39 = vrot.slane %v14492_v29, 9  ;;  %v19486_v29 = vld [vmem:[%s24527_s1 + $0x48] sm:$0xff]   ;;  %p19773_p13 = pnand %p19772_p12, %p19919_p4 }
  0x20   : > { %17370 = vmatpush3.bf16.msra.mxu1 %v19475_v8  ;;  %v336_v33 = vsel %vm19983_vm4, %v334_v26, %v335_v18  ;;  %v6982_v34 = vsel %vm19989_vm5, %v15673_v23, %v6981_v27  ;;  %v6983_v35 = vrot.slane %v6981_v27, 4  ;;  %v339_v36 = vrot.slane %v14493_v31, 5  ;;  %v15628_v41 = vld [vmem:[%s19972_s11 + $0x214] sm:$0x8]  ;;  %v15629_v42 = vld [vmem:[%s19972_s11 + $0x218] sm:$0xf] }
  0x21   : > { %17946 = vmatpush3.bf16.msra.mxu0 %v19476_v9  ;;  %17371 = vmatprep.subr.bf16.mxu1 %v19477_v10  ;;  %v14553_v38 = vcombine.low %v333_v25, %v336_v33  ;;  %v342_v40 = vrot.slane %v14494_v32, 5  ;;  %v15630_v46 = vld [vmem:[%s19972_s11 + $0x21c] sm:$0x7]  ;;  %v15674_v47 = vrot.slane %v15628_v41, 11  ;;  %v6988_v49 = vrot.slane %v15629_v42, 7  ;;  %v19485_v23 = vld [vmem:[%s24527_s1 + $0x348] sm:$0xff]   ;;  %p19774_p0 = pneg %p19773_p13 }
  0x22   : > { %17947 = vmatprep.subr.bf16.mxu0 %v19478_v14  ;;  %v6985_v44 = vsel %vm19989_vm5, %v6983_v35, %v6984_v28  ;;  %v341_v45 = vrot.slane %v339_v36, 4  ;;  %v6991_v50 = vrot.slane %v15630_v46, 7  ;;  %v14495_v51 = vld [vmem:[%s19972_s11 + $0x238] sm:$0xe]  ;;  %v14496_v52 = vld [vmem:[%s19972_s11 + $0x23c] sm:$0xf]  ;;  %v340_v53 = vsel %vm19983_vm4, %v14538_v39, %v339_v36 }
  0x23   : > { %v15705_v48 = vcombine.low %v6982_v34, %v6985_v44  ;;  %17377 = vmatprep.mubr.bf16.mxu1 %v14553_v38  ;;  %v6990_v56 = vrot.slane %v6988_v49, 4  ;;  %v14497_v57 = vld [vmem:[%s19972_s11 + $0x240] sm:$0x1]  ;;  %v14539_v58 = vrot.slane %v14495_v51, 9  ;;  %v15631_v59 = vld [vmem:[%s19972_s11 + $0x230] sm:$0x8]  ;;  %v6989_v60 = vsel %vm19989_vm5, %v15674_v47, %v6988_v49 }
  0x24   : > { %17372 = vmatpush3.bf16.msra.mxu1 %v19477_v10  ;;  %v343_v54 = vsel %vm19983_vm4, %v341_v45, %v342_v40  ;;  %v346_v61 = vrot.slane %v14496_v52, 5  ;;  %v349_v62 = vrot.slane %v14497_v57, 5  ;;  %v15632_v63 = vld [vmem:[%s19972_s11 + $0x234] sm:$0xf]  ;;  %v15633_v0 = vld [vmem:[%s19972_s11 + $0x238] sm:$0x7] }
  0x25   : > { %17948 = vmatpush3.bf16.msra.mxu0 %v19478_v14  ;;  %17373 = vmatprep.subr.bf16.mxu1 %v19479_v24  ;;  %v6992_v1 = vsel %vm19989_vm5, %v6990_v56, %v6991_v50  ;;  %v15675_v3 = vrot.slane %v15631_v59, 11  ;;  %v6995_v4 = vrot.slane %v15632_v63, 7  ;;  %v6998_v5 = vrot.slane %v15633_v0, 7  ;;  %v14498_v6 = vld [vmem:[%s19972_s11 + $0x254] sm:$0xe] }
  0x26   : > { %17949 = vmatprep.subr.bf16.mxu0 %v19480_v30  ;;  %17953 = vmatprep.mubr.bf16.mxu0 %v15705_v48  ;;  %v14554_v7 = vcombine.low %v340_v53, %v343_v54  ;;  %v347_v8 = vsel %vm19983_vm4, %v14539_v58, %v346_v61  ;;  %v348_v9 = vrot.slane %v346_v61, 4  ;;  %v14499_v10 = vld [vmem:[%s19972_s11 + $0x258] sm:$0xf]  ;;  %v14500_v11 = vld [vmem:[%s19972_s11 + $0x25c] sm:$0x1]  ;;  %v14540_v12 = vrot.slane %v14498_v6, 9 }
  0x27   : > { %v6996_v13 = vsel %vm19989_vm5, %v15675_v3, %v6995_v4  ;;  %v6997_v14 = vrot.slane %v6995_v4, 4  ;;  %v353_v16 = vrot.slane %v14499_v10, 5  ;;  %v356_v17 = vrot.slane %v14500_v11, 5  ;;  %v15634_v21 = vld [vmem:[%s19972_s11 + $0x24c] sm:$0x8]  ;;  %v20069_v36 = vld [vmem:[%s24527_s1 + $0x50] sm:$0xff]  }
  0x28   : > { %17374 = vmatpush3.bf16.msra.mxu1 %v19479_v24  ;;  %v15706_v18 = vcombine.low %v6989_v60, %v6992_v1  ;;  %v350_v19 = vsel %vm19983_vm4, %v348_v9, %v349_v62  ;;  %v15635_v22 = vld [vmem:[%s19972_s11 + $0x250] sm:$0xf]  ;;  %v15636_v27 = vld [vmem:[%s19972_s11 + $0x254] sm:$0x7]  ;;  %v14503_v41 = vld [vmem:[%s19972_s11 + $0x278] sm:$0x1] }
  0x29   : > { %17950 = vmatpush3.bf16.msra.mxu0 %v19480_v30  ;;  %17375 = vmatprep.subr.bf16.mxu1 %v19481_v37  ;;  %v14555_v24 = vcombine.low %v347_v8, %v350_v19  ;;  %v6999_v25 = vsel %vm19989_vm5, %v6997_v14, %v6998_v5  ;;  %v355_v26 = vrot.slane %v353_v16, 4  ;;  %v15676_v30 = vrot.slane %v15634_v21, 11  ;;  %v14501_v35 = vld [vmem:[%s19972_s11 + $0x270] sm:$0xe]  ;;  %v14502_v40 = vld [vmem:[%s19972_s11 + $0x274] sm:$0xf] }
  0x2a   : > { %17951 = vmatprep.subr.bf16.mxu0 %v19482_v43  ;;  %v15707_v28 = vcombine.low %v6996_v13, %v6999_v25  ;;  %v7002_v31 = vrot.slane %v15635_v22, 7  ;;  %v7005_v32 = vrot.slane %v15636_v27, 7  ;;  %v354_v33 = vsel %vm19983_vm4, %v14540_v12, %v353_v16  ;;  %v19487_v39 = vld [vmem:[%s24527_s1 + $0x350] sm:$0xff]   ;;  %v15637_v45 = vld [vmem:[%s19972_s11 + $0x268] sm:$0x8]  ;;  %v19492_v12 = vld [vmem:[%s24527_s1 + $0x58] sm:$0xff]  }
  0x2b   : > { %v357_v34 = vsel %vm19983_vm4, %v355_v26, %v356_v17  ;;  %v14541_v42 = vrot.slane %v14501_v35, 9  ;;  %v363_v44 = vrot.slane %v14503_v41, 5  ;;  %v15638_v46 = vld [vmem:[%s19972_s11 + $0x26c] sm:$0xf]  ;;  %v15639_v49 = vld [vmem:[%s19972_s11 + $0x270] sm:$0x7] }
  0x2c   : > { %17376 = vmatpush3.bf16.msra.mxu1 %v19481_v37  ;;  %v7003_v37 = vsel %vm19989_vm5, %v15676_v30, %v7002_v31  ;;  %v7004_v38 = vrot.slane %v7002_v31, 4  ;;  %v14556_v47 = vcombine.low %v354_v33, %v357_v34  ;;  %v15677_v50 = vrot.slane %v15637_v45, 11  ;;  %v14504_v52 = vld [vmem:[%s19972_s11 + $0x28c] sm:$0xe]  ;;  %v14505_v57 = vld [vmem:[%s19972_s11 + $0x290] sm:$0xf] }
  0x2d   : > { %17952 = vmatpush3.bf16.msra.mxu0 %v19482_v43  ;;  %17409 = vmatprep.subr.bf16.mxu1 %v19483_v55  ;;  %v360_v43 = vrot.slane %v14502_v40, 5  ;;  %v7009_v51 = vrot.slane %v15638_v46, 7  ;;  %v7012_v56 = vrot.slane %v15639_v49, 7  ;;  %v14506_v58 = vld [vmem:[%s19972_s11 + $0x294] sm:$0x1]  ;;  %v14542_v61 = vrot.slane %v14504_v52, 9 }
  0x2e   : > { %17985 = vmatprep.subr.bf16.mxu0 %v19484_v2  ;;  %v7006_v48 = vsel %vm19989_vm5, %v7004_v38, %v7005_v32  ;;  %v367_v62 = vrot.slane %v14505_v57, 5  ;;  %v370_v0 = vrot.slane %v14506_v58, 5  ;;  %v15640_v1 = vld [vmem:[%s19972_s11 + $0x284] sm:$0x8]  ;;  %v15641_v6 = vld [vmem:[%s19972_s11 + $0x288] sm:$0xf] }
  0x2f   : > { %17378 = vmatmul.mubr.bf16.vlgmr.msra.gmra.mrb[0].mxu1 %v14554_v7  ;;  %v15708_v53 = vcombine.low %v7003_v37, %v7006_v48  ;;  %v361_v54 = vsel %vm19983_vm4, %v14541_v42, %v360_v43  ;;  %v7010_v59 = vsel %vm19989_vm5, %v15677_v50, %v7009_v51  ;;  %v7011_v60 = vrot.slane %v7009_v51, 4  ;;  %v15642_v7 = vld [vmem:[%s19972_s11 + $0x28c] sm:$0x7]  ;;  %v19490_v16 = vld [vmem:[%s24527_s1 + $0x360] sm:$0xff]   ;;  %v14507_v19 = vld [vmem:[%s19972_s11 + $0x2a8] sm:$0xe] }
  0x30   : > { %17954 = vmatmul.mubr.bf16.vlgmr.msra.gmra.mrb[0].mxu0 %v15706_v18  ;;  %17410 = vmatpush3.bf16.msra.mxu1 %v19483_v55  ;;  %v362_v55 = vrot.slane %v360_v43, 4  ;;  %v369_v5 = vrot.slane %v367_v62, 4  ;;  %v15678_v9 = vrot.slane %v15640_v1, 11  ;;  %v7016_v10 = vrot.slane %v15641_v6, 7  ;;  %v14508_v21 = vld [vmem:[%s19972_s11 + $0x2ac] sm:$0xf] }
  0x31   : > { %17986 = vmatpush3.bf16.msra.mxu0 %v19484_v2  ;;  %17381 = vmatprep.mubr.bf16.mxu1 %v14555_v24  ;;  %v19488_v2 = vld [vmem:[%s24527_s1 + $0x358] sm:$0xff]   ;;  %v7013_v4 = vsel %vm19989_vm5, %v7011_v60, %v7012_v56  ;;  %v7019_v11 = vrot.slane %v15642_v7, 7  ;;  %v368_v13 = vsel %vm19983_vm4, %v14542_v61, %v367_v62  ;;  %v19495_v22 = vld [vmem:[%s24527_s1 + $0x60] sm:$0xff]   ;;  %v14543_v24 = vrot.slane %v14507_v19, 9  ;;  %v15645_v31 = vld [vmem:[%s19972_s11 + $0x2a8] sm:$0x7] }
  0x32   : > { %17987 = vmatprep.subr.bf16.mxu0 %v19485_v23  ;;  %17957 = vmatprep.mubr.bf16.mxu0 %v15707_v28  ;;  %v364_v63 = vsel %vm19983_vm4, %v362_v55, %v363_v44  ;;  %v15709_v8 = vcombine.low %v7010_v59, %v7013_v4  ;;  %v371_v14 = vsel %vm19983_vm4, %v369_v5, %v370_v0  ;;  %v7018_v18 = vrot.slane %v7016_v10, 4  ;;  %v15643_v26 = vld [vmem:[%s19972_s11 + $0x2a0] sm:$0x8]  ;;  %v15644_v30 = vld [vmem:[%s19972_s11 + $0x2a4] sm:$0xf]  ;;  %v19496_v52 = vld [vmem:[%s24527_s1 + $0x68] sm:$0xff]  }
  0x33   : > { %17411 = vmatprep.subr.bf16.mxu1 %v19486_v29  ;;  %v14557_v3 = vcombine.low %v361_v54, %v364_v63  ;;  %v7017_v17 = vsel %vm19989_vm5, %v15678_v9, %v7016_v10  ;;  %v374_v25 = vrot.slane %v14508_v21, 5  ;;  %v14558_v27 = vcombine.low %v368_v13, %v371_v14  ;;  %v14510_v37 = vld [vmem:[%s19972_s11 + $0x2c4] sm:$0xe]  ;;  %v14511_v38 = vld [vmem:[%s19972_s11 + $0x2c8] sm:$0xf]  ;;  %v19493_v63 = vld [vmem:[%s24527_s1 + $0x370] sm:$0xff]  }
  0x34   : > { %17412 = vmatpush3.bf16.msra.mxu1 %v19486_v29  ;;  %v7020_v28 = vsel %vm19989_vm5, %v7018_v18, %v7019_v11  ;;  %v15679_v32 = vrot.slane %v15643_v26, 11  ;;  %v7026_v40 = vrot.slane %v15645_v31, 7  ;;  %v14512_v41 = vld [vmem:[%s19972_s11 + $0x2cc] sm:$0x1]  ;;  %v14544_v42 = vrot.slane %v14510_v37, 9  ;;  %v19498_v5 = vld [vmem:[%s24527_s1 + $0x70] sm:$0xff]  }
  0x35   : > { %17988 = vmatpush3.bf16.msra.mxu0 %v19485_v23  ;;  %17413 = vmatprep.subr.bf16.mxu1 %v20069_v36  ;;  %v14509_v23 = vld [vmem:[%s19972_s11 + $0x2b0] sm:$0x1]  ;;  %v15710_v33 = vcombine.low %v7017_v17, %v7020_v28  ;;  %v375_v34 = vsel %vm19983_vm4, %v14543_v24, %v374_v25  ;;  %v376_v35 = vrot.slane %v374_v25, 4  ;;  %v381_v43 = vrot.slane %v14511_v38, 5  ;;  %v15646_v50 = vld [vmem:[%s19972_s11 + $0x2bc] sm:$0x8] }
  0x36   : > { %17989 = vmatprep.subr.bf16.mxu0 %v19487_v39  ;;  %v377_v29 = vrot.slane %v14509_v23, 5  ;;  %v15647_v51 = vld [vmem:[%s19972_s11 + $0x2c0] sm:$0xf]  ;;  %v15648_v55 = vld [vmem:[%s19972_s11 + $0x2c4] sm:$0x7]  ;;  %v15680_v56 = vrot.slane %v15646_v50, 11 }
  0x37   : > { %17382 = vmatmul.mubr.bf16.gmra.mrb[4].mxu1 %v14556_v47  ;;  %v384_v47 = vrot.slane %v14512_v41, 5  ;;  %v383_v49 = vrot.slane %v381_v43, 4  ;;  %v382_v54 = vsel %vm19983_vm4, %v14544_v42, %v381_v43  ;;  %v7030_v57 = vrot.slane %v15647_v51, 7  ;;  %v14513_v0 = vld [vmem:[%s19972_s11 + $0x2e0] sm:$0xe]  ;;  %v19494_v7 = vld [vmem:[%s24527_s1 + $0x378] sm:$0xff]  }
  0x38   : > { %17958 = vmatmul.mubr.bf16.gmra.mrb[4].mxu0 %v15708_v53  ;;  %17385 = vmatprep.mubr.bf16.mxu1 %v14557_v3  ;;  %v378_v44 = vsel %vm19983_vm4, %v376_v35, %v377_v29  ;;  %v7033_v60 = vrot.slane %v15648_v55, 7  ;;  %v14515_v3 = vld [vmem:[%s19972_s11 + $0x2e8] sm:$0x1]  ;;  %v14545_v4 = vrot.slane %v14513_v0, 9  ;;  %v15729_v10 = vld [vmem:[%s19972_s11 + $0x204] sm:$0x8] }
  0x39   : > { %17990 = vmatpush3.bf16.msra.mxu0 %v19487_v39  ;;  %17961 = vmatprep.mubr.bf16.mxu0 %v15709_v8  ;;  %v19491_v39 = vld [vmem:[%s24527_s1 + $0x368] sm:$0xff]   ;;  %v14559_v48 = vcombine.low %v375_v34, %v378_v44  ;;  %v385_v59 = vsel %vm19983_vm4, %v383_v49, %v384_v47  ;;  %v7031_v61 = vsel %vm19989_vm5, %v15680_v56, %v7030_v57  ;;  %v7032_v62 = vrot.slane %v7030_v57, 4  ;;  %v14516_v17 = vld [vmem:[%s19972_s11 + $0x2fc] sm:$0xe]  ;;  %v14518_v23 = vld [vmem:[%s19972_s11 + $0x304] sm:$0x1] }
  0x3a   : > { %17991 = vmatprep.subr.bf16.mxu0 %v19488_v2  ;;  %17414 = vmatpush3.bf16.msra.mxu1 %v20069_v36  ;;  %v7023_v36 = vrot.slane %v15644_v30, 7  ;;  %v14560_v1 = vcombine.low %v382_v54, %v385_v59  ;;  %v391_v9 = vrot.slane %v14515_v3, 5  ;;  %v15730_v11 = vld [vmem:[%s19972_s11 + $0x208] sm:$0xf]  ;;  %v15731_v13 = vld [vmem:[%s19972_s11 + $0x20c] sm:$0x7] }
  0x3b   : > { %17415 = vmatprep.subr.bf16.mxu1 %v19492_v12  ;;  %v7034_v6 = vsel %vm19989_vm5, %v7032_v62, %v7033_v60  ;;  %v15777_v14 = vrot.slane %v15729_v10, 11  ;;  %v7578_v21 = vrot.slane %v15731_v13, 7  ;;  %v14546_v26 = vrot.slane %v14516_v17, 9  ;;  %v19500_v28 = vld [vmem:[%s24527_s1 + $0x78] sm:$0xff]   ;;  %v15732_v31 = vld [vmem:[%s19972_s11 + $0x220] sm:$0x8] }
  0x3c   : > { %v7024_v45 = vsel %vm19989_vm5, %v15679_v32, %v7023_v36  ;;  %v7025_v46 = vrot.slane %v7023_v36, 4  ;;  %v398_v30 = vrot.slane %v14518_v23, 5  ;;  %v15733_v36 = vld [vmem:[%s19972_s11 + $0x224] sm:$0xf]  ;;  %v15734_v37 = vld [vmem:[%s19972_s11 + $0x228] sm:$0x7] }
  0x3d   : > { %17992 = vmatpush3.bf16.msra.mxu0 %v19488_v2  ;;  %v14514_v2 = vld [vmem:[%s19972_s11 + $0x2e4] sm:$0xf]  ;;  %v7585_v41 = vrot.slane %v15734_v37, 7  ;;  %v14519_v42 = vld [vmem:[%s19972_s11 + $0x318] sm:$0xe]  ;;  %v19499_v59 = vld [vmem:[%s24527_s1 + $0x388] sm:$0xff]  }
  0x3e   : > { %17993 = vmatprep.subr.bf16.mxu0 %v19490_v16  ;;  %17416 = vmatpush3.bf16.msra.mxu1 %v19492_v12  ;;  %v7027_v53 = vsel %vm19989_vm5, %v7025_v46, %v7026_v40  ;;  %v388_v8 = vrot.slane %v14514_v2, 5  ;;  %v15712_v12 = vcombine.low %v7031_v61, %v7034_v6  ;;  %v7582_v40 = vrot.slane %v15733_v36, 7  ;;  %v19497_v43 = vld [vmem:[%s24527_s1 + $0x380] sm:$0xff]   ;;  %v14522_v0 = vld [vmem:[%s19972_s11 + $0x334] sm:$0xe] }
  0x3f   : > { %17386 = vmatmul.mubr.bf16.gmra.mrb[8].mxu1 %v14558_v27  ;;  %17417 = vmatprep.subr.bf16.mxu1 %v19495_v22  ;;  %v15711_v58 = vcombine.low %v7024_v45, %v7027_v53  ;;  %v14520_v45 = vld [vmem:[%s19972_s11 + $0x31c] sm:$0xf]  ;;  %v14521_v46 = vld [vmem:[%s19972_s11 + $0x320] sm:$0x1]  ;;  %v14547_v47 = vrot.slane %v14519_v42, 9  ;;  %v14548_v6 = vrot.slane %v14522_v0, 9 }
  0x40   : > { %17962 = vmatmul.mubr.bf16.gmra.mrb[8].mxu0 %v15710_v33  ;;  %17389 = vmatprep.mubr.bf16.mxu1 %v14559_v48  ;;  %v389_v18 = vsel %vm19983_vm4, %v14545_v4, %v388_v8  ;;  %v390_v19 = vrot.slane %v388_v8, 4  ;;  %v20198_v48 = vld [vmem:[%s24527_s1 + $0x80] sm:$0xff]   ;;  %v7584_v51 = vrot.slane %v7582_v40, 4  ;;  %v15735_v53 = vld [vmem:[%s19972_s11 + $0x23c] sm:$0x8]  ;;  %v405_v55 = vrot.slane %v14521_v46, 5 }
  0x41   : > { %17994 = vmatpush3.bf16.msra.mxu0 %v19490_v16  ;;  %17965 = vmatprep.mubr.bf16.mxu0 %v15711_v58  ;;  %v7575_v16 = vrot.slane %v15730_v11, 7  ;;  %v15736_v54 = vld [vmem:[%s19972_s11 + $0x240] sm:$0xf]  ;;  %v15737_v56 = vld [vmem:[%s19972_s11 + $0x244] sm:$0x7]  ;;  %v15779_v57 = vrot.slane %v15735_v53, 11 }
  0x42   : > { %17995 = vmatprep.subr.bf16.mxu0 %v19491_v39  ;;  %17418 = vmatpush3.bf16.msra.mxu1 %v19495_v22  ;;  %v14517_v22 = vld [vmem:[%s19972_s11 + $0x300] sm:$0xf]  ;;  %v392_v29 = vsel %vm19983_vm4, %v390_v19, %v391_v9  ;;  %v7589_v58 = vrot.slane %v15736_v54, 7  ;;  %v7586_v60 = vsel %vm19989_vm5, %v7584_v51, %v7585_v41  ;;  %v15738_v10 = vld [vmem:[%s19972_s11 + $0x258] sm:$0x8] }
  0x43   : > { %17419 = vmatprep.subr.bf16.mxu1 %v19496_v52  ;;  %v7576_v24 = vsel %vm19989_vm5, %v15777_v14, %v7575_v16  ;;  %v7577_v25 = vrot.slane %v7575_v16, 4  ;;  %v395_v27 = vrot.slane %v14517_v22, 5  ;;  %v14561_v32 = vcombine.low %v389_v18, %v392_v29  ;;  %v15739_v13 = vld [vmem:[%s19972_s11 + $0x25c] sm:$0xf]  ;;  %v15740_v14 = vld [vmem:[%s19972_s11 + $0x260] sm:$0x7] }
  0x44   : > { %v7590_v3 = vsel %vm19989_vm5, %v15779_v57, %v7589_v58  ;;  %v7591_v4 = vrot.slane %v7589_v58, 4  ;;  %v15780_v16 = vrot.slane %v15738_v10, 11  ;;  %v7599_v22 = vrot.slane %v15740_v14, 7  ;;  %v14525_v23 = vld [vmem:[%s19972_s11 + $0x350] sm:$0xe]  ;;  %v19503_v42 = vld [vmem:[%s24527_s1 + $0x398] sm:$0xff]  }
  0x45   : > { %17996 = vmatpush3.bf16.msra.mxu0 %v19491_v39  ;;  %v7579_v33 = vsel %vm19989_vm5, %v7577_v25, %v7578_v21  ;;  %v396_v34 = vsel %vm19983_vm4, %v14546_v26, %v395_v27  ;;  %v397_v35 = vrot.slane %v395_v27, 4  ;;  %v15778_v39 = vrot.slane %v15732_v31, 11  ;;  %v19501_v25 = vld [vmem:[%s24527_s1 + $0x390] sm:$0xff]   ;;  %v14527_v29 = vld [vmem:[%s19972_s11 + $0x358] sm:$0x1] }
  0x46   : > { %17997 = vmatprep.subr.bf16.mxu0 %v19493_v63  ;;  %17420 = vmatpush3.bf16.msra.mxu1 %v19496_v52  ;;  %v15809_v38 = vcombine.low %v7576_v24, %v7579_v33  ;;  %v402_v52 = vrot.slane %v14520_v45, 5  ;;  %v7596_v21 = vrot.slane %v15739_v13, 7  ;;  %v14526_v24 = vld [vmem:[%s19972_s11 + $0x354] sm:$0xf]  ;;  %v15743_v36 = vld [vmem:[%s19972_s11 + $0x27c] sm:$0x7] }
  0x47   : > { %17390 = vmatmul.mubr.bf16.gmra.mrb[12].mxu1 %v14560_v1  ;;  %17421 = vmatprep.subr.bf16.mxu1 %v19498_v5  ;;  %v399_v44 = vsel %vm19983_vm4, %v397_v35, %v398_v30  ;;  %v7583_v50 = vsel %vm19989_vm5, %v15778_v39, %v7582_v40  ;;  %v14523_v1 = vld [vmem:[%s19972_s11 + $0x338] sm:$0xf]  ;;  %v14549_v30 = vrot.slane %v14525_v23, 9  ;;  %v15741_v31 = vld [vmem:[%s19972_s11 + $0x274] sm:$0x8]  ;;  %v416_v33 = vrot.slane %v14526_v24, 5 }
  0x48   : > { %17966 = vmatmul.mubr.bf16.gmra.mrb[12].mxu0 %v15712_v12  ;;  %17393 = vmatprep.mubr.bf16.mxu1 %v14561_v32  ;;  %v14562_v49 = vcombine.low %v396_v34, %v399_v44  ;;  %v403_v61 = vsel %vm19983_vm4, %v14547_v47, %v402_v52  ;;  %v404_v62 = vrot.slane %v402_v52, 4  ;;  %v15810_v2 = vcombine.low %v7583_v50, %v7586_v60  ;;  %v15742_v35 = vld [vmem:[%s19972_s11 + $0x278] sm:$0xf]  ;;  %v14528_v41 = vld [vmem:[%s19972_s11 + $0x36c] sm:$0xe] }
  0x49   : > { %17998 = vmatpush3.bf16.msra.mxu0 %v19493_v63  ;;  %18001 = vmatprep.mubr.bf16.mxu0 %v15809_v38  ;;  %v7592_v63 = vrot.slane %v15737_v56, 7  ;;  %v409_v8 = vrot.slane %v14523_v1, 5  ;;  %v7597_v27 = vsel %vm19989_vm5, %v15780_v16, %v7596_v21  ;;  %v419_v34 = vrot.slane %v14527_v29, 5  ;;  %v14529_v46 = vld [vmem:[%s19972_s11 + $0x370] sm:$0xf]  ;;  %v19507_v29 = vld [vmem:[%s24527_s1 + $0x3a8] sm:$0xff]  }
  0x4a   : > { %17999 = vmatprep.subr.bf16.mxu0 %v19494_v7  ;;  %17422 = vmatpush3.bf16.msra.mxu1 %v19498_v5  ;;  %v14524_v5 = vld [vmem:[%s19972_s11 + $0x33c] sm:$0x1]  ;;  %v15781_v38 = vrot.slane %v15741_v31, 11  ;;  %v7603_v39 = vrot.slane %v15742_v35, 7  ;;  %v7606_v40 = vrot.slane %v15743_v36, 7  ;;  %v417_v44 = vsel %vm19983_vm4, %v14549_v30, %v416_v33 }
  0x4b   : > { %17423 = vmatprep.subr.bf16.mxu1 %v19500_v28  ;;  %v412_v9 = vrot.slane %v14524_v5, 5  ;;  %v7593_v12 = vsel %vm19989_vm5, %v7591_v4, %v7592_v63  ;;  %v410_v18 = vsel %vm19983_vm4, %v14548_v6, %v409_v8  ;;  %v411_v19 = vrot.slane %v409_v8, 4  ;;  %v14530_v47 = vld [vmem:[%s19972_s11 + $0x374] sm:$0x1]  ;;  %v14531_v4 = vld [vmem:[%s19972_s11 + $0x388] sm:$0xe] }
  0x4c   : > { %v15811_v17 = vcombine.low %v7590_v3, %v7593_v12  ;;  %v418_v45 = vrot.slane %v416_v33, 4  ;;  %v7604_v50 = vsel %vm19989_vm5, %v15781_v38, %v7603_v39  ;;  %v7605_v51 = vrot.slane %v7603_v39, 4  ;;  %v15745_v56 = vld [vmem:[%s19972_s11 + $0x294] sm:$0xf]  ;;  %v14532_v5 = vld [vmem:[%s19972_s11 + $0x38c] sm:$0xf] }
  0x4d   : > { %18000 = vmatpush3.bf16.msra.mxu0 %v19494_v7  ;;  %v406_v7 = vsel %vm19983_vm4, %v404_v62, %v405_v55  ;;  %v413_v26 = vsel %vm19983_vm4, %v411_v19, %v412_v9  ;;  %v423_v52 = vrot.slane %v14529_v46, 5  ;;  %v426_v53 = vrot.slane %v14530_v47, 5  ;;  %v15744_v55 = vld [vmem:[%s19972_s11 + $0x290] sm:$0x8]  ;;  %v14533_v6 = vld [vmem:[%s19972_s11 + $0x390] sm:$0x1] }
  0x4e   : > { %18033 = vmatprep.subr.bf16.mxu0 %v19497_v43  ;;  %17424 = vmatpush3.bf16.msra.mxu1 %v19500_v28  ;;  %v14563_v11 = vcombine.low %v403_v61, %v406_v7  ;;  %v7598_v28 = vrot.slane %v7596_v21, 4  ;;  %v14564_v32 = vcombine.low %v410_v18, %v413_v26  ;;  %v420_v54 = vsel %vm19983_vm4, %v418_v45, %v419_v34  ;;  %v15746_v61 = vld [vmem:[%s19972_s11 + $0x298] sm:$0x7]  ;;  %v15748_v12 = vld [vmem:[%s19972_s11 + $0x2b0] sm:$0xf] }
  0x4f   : > { %17394 = vmatmul.mubr.bf16.gmra.mrb[16].mxu1 %v14562_v49  ;;  %17457 = vmatprep.subr.bf16.mxu1 %v20198_v48  ;;  %v14550_v49 = vrot.slane %v14528_v41, 9  ;;  %v14565_v57 = vcombine.low %v417_v44, %v420_v54  ;;  %v7607_v58 = vsel %vm19989_vm5, %v7605_v51, %v7606_v40  ;;  %v425_v60 = vrot.slane %v423_v52, 4  ;;  %v15749_v16 = vld [vmem:[%s19972_s11 + $0x2b4] sm:$0x7]  ;;  %v14535_v23 = vld [vmem:[%s19972_s11 + $0x3a8] sm:$0xf] }
  0x50   : > { %18002 = vmatmul.mubr.bf16.vlgmr.msra.gmra.mrb[0].mxu0 %v15810_v2  ;;  %17397 = vmatprep.mubr.bf16.mxu1 %v14563_v11  ;;  %v7600_v37 = vsel %vm19989_vm5, %v7598_v28, %v7599_v22  ;;  %v15813_v62 = vcombine.low %v7604_v50, %v7607_v58  ;;  %v15782_v63 = vrot.slane %v15744_v55, 11  ;;  %v7610_v0 = vrot.slane %v15745_v56, 7  ;;  %v19505_v2 = vld [vmem:[%s24527_s1 + $0x3a0] sm:$0xff]   ;;  %v15747_v11 = vld [vmem:[%s19972_s11 + $0x2ac] sm:$0x8]  ;;  %v19509_v47 = vld [vmem:[%s24527_s1 + $0x3b0] sm:$0xff]  }
  0x51   : > { %18034 = vmatpush3.bf16.msra.mxu0 %v19497_v43  ;;  %18005 = vmatprep.mubr.bf16.mxu0 %v15811_v17  ;;  %v15812_v43 = vcombine.low %v7597_v27, %v7600_v37  ;;  %v7613_v1 = vrot.slane %v15746_v61, 7  ;;  %v427_v3 = vsel %vm19983_vm4, %v425_v60, %v426_v53  ;;  %v14551_v10 = vrot.slane %v14531_v4, 9  ;;  %v14534_v22 = vld [vmem:[%s19972_s11 + $0x3a4] sm:$0xe]  ;;  %v14536_v28 = vld [vmem:[%s19972_s11 + $0x3ac] sm:$0x1] }
  0x52   : > { %18035 = vmatprep.subr.bf16.mxu0 %v19499_v59  ;;  %v7611_v8 = vsel %vm19989_vm5, %v15782_v63, %v7610_v0  ;;  %v7612_v9 = vrot.slane %v7610_v0, 4  ;;  %v430_v13 = vrot.slane %v14532_v5, 5  ;;  %v433_v14 = vrot.slane %v14533_v6, 5  ;;  %v15750_v35 = vld [vmem:[%s19972_s11 + $0x2c8] sm:$0x8]  ;;  %v19510_v0 = vld [vmem:[%s24527_s1 + $0x3b8] sm:$0xff]  }
  0x53   : > { %v15783_v17 = vrot.slane %v15747_v11, 11  ;;  %v7617_v18 = vrot.slane %v15748_v12, 7  ;;  %v7620_v21 = vrot.slane %v15749_v16, 7  ;;  %v14552_v31 = vrot.slane %v14534_v22, 9  ;;  %v15751_v36 = vld [vmem:[%s19972_s11 + $0x2cc] sm:$0xf] }
  0x54   : > { %v7614_v19 = vsel %vm19989_vm5, %v7612_v9, %v7613_v1  ;;  %v432_v26 = vrot.slane %v430_v13, 4  ;;  %v440_v33 = vrot.slane %v14536_v28, 5  ;;  %v15752_v37 = vld [vmem:[%s19972_s11 + $0x2d0] sm:$0x7]  ;;  %v7624_v44 = vrot.slane %v15751_v36, 7 }
  0x55   : > { %18036 = vmatpush3.bf16.msra.mxu0 %v19499_v59  ;;  %v424_v59 = vsel %vm19983_vm4, %v14550_v49, %v423_v52  ;;  %v15814_v24 = vcombine.low %v7611_v8, %v7614_v19  ;;  %v7618_v27 = vsel %vm19989_vm5, %v15783_v17, %v7617_v18  ;;  %v7619_v30 = vrot.slane %v7617_v18, 4  ;;  %v14577_v46 = vld [vmem:[%s19972_s11 + $0x154] sm:$0xc]  ;;  %v14578_v50 = vld [vmem:[%s19972_s11 + $0x158] sm:$0xf] }
  0x56   : > { %18037 = vmatprep.subr.bf16.mxu0 %v19501_v25  ;;  %v14566_v7 = vcombine.low %v424_v59, %v427_v3  ;;  %v434_v34 = vsel %vm19983_vm4, %v432_v26, %v433_v14  ;;  %v7627_v45 = vrot.slane %v15752_v37, 7  ;;  %v14579_v51 = vld [vmem:[%s19972_s11 + $0x15c] sm:$0x3]  ;;  %v14625_v53 = vrot.slane %v14577_v46, 10  ;;  %v15753_v58 = vld [vmem:[%s19972_s11 + $0x2e4] sm:$0x8] }
  0x57   : > { %17398 = vmatmul.mubr.bf16.gmra.mrb[20].mxu1 %v14564_v32  ;;  %v437_v32 = vrot.slane %v14535_v23, 5  ;;  %v7621_v39 = vsel %vm19989_vm5, %v7619_v30, %v7620_v21  ;;  %v7626_v56 = vrot.slane %v7624_v44, 4  ;;  %v15754_v59 = vld [vmem:[%s19972_s11 + $0x2e8] sm:$0xf]  ;;  %v871_v60 = vrot.slane %v14579_v51, 6 }
  0x58   : > { %18006 = vmatmul.mubr.bf16.gmra.mrb[4].mxu0 %v15812_v43  ;;  %17401 = vmatprep.mubr.bf16.mxu1 %v14565_v57  ;;  %v15784_v43 = vrot.slane %v15750_v35, 11  ;;  %v868_v57 = vrot.slane %v14578_v50, 6  ;;  %v15755_v61 = vld [vmem:[%s19972_s11 + $0x2ec] sm:$0x7]  ;;  %v7631_v63 = vrot.slane %v15754_v59, 7 }
  0x59   : > { %18038 = vmatpush3.bf16.msra.mxu0 %v19501_v25  ;;  %18009 = vmatprep.mubr.bf16.mxu0 %v15813_v62  ;;  %v431_v25 = vsel %vm19983_vm4, %v14551_v10, %v430_v13  ;;  %v438_v40 = vsel %vm19983_vm4, %v14552_v31, %v437_v32  ;;  %v439_v41 = vrot.slane %v437_v32, 4  ;;  %v15785_v62 = vrot.slane %v15753_v58, 11  ;;  %v14580_v5 = vld [vmem:[%s19972_s11 + $0x170] sm:$0xc]  ;;  %v14581_v6 = vld [vmem:[%s19972_s11 + $0x174] sm:$0xf] }
  0x5a   : > { %18039 = vmatprep.subr.bf16.mxu0 %v19503_v42  ;;  %v14567_v38 = vcombine.low %v431_v25, %v434_v34  ;;  %v7625_v55 = vsel %vm19989_vm5, %v15784_v43, %v7624_v44  ;;  %v7628_v1 = vsel %vm19989_vm5, %v7626_v56, %v7627_v45  ;;  %v870_v3 = vrot.slane %v868_v57, 4  ;;  %v14582_v10 = vld [vmem:[%s19972_s11 + $0x178] sm:$0x3]  ;;  %v15756_v16 = vld [vmem:[%s19972_s11 + $0x300] sm:$0x8]  ;;  %v19504_v30 = vld [vmem:[%s24527_s1 + $0x88] sm:$0xff]  }
  0x5b   : > { %v441_v49 = vsel %vm19983_vm4, %v439_v41, %v440_v33  ;;  %v7634_v4 = vrot.slane %v15755_v61, 7  ;;  %v7632_v8 = vsel %vm19989_vm5, %v15785_v62, %v7631_v63  ;;  %v7633_v9 = vrot.slane %v7631_v63, 4  ;;  %v15757_v19 = vld [vmem:[%s19972_s11 + $0x304] sm:$0xf]  ;;  %v15758_v21 = vld [vmem:[%s19972_s11 + $0x308] sm:$0x7] }
  0x5c   : > { %v14568_v54 = vcombine.low %v438_v40, %v441_v49  ;;  %v14626_v11 = vrot.slane %v14580_v5, 10  ;;  %v872_v12 = vsel %vm20305_vm8, %v870_v3, %v871_v60  ;;  %v875_v13 = vrot.slane %v14581_v6, 6  ;;  %v14583_v28 = vld [vmem:[%s19972_s11 + $0x18c] sm:$0xc]  ;;  %v20343_v31 = vld [vmem:[%s24527_s1 + $0x3c0] sm:$0xff]   ;;  %v19506_v60 = vld [vmem:[%s24527_s1 + $0x90] sm:$0xff]  }
  0x5d   : > { %18040 = vmatpush3.bf16.msra.mxu0 %v19503_v42  ;;  %v15815_v42 = vcombine.low %v7618_v27, %v7621_v39  ;;  %v878_v14 = vrot.slane %v14582_v10, 6  ;;  %v7635_v18 = vsel %vm19989_vm5, %v7633_v9, %v7634_v4  ;;  %v15786_v22 = vrot.slane %v15756_v16, 11  ;;  %v14585_v35 = vld [vmem:[%s19972_s11 + $0x194] sm:$0x3]  ;;  %v15759_v37 = vld [vmem:[%s19972_s11 + $0x31c] sm:$0x8] }
  0x5e   : > { %18041 = vmatprep.subr.bf16.mxu0 %v19505_v2  ;;  %v15817_v23 = vcombine.low %v7632_v8, %v7635_v18  ;;  %v877_v25 = vrot.slane %v875_v13, 4  ;;  %v7638_v26 = vrot.slane %v15757_v19, 7  ;;  %v7641_v27 = vrot.slane %v15758_v21, 7  ;;  %v15760_v41 = vld [vmem:[%s19972_s11 + $0x320] sm:$0xf]  ;;  %v19508_v8 = vld [vmem:[%s24527_s1 + $0x98] sm:$0xff]  }
  0x5f   : > { %17402 = vmatmul.mubr.bf16.gmra.mrb[24].mxu1 %v14566_v7  ;;  %v15816_v7 = vcombine.low %v7625_v55, %v7628_v1  ;;  %v14627_v36 = vrot.slane %v14583_v28, 10  ;;  %v885_v40 = vrot.slane %v14585_v35, 6  ;;  %v15787_v44 = vrot.slane %v15759_v37, 11  ;;  %v15762_v62 = vld [vmem:[%s19972_s11 + $0x338] sm:$0x8] }
  0x60   : > { %18010 = vmatmul.mubr.bf16.gmra.mrb[8].mxu0 %v15814_v24  ;;  %17405 = vmatprep.mubr.bf16.mxu1 %v14567_v38  ;;  %v876_v24 = vsel %vm20305_vm8, %v14626_v11, %v875_v13  ;;  %v879_v32 = vsel %vm20305_vm8, %v877_v25, %v878_v14  ;;  %v7639_v33 = vsel %vm19989_vm5, %v15786_v22, %v7638_v26  ;;  %v7640_v34 = vrot.slane %v7638_v26, 4  ;;  %v15763_v63 = vld [vmem:[%s19972_s11 + $0x33c] sm:$0xf]  ;;  %v15764_v3 = vld [vmem:[%s19972_s11 + $0x340] sm:$0x7] }
  0x61   : > { %18042 = vmatpush3.bf16.msra.mxu0 %v19505_v2  ;;  %18013 = vmatprep.mubr.bf16.mxu0 %v15815_v42  ;;  %v869_v2 = vsel %vm20305_vm8, %v14625_v53, %v868_v57  ;;  %v14658_v38 = vcombine.low %v876_v24, %v879_v32  ;;  %v15761_v42 = vld [vmem:[%s19972_s11 + $0x324] sm:$0x7]  ;;  %v7645_v45 = vrot.slane %v15760_v41, 7  ;;  %v14587_v53 = vld [vmem:[%s19972_s11 + $0x1ac] sm:$0xf]  ;;  %v15788_v5 = vrot.slane %v15762_v62, 11 }
  0x62   : > { %18043 = vmatprep.subr.bf16.mxu0 %v19507_v29  ;;  %v14657_v17 = vcombine.low %v869_v2, %v872_v12  ;;  %v7642_v43 = vsel %vm19989_vm5, %v7640_v34, %v7641_v27  ;;  %v7648_v46 = vrot.slane %v15761_v42, 7  ;;  %v889_v58 = vrot.slane %v14587_v53, 6  ;;  %v14589_v10 = vld [vmem:[%s19972_s11 + $0x1c4] sm:$0xc]  ;;  %v14590_v11 = vld [vmem:[%s19972_s11 + $0x1c8] sm:$0xf] }
  0x63   : > { %v15818_v49 = vcombine.low %v7639_v33, %v7642_v43  ;;  %v7646_v56 = vsel %vm19989_vm5, %v15787_v44, %v7645_v45  ;;  %v7647_v57 = vrot.slane %v7645_v45, 4  ;;  %v7652_v6 = vrot.slane %v15763_v63, 7  ;;  %v14591_v12 = vld [vmem:[%s19972_s11 + $0x1cc] sm:$0x3]  ;;  %v15765_v18 = vld [vmem:[%s19972_s11 + $0x354] sm:$0x8] }
  0x64   : > { %v891_v2 = vrot.slane %v889_v58, 4  ;;  %v15766_v19 = vld [vmem:[%s19972_s11 + $0x358] sm:$0xf]  ;;  %v896_v21 = vrot.slane %v14590_v11, 6  ;;  %v899_v22 = vrot.slane %v14591_v12, 6  ;;  %v15789_v24 = vrot.slane %v15765_v18, 11 }
  0x65   : > { %18044 = vmatpush3.bf16.msra.mxu0 %v19507_v29  ;;  %v14584_v29 = vld [vmem:[%s19972_s11 + $0x190] sm:$0xf]  ;;  %v7653_v14 = vsel %vm19989_vm5, %v15788_v5, %v7652_v6  ;;  %v7654_v16 = vrot.slane %v7652_v6, 4  ;;  %v7659_v25 = vrot.slane %v15766_v19, 7  ;;  %v14592_v28 = vld [vmem:[%s19972_s11 + $0x1e0] sm:$0xc] }
  0x66   : > { %18045 = vmatprep.subr.bf16.mxu0 %v19509_v47  ;;  %v882_v39 = vrot.slane %v14584_v29, 6  ;;  %v14593_v29 = vld [vmem:[%s19972_s11 + $0x1e4] sm:$0xf]  ;;  %v898_v33 = vrot.slane %v896_v21, 4  ;;  %v14594_v35 = vld [vmem:[%s19972_s11 + $0x1e8] sm:$0x3] }
  0x67   : > { %17406 = vmatmul.mubr.bf16.gmra.mrb[28].mxu1 %v14568_v54  ;;  %v14588_v54 = vld [vmem:[%s19972_s11 + $0x1b0] sm:$0x3]  ;;  %v7660_v34 = vsel %vm19989_vm5, %v15789_v24, %v7659_v25  ;;  %v7661_v37 = vrot.slane %v7659_v25, 4  ;;  %v15768_v42 = vld [vmem:[%s19972_s11 + $0x370] sm:$0x8] }
  0x68   : > { %18014 = vmatmul.mubr.bf16.gmra.mrb[12].mxu0 %v15816_v7  ;;  %17425 = vmatprep.mubr.bf16.mxu1 %v14657_v17  ;;  %v883_v50 = vsel %vm20305_vm8, %v14627_v36, %v882_v39  ;;  %v884_v51 = vrot.slane %v882_v39, 4  ;;  %v892_v59 = vrot.slane %v14588_v54, 6  ;;  %v7655_v7 = vrot.slane %v15764_v3, 7  ;;  %v19511_v36 = vld [vmem:[%s24527_s1 + $0xa0] sm:$0xff]   ;;  %v15769_v43 = vld [vmem:[%s19972_s11 + $0x374] sm:$0xf] }
  0x69   : > { %18046 = vmatpush3.bf16.msra.mxu0 %v19509_v47  ;;  %18017 = vmatprep.mubr.bf16.mxu0 %v15817_v23  ;;  %v14586_v47 = vld [vmem:[%s19972_s11 + $0x1a8] sm:$0xc]  ;;  %v14629_v17 = vrot.slane %v14589_v10, 10  ;;  %v15767_v23 = vld [vmem:[%s19972_s11 + $0x35c] sm:$0x7]  ;;  %v903_v39 = vrot.slane %v14593_v29, 6  ;;  %v900_v41 = vsel %vm20305_vm8, %v898_v33, %v899_v22 }
  0x6a   : > { %18047 = vmatprep.subr.bf16.mxu0 %v19510_v0  ;;  %v14628_v55 = vrot.slane %v14586_v47, 10  ;;  %v886_v61 = vsel %vm20305_vm8, %v884_v51, %v885_v40  ;;  %v893_v9 = vsel %vm20305_vm8, %v891_v2, %v892_v59  ;;  %v7656_v26 = vsel %vm19989_vm5, %v7654_v16, %v7655_v7  ;;  %v15770_v44 = vld [vmem:[%s19972_s11 + $0x378] sm:$0x7]  ;;  %v15773_v3 = vld [vmem:[%s19972_s11 + $0x394] sm:$0x7] }
  0x6b   : > { %v7662_v27 = vrot.slane %v15767_v23, 7  ;;  %v897_v32 = vsel %vm20305_vm8, %v14629_v17, %v896_v21  ;;  %v906_v40 = vrot.slane %v14594_v35, 6  ;;  %v15790_v51 = vrot.slane %v15768_v42, 11  ;;  %v14598_v10 = vld [vmem:[%s19972_s11 + $0x218] sm:$0xc]  ;;  %v19514_v12 = vld [vmem:[%s24527_s1 + $0xb0] sm:$0xff]  }
  0x6c   : > { %v890_v1 = vsel %vm20305_vm8, %v14628_v55, %v889_v58  ;;  %v14661_v45 = vcombine.low %v897_v32, %v900_v41  ;;  %v7666_v53 = vrot.slane %v15769_v43, 7  ;;  %v7669_v54 = vrot.slane %v15770_v44, 7  ;;  %v14595_v55 = vld [vmem:[%s19972_s11 + $0x1fc] sm:$0xc]  ;;  %v14597_v58 = vld [vmem:[%s19972_s11 + $0x204] sm:$0x3] }
  0x6d   : > { %18048 = vmatpush3.bf16.msra.mxu0 %v19510_v0  ;;  %v7649_v0 = vsel %vm19989_vm5, %v7647_v57, %v7648_v46  ;;  %v14660_v13 = vcombine.low %v890_v1, %v893_v9  ;;  %v7663_v46 = vsel %vm19989_vm5, %v7661_v37, %v7662_v27  ;;  %v14596_v57 = vld [vmem:[%s19972_s11 + $0x200] sm:$0xf]  ;;  %v14631_v59 = vrot.slane %v14595_v55, 10  ;;  %v15772_v1 = vld [vmem:[%s19972_s11 + $0x390] sm:$0xf] }
  0x6e   : > { %18081 = vmatprep.subr.bf16.mxu0 %v20343_v31  ;;  %v15819_v4 = vcombine.low %v7646_v56, %v7649_v0  ;;  %v7667_v62 = vsel %vm19989_vm5, %v15790_v51, %v7666_v53  ;;  %v7668_v63 = vrot.slane %v7666_v53, 4  ;;  %v15771_v0 = vld [vmem:[%s19972_s11 + $0x38c] sm:$0x8]  ;;  %v913_v2 = vrot.slane %v14597_v58, 6  ;;  %v14599_v11 = vld [vmem:[%s19972_s11 + $0x21c] sm:$0xf] }
  0x6f   : > { %17426 = vmatmul.mubr.bf16.vlgmr.msra.gmra.mrb[0].mxu1 %v14658_v38  ;;  %v14630_v38 = vrot.slane %v14592_v28, 10  ;;  %v7673_v5 = vrot.slane %v15772_v1, 7  ;;  %v7676_v9 = vrot.slane %v15773_v3, 7  ;;  %v14600_v17 = vld [vmem:[%s19972_s11 + $0x220] sm:$0x3]  ;;  %v14632_v18 = vrot.slane %v14598_v10, 10 }
  0x70   : > { %17458 = vmatpush3.bf16.msra.mxu1 %v20198_v48  ;;  %18018 = vmatmul.mubr.bf16.gmra.mrb[16].mxu0 %v15818_v49  ;;  %v14659_v48 = vcombine.low %v883_v50, %v886_v61  ;;  %v905_v49 = vrot.slane %v903_v39, 4  ;;  %v15821_v50 = vcombine.low %v7660_v34, %v7663_v46  ;;  %v7670_v6 = vsel %vm19989_vm5, %v7668_v63, %v7669_v54  ;;  %v15774_v23 = vld [vmem:[%s19972_s11 + $0x3a8] sm:$0x8]  ;;  %v15776_v27 = vld [vmem:[%s19972_s11 + $0x3b0] sm:$0x7]  ;;  %v20467_v63 = vld [vmem:[%s24527_s1 + $0xc0] sm:$0xff]  }
  0x71   : > { %17459 = vmatprep.subr.bf16.mxu1 %v19504_v30  ;;  %18021 = vmatprep.mubr.bf16.mxu0 %v15819_v4  ;;  %v904_v47 = vsel %vm20305_vm8, %v14630_v38, %v903_v39  ;;  %v15791_v4 = vrot.slane %v15771_v0, 11  ;;  %v7675_v16 = vrot.slane %v7673_v5, 4  ;;  %v917_v21 = vrot.slane %v14599_v11, 6  ;;  %v14601_v38 = vld [vmem:[%s19972_s11 + $0x234] sm:$0xc] }
  0x72   : > { %17429 = vmatprep.mubr.bf16.mxu1 %v14659_v48  ;;  %v907_v56 = vsel %vm20305_vm8, %v905_v49, %v906_v40  ;;  %v910_v48 = vrot.slane %v14596_v57, 6  ;;  %v920_v22 = vrot.slane %v14600_v17, 6  ;;  %v15792_v28 = vrot.slane %v15774_v23, 11  ;;  %v14602_v39 = vld [vmem:[%s19972_s11 + $0x238] sm:$0xf] }
  0x73   : > { %v14662_v61 = vcombine.low %v904_v47, %v907_v56  ;;  %v7677_v25 = vsel %vm19989_vm5, %v7675_v16, %v7676_v9  ;;  %v919_v32 = vrot.slane %v917_v21, 4  ;;  %v7683_v34 = vrot.slane %v15776_v27, 7  ;;  %v19516_v40 = vld [vmem:[%s24527_s1 + $0xb8] sm:$0xff]   ;;  %v15834_v49 = vld [vmem:[%s19972_s11 + $0x34c] sm:$0xf] }
  0x74   : > { %17460 = vmatpush3.bf16.msra.mxu1 %v19504_v30  ;;  %v15820_v30 = vcombine.low %v7653_v14, %v7656_v26  ;;  %v911_v7 = vsel %vm20305_vm8, %v14631_v59, %v910_v48  ;;  %v7674_v14 = vsel %vm19989_vm5, %v15791_v4, %v7673_v5  ;;  %v15775_v26 = vld [vmem:[%s19972_s11 + $0x3ac] sm:$0xf]  ;;  %v14603_v42 = vld [vmem:[%s19972_s11 + $0x23c] sm:$0x3]  ;;  %v14633_v43 = vrot.slane %v14601_v38, 10 }
  0x75   : > { %17461 = vmatprep.subr.bf16.mxu1 %v19506_v60  ;;  %v15823_v29 = vcombine.low %v7674_v14, %v7677_v25  ;;  %v7680_v33 = vrot.slane %v15775_v26, 7  ;;  %v921_v35 = vsel %vm20305_vm8, %v919_v32, %v920_v22  ;;  %v924_v44 = vrot.slane %v14602_v39, 6  ;;  %v14604_v57 = vld [vmem:[%s19972_s11 + $0x250] sm:$0xc]  ;;  %v14605_v58 = vld [vmem:[%s19972_s11 + $0x254] sm:$0xf] }
  0x76   : > { %v927_v47 = vrot.slane %v14603_v42, 6  ;;  %v8173_v56 = vrot.slane %v15834_v49, 7  ;;  %v15838_v9 = vld [vmem:[%s19972_s11 + $0x36c] sm:$0x7]  ;;  %v14608_v17 = vld [vmem:[%s19972_s11 + $0x270] sm:$0xf] }
  0x77   : > { %17430 = vmatmul.mubr.bf16.gmra.mrb[4].mxu1 %v14660_v13  ;;  %v15822_v13 = vcombine.low %v7667_v62, %v7670_v6  ;;  %v7682_v37 = vrot.slane %v7680_v33, 4  ;;  %v925_v54 = vsel %vm20305_vm8, %v14633_v43, %v924_v44  ;;  %v926_v55 = vrot.slane %v924_v44, 4  ;;  %v15836_v6 = vld [vmem:[%s19972_s11 + $0x364] sm:$0x8]  ;;  %v15839_v25 = vld [vmem:[%s19972_s11 + $0x380] sm:$0x8] }
  0x78   : > { %17462 = vmatpush3.bf16.msra.mxu1 %v19506_v60  ;;  %18022 = vmatmul.mubr.bf16.gmra.mrb[20].mxu0 %v15820_v30  ;;  %v19512_v60 = vld [vmem:[%s24527_s1 + $0xa8] sm:$0xff]   ;;  %v918_v30 = vsel %vm20305_vm8, %v14632_v18, %v917_v21  ;;  %v931_v62 = vrot.slane %v14605_v58, 6  ;;  %v8175_v1 = vrot.slane %v8173_v56, 4  ;;  %v15882_v10 = vrot.slane %v15836_v6, 11  ;;  %v14609_v18 = vld [vmem:[%s19972_s11 + $0x274] sm:$0x3] }
  0x79   : > { %17463 = vmatprep.subr.bf16.mxu1 %v19508_v8  ;;  %17433 = vmatprep.mubr.bf16.mxu1 %v14661_v45  ;;  %v14664_v41 = vcombine.low %v918_v30, %v921_v35  ;;  %v15833_v45 = vld [vmem:[%s19972_s11 + $0x348] sm:$0x8]  ;;  %v7684_v46 = vsel %vm19989_vm5, %v7682_v37, %v7683_v34  ;;  %v8183_v16 = vrot.slane %v15838_v9, 7  ;;  %v15840_v26 = vld [vmem:[%s19972_s11 + $0x384] sm:$0xf]  ;;  %v941_v27 = vrot.slane %v14609_v18, 6 }
  0x7a   : > { %18025 = vmatprep.mubr.bf16.mxu0 %v15821_v50  ;;  %v15835_v50 = vld [vmem:[%s19972_s11 + $0x350] sm:$0x7]  ;;  %v15881_v51 = vrot.slane %v15833_v45, 11  ;;  %v933_v5 = vrot.slane %v931_v62, 4  ;;  %v8187_v30 = vrot.slane %v15840_v26, 7  ;;  %v19515_v32 = vld [vmem:[%s24527_s1 + $0x3c8] sm:$0xff]  }
  0x7b   : > { %v8176_v59 = vrot.slane %v15835_v50, 7  ;;  %v14610_v37 = vld [vmem:[%s19972_s11 + $0x288] sm:$0xc]  ;;  %v14611_v38 = vld [vmem:[%s19972_s11 + $0x28c] sm:$0xf] }
  0x7c   : > { %17464 = vmatpush3.bf16.msra.mxu1 %v19508_v8  ;;  %v912_v8 = vrot.slane %v910_v48, 4  ;;  %v928_v48 = vsel %vm20305_vm8, %v926_v55, %v927_v47  ;;  %v8174_v0 = vsel %vm19989_vm5, %v15881_v51, %v8173_v56  ;;  %v14612_v42 = vld [vmem:[%s19972_s11 + $0x290] sm:$0x3]  ;;  %v14636_v43 = vrot.slane %v14610_v37, 10  ;;  %v15842_v47 = vld [vmem:[%s19972_s11 + $0x39c] sm:$0x8] }
  0x7d   : > { %17465 = vmatprep.subr.bf16.mxu1 %v19511_v36  ;;  %v14665_v3 = vcombine.low %v925_v54, %v928_v48  ;;  %v945_v45 = vrot.slane %v14611_v38, 6  ;;  %v15843_v51 = vld [vmem:[%s19972_s11 + $0x3a0] sm:$0xf]  ;;  %v15884_v54 = vrot.slane %v15842_v47, 11 }
  0x7e   : > { %v914_v19 = vsel %vm20305_vm8, %v912_v8, %v913_v2  ;;  %v8177_v8 = vsel %vm19989_vm5, %v8175_v1, %v8176_v59  ;;  %v8194_v58 = vrot.slane %v15843_v51, 7  ;;  %v14615_v1 = vld [vmem:[%s19972_s11 + $0x2ac] sm:$0x3]  ;;  %v15852_v51 = vld [vmem:[%s19972_s11 + $0x3f4] sm:$0xf] }
  0x7f   : > { %17434 = vmatmul.mubr.bf16.gmra.mrb[8].mxu1 %v14662_v61  ;;  %v14663_v24 = vcombine.low %v911_v7, %v914_v19  ;;  %v14634_v61 = vrot.slane %v14604_v57, 10  ;;  %v15837_v7 = vld [vmem:[%s19972_s11 + $0x368] sm:$0xf]  ;;  %v946_v56 = vsel %vm20305_vm8, %v14636_v43, %v945_v45  ;;  %v947_v57 = vrot.slane %v945_v45, 4  ;;  %v14620_v43 = vld [vmem:[%s19972_s11 + $0x2e0] sm:$0xf] }
  0x80   : > { %17466 = vmatpush3.bf16.msra.mxu1 %v19511_v36  ;;  %18026 = vmatmul.mubr.bf16.gmra.mrb[24].mxu0 %v15822_v13  ;;  %v7681_v36 = vsel %vm19989_vm5, %v15792_v28, %v7680_v33  ;;  %v8180_v11 = vrot.slane %v15837_v7, 7  ;;  %v15913_v13 = vcombine.low %v8174_v0, %v8177_v8  ;;  %v15841_v28 = vld [vmem:[%s19972_s11 + $0x388] sm:$0x7]  ;;  %v8195_v0 = vsel %vm19989_vm5, %v15884_v54, %v8194_v58  ;;  %v15846_v7 = vld [vmem:[%s19972_s11 + $0x3bc] sm:$0xf] }
  0x81   : > { %17467 = vmatprep.subr.bf16.mxu1 %v19512_v60  ;;  %17437 = vmatprep.mubr.bf16.mxu1 %v14663_v24  ;;  %v15824_v53 = vcombine.low %v7681_v36, %v7684_v46  ;;  %v932_v4 = vsel %vm20305_vm8, %v14634_v61, %v931_v62  ;;  %v938_v24 = vrot.slane %v14608_v17, 6  ;;  %v8190_v36 = vrot.slane %v15841_v28, 7  ;;  %v14614_v61 = vld [vmem:[%s19972_s11 + $0x2a8] sm:$0xf]  ;;  %v19517_v62 = vld [vmem:[%s24527_s1 + $0x3d0] sm:$0xff]  }
  0x82   : > { %18029 = vmatprep.mubr.bf16.mxu0 %v15823_v29  ;;  %v8181_v22 = vsel %vm19989_vm5, %v15882_v10, %v8180_v11  ;;  %v8182_v23 = vrot.slane %v8180_v11, 4  ;;  %v15883_v29 = vrot.slane %v15839_v25, 11  ;;  %v948_v46 = vrot.slane %v14612_v42, 6  ;;  %v15847_v8 = vld [vmem:[%s19972_s11 + $0x3c0] sm:$0x7] }
  0x83   : > { %v940_v35 = vrot.slane %v938_v24, 4  ;;  %v955_v6 = vrot.slane %v14615_v1, 6  ;;  %v8201_v11 = vrot.slane %v15846_v7, 7  ;;  %v15848_v28 = vld [vmem:[%s19972_s11 + $0x3d4] sm:$0x8] }
  0x84   : > { %17468 = vmatpush3.bf16.msra.mxu1 %v19512_v60  ;;  %v14606_v60 = vld [vmem:[%s19972_s11 + $0x258] sm:$0x3]  ;;  %v8184_v33 = vsel %vm19989_vm5, %v8182_v23, %v8183_v16  ;;  %v949_v48 = vsel %vm20305_vm8, %v947_v57, %v948_v46  ;;  %v15886_v37 = vrot.slane %v15848_v28, 11  ;;  %v14619_v42 = vld [vmem:[%s19972_s11 + $0x2dc] sm:$0xc]  ;;  %v8215_v57 = vrot.slane %v15852_v51, 7 }
  0x85   : > { %17469 = vmatprep.subr.bf16.mxu1 %v19514_v12  ;;  %v934_v2 = vrot.slane %v14606_v60, 6  ;;  %v15914_v39 = vcombine.low %v8181_v22, %v8184_v33  ;;  %v942_v44 = vsel %vm20305_vm8, %v940_v35, %v941_v27  ;;  %v14613_v60 = vld [vmem:[%s19972_s11 + $0x2a4] sm:$0xc]  ;;  %v15850_v35 = vld [vmem:[%s19972_s11 + $0x3dc] sm:$0x7] }
  0x86   : > { %v14624_v1 = vld [vmem:[%s19972_s11 + $0x300] sm:$0x3] }
  0x87   : > { %17438 = vmatmul.mubr.bf16.gmra.mrb[12].mxu1 %v14664_v41  ;;  %v935_v14 = vsel %vm20305_vm8, %v933_v5, %v934_v2  ;;  %v8189_v41 = vrot.slane %v8187_v30, 4  ;;  %v14637_v2 = vrot.slane %v14613_v60, 10  ;;  %v952_v5 = vrot.slane %v14614_v61, 6  ;;  %v14622_v60 = vld [vmem:[%s19972_s11 + $0x2f8] sm:$0xc] }
  0x88   : > { %17470 = vmatpush3.bf16.msra.mxu1 %v19514_v12  ;;  %18030 = vmatmul.mubr.bf16.gmra.mrb[28].mxu0 %v15824_v53  ;;  %v14607_v12 = vld [vmem:[%s19972_s11 + $0x26c] sm:$0xc]  ;;  %v14666_v21 = vcombine.low %v932_v4, %v935_v14  ;;  %v15844_v53 = vld [vmem:[%s19972_s11 + $0x3a4] sm:$0x7]  ;;  %v14668_v4 = vcombine.low %v946_v56, %v949_v48  ;;  %v19519_v14 = vld [vmem:[%s24527_s1 + $0x3d8] sm:$0xff]  }
  0x89   : > { %17471 = vmatprep.subr.bf16.mxu1 %v19516_v40  ;;  %17441 = vmatprep.mubr.bf16.mxu1 %v14665_v3  ;;  %v14635_v19 = vrot.slane %v14607_v12, 10  ;;  %v8191_v50 = vsel %vm19989_vm5, %v8189_v41, %v8190_v36  ;;  %v8197_v59 = vrot.slane %v15844_v53, 7  ;;  %v15845_v3 = vld [vmem:[%s19972_s11 + $0x3b8] sm:$0x8]  ;;  %v8204_v12 = vrot.slane %v15847_v8, 7 }
  0x8a   : > { %18049 = vmatprep.mubr.bf16.mxu0 %v15913_v13  ;;  %v15885_v10 = vrot.slane %v15845_v3, 11  ;;  %v14616_v13 = vld [vmem:[%s19972_s11 + $0x2c0] sm:$0xc]  ;;  %v953_v17 = vsel %vm20305_vm8, %v14637_v2, %v952_v5  ;;  %v954_v18 = vrot.slane %v952_v5, 4  ;;  %v966_v53 = vrot.slane %v14620_v43, 6  ;;  %v19523_v2 = vld [vmem:[%s24527_s1 + $0x3e8] sm:$0xff]  }
  0x8b   : > { %v939_v34 = vsel %vm20305_vm8, %v14635_v19, %v938_v24  ;;  %v14617_v19 = vld [vmem:[%s19972_s11 + $0x2c4] sm:$0xf]  ;;  %v14638_v22 = vrot.slane %v14616_v13, 10  ;;  %v8203_v24 = vrot.slane %v8201_v11, 4  ;;  %v14623_v61 = vld [vmem:[%s19972_s11 + $0x2fc] sm:$0xf] }
  0x8c   : > { %17472 = vmatpush3.bf16.msra.mxu1 %v19516_v40  ;;  %v8188_v40 = vsel %vm19989_vm5, %v15883_v29, %v8187_v30  ;;  %v14667_v49 = vcombine.low %v939_v34, %v942_v44  ;;  %v8202_v23 = vsel %vm19989_vm5, %v15885_v10, %v8201_v11  ;;  %v959_v25 = vrot.slane %v14617_v19, 6  ;;  %v15849_v29 = vld [vmem:[%s19972_s11 + $0x3d8] sm:$0xf]  ;;  %v14621_v44 = vld [vmem:[%s19972_s11 + $0x2e4] sm:$0x3] }
  0x8d   : > { %17505 = vmatprep.subr.bf16.mxu1 %v20467_v63  ;;  %v15915_v55 = vcombine.low %v8188_v40, %v8191_v50  ;;  %v956_v27 = vsel %vm20305_vm8, %v954_v18, %v955_v6  ;;  %v8208_v38 = vrot.slane %v15849_v29, 7  ;;  %v19521_v40 = vld [vmem:[%s24527_s1 + $0x3e0] sm:$0xff]   ;;  %v15851_v50 = vld [vmem:[%s19972_s11 + $0x3f0] sm:$0x8]  ;;  %v969_v54 = vrot.slane %v14621_v44, 6 }
  0x8e   : > { %v14669_v30 = vcombine.low %v953_v17, %v956_v27  ;;  %v960_v33 = vsel %vm20305_vm8, %v14638_v22, %v959_v25  ;;  %v961_v34 = vrot.slane %v959_v25, 4  ;;  %v15887_v56 = vrot.slane %v15851_v50, 11  ;;  %v15854_v8 = vld [vmem:[%s19972_s11 + $0x40c] sm:$0x8]  ;;  %v15856_v10 = vld [vmem:[%s19972_s11 + $0x414] sm:$0x7] }
  0x8f   : > { %17442 = vmatmul.mubr.bf16.gmra.mrb[16].mxu1 %v14666_v21  ;;  %v14618_v21 = vld [vmem:[%s19972_s11 + $0x2c8] sm:$0x3]  ;;  %v8209_v46 = vsel %vm19989_vm5, %v15886_v37, %v8208_v38  ;;  %v8210_v47 = vrot.slane %v8208_v38, 4  ;;  %v8217_v3 = vrot.slane %v8215_v57, 4  ;;  %v973_v5 = vrot.slane %v14623_v61, 6  ;;  %v19525_v22 = vld [vmem:[%s24527_s1 + $0x3f0] sm:$0xff]  }
  0x90   : > { %18050 = vmatmul.mubr.bf16.vlgmr.msra.gmra.mrb[0].mxu0 %v15914_v39  ;;  %17445 = vmatprep.mubr.bf16.mxu1 %v14667_v49  ;;  %v962_v26 = vrot.slane %v14618_v21, 6  ;;  %v8211_v39 = vrot.slane %v15850_v35, 7  ;;  %v14639_v49 = vrot.slane %v14619_v42, 10  ;;  %v976_v6 = vrot.slane %v14624_v1, 6  ;;  %v14681_v21 = vld [vmem:[%s19972_s11 + $0x158] sm:$0xe] }
  0x91   : > { %18082 = vmatpush3.bf16.msra.mxu0 %v20343_v31  ;;  %18053 = vmatprep.mubr.bf16.mxu0 %v15915_v55  ;;  %v8196_v31 = vrot.slane %v8194_v58, 4  ;;  %v15853_v55 = vld [vmem:[%s19972_s11 + $0x3f8] sm:$0x7]  ;;  %v15888_v17 = vrot.slane %v15854_v8, 11  ;;  %v8225_v19 = vrot.slane %v15856_v10, 7 }
  0x92   : > { %18083 = vmatprep.subr.bf16.mxu0 %v19515_v32  ;;  %v963_v41 = vsel %vm20305_vm8, %v961_v34, %v962_v26  ;;  %v8212_v58 = vsel %vm19989_vm5, %v8210_v47, %v8211_v39  ;;  %v967_v48 = vsel %vm20305_vm8, %v14639_v49, %v966_v53  ;;  %v14683_v25 = vld [vmem:[%s19972_s11 + $0x160] sm:$0x1]  ;;  %v14729_v26 = vrot.slane %v14681_v21, 9  ;;  %v15859_v35 = vld [vmem:[%s19972_s11 + $0x430] sm:$0x7]  ;;  %v19526_v38 = vld [vmem:[%s24527_s1 + $0x3f8] sm:$0xff]  }
  0x93   : > { %v8198_v9 = vsel %vm19989_vm5, %v8196_v31, %v8197_v59  ;;  %v14670_v45 = vcombine.low %v960_v33, %v963_v41  ;;  %v8218_v59 = vrot.slane %v15853_v55, 7  ;;  %v8216_v31 = vsel %vm19989_vm5, %v15887_v56, %v8215_v57  ;;  %v15858_v33 = vld [vmem:[%s19972_s11 + $0x42c] sm:$0xf]  ;;  %v14684_v43 = vld [vmem:[%s19972_s11 + $0x174] sm:$0xe] }
  0x94   : > { %v15916_v16 = vcombine.low %v8195_v0, %v8198_v9  ;;  %v968_v0 = vrot.slane %v966_v53, 4  ;;  %v15855_v9 = vld [vmem:[%s19972_s11 + $0x410] sm:$0xf]  ;;  %v1465_v34 = vrot.slane %v14683_v25, 5  ;;  %v8229_v37 = vrot.slane %v15858_v33, 7 }
  0x95   : > { %18084 = vmatpush3.bf16.msra.mxu0 %v19515_v32  ;;  %v8205_v32 = vsel %vm19989_vm5, %v8203_v24, %v8204_v12  ;;  %v8219_v12 = vsel %vm19989_vm5, %v8217_v3, %v8218_v59  ;;  %v8222_v18 = vrot.slane %v15855_v9, 7  ;;  %v14682_v24 = vld [vmem:[%s19972_s11 + $0x15c] sm:$0xf]  ;;  %v8232_v42 = vrot.slane %v15859_v35, 7  ;;  %v14685_v44 = vld [vmem:[%s19972_s11 + $0x178] sm:$0xf] }
  0x96   : > { %18085 = vmatprep.subr.bf16.mxu0 %v19517_v62  ;;  %v15917_v36 = vcombine.low %v8202_v23, %v8205_v32  ;;  %v970_v7 = vsel %vm20305_vm8, %v968_v0, %v969_v54  ;;  %v15857_v32 = vld [vmem:[%s19972_s11 + $0x428] sm:$0x8]  ;;  %v8231_v47 = vrot.slane %v8229_v37, 4  ;;  %v14686_v49 = vld [vmem:[%s19972_s11 + $0x17c] sm:$0x1]  ;;  %v14730_v50 = vrot.slane %v14684_v43, 9 }
  0x97   : > { %17446 = vmatmul.mubr.bf16.gmra.mrb[20].mxu1 %v14668_v4  ;;  %v14640_v4 = vrot.slane %v14622_v60, 10  ;;  %v14671_v11 = vcombine.low %v967_v48, %v970_v7  ;;  %v8223_v28 = vsel %vm19989_vm5, %v15888_v17, %v8222_v18  ;;  %v8224_v29 = vrot.slane %v8222_v18, 4  ;;  %v15860_v55 = vld [vmem:[%s19972_s11 + $0x444] sm:$0x8]  ;;  %v15862_v59 = vld [vmem:[%s19972_s11 + $0x44c] sm:$0x7] }
  0x98   : > { %18054 = vmatmul.mubr.bf16.gmra.mrb[4].mxu0 %v15916_v16  ;;  %17449 = vmatprep.mubr.bf16.mxu1 %v14669_v30  ;;  %v15919_v16 = vcombine.low %v8216_v31, %v8219_v12  ;;  %v1462_v30 = vrot.slane %v14682_v24, 5  ;;  %v1469_v53 = vrot.slane %v14685_v44, 5  ;;  %v1472_v54 = vrot.slane %v14686_v49, 5  ;;  %v14687_v1 = vld [vmem:[%s19972_s11 + $0x190] sm:$0xe]  ;;  %v19520_v3 = vld [vmem:[%s24527_s1 + $0xc8] sm:$0xff]  }
  0x99   : > { %18086 = vmatpush3.bf16.msra.mxu0 %v19517_v62  ;;  %18057 = vmatprep.mubr.bf16.mxu0 %v15917_v36  ;;  %v15918_v62 = vcombine.low %v8209_v46, %v8212_v58  ;;  %v974_v13 = vsel %vm20305_vm8, %v14640_v4, %v973_v5  ;;  %v15889_v36 = vrot.slane %v15857_v32, 11  ;;  %v8226_v39 = vsel %vm19989_vm5, %v8224_v29, %v8225_v19  ;;  %v15861_v58 = vld [vmem:[%s19972_s11 + $0x448] sm:$0xf]  ;;  %v20623_v4 = vld [vmem:[%s24527_s1 + $0x400] sm:$0xff]   ;;  %v14689_v8 = vld [vmem:[%s19972_s11 + $0x198] sm:$0x1] }
  0x9a   : > { %18087 = vmatprep.subr.bf16.mxu0 %v19519_v14  ;;  %v1464_v41 = vrot.slane %v1462_v30, 4  ;;  %v8233_v57 = vsel %vm19989_vm5, %v8231_v47, %v8232_v42  ;;  %v15890_v60 = vrot.slane %v15860_v55, 11  ;;  %v1471_v48 = vrot.slane %v1469_v53, 4  ;;  %v15863_v10 = vld [vmem:[%s19972_s11 + $0x460] sm:$0x8] }
  0x9b   : > { %v8230_v46 = vsel %vm19989_vm5, %v15889_v36, %v8229_v37  ;;  %v8236_v0 = vrot.slane %v15861_v58, 7  ;;  %v8239_v31 = vrot.slane %v15862_v59, 7  ;;  %v14731_v9 = vrot.slane %v14687_v1, 9  ;;  %v15866_v36 = vld [vmem:[%s19972_s11 + $0x47c] sm:$0x8] }
  0x9c   : > { %v1466_v51 = vsel %vm19983_vm4, %v1464_v41, %v1465_v34  ;;  %v15921_v61 = vcombine.low %v8230_v46, %v8233_v57  ;;  %v15891_v18 = vrot.slane %v15863_v10, 11  ;;  %v19522_v34 = vld [vmem:[%s24527_s1 + $0xd0] sm:$0xff]   ;;  %v15867_v37 = vld [vmem:[%s19972_s11 + $0x480] sm:$0xf]  ;;  %v15868_v41 = vld [vmem:[%s19972_s11 + $0x484] sm:$0x7] }
  0x9d   : > { %18088 = vmatpush3.bf16.msra.mxu0 %v19519_v14  ;;  %v975_v14 = vrot.slane %v973_v5, 4  ;;  %v1473_v5 = vsel %vm19983_vm4, %v1471_v48, %v1472_v54  ;;  %v8238_v7 = vrot.slane %v8236_v0, 4  ;;  %v15892_v43 = vrot.slane %v15866_v36, 11  ;;  %v19524_v46 = vld [vmem:[%s24527_s1 + $0xd8] sm:$0xff]   ;;  %v14693_v49 = vld [vmem:[%s19972_s11 + $0x1c8] sm:$0xe] }
  0x9e   : > { %18089 = vmatprep.subr.bf16.mxu0 %v19521_v40  ;;  %v8250_v44 = vrot.slane %v15867_v37, 7  ;;  %v15869_v57 = vld [vmem:[%s19972_s11 + $0x498] sm:$0x8]  ;;  %v15870_v58 = vld [vmem:[%s19972_s11 + $0x49c] sm:$0xf] }
  0x9f   : > { %17450 = vmatmul.mubr.bf16.gmra.mrb[24].mxu1 %v14670_v45  ;;  %v977_v23 = vsel %vm20305_vm8, %v975_v14, %v976_v6  ;;  %v15920_v45 = vcombine.low %v8223_v28, %v8226_v39  ;;  %v8237_v6 = vsel %vm19989_vm5, %v15890_v60, %v8236_v0  ;;  %v15864_v14 = vld [vmem:[%s19972_s11 + $0x464] sm:$0xf]  ;;  %v8240_v17 = vsel %vm19989_vm5, %v8238_v7, %v8239_v31 }
  0xa0   : > { %18058 = vmatmul.mubr.bf16.gmra.mrb[8].mxu0 %v15918_v62  ;;  %17453 = vmatprep.mubr.bf16.mxu1 %v14671_v11  ;;  %v14672_v27 = vcombine.low %v974_v13, %v977_v23  ;;  %v1470_v62 = vsel %vm19983_vm4, %v14730_v50, %v1469_v53  ;;  %v1479_v13 = vrot.slane %v14689_v8, 5  ;;  %v8243_v19 = vrot.slane %v15864_v14, 7  ;;  %v14694_v50 = vld [vmem:[%s19972_s11 + $0x1cc] sm:$0xf]  ;;  %v14696_v1 = vld [vmem:[%s19972_s11 + $0x1e4] sm:$0xe] }
  0xa1   : > { %18090 = vmatpush3.bf16.msra.mxu0 %v19521_v40  ;;  %18061 = vmatprep.mubr.bf16.mxu0 %v15919_v16  ;;  %v1463_v40 = vsel %vm19983_vm4, %v14729_v26, %v1462_v30  ;;  %v14762_v11 = vcombine.low %v1470_v62, %v1473_v5  ;;  %v15865_v16 = vld [vmem:[%s19972_s11 + $0x468] sm:$0x7]  ;;  %v15922_v23 = vcombine.low %v8237_v6, %v8240_v17  ;;  %v14691_v26 = vld [vmem:[%s19972_s11 + $0x1b0] sm:$0xf]  ;;  %v8252_v55 = vrot.slane %v8250_v44, 4 }
  0xa2   : > { %18091 = vmatprep.subr.bf16.mxu0 %v19523_v2  ;;  %v14761_v56 = vcombine.low %v1463_v40, %v1466_v51  ;;  %v8246_v21 = vrot.slane %v15865_v16, 7  ;;  %v8244_v29 = vsel %vm19989_vm5, %v15891_v18, %v8243_v19  ;;  %v8245_v30 = vrot.slane %v8243_v19, 4  ;;  %v14695_v51 = vld [vmem:[%s19972_s11 + $0x1d0] sm:$0x1]  ;;  %v14698_v8 = vld [vmem:[%s19972_s11 + $0x1ec] sm:$0x1] }
  0xa3   : > { %v1483_v32 = vrot.slane %v14691_v26, 5  ;;  %v8251_v54 = vsel %vm19989_vm5, %v15892_v43, %v8250_v44  ;;  %v1490_v59 = vrot.slane %v14694_v50, 5  ;;  %v1493_v60 = vrot.slane %v14695_v51, 5  ;;  %v15872_v16 = vld [vmem:[%s19972_s11 + $0x4b4] sm:$0x8] }
  0xa4   : > { %v15893_v62 = vrot.slane %v15869_v57, 11  ;;  %v8257_v48 = vrot.slane %v15870_v58, 7  ;;  %v15873_v17 = vld [vmem:[%s19972_s11 + $0x4b8] sm:$0xf]  ;;  %v15874_v18 = vld [vmem:[%s19972_s11 + $0x4bc] sm:$0x7] }
  0xa5   : > { %18092 = vmatpush3.bf16.msra.mxu0 %v19523_v2  ;;  %v14688_v2 = vld [vmem:[%s19972_s11 + $0x194] sm:$0xf]  ;;  %v1485_v40 = vrot.slane %v1483_v32, 4  ;;  %v1492_v6 = vrot.slane %v1490_v59, 4  ;;  %v8264_v26 = vrot.slane %v15873_v17, 7 }
  0xa6   : > { %18093 = vmatprep.subr.bf16.mxu0 %v19525_v22  ;;  %v1476_v12 = vrot.slane %v14688_v2, 5  ;;  %v14697_v2 = vld [vmem:[%s19972_s11 + $0x1e8] sm:$0xf]  ;;  %v8258_v7 = vsel %vm19989_vm5, %v15893_v62, %v8257_v48  ;;  %v8259_v10 = vrot.slane %v8257_v48, 4  ;;  %v14703_v50 = vld [vmem:[%s19972_s11 + $0x220] sm:$0xf] }
  0xa7   : > { %17454 = vmatmul.mubr.bf16.gmra.mrb[28].mxu1 %v14672_v27  ;;  %v14692_v27 = vld [vmem:[%s19972_s11 + $0x1b4] sm:$0x1]  ;;  %v1494_v14 = vsel %vm19983_vm4, %v1492_v6, %v1493_v60  ;;  %v8266_v37 = vrot.slane %v8264_v26, 4 }
  0xa8   : > { %18062 = vmatmul.mubr.bf16.gmra.mrb[12].mxu0 %v15920_v45  ;;  %17473 = vmatprep.mubr.bf16.mxu1 %v14761_v56  ;;  %v1477_v24 = vsel %vm19983_vm4, %v14731_v9, %v1476_v12  ;;  %v1478_v25 = vrot.slane %v1476_v12, 4  ;;  %v1486_v33 = vrot.slane %v14692_v27, 5  ;;  %v8253_v45 = vrot.slane %v15868_v41, 7  ;;  %v19527_v9 = vld [vmem:[%s24527_s1 + $0xe0] sm:$0xff]   ;;  %v15877_v41 = vld [vmem:[%s19972_s11 + $0x4d8] sm:$0x7] }
  0xa9   : > { %18094 = vmatpush3.bf16.msra.mxu0 %v19525_v22  ;;  %18065 = vmatprep.mubr.bf16.mxu0 %v15921_v61  ;;  %v14690_v22 = vld [vmem:[%s19972_s11 + $0x1ac] sm:$0xe]  ;;  %v14733_v56 = vrot.slane %v14693_v49, 9  ;;  %v15871_v61 = vld [vmem:[%s19972_s11 + $0x4a0] sm:$0x7]  ;;  %v1497_v12 = vrot.slane %v14697_v2, 5 }
  0xaa   : > { %18095 = vmatprep.subr.bf16.mxu0 %v19526_v38  ;;  %v14732_v28 = vrot.slane %v14690_v22, 9  ;;  %v1480_v35 = vsel %vm19983_vm4, %v1478_v25, %v1479_v13  ;;  %v1487_v47 = vsel %vm19983_vm4, %v1485_v40, %v1486_v33  ;;  %v8254_v0 = vsel %vm19989_vm5, %v8252_v55, %v8253_v45  ;;  %v14702_v49 = vld [vmem:[%s19972_s11 + $0x21c] sm:$0xe]  ;;  %v19530_v51 = vld [vmem:[%s24527_s1 + $0xf0] sm:$0xff]  }
  0xab   : > { %v8260_v31 = vrot.slane %v15871_v61, 7  ;;  %v1491_v5 = vsel %vm19983_vm4, %v14733_v56, %v1490_v59  ;;  %v1500_v13 = vrot.slane %v14698_v8, 5  ;;  %v15894_v25 = vrot.slane %v15872_v16, 11  ;;  %v14704_v56 = vld [vmem:[%s19972_s11 + $0x224] sm:$0x1] }
  0xac   : > { %v1484_v39 = vsel %vm19983_vm4, %v14732_v28, %v1483_v32  ;;  %v14765_v19 = vcombine.low %v1491_v5, %v1494_v14  ;;  %v8267_v27 = vrot.slane %v15874_v18, 7  ;;  %v14699_v28 = vld [vmem:[%s19972_s11 + $0x200] sm:$0xe]  ;;  %v14701_v32 = vld [vmem:[%s19972_s11 + $0x208] sm:$0x1]  ;;  %v14736_v57 = vrot.slane %v14702_v49, 9 }
  0xad   : > { %18096 = vmatpush3.bf16.msra.mxu0 %v19526_v38  ;;  %v8247_v38 = vsel %vm19989_vm5, %v8245_v30, %v8246_v21  ;;  %v14764_v53 = vcombine.low %v1484_v39, %v1487_v47  ;;  %v8261_v21 = vsel %vm19989_vm5, %v8259_v10, %v8260_v31  ;;  %v14700_v30 = vld [vmem:[%s19972_s11 + $0x204] sm:$0xf]  ;;  %v14735_v33 = vrot.slane %v14699_v28, 9  ;;  %v15876_v39 = vld [vmem:[%s19972_s11 + $0x4d4] sm:$0xf] }
  0xae   : > { %18129 = vmatprep.subr.bf16.mxu0 %v20623_v4  ;;  %v15923_v42 = vcombine.low %v8244_v29, %v8247_v38  ;;  %v8265_v36 = vsel %vm19989_vm5, %v15894_v25, %v8264_v26  ;;  %v15875_v38 = vld [vmem:[%s19972_s11 + $0x4d0] sm:$0x8]  ;;  %v1507_v40 = vrot.slane %v14701_v32, 5  ;;  %v8271_v43 = vrot.slane %v15876_v39, 7  ;;  %v15878_v61 = vld [vmem:[%s19972_s11 + $0x4ec] sm:$0x8] }
  0xaf   : > { %17474 = vmatmul.mubr.bf16.vlgmr.msra.gmra.mrb[0].mxu1 %v14762_v11  ;;  %v14734_v11 = vrot.slane %v14696_v1, 9  ;;  %v8268_v44 = vsel %vm19989_vm5, %v8266_v37, %v8267_v27  ;;  %v8274_v47 = vrot.slane %v15877_v41, 7  ;;  %v1511_v59 = vrot.slane %v14703_v50, 5  ;;  %v15880_v31 = vld [vmem:[%s19972_s11 + $0x4f4] sm:$0x7]  ;;  %v20747_v37 = vld [vmem:[%s24527_s1 + $0x100] sm:$0xff]  }
  0xb0   : > { %17506 = vmatpush3.bf16.msra.mxu1 %v20467_v63  ;;  %18066 = vmatmul.mubr.bf16.gmra.mrb[16].mxu0 %v15922_v23  ;;  %v14763_v63 = vcombine.low %v1477_v24, %v1480_v35  ;;  %v1499_v23 = vrot.slane %v1497_v12, 4  ;;  %v15925_v24 = vcombine.low %v8258_v7, %v8261_v21  ;;  %v8273_v55 = vrot.slane %v8271_v43, 4  ;;  %v14707_v16 = vld [vmem:[%s19972_s11 + $0x240] sm:$0x1]  ;;  %v14709_v32 = vld [vmem:[%s19972_s11 + $0x258] sm:$0xf] }
  0xb1   : > { %17507 = vmatprep.subr.bf16.mxu1 %v19520_v3  ;;  %18069 = vmatprep.mubr.bf16.mxu0 %v15923_v42  ;;  %v1498_v22 = vsel %vm19983_vm4, %v14734_v11, %v1497_v12  ;;  %v15895_v42 = vrot.slane %v15875_v38, 11  ;;  %v1514_v60 = vrot.slane %v14704_v56, 5  ;;  %v15896_v1 = vrot.slane %v15878_v61, 11  ;;  %v14705_v11 = vld [vmem:[%s19972_s11 + $0x238] sm:$0xe] }
  0xb2   : > { %17477 = vmatprep.mubr.bf16.mxu1 %v14763_v63  ;;  %v1501_v29 = vsel %vm19983_vm4, %v1499_v23, %v1500_v13  ;;  %v1504_v63 = vrot.slane %v14700_v30, 5  ;;  %v8275_v48 = vsel %vm19989_vm5, %v8273_v55, %v8274_v47  ;;  %v1513_v5 = vrot.slane %v1511_v59, 4  ;;  %v14706_v12 = vld [vmem:[%s19972_s11 + $0x23c] sm:$0xf]  ;;  %v15938_v23 = vld [vmem:[%s19972_s11 + $0x354] sm:$0xf] }
  0xb3   : > { %v14766_v35 = vcombine.low %v1498_v22, %v1501_v29  ;;  %v8281_v7 = vrot.slane %v15880_v31, 7  ;;  %v19532_v13 = vld [vmem:[%s24527_s1 + $0xf8] sm:$0xff]   ;;  %v14737_v17 = vrot.slane %v14705_v11, 9  ;;  %v1518_v18 = vrot.slane %v14706_v12, 5  ;;  %v14708_v30 = vld [vmem:[%s19972_s11 + $0x254] sm:$0xe] }
  0xb4   : > { %17508 = vmatpush3.bf16.msra.mxu1 %v19520_v3  ;;  %v15924_v3 = vcombine.low %v8251_v54, %v8254_v0  ;;  %v1505_v45 = vsel %vm19983_vm4, %v14735_v33, %v1504_v63  ;;  %v8272_v54 = vsel %vm19989_vm5, %v15895_v42, %v8271_v43  ;;  %v15879_v0 = vld [vmem:[%s19972_s11 + $0x4f0] sm:$0xf]  ;;  %v1515_v8 = vsel %vm19983_vm4, %v1513_v5, %v1514_v60  ;;  %v15942_v47 = vld [vmem:[%s19972_s11 + $0x374] sm:$0x1]  ;;  %v19531_v5 = vld [vmem:[%s24527_s1 + $0x408] sm:$0xff]  }
  0xb5   : > { %17509 = vmatprep.subr.bf16.mxu1 %v19522_v34  ;;  %v15927_v2 = vcombine.low %v8272_v54, %v8275_v48  ;;  %v8278_v6 = vrot.slane %v15879_v0, 7  ;;  %v1521_v22 = vrot.slane %v14707_v16, 5  ;;  %v1519_v27 = vsel %vm19983_vm4, %v14737_v17, %v1518_v18  ;;  %v14712_v56 = vld [vmem:[%s19972_s11 + $0x274] sm:$0xf]  ;;  %v15943_v48 = vld [vmem:[%s19972_s11 + $0x388] sm:$0xe] }
  0xb6   : > { %v1520_v28 = vrot.slane %v1518_v18, 4  ;;  %v8767_v29 = vrot.slane %v15938_v23, 5  ;;  %v8777_v55 = vrot.slane %v15942_v47, 5  ;;  %v15944_v0 = vld [vmem:[%s19972_s11 + $0x38c] sm:$0xf] }
  0xb7   : > { %17478 = vmatmul.mubr.bf16.gmra.mrb[4].mxu1 %v14764_v53  ;;  %v15926_v53 = vcombine.low %v8265_v36, %v8268_v44  ;;  %v8280_v10 = vrot.slane %v8278_v6, 4  ;;  %v1525_v36 = vrot.slane %v14709_v32, 5  ;;  %v15940_v44 = vld [vmem:[%s19972_s11 + $0x36c] sm:$0xe]  ;;  %v14715_v11 = vld [vmem:[%s19972_s11 + $0x290] sm:$0xf] }
  0xb8   : > { %17510 = vmatpush3.bf16.msra.mxu1 %v19522_v34  ;;  %18070 = vmatmul.mubr.bf16.gmra.mrb[20].mxu0 %v15924_v3  ;;  %v19528_v34 = vld [vmem:[%s24527_s1 + $0xe8] sm:$0xff]   ;;  %v1512_v3 = vsel %vm19983_vm4, %v14736_v57, %v1511_v59  ;;  %v8769_v39 = vrot.slane %v8767_v29, 4  ;;  %v15986_v49 = vrot.slane %v15940_v44, 9  ;;  %v14713_v57 = vld [vmem:[%s19972_s11 + $0x278] sm:$0x1] }
  0xb9   : > { %17511 = vmatprep.subr.bf16.mxu1 %v19524_v46  ;;  %17481 = vmatprep.mubr.bf16.mxu1 %v14765_v19  ;;  %v14768_v14 = vcombine.low %v1512_v3, %v1515_v8  ;;  %v15937_v19 = vld [vmem:[%s19972_s11 + $0x350] sm:$0xe]  ;;  %v8282_v21 = vsel %vm19989_vm5, %v8280_v10, %v8281_v7  ;;  %v1527_v43 = vrot.slane %v1525_v36, 4  ;;  %v1535_v31 = vrot.slane %v14713_v57, 5  ;;  %v14714_v10 = vld [vmem:[%s19972_s11 + $0x28c] sm:$0xe] }
  0xba   : > { %18073 = vmatprep.mubr.bf16.mxu0 %v15925_v24  ;;  %v15939_v24 = vld [vmem:[%s19972_s11 + $0x358] sm:$0x1]  ;;  %v15985_v25 = vrot.slane %v15937_v19, 9  ;;  %v8781_v3 = vrot.slane %v15944_v0, 5  ;;  %v14716_v16 = vld [vmem:[%s19972_s11 + $0x294] sm:$0x1] }
  0xbb   : > { %v8770_v33 = vrot.slane %v15939_v24, 5  ;;  %v14740_v17 = vrot.slane %v14714_v10, 9  ;;  %v1539_v19 = vrot.slane %v14715_v11, 5 }
  0xbc   : > { %17512 = vmatpush3.bf16.msra.mxu1 %v19524_v46  ;;  %v1506_v46 = vrot.slane %v1504_v63, 4  ;;  %v1522_v63 = vsel %vm19983_vm4, %v1520_v28, %v1521_v22  ;;  %v8768_v38 = vsel %vm19983_vm4, %v15985_v25, %v8767_v29  ;;  %v15946_v22 = vld [vmem:[%s19972_s11 + $0x3a4] sm:$0xe]  ;;  %v15947_v25 = vld [vmem:[%s19972_s11 + $0x3a8] sm:$0xf] }
  0xbd   : > { %17513 = vmatprep.subr.bf16.mxu1 %v19527_v9  ;;  %v14769_v41 = vcombine.low %v1519_v27, %v1522_v63  ;;  %v15988_v27 = vrot.slane %v15946_v22, 9  ;;  %v1540_v29 = vsel %vm19983_vm4, %v14740_v17, %v1539_v19  ;;  %v8788_v32 = vrot.slane %v15947_v25, 5  ;;  %v14724_v17 = vld [vmem:[%s19972_s11 + $0x2e4] sm:$0xf]  ;;  %v15956_v25 = vld [vmem:[%s19972_s11 + $0x3fc] sm:$0xf] }
  0xbe   : > { %v1508_v58 = vsel %vm19983_vm4, %v1506_v46, %v1507_v40  ;;  %v8771_v46 = vsel %vm19983_vm4, %v8769_v39, %v8770_v33  ;;  %v14719_v39 = vld [vmem:[%s19972_s11 + $0x2b0] sm:$0x1] }
  0xbf   : > { %17482 = vmatmul.mubr.bf16.gmra.mrb[8].mxu1 %v14766_v35  ;;  %v14767_v62 = vcombine.low %v1505_v45, %v1508_v58  ;;  %v14738_v35 = vrot.slane %v14708_v30, 9  ;;  %v15941_v45 = vld [vmem:[%s19972_s11 + $0x370] sm:$0xf]  ;;  %v1541_v30 = vrot.slane %v1539_v19, 4  ;;  %v1549_v44 = vrot.slane %v14719_v39, 5 }
  0xc0   : > { %17514 = vmatpush3.bf16.msra.mxu1 %v19527_v9  ;;  %18074 = vmatmul.mubr.bf16.gmra.mrb[24].mxu0 %v15926_v53  ;;  %v8279_v9 = vsel %vm19989_vm5, %v15896_v1, %v8278_v6  ;;  %v8774_v50 = vrot.slane %v15941_v45, 5  ;;  %v16017_v53 = vcombine.low %v8768_v38, %v8771_v46  ;;  %v15945_v1 = vld [vmem:[%s19972_s11 + $0x390] sm:$0x1]  ;;  %v8789_v38 = vsel %vm19983_vm4, %v15988_v27, %v8788_v32  ;;  %v15950_v45 = vld [vmem:[%s19972_s11 + $0x3c4] sm:$0xf] }
  0xc1   : > { %17515 = vmatprep.subr.bf16.mxu1 %v19528_v34  ;;  %17485 = vmatprep.mubr.bf16.mxu1 %v14767_v62  ;;  %v15928_v26 = vcombine.low %v8279_v9, %v8282_v21  ;;  %v1526_v42 = vsel %vm19983_vm4, %v14738_v35, %v1525_v36  ;;  %v1532_v62 = vrot.slane %v14712_v56, 5  ;;  %v8784_v9 = vrot.slane %v15945_v1, 5  ;;  %v14718_v35 = vld [vmem:[%s19972_s11 + $0x2ac] sm:$0xf]  ;;  %v19533_v36 = vld [vmem:[%s24527_s1 + $0x410] sm:$0xff]  }
  0xc2   : > { %18077 = vmatprep.mubr.bf16.mxu0 %v15927_v2  ;;  %v8775_v60 = vsel %vm19983_vm4, %v15986_v49, %v8774_v50  ;;  %v8776_v61 = vrot.slane %v8774_v50, 4  ;;  %v15987_v2 = vrot.slane %v15943_v48, 9  ;;  %v1542_v21 = vrot.slane %v14716_v16, 5  ;;  %v15951_v46 = vld [vmem:[%s19972_s11 + $0x3c8] sm:$0x1] }
  0xc3   : > { %v1534_v8 = vrot.slane %v1532_v62, 4  ;;  %v8795_v50 = vrot.slane %v15950_v45, 5  ;;  %v15952_v1 = vld [vmem:[%s19972_s11 + $0x3dc] sm:$0xe]  ;;  %v14723_v16 = vld [vmem:[%s19972_s11 + $0x2e0] sm:$0xe] }
  0xc4   : > { %17516 = vmatpush3.bf16.msra.mxu1 %v19528_v34  ;;  %v14710_v34 = vld [vmem:[%s19972_s11 + $0x25c] sm:$0x1]  ;;  %v8778_v6 = vsel %vm19983_vm4, %v8776_v61, %v8777_v55  ;;  %v1543_v63 = vsel %vm19983_vm4, %v1541_v30, %v1542_v21  ;;  %v15990_v10 = vrot.slane %v15952_v1, 9  ;;  %v8809_v30 = vrot.slane %v15956_v25, 5  ;;  %v14728_v39 = vld [vmem:[%s19972_s11 + $0x304] sm:$0x1] }
  0xc5   : > { %17517 = vmatprep.subr.bf16.mxu1 %v19530_v51  ;;  %v1528_v40 = vrot.slane %v14710_v34, 5  ;;  %v16018_v12 = vcombine.low %v8775_v60, %v8778_v6  ;;  %v1536_v18 = vsel %vm19983_vm4, %v1534_v8, %v1535_v31  ;;  %v14717_v34 = vld [vmem:[%s19972_s11 + $0x2a8] sm:$0xe]  ;;  %v15954_v8 = vld [vmem:[%s19972_s11 + $0x3e4] sm:$0x1] }
  0xc7   : > { %17486 = vmatmul.mubr.bf16.gmra.mrb[12].mxu1 %v14768_v14  ;;  %v1529_v54 = vsel %vm19983_vm4, %v1527_v43, %v1528_v40  ;;  %v8783_v14 = vrot.slane %v8781_v3, 4  ;;  %v14741_v40 = vrot.slane %v14717_v34, 9  ;;  %v1546_v43 = vrot.slane %v14718_v35, 5  ;;  %v14726_v34 = vld [vmem:[%s19972_s11 + $0x2fc] sm:$0xe] }
  0xc8   : > { %17518 = vmatpush3.bf16.msra.mxu1 %v19530_v51  ;;  %18078 = vmatmul.mubr.bf16.gmra.mrb[28].mxu0 %v15928_v26  ;;  %v14711_v51 = vld [vmem:[%s19972_s11 + $0x270] sm:$0xe]  ;;  %v14770_v59 = vcombine.low %v1526_v42, %v1529_v54  ;;  %v15948_v26 = vld [vmem:[%s19972_s11 + $0x3ac] sm:$0x1]  ;;  %v14772_v42 = vcombine.low %v1540_v29, %v1543_v63  ;;  %v19537_v54 = vld [vmem:[%s24527_s1 + $0x418] sm:$0xff]  }
  0xc9   : > { %17519 = vmatprep.subr.bf16.mxu1 %v19532_v13  ;;  %17489 = vmatprep.mubr.bf16.mxu1 %v14769_v41  ;;  %v14739_v58 = vrot.slane %v14711_v51, 9  ;;  %v8785_v24 = vsel %vm19983_vm4, %v8783_v14, %v8784_v9  ;;  %v8791_v33 = vrot.slane %v15948_v26, 5  ;;  %v15949_v41 = vld [vmem:[%s19972_s11 + $0x3c0] sm:$0xe]  ;;  %v8798_v51 = vrot.slane %v15951_v46, 5 }
  0xca   : > { %18097 = vmatprep.mubr.bf16.mxu0 %v16017_v53  ;;  %v15989_v49 = vrot.slane %v15949_v41, 9  ;;  %v14720_v53 = vld [vmem:[%s19972_s11 + $0x2c4] sm:$0xe]  ;;  %v1547_v56 = vsel %vm19983_vm4, %v14741_v40, %v1546_v43  ;;  %v1548_v57 = vrot.slane %v1546_v43, 4  ;;  %v1560_v26 = vrot.slane %v14724_v17, 5  ;;  %v19545_v40 = vld [vmem:[%s24527_s1 + $0x428] sm:$0xff]  }
  0xcb   : > { %v1533_v7 = vsel %vm19983_vm4, %v14739_v58, %v1532_v62  ;;  %v14721_v58 = vld [vmem:[%s19972_s11 + $0x2c8] sm:$0xf]  ;;  %v14742_v60 = vrot.slane %v14720_v53, 9  ;;  %v8797_v62 = vrot.slane %v8795_v50, 4  ;;  %v14727_v35 = vld [vmem:[%s19972_s11 + $0x300] sm:$0xf] }
  0xcc   : > { %17520 = vmatpush3.bf16.msra.mxu1 %v19532_v13  ;;  %v8782_v13 = vsel %vm19983_vm4, %v15987_v2, %v8781_v3  ;;  %v14771_v23 = vcombine.low %v1533_v7, %v1536_v18  ;;  %v8796_v61 = vsel %vm19983_vm4, %v15989_v49, %v8795_v50  ;;  %v1553_v48 = vrot.slane %v14721_v58, 5  ;;  %v15953_v2 = vld [vmem:[%s19972_s11 + $0x3e0] sm:$0xf]  ;;  %v14725_v18 = vld [vmem:[%s19972_s11 + $0x2e8] sm:$0x1]  ;;  %v19535_v17 = vld [vmem:[%s19972_s11 + $0x178] sm:$0xff]  }
  0xcd   : > { %17553 = vmatprep.subr.bf16.mxu1 %v20747_v37  ;;  %v16019_v28 = vcombine.low %v8782_v13, %v8785_v24  ;;  %v1550_v31 = vsel %vm19983_vm4, %v1548_v57, %v1549_v44  ;;  %v8802_v11 = vrot.slane %v15953_v2, 5  ;;  %v19541_v13 = vld [vmem:[%s24527_s1 + $0x420] sm:$0xff]   ;;  %v15955_v24 = vld [vmem:[%s19972_s11 + $0x3f8] sm:$0xe]  ;;  %v1563_v27 = vrot.slane %v14725_v18, 5 }
  0xce   : > { %v14773_v3 = vcombine.low %v1547_v56, %v1550_v31  ;;  %v1554_v6 = vsel %vm19983_vm4, %v14742_v60, %v1553_v48  ;;  %v1555_v7 = vrot.slane %v1553_v48, 4  ;;  %v15991_v29 = vrot.slane %v15955_v24, 9  ;;  %v15958_v46 = vld [vmem:[%s19972_s11 + $0x414] sm:$0xe]  ;;  %v15960_v49 = vld [vmem:[%s19972_s11 + $0x41c] sm:$0x1] }
  0xcf   : > { %17490 = vmatmul.mubr.bf16.gmra.mrb[16].mxu1 %v14770_v59  ;;  %v14722_v59 = vld [vmem:[%s19972_s11 + $0x2cc] sm:$0x1]  ;;  %v8803_v21 = vsel %vm19983_vm4, %v15990_v10, %v8802_v11  ;;  %v8804_v22 = vrot.slane %v8802_v11, 4  ;;  %v8811_v41 = vrot.slane %v8809_v30, 4  ;;  %v1567_v43 = vrot.slane %v14727_v35, 5  ;;  %v19549_v60 = vld [vmem:[%s24527_s1 + $0x430] sm:$0xff]  }
  0xd0   : > { %18098 = vmatmul.mubr.bf16.vlgmr.msra.gmra.mrb[0].mxu0 %v16018_v12  ;;  %17493 = vmatprep.mubr.bf16.mxu1 %v14771_v23  ;;  %v1556_v0 = vrot.slane %v14722_v59, 5  ;;  %v8805_v12 = vrot.slane %v15954_v8, 5  ;;  %v14743_v23 = vrot.slane %v14723_v16, 9  ;;  %v1570_v44 = vrot.slane %v14728_v39, 5  ;;  %v15962_v48 = vld [vmem:[%s19972_s11 + $0x434] sm:$0xf] }
  0xd1   : > { %18130 = vmatpush3.bf16.msra.mxu0 %v20623_v4  ;;  %18101 = vmatprep.mubr.bf16.mxu0 %v16019_v28  ;;  %v8790_v4 = vrot.slane %v8788_v32, 4  ;;  %v15957_v28 = vld [vmem:[%s19972_s11 + $0x400] sm:$0x1]  ;;  %v15992_v57 = vrot.slane %v15958_v46, 9  ;;  %v8819_v59 = vrot.slane %v15960_v49, 5 }
  0xd2   : > { %18131 = vmatprep.subr.bf16.mxu0 %v19531_v5  ;;  %v1557_v14 = vsel %vm19983_vm4, %v1555_v7, %v1556_v0  ;;  %v8806_v32 = vsel %vm19983_vm4, %v8804_v22, %v8805_v12  ;;  %v1561_v63 = vsel %vm19983_vm4, %v14743_v23, %v1560_v26  ;;  %v15963_v2 = vld [vmem:[%s19972_s11 + $0x438] sm:$0x1]  ;;  %v15965_v10 = vld [vmem:[%s19972_s11 + $0x450] sm:$0xf]  ;;  %v15967_v23 = vld [vmem:[%s19972_s11 + $0x468] sm:$0xe] }
  0xd3   : > { %v8792_v47 = vsel %vm19983_vm4, %v8790_v4, %v8791_v33  ;;  %v14774_v19 = vcombine.low %v1554_v6, %v1557_v14  ;;  %v8812_v33 = vrot.slane %v15957_v28, 5  ;;  %v8810_v4 = vsel %vm19983_vm4, %v15991_v29, %v8809_v30  ;;  %v19550_v7 = vld [vmem:[%s24527_s1 + $0x438] sm:$0xff]   ;;  %v15966_v14 = vld [vmem:[%s19972_s11 + $0x454] sm:$0x1]  ;;  %v15968_v24 = vld [vmem:[%s19972_s11 + $0x46c] sm:$0xf] }
  0xd4   : > { %v16020_v55 = vcombine.low %v8789_v38, %v8792_v47  ;;  %v1562_v38 = vrot.slane %v1560_v26, 4  ;;  %v15959_v47 = vld [vmem:[%s19972_s11 + $0x418] sm:$0xf]  ;;  %v8826_v6 = vrot.slane %v15963_v2, 5  ;;  %v8830_v18 = vrot.slane %v15965_v10, 5  ;;  %v19540_v30 = vld [vmem:[%s24527_s1 + $0x108] sm:$0xff]  }
  0xd5   : > { %18132 = vmatpush3.bf16.msra.mxu0 %v19531_v5  ;;  %v8799_v5 = vsel %vm19983_vm4, %v8797_v62, %v8798_v51  ;;  %v8813_v51 = vsel %vm19983_vm4, %v8811_v41, %v8812_v33  ;;  %v8816_v58 = vrot.slane %v15959_v47, 5  ;;  %v15961_v62 = vld [vmem:[%s19972_s11 + $0x430] sm:$0xe]  ;;  %v19538_v22 = vld [vmem:[%s19972_s11 + $0x194] sm:$0xff]   ;;  %v15969_v28 = vld [vmem:[%s19972_s11 + $0x470] sm:$0x1] }
  0xd6   : > { %18133 = vmatprep.subr.bf16.mxu0 %v19533_v36  ;;  %v16021_v9 = vcombine.low %v8796_v61, %v8799_v5  ;;  %v1564_v45 = vsel %vm19983_vm4, %v1562_v38, %v1563_v27  ;;  %v16023_v56 = vcombine.low %v8810_v4, %v8813_v51  ;;  %v8823_v5 = vrot.slane %v15962_v48, 5  ;;  %v15973_v46 = vld [vmem:[%s19972_s11 + $0x4a0] sm:$0xe]  ;;  %v15974_v47 = vld [vmem:[%s19972_s11 + $0x4a4] sm:$0xf] }
  0xd7   : > { %17494 = vmatmul.mubr.bf16.gmra.mrb[20].mxu1 %v14772_v42  ;;  %v14744_v42 = vrot.slane %v14726_v34, 9  ;;  %v14775_v50 = vcombine.low %v1561_v63, %v1564_v45  ;;  %v8817_v31 = vsel %vm19983_vm4, %v15992_v57, %v8816_v58  ;;  %v8818_v1 = vrot.slane %v8816_v58, 4  ;;  %v15971_v63 = vld [vmem:[%s19972_s11 + $0x488] sm:$0xf]  ;;  %v15981_v10 = vld [vmem:[%s19972_s11 + $0x4e0] sm:$0x1] }
  0xd8   : > { %18102 = vmatmul.mubr.bf16.gmra.mrb[4].mxu0 %v16020_v55  ;;  %17497 = vmatprep.mubr.bf16.mxu1 %v14773_v3  ;;  %v19534_v55 = vld [vmem:[%s19972_s11 + $0x15c] sm:$0xff]   ;;  %v15993_v3 = vrot.slane %v15961_v62, 9  ;;  %v8832_v27 = vrot.slane %v8830_v18, 4  ;;  %v15995_v29 = vrot.slane %v15967_v23, 9  ;;  %v8837_v33 = vrot.slane %v15968_v24, 5 }
  0xd9   : > { %18134 = vmatpush3.bf16.msra.mxu0 %v19533_v36  ;;  %18105 = vmatprep.mubr.bf16.mxu0 %v16021_v9  ;;  %v16022_v36 = vcombine.low %v8803_v21, %v8806_v32  ;;  %v1568_v53 = vsel %vm19983_vm4, %v14744_v42, %v1567_v43  ;;  %v8820_v8 = vsel %vm19983_vm4, %v8818_v1, %v8819_v59  ;;  %v15964_v9 = vld [vmem:[%s19972_s11 + $0x44c] sm:$0xe]  ;;  %v20897_v32 = vld [vmem:[%s24527_s1 + $0x440] sm:$0xff]   ;;  %v8840_v34 = vrot.slane %v15969_v28, 5  ;;  %v15976_v59 = vld [vmem:[%s19972_s11 + $0x4bc] sm:$0xe] }
  0xda   : > { %18135 = vmatprep.subr.bf16.mxu0 %v19537_v54  ;;  %v16024_v11 = vcombine.low %v8817_v31, %v8820_v8  ;;  %v8824_v12 = vsel %vm19983_vm4, %v15993_v3, %v8823_v5  ;;  %v15994_v16 = vrot.slane %v15964_v9, 9  ;;  %v8838_v4 = vsel %vm19983_vm4, %v15995_v29, %v8837_v33 }
  0xdb   : > { %v8839_v39 = vrot.slane %v8837_v33, 4  ;;  %v8844_v42 = vrot.slane %v15971_v63, 5  ;;  %v15998_v31 = vrot.slane %v15976_v59, 9  ;;  %v16041_v33 = vld [vmem:[%s19972_s11 + $0x354] sm:$0x8] }
  0xdc   : > { %v8831_v26 = vsel %vm19983_vm4, %v15994_v16, %v8830_v18  ;;  %v19543_v16 = vld [vmem:[%s19972_s11 + $0x1e8] sm:$0xff]   ;;  %v15983_v18 = vld [vmem:[%s19972_s11 + $0x4f8] sm:$0xf]  ;;  %v16043_v63 = vld [vmem:[%s19972_s11 + $0x35c] sm:$0x7] }
  0xdd   : > { %18136 = vmatpush3.bf16.msra.mxu0 %v19537_v54  ;;  %v1569_v54 = vrot.slane %v1567_v43, 4  ;;  %v8841_v45 = vsel %vm19983_vm4, %v8839_v39, %v8840_v34  ;;  %v8846_v51 = vrot.slane %v8844_v42, 4  ;;  %v16042_v34 = vld [vmem:[%s19972_s11 + $0x358] sm:$0xf]  ;;  %v16089_v39 = vrot.slane %v16041_v33, 11 }
  0xde   : > { %18137 = vmatprep.subr.bf16.mxu0 %v19541_v13  ;;  %v16027_v49 = vcombine.low %v8838_v4, %v8841_v45  ;;  %v16060_v33 = vld [vmem:[%s19972_s11 + $0x400] sm:$0xf] }
  0xdf   : > { %17498 = vmatmul.mubr.bf16.gmra.mrb[24].mxu1 %v14774_v19  ;;  %v1571_v61 = vsel %vm19983_vm4, %v1569_v54, %v1570_v44  ;;  %v8833_v19 = vrot.slane %v15966_v14, 5  ;;  %v19544_v44 = vld [vmem:[%s24527_s1 + $0x110] sm:$0xff]   ;;  %v15997_v54 = vrot.slane %v15973_v46, 9  ;;  %v8868_v14 = vrot.slane %v15981_v10, 5  ;;  %v16046_v46 = vld [vmem:[%s19972_s11 + $0x378] sm:$0x7] }
  0xe0   : > { %18106 = vmatmul.mubr.bf16.gmra.mrb[8].mxu0 %v16022_v36  ;;  %17501 = vmatprep.mubr.bf16.mxu1 %v14775_v50  ;;  %v14776_v0 = vcombine.low %v1568_v53, %v1571_v61  ;;  %v15970_v36 = vld [vmem:[%s19972_s11 + $0x484] sm:$0xe]  ;;  %v19539_v50 = vld [vmem:[%s19972_s11 + $0x1b0] sm:$0xff]   ;;  %v15975_v53 = vld [vmem:[%s19972_s11 + $0x4a8] sm:$0x1] }
  0xe1   : > { %18138 = vmatpush3.bf16.msra.mxu0 %v19541_v13  ;;  %18109 = vmatprep.mubr.bf16.mxu0 %v16023_v56  ;;  %v8825_v13 = vrot.slane %v8823_v5, 4  ;;  %v8834_v35 = vsel %vm19983_vm4, %v8832_v27, %v8833_v19  ;;  %v15996_v41 = vrot.slane %v15970_v36, 9  ;;  %v8854_v56 = vrot.slane %v15975_v53, 5  ;;  %v19548_v61 = vld [vmem:[%s24527_s1 + $0x118] sm:$0xff]   ;;  %v19546_v19 = vld [vmem:[%s19972_s11 + $0x204] sm:$0xff]  }
  0xe2   : > { %18139 = vmatprep.subr.bf16.mxu0 %v19545_v40  ;;  %v16026_v38 = vcombine.low %v8831_v26, %v8834_v35  ;;  %v19556_v26 = vld [vmem:[%s24527_s1 + $0x128] sm:$0xff]  }
  0xe3   : > { %v8827_v21 = vsel %vm19983_vm4, %v8825_v13, %v8826_v6  ;;  %v8845_v57 = vsel %vm19983_vm4, %v15996_v41, %v8844_v42  ;;  %v15979_v6 = vld [vmem:[%s19972_s11 + $0x4d8] sm:$0xe]  ;;  %v16044_v42 = vld [vmem:[%s19972_s11 + $0x370] sm:$0x8]  ;;  %v16055_v10 = vld [vmem:[%s19972_s11 + $0x3cc] sm:$0x7] }
  0xe4   : > { %v16025_v25 = vcombine.low %v8824_v12, %v8827_v21  ;;  %v19553_v12 = vld [vmem:[%s24527_s1 + $0x120] sm:$0xff]  }
  0xe5   : > { %18140 = vmatpush3.bf16.msra.mxu0 %v19545_v40  ;;  %v15972_v40 = vld [vmem:[%s19972_s11 + $0x48c] sm:$0x1] }
  0xe6   : > { %18141 = vmatprep.subr.bf16.mxu0 %v19549_v60  ;;  %v8847_v43 = vrot.slane %v15972_v40, 5  ;;  %v9364_v40 = vrot.slane %v16043_v63, 7  ;;  %v19558_v63 = vld [vmem:[%s19972_s11 + $0x2ac] sm:$0xff]  }
  0xe7   : > { %17502 = vmatmul.mubr.bf16.gmra.mrb[28].mxu1 %v14776_v0  ;;  %v15978_v0 = vld [vmem:[%s19972_s11 + $0x4c4] sm:$0x1] }
  0xe8   : > { %17521 = vmatprep.mubr.bf16.mxu1 %v19534_v55  ;;  %18110 = vmatmul.mubr.bf16.gmra.mrb[12].mxu0 %v16024_v11  ;;  %v19542_v55 = vld [vmem:[%s19972_s11 + $0x1cc] sm:$0xff]   ;;  %v8848_v58 = vsel %vm19983_vm4, %v8846_v51, %v8847_v43  ;;  %v8861_v2 = vrot.slane %v15978_v0, 5  ;;  %v15999_v11 = vrot.slane %v15979_v6, 9  ;;  %v16045_v43 = vld [vmem:[%s19972_s11 + $0x374] sm:$0xf] }
  0xe9   : > { %18142 = vmatpush3.bf16.msra.mxu0 %v19549_v60  ;;  %18113 = vmatprep.mubr.bf16.mxu0 %v16025_v25  ;;  %v15977_v60 = vld [vmem:[%s19972_s11 + $0x4c0] sm:$0xf]  ;;  %v16028_v3 = vcombine.low %v8845_v57, %v8848_v58  ;;  %v8872_v25 = vrot.slane %v15983_v18, 5  ;;  %v9368_v53 = vrot.slane %v16045_v43, 7  ;;  %v19564_v58 = vld [vmem:[%s24527_s1 + $0x138] sm:$0xff]   ;;  %v9403_v43 = vrot.slane %v16060_v33, 7 }
  0xea   : > { %18143 = vmatprep.subr.bf16.mxu0 %v19550_v7  ;;  %v8858_v1 = vrot.slane %v15977_v60, 5 }
  0xeb   : > { %v8874_v36 = vrot.slane %v8872_v25, 4 }
  0xec   : > { %v8860_v9 = vrot.slane %v8858_v1, 4  ;;  %v8859_v23 = vsel %vm19983_vm4, %v15998_v31, %v8858_v1 }
  0xed   : > { %18144 = vmatpush3.bf16.msra.mxu0 %v19550_v7  ;;  %v15980_v7 = vld [vmem:[%s19972_s11 + $0x4dc] sm:$0xf] }
  0xee   : > { %18177 = vmatprep.subr.bf16.mxu0 %v20897_v32  ;;  %v8865_v13 = vrot.slane %v15980_v7, 5  ;;  %v8862_v24 = vsel %vm19983_vm4, %v8860_v9, %v8861_v2  ;;  %v16051_v2 = vld [vmem:[%s19972_s11 + $0x3ac] sm:$0xf]  ;;  %v20985_v7 = vld [vmem:[%s24527_s1 + $0x140] sm:$0xff]   ;;  %v16054_v9 = vld [vmem:[%s19972_s11 + $0x3c8] sm:$0xf] }
  0xef   : > { %17522 = vmatmul.mubr.bf16.vlgmr.msra.gmra.mrb[0].mxu1 %v19535_v17  ;;  %v15982_v17 = vld [vmem:[%s19972_s11 + $0x4f4] sm:$0xe]  ;;  %v16030_v35 = vcombine.low %v8859_v23, %v8862_v24  ;;  %v9382_v6 = vrot.slane %v16051_v2, 7  ;;  %v21045_v2 = vld [vmem:[%s19972_s11 + $0x21c] sm:$0xf] }
  0xf0   : > { %17554 = vmatpush3.bf16.msra.mxu1 %v20747_v37  ;;  %17525 = vmatprep.mubr.bf16.mxu1 %v19538_v22  ;;  %v8851_v37 = vrot.slane %v15974_v47, 5  ;;  %v8867_v21 = vrot.slane %v8865_v13, 4  ;;  %v15984_v22 = vld [vmem:[%s19972_s11 + $0x4fc] sm:$0x1]  ;;  %v8866_v27 = vsel %vm19983_vm4, %v15999_v11, %v8865_v13  ;;  %v16000_v29 = vrot.slane %v15982_v17, 9  ;;  %v19547_v47 = vld [vmem:[%s19972_s11 + $0x220] sm:$0xff]  }
  0xf1   : > { %17555 = vmatprep.subr.bf16.mxu1 %v19540_v30  ;;  %18114 = vmatmul.mubr.bf16.gmra.mrb[16].mxu0 %v16026_v38  ;;  %v9361_v38 = vrot.slane %v16042_v34, 7  ;;  %v19552_v11 = vld [vmem:[%s19972_s11 + $0x258] sm:$0xff]   ;;  %v19555_v34 = vld [vmem:[%s19972_s11 + $0x290] sm:$0xff]  }
  0xf2   : > { %18117 = vmatprep.mubr.bf16.mxu0 %v16027_v49  ;;  %v8852_v62 = vsel %vm19983_vm4, %v15997_v54, %v8851_v37  ;;  %v8853_v48 = vrot.slane %v8851_v37, 4  ;;  %v8869_v28 = vsel %vm19983_vm4, %v8867_v21, %v8868_v14  ;;  %v8873_v45 = vsel %vm19983_vm4, %v16000_v29, %v8872_v25  ;;  %v16047_v54 = vld [vmem:[%s19972_s11 + $0x38c] sm:$0x8]  ;;  %v19551_v37 = vld [vmem:[%s19972_s11 + $0x23c] sm:$0xff]  }
  0xf3   : > { %v16031_v4 = vcombine.low %v8866_v27, %v8869_v28  ;;  %v9363_v41 = vrot.slane %v9361_v38, 4  ;;  %v16091_v0 = vrot.slane %v16047_v54, 11  ;;  %v9389_v14 = vrot.slane %v16054_v9, 7  ;;  %v16057_v28 = vld [vmem:[%s19972_s11 + $0x3e4] sm:$0xf] }
  0xf4   : > { %17556 = vmatpush3.bf16.msra.mxu1 %v19540_v30  ;;  %v8855_v5 = vsel %vm19983_vm4, %v8853_v48, %v8854_v56  ;;  %v8875_v30 = vrot.slane %v15984_v22, 5  ;;  %v16049_v56 = vld [vmem:[%s19972_s11 + $0x394] sm:$0x7]  ;;  %v9370_v48 = vrot.slane %v9368_v53, 4  ;;  %v9384_v21 = vrot.slane %v9382_v6, 4 }
  0xf5   : > { %17557 = vmatprep.subr.bf16.mxu1 %v19544_v44  ;;  %v16029_v8 = vcombine.low %v8852_v62, %v8855_v5  ;;  %v9365_v51 = vsel %vm19989_vm5, %v9363_v41, %v9364_v40  ;;  %v9371_v62 = vrot.slane %v16046_v46, 7  ;;  %v9378_v1 = vrot.slane %v16049_v56, 7  ;;  %v16052_v5 = vld [vmem:[%s19972_s11 + $0x3b0] sm:$0x7]  ;;  %v16056_v29 = vld [vmem:[%s19972_s11 + $0x3e0] sm:$0x8] }
  0xf6   : > { %v8876_v49 = vsel %vm19983_vm4, %v8874_v36, %v8875_v30  ;;  %v9385_v22 = vrot.slane %v16052_v5, 7  ;;  %v9391_v25 = vrot.slane %v9389_v14, 4  ;;  %v19561_v30 = vld [vmem:[%s24527_s1 + $0x448] sm:$0xff]   ;;  %v16059_v41 = vld [vmem:[%s19972_s11 + $0x3fc] sm:$0x8]  ;;  %v16094_v46 = vrot.slane %v16056_v29, 11 }
  0xf7   : > { %17526 = vmatmul.mubr.bf16.gmra.mrb[4].mxu1 %v19539_v50  ;;  %v9362_v50 = vsel %vm19989_vm5, %v16089_v39, %v9361_v38  ;;  %v16032_v59 = vcombine.low %v8873_v45, %v8876_v49  ;;  %v9372_v13 = vsel %vm19989_vm5, %v9370_v48, %v9371_v62  ;;  %v9396_v38 = vrot.slane %v16057_v28, 7  ;;  %v21025_v45 = vld [vmem:[%s19972_s11 + $0x418] sm:$0x8]  ;;  %v21032_v54 = vld [vmem:[%s19972_s11 + $0x420] sm:$0x7] }
  0xf8   : > { %17529 = vmatprep.mubr.bf16.mxu1 %v19542_v55  ;;  %17558 = vmatpush3.bf16.msra.mxu1 %v19544_v44  ;;  %v19560_v44 = vld [vmem:[%s24527_s1 + $0x130] sm:$0xff]   ;;  %v16121_v60 = vcombine.low %v9362_v50, %v9365_v51  ;;  %v9405_v56 = vrot.slane %v9403_v43, 4  ;;  %v16066_v48 = vld [vmem:[%s19972_s11 + $0x438] sm:$0xf]  ;;  %v16067_v9 = vld [vmem:[%s19972_s11 + $0x43c] sm:$0x7] }
  0xf9   : > { %17559 = vmatprep.subr.bf16.mxu1 %v19548_v61  ;;  %18118 = vmatmul.mubr.bf16.gmra.mrb[20].mxu0 %v16028_v3  ;;  %v16048_v55 = vld [vmem:[%s19972_s11 + $0x390] sm:$0xf]  ;;  %v16050_v3 = vld [vmem:[%s19972_s11 + $0x3a8] sm:$0x8]  ;;  %v9398_v51 = vrot.slane %v9396_v38, 4  ;;  %v9420_v33 = vrot.slane %v16067_v9, 7 }
  0xfa   : > { %18121 = vmatprep.mubr.bf16.mxu0 %v16029_v8  ;;  %v9375_v57 = vrot.slane %v16048_v55, 7  ;;  %v16053_v8 = vld [vmem:[%s19972_s11 + $0x3c4] sm:$0x8]  ;;  %v14857_v55 = vld [vmem:[%s19972_s11 + $0x1fc] sm:$0xc] }
  0xfb   : > { %v16093_v23 = vrot.slane %v16053_v8, 11  ;;  %v16065_v8 = vld [vmem:[%s19972_s11 + $0x434] sm:$0x8]  ;;  %v14864_v29 = vld [vmem:[%s19972_s11 + $0x238] sm:$0xf] }
  0xfc   : > { %17560 = vmatpush3.bf16.msra.mxu1 %v19548_v61  ;;  %v16090_v61 = vrot.slane %v16044_v42, 11  ;;  %v9377_v31 = vrot.slane %v9375_v57, 4  ;;  %v9376_v17 = vsel %vm19989_vm5, %v16091_v0, %v9375_v57  ;;  %v16061_v42 = vld [vmem:[%s19972_s11 + $0x404] sm:$0x7]  ;;  %v19559_v0 = vld [vmem:[%s19972_s11 + $0x2c8] sm:$0xff]  }
  0xfd   : > { %17561 = vmatprep.subr.bf16.mxu1 %v19553_v12  ;;  %v9390_v39 = vsel %vm19989_vm5, %v16093_v23, %v9389_v14  ;;  %v9406_v57 = vrot.slane %v16061_v42, 7  ;;  %v9417_v14 = vrot.slane %v16066_v48, 7  ;;  %v21065_v23 = vld [vmem:[%s19972_s11 + $0x450] sm:$0x8]  ;;  %v14863_v28 = vld [vmem:[%s19972_s11 + $0x234] sm:$0xc] }
  0xfe   : > { %v9379_v18 = vsel %vm19989_vm5, %v9377_v31, %v9378_v1  ;;  %v9413_v31 = vrot.slane %v21032_v54, 7  ;;  %v14905_v1 = vrot.slane %v14857_v55, 10  ;;  %v19563_v42 = vld [vmem:[%s19972_s11 + $0x300] sm:$0xff]   ;;  %v19573_v54 = vld [vmem:[%s24527_s1 + $0x470] sm:$0xff]  }
  0xff   : > { %17530 = vmatmul.mubr.bf16.gmra.mrb[8].mxu1 %v19543_v16  ;;  %v19554_v16 = vld [vmem:[%s19972_s11 + $0x274] sm:$0xff]   ;;  %v16123_v27 = vcombine.low %v9376_v17, %v9379_v18  ;;  %v14862_v17 = vld [vmem:[%s19972_s11 + $0x220] sm:$0x3] }
 0x100   : > { %17533 = vmatprep.mubr.bf16.mxu1 %v19546_v19  ;;  %17562 = vmatpush3.bf16.msra.mxu1 %v19553_v12  ;;  %v9369_v12 = vsel %vm19989_vm5, %v16090_v61, %v9368_v53  ;;  %v16092_v19 = vrot.slane %v16050_v3, 11  ;;  %v14859_v61 = vld [vmem:[%s19972_s11 + $0x204] sm:$0x3]  ;;  %v9397_v3 = vsel %vm19989_vm5, %v16094_v46, %v9396_v38  ;;  %v14907_v46 = vrot.slane %v14863_v28, 10 }
 0x101   : > { %17563 = vmatprep.subr.bf16.mxu1 %v19556_v26  ;;  %18122 = vmatmul.mubr.bf16.gmra.mrb[24].mxu0 %v16030_v35  ;;  %v16122_v24 = vcombine.low %v9369_v12, %v9372_v13  ;;  %v16058_v35 = vld [vmem:[%s19972_s11 + $0x3e8] sm:$0x7]  ;;  %v9407_v12 = vsel %vm19989_vm5, %v9405_v56, %v9406_v57  ;;  %v2509_v13 = vrot.slane %v14859_v61, 6 }
 0x102   : > { %18125 = vmatprep.mubr.bf16.mxu0 %v16031_v4  ;;  %v9383_v36 = vsel %vm19989_vm5, %v16092_v19, %v9382_v6  ;;  %v9386_v4 = vsel %vm19989_vm5, %v9384_v21, %v9385_v22  ;;  %v9399_v53 = vrot.slane %v16058_v35, 7  ;;  %v19562_v6 = vld [vmem:[%s19972_s11 + $0x2e4] sm:$0xff]   ;;  %v2513_v19 = vrot.slane %v21045_v2, 6 }
 0x103   : > { %v16124_v49 = vcombine.low %v9383_v36, %v9386_v4  ;;  %v16097_v22 = vrot.slane %v16065_v8, 11  ;;  %v2516_v35 = vrot.slane %v14862_v17, 6  ;;  %v19571_v36 = vld [vmem:[%s24527_s1 + $0x468] sm:$0xff]   ;;  %v21127_v8 = vld [vmem:[%s19972_s11 + $0x270] sm:$0xf] }
 0x104   : > { %17564 = vmatpush3.bf16.msra.mxu1 %v19556_v26  ;;  %v9392_v26 = vrot.slane %v16055_v10, 7  ;;  %v9400_v5 = vsel %vm19989_vm5, %v9398_v51, %v9399_v53  ;;  %v19569_v10 = vld [vmem:[%s24527_s1 + $0x460] sm:$0xff]   ;;  %v2515_v4 = vrot.slane %v2513_v19, 4  ;;  %v16071_v51 = vld [vmem:[%s19972_s11 + $0x46c] sm:$0x8] }
 0x105   : > { %17565 = vmatprep.subr.bf16.mxu1 %v19560_v44  ;;  %v16073_v53 = vld [vmem:[%s19972_s11 + $0x474] sm:$0x7] }
 0x106   : > { %v9393_v40 = vsel %vm19989_vm5, %v9391_v25, %v9392_v26  ;;  %v16126_v25 = vcombine.low %v9397_v3, %v9400_v5  ;;  %v21123_v5 = vld [vmem:[%s19972_s11 + $0x490] sm:$0x7] }
 0x107   : > { %17534 = vmatmul.mubr.bf16.gmra.mrb[12].mxu1 %v19547_v47  ;;  %v14858_v47 = vld [vmem:[%s19972_s11 + $0x200] sm:$0xf]  ;;  %v16125_v50 = vcombine.low %v9390_v39, %v9393_v40  ;;  %v14865_v39 = vld [vmem:[%s19972_s11 + $0x23c] sm:$0x3]  ;;  %v2520_v40 = vrot.slane %v14864_v29, 6 }
 0x108   : > { %17537 = vmatprep.mubr.bf16.mxu1 %v19551_v37  ;;  %17566 = vmatpush3.bf16.msra.mxu1 %v19560_v44  ;;  %v19565_v44 = vld [vmem:[%s24527_s1 + $0x450] sm:$0xff]   ;;  %v16095_v37 = vrot.slane %v16059_v41, 11  ;;  %v2506_v62 = vrot.slane %v14858_v47, 6  ;;  %v2523_v56 = vrot.slane %v14865_v39, 6 }
 0x109   : > { %17567 = vmatprep.subr.bf16.mxu1 %v19564_v58  ;;  %18126 = vmatmul.mubr.bf16.gmra.mrb[28].mxu0 %v16032_v59  ;;  %v19567_v59 = vld [vmem:[%s24527_s1 + $0x458] sm:$0xff]   ;;  %v21084_v41 = vld [vmem:[%s19972_s11 + $0x470] sm:$0xf]  ;;  %v2522_v61 = vrot.slane %v2520_v40, 4 }
 0x10a   : > { %18145 = vmatprep.mubr.bf16.mxu0 %v16121_v60  ;;  %v2508_v18 = vrot.slane %v2506_v62, 4  ;;  %v9431_v57 = vrot.slane %v21084_v41, 7 }
 0x10b   : > { %v2524_v17 = vsel %vm20305_vm8, %v2522_v61, %v2523_v56  ;;  %v14876_v56 = vld [vmem:[%s19972_s11 + $0x2a8] sm:$0xf] }
 0x10c   : > { %17568 = vmatpush3.bf16.msra.mxu1 %v19564_v58  ;;  %v16096_v58 = vrot.slane %v21025_v45, 11  ;;  %v2510_v38 = vsel %vm20305_vm8, %v2508_v18, %v2509_v13  ;;  %v14869_v13 = vld [vmem:[%s19972_s11 + $0x26c] sm:$0xc] }
 0x10d   : > { %17601 = vmatprep.subr.bf16.mxu1 %v20985_v7 }
 0x10f   : > { %17538 = vmatmul.mubr.bf16.gmra.mrb[16].mxu1 %v19552_v11  ;;  %v9404_v11 = vsel %vm19989_vm5, %v16095_v37, %v9403_v43  ;;  %v16098_v43 = vrot.slane %v21065_v23, 11 }
 0x110   : > { %17541 = vmatprep.mubr.bf16.mxu1 %v19554_v16  ;;  %v14860_v16 = vld [vmem:[%s19972_s11 + $0x218] sm:$0xc]  ;;  %v16127_v26 = vcombine.low %v9404_v11, %v9407_v12  ;;  %v9433_v11 = vrot.slane %v9431_v57, 4  ;;  %v9434_v12 = vrot.slane %v16073_v53, 7 }
 0x111   : > { %18146 = vmatmul.mubr.bf16.vlgmr.msra.gmra.mrb[0].mxu0 %v16122_v24  ;;  %v21068_v24 = vld [vmem:[%s19972_s11 + $0x454] sm:$0xf] }
 0x112   : > { %18149 = vmatprep.mubr.bf16.mxu0 %v16123_v27  ;;  %18178 = vmatpush3.bf16.msra.mxu0 %v20897_v32  ;;  %v21028_v32 = vld [vmem:[%s19972_s11 + $0x41c] sm:$0xf]  ;;  %v21071_v27 = vld [vmem:[%s19972_s11 + $0x458] sm:$0x7] }
 0x113   : > { %18179 = vmatprep.subr.bf16.mxu0 %v19561_v30  ;;  %v9410_v60 = vrot.slane %v21028_v32, 7  ;;  %v9427_v45 = vrot.slane %v21071_v27, 7  ;;  %v21091_v32 = vld [vmem:[%s19972_s11 + $0x254] sm:$0xf] }
 0x114   : > { %v2527_v48 = vrot.slane %v21091_v32, 6 }
 0x115   : > { %v9412_v21 = vrot.slane %v9410_v60, 4  ;;  %v9411_v47 = vsel %vm19989_vm5, %v16096_v58, %v9410_v60  ;;  %v21108_v58 = vld [vmem:[%s19972_s11 + $0x250] sm:$0xc]  ;;  %v2517_v60 = vsel %vm20305_vm8, %v2515_v4, %v2516_v35  ;;  %v16079_v4 = vld [vmem:[%s19972_s11 + $0x4ac] sm:$0x7] }
 0x116   : > { %18180 = vmatpush3.bf16.msra.mxu0 %v19561_v30  ;;  %v9419_v30 = vrot.slane %v9417_v14, 4  ;;  %v14908_v18 = vrot.slane %v21108_v58, 10  ;;  %v2529_v23 = vrot.slane %v2527_v48, 4 }
 0x117   : > { %17542 = vmatmul.mubr.bf16.gmra.mrb[20].mxu1 %v19555_v34  ;;  %18181 = vmatprep.subr.bf16.mxu0 %v19565_v44  ;;  %v14906_v34 = vrot.slane %v14860_v16, 10  ;;  %v2521_v16 = vsel %vm20305_vm8, %v14907_v46, %v2520_v40  ;;  %v21165_v40 = vld [vmem:[%s24527_s1 + $0x480] sm:$0xff]  }
 0x118   : > { %17545 = vmatprep.mubr.bf16.mxu1 %v19558_v63  ;;  %v2507_v63 = vsel %vm20305_vm8, %v14905_v1, %v2506_v62  ;;  %v9421_v37 = vsel %vm19989_vm5, %v9419_v30, %v9420_v33  ;;  %v14868_v62 = vld [vmem:[%s19972_s11 + $0x258] sm:$0x3]  ;;  %v14909_v30 = vrot.slane %v14869_v13, 10  ;;  %v16077_v33 = vld [vmem:[%s19972_s11 + $0x4a4] sm:$0x8]  ;;  %v14939_v41 = vcombine.low %v2521_v16, %v2524_v17 }
 0x119   : > { %18150 = vmatmul.mubr.bf16.gmra.mrb[4].mxu0 %v16124_v49  ;;  %v9414_v49 = vsel %vm19989_vm5, %v9412_v21, %v9413_v31  ;;  %v14937_v55 = vcombine.low %v2507_v63, %v2510_v38  ;;  %v21120_v31 = vld [vmem:[%s19972_s11 + $0x488] sm:$0x8]  ;;  %v14871_v21 = vld [vmem:[%s19972_s11 + $0x274] sm:$0x3]  ;;  %v21171_v46 = vld [vmem:[%s19972_s11 + $0x4c4] sm:$0xf] }
 0x11a   : > { %18153 = vmatprep.mubr.bf16.mxu0 %v16125_v50  ;;  %18182 = vmatpush3.bf16.msra.mxu0 %v19565_v44  ;;  %v9424_v44 = vrot.slane %v21068_v24, 7  ;;  %v9418_v50 = vsel %vm19989_vm5, %v16097_v22, %v9417_v14  ;;  %v16128_v1 = vcombine.low %v9411_v47, %v9414_v49  ;;  %v19574_v14 = vld [vmem:[%s24527_s1 + $0x478] sm:$0xff]   ;;  %v21140_v22 = vld [vmem:[%s19972_s11 + $0x4a8] sm:$0xf]  ;;  %v16100_v24 = vrot.slane %v21120_v31, 11 }
 0x11b   : > { %18183 = vmatprep.subr.bf16.mxu0 %v19567_v59  ;;  %v16129_v2 = vcombine.low %v9418_v50, %v9421_v37  ;;  %v19568_v63 = vld [vmem:[%s24527_s1 + $0x148] sm:$0xff]   ;;  %v2537_v38 = vrot.slane %v14871_v21, 6  ;;  %v9445_v39 = vrot.slane %v21140_v22, 7  ;;  %v2528_v49 = vsel %vm20305_vm8, %v14908_v18, %v2527_v48  ;;  %v19570_v37 = vld [vmem:[%s24527_s1 + $0x150] sm:$0xff]   ;;  %v14879_v13 = vld [vmem:[%s19972_s11 + $0x2c4] sm:$0xf] }
 0x11c   : > { %v9426_v3 = vrot.slane %v9424_v44, 4  ;;  %v9425_v27 = vsel %vm19989_vm5, %v16098_v43, %v9424_v44  ;;  %v14874_v43 = vld [vmem:[%s19972_s11 + $0x290] sm:$0x3]  ;;  %v9452_v61 = vrot.slane %v21171_v46, 7  ;;  %v16082_v31 = vld [vmem:[%s19972_s11 + $0x4c8] sm:$0x7] }
 0x11d   : > { %v9447_v53 = vrot.slane %v9445_v39, 4  ;;  %v14878_v21 = vld [vmem:[%s19972_s11 + $0x2c0] sm:$0xc] }
 0x11e   : > { %18184 = vmatpush3.bf16.msra.mxu0 %v19567_v59  ;;  %v2514_v59 = vsel %vm20305_vm8, %v14906_v34, %v2513_v19  ;;  %v2530_v19 = vrot.slane %v14868_v62, 6  ;;  %v9428_v28 = vsel %vm19989_vm5, %v9426_v3, %v9427_v45  ;;  %v21151_v34 = vld [vmem:[%s19972_s11 + $0x28c] sm:$0xf]  ;;  %v21191_v62 = vld [vmem:[%s19972_s11 + $0x4e0] sm:$0xf]  ;;  %v9454_v18 = vrot.slane %v9452_v61, 4 }
 0x11f   : > { %17546 = vmatmul.mubr.bf16.gmra.mrb[24].mxu1 %v19559_v0  ;;  %18185 = vmatprep.subr.bf16.mxu0 %v19569_v10  ;;  %v21117_v0 = vld [vmem:[%s19972_s11 + $0x48c] sm:$0xf]  ;;  %v14938_v9 = vcombine.low %v2514_v59, %v2517_v60  ;;  %v2541_v45 = vrot.slane %v21151_v34, 6  ;;  %v16130_v32 = vcombine.low %v9425_v27, %v9428_v28  ;;  %v2544_v59 = vrot.slane %v14874_v43, 6  ;;  %v21187_v60 = vld [vmem:[%s19972_s11 + $0x4c0] sm:$0x8] }
 0x120   : > { %17549 = vmatprep.mubr.bf16.mxu1 %v19562_v6  ;;  %v9438_v6 = vrot.slane %v21117_v0, 7  ;;  %v2531_v50 = vsel %vm20305_vm8, %v2529_v23, %v2530_v19  ;;  %v9455_v19 = vrot.slane %v16082_v31, 7  ;;  %v16086_v43 = vld [vmem:[%s19972_s11 + $0x4f8] sm:$0x8]  ;;  %v14887_v31 = vld [vmem:[%s19972_s11 + $0x314] sm:$0xc] }
 0x121   : > { %18154 = vmatmul.mubr.bf16.gmra.mrb[8].mxu0 %v16126_v25  ;;  %v9441_v25 = vrot.slane %v21123_v5, 7  ;;  %v2543_v0 = vrot.slane %v2541_v45, 4  ;;  %v14940_v3 = vcombine.low %v2528_v49, %v2531_v50  ;;  %v14877_v5 = vld [vmem:[%s19972_s11 + $0x2ac] sm:$0x3] }
 0x122   : > { %18157 = vmatprep.mubr.bf16.mxu0 %v16127_v26  ;;  %18186 = vmatpush3.bf16.msra.mxu0 %v19569_v10  ;;  %v16099_v10 = vrot.slane %v16071_v51, 11  ;;  %v2534_v26 = vrot.slane %v21127_v8, 6  ;;  %v9440_v29 = vrot.slane %v9438_v6, 4  ;;  %v16101_v51 = vrot.slane %v16077_v33, 11  ;;  %v16085_v8 = vld [vmem:[%s19972_s11 + $0x4e4] sm:$0x7] }
 0x123   : > { %18187 = vmatprep.subr.bf16.mxu0 %v19571_v36  ;;  %v2545_v28 = vsel %vm20305_vm8, %v2543_v0, %v2544_v59  ;;  %v16104_v0 = vrot.slane %v16086_v43, 11 }
 0x124   : > { %v9432_v35 = vsel %vm19989_vm5, %v16099_v10, %v9431_v57  ;;  %v2536_v44 = vrot.slane %v2534_v26, 4  ;;  %v9439_v57 = vsel %vm19989_vm5, %v16100_v24, %v9438_v6  ;;  %v9442_v58 = vsel %vm19989_vm5, %v9440_v29, %v9441_v25  ;;  %v16083_v6 = vld [vmem:[%s19972_s11 + $0x4dc] sm:$0x8] }
 0x125   : > { %v9446_v10 = vsel %vm19989_vm5, %v16101_v51, %v9445_v39  ;;  %v2551_v24 = vrot.slane %v14877_v5, 6  ;;  %v16103_v25 = vrot.slane %v16083_v6, 11  ;;  %v9462_v29 = vrot.slane %v16085_v8, 7  ;;  %v14889_v8 = vld [vmem:[%s19972_s11 + $0x31c] sm:$0x3] }
 0x126   : > { %18188 = vmatpush3.bf16.msra.mxu0 %v19571_v36  ;;  %v9435_v36 = vsel %vm19989_vm5, %v9433_v11, %v9434_v12  ;;  %v2538_v48 = vsel %vm20305_vm8, %v2536_v44, %v2537_v38  ;;  %v16102_v11 = vrot.slane %v21187_v60, 11  ;;  %v9459_v12 = vrot.slane %v21191_v62, 7  ;;  %v14881_v38 = vld [vmem:[%s19972_s11 + $0x2dc] sm:$0xc]  ;;  %v14883_v44 = vld [vmem:[%s19972_s11 + $0x2e4] sm:$0x3] }
 0x127   : > { %17550 = vmatmul.mubr.bf16.gmra.mrb[28].mxu1 %v19563_v42  ;;  %18189 = vmatprep.subr.bf16.mxu0 %v19573_v54  ;;  %v14872_v42 = vld [vmem:[%s19972_s11 + $0x288] sm:$0xc]  ;;  %v16131_v47 = vcombine.low %v9432_v35, %v9435_v36  ;;  %v14912_v35 = vrot.slane %v14878_v21, 10  ;;  %v21220_v36 = vld [vmem:[%s19972_s11 + $0x4fc] sm:$0xf]  ;;  %v9456_v51 = vsel %vm19989_vm5, %v9454_v18, %v9455_v19  ;;  %v19583_v19 = vld [vmem:[%s24527_s1 + $0x170] sm:$0xff]  }
 0x128   : > { %17569 = vmatprep.mubr.bf16.mxu1 %v14937_v55  ;;  %v14910_v55 = vrot.slane %v14872_v42, 10  ;;  %v9461_v34 = vrot.slane %v9459_v12, 4  ;;  %v9453_v50 = vsel %vm19989_vm5, %v16102_v11, %v9452_v61  ;;  %v14886_v60 = vld [vmem:[%s19972_s11 + $0x300] sm:$0x3]  ;;  %v21264_v18 = vld [vmem:[%s19972_s11 + $0x334] sm:$0xf] }
 0x129   : > { %18158 = vmatmul.mubr.bf16.gmra.mrb[12].mxu0 %v16128_v1  ;;  %v14875_v1 = vld [vmem:[%s19972_s11 + $0x2a4] sm:$0xc]  ;;  %v2572_v11 = vrot.slane %v14886_v60, 6  ;;  %v21270_v21 = vld [vmem:[%s19972_s11 + $0x330] sm:$0xc] }
 0x12a   : > { %18161 = vmatprep.mubr.bf16.mxu0 %v16129_v2  ;;  %18190 = vmatpush3.bf16.msra.mxu0 %v19573_v54  ;;  %v9448_v54 = vrot.slane %v16079_v4, 7  ;;  %v2548_v2 = vrot.slane %v14876_v56, 6  ;;  %v14911_v22 = vrot.slane %v14875_v1, 10  ;;  %v2542_v27 = vsel %vm20305_vm8, %v14910_v55, %v2541_v45  ;;  %v14882_v4 = vld [vmem:[%s19972_s11 + $0x2e0] sm:$0xf]  ;;  %v19579_v56 = vld [vmem:[%s24527_s1 + $0x168] sm:$0xff]  }
 0x12b   : > { %18191 = vmatprep.subr.bf16.mxu0 %v19574_v14  ;;  %v14942_v39 = vcombine.low %v2542_v27, %v2545_v28  ;;  %v2562_v49 = vrot.slane %v14882_v4, 6  ;;  %v21240_v55 = vld [vmem:[%s19972_s11 + $0x2f8] sm:$0xc]  ;;  %v9463_v59 = vsel %vm19989_vm5, %v9461_v34, %v9462_v29  ;;  %v14892_v28 = vld [vmem:[%s19972_s11 + $0x338] sm:$0x3]  ;;  %v2583_v29 = vrot.slane %v21264_v18, 6 }
 0x12c   : > { %v9449_v17 = vsel %vm19989_vm5, %v9447_v53, %v9448_v54  ;;  %v2550_v23 = vrot.slane %v2548_v2, 4  ;;  %v14913_v53 = vrot.slane %v14881_v38, 10  ;;  %v2565_v54 = vrot.slane %v14883_v44, 6  ;;  %v14888_v1 = vld [vmem:[%s19972_s11 + $0x318] sm:$0xf] }
 0x12d   : > { %v16133_v33 = vcombine.low %v9446_v10, %v9449_v17  ;;  %v2564_v61 = vrot.slane %v2562_v49, 4  ;;  %v14914_v10 = vrot.slane %v21240_v55, 10  ;;  %v2579_v17 = vrot.slane %v14889_v8, 6  ;;  %v14895_v34 = vld [vmem:[%s19972_s11 + $0x354] sm:$0x3] }
 0x12e   : > { %18192 = vmatpush3.bf16.msra.mxu0 %v19574_v14  ;;  %v19572_v14 = vld [vmem:[%s24527_s1 + $0x158] sm:$0xff]   ;;  %v2552_v42 = vsel %vm20305_vm8, %v2550_v23, %v2551_v24  ;;  %v14916_v38 = vrot.slane %v21270_v21, 10  ;;  %v2586_v4 = vrot.slane %v14892_v28, 6  ;;  %v14901_v60 = vld [vmem:[%s19972_s11 + $0x38c] sm:$0x3]  ;;  %v19582_v21 = vld [vmem:[%s19972_s11 + $0x70] sm:$0xff]  }
 0x12f   : > { %17570 = vmatmul.mubr.bf16.vlgmr.msra.gmra.mrb[0].mxu1 %v14938_v9  ;;  %18225 = vmatprep.subr.bf16.mxu0 %v21165_v40  ;;  %v16132_v9 = vcombine.low %v9439_v57, %v9442_v58  ;;  %v9460_v58 = vsel %vm19989_vm5, %v16103_v25, %v9459_v12  ;;  %v2576_v12 = vrot.slane %v14888_v1, 6  ;;  %v19587_v25 = vld [vmem:[%s24527_s1 + $0x178] sm:$0xff]   ;;  %v19584_v28 = vld [vmem:[%s19972_s11 + $0x8c] sm:$0xff]  }
 0x130   : > { %17602 = vmatpush3.bf16.msra.mxu1 %v20985_v7  ;;  %17573 = vmatprep.mubr.bf16.mxu1 %v14939_v41  ;;  %v2535_v7 = vsel %vm20305_vm8, %v14909_v30, %v2534_v26  ;;  %v14880_v26 = vld [vmem:[%s19972_s11 + $0x2c8] sm:$0x3]  ;;  %v2555_v30 = vrot.slane %v14879_v13, 6  ;;  %v2549_v41 = vsel %vm20305_vm8, %v14911_v22, %v2548_v2  ;;  %v16135_v2 = vcombine.low %v9460_v58, %v9463_v59  ;;  %v19580_v18 = vld [vmem:[%s19972_s11 + $0x54] sm:$0xff]  }
 0x131   : > { %17603 = vmatprep.subr.bf16.mxu1 %v19568_v63  ;;  %18162 = vmatmul.mubr.bf16.gmra.mrb[16].mxu0 %v16130_v32  ;;  %v14941_v16 = vcombine.low %v2535_v7, %v2538_v48  ;;  %v2558_v46 = vrot.slane %v14880_v26, 6  ;;  %v16088_v32 = vld [vmem:[%s19972_s11 + $0x500] sm:$0x7]  ;;  %v14943_v57 = vcombine.low %v2549_v41, %v2552_v42  ;;  %v16134_v7 = vcombine.low %v9453_v50, %v9456_v51  ;;  %v14897_v41 = vld [vmem:[%s19972_s11 + $0x36c] sm:$0xf] }
 0x132   : > { %18165 = vmatprep.mubr.bf16.mxu0 %v16131_v47  ;;  %v2557_v45 = vrot.slane %v2555_v30, 4  ;;  %v9466_v47 = vrot.slane %v21220_v36, 7  ;;  %v2556_v48 = vsel %vm20305_vm8, %v14912_v35, %v2555_v30  ;;  %v9469_v6 = vrot.slane %v16088_v32, 7  ;;  %v14893_v30 = vld [vmem:[%s19972_s11 + $0x34c] sm:$0xc]  ;;  %v19575_v36 = vld [vmem:[%s19972_s11] sm:$0xff]  }
 0x133   : > { %v2566_v13 = vsel %vm20305_vm8, %v2564_v61, %v2565_v54  ;;  %v2578_v27 = vrot.slane %v2576_v12, 4  ;;  %v21293_v42 = vld [vmem:[%s24527_s1 + $0x180] sm:$0xff]   ;;  %v14898_v32 = vld [vmem:[%s19972_s11 + $0x370] sm:$0x3]  ;;  %v2593_v50 = vrot.slane %v14895_v34, 6  ;;  %v2597_v51 = vrot.slane %v14897_v41, 6 }
 0x134   : > { %17604 = vmatpush3.bf16.msra.mxu1 %v19568_v63  ;;  %v19576_v63 = vld [vmem:[%s24527_s1 + $0x160] sm:$0xff]   ;;  %v9468_v5 = vrot.slane %v9466_v47, 4  ;;  %v9467_v23 = vsel %vm19989_vm5, %v16104_v0, %v9466_v47  ;;  %v2600_v59 = vrot.slane %v14898_v32, 6  ;;  %v19614_v41 = vld [vmem:[%s24527_s1 + $0x4b8] sm:$0xff]  }
 0x135   : > { %17605 = vmatprep.subr.bf16.mxu1 %v19570_v37  ;;  %v14902_v0 = vld [vmem:[%s19972_s11 + $0x3a0] sm:$0xc] }
 0x136   : > { %v9470_v24 = vsel %vm19989_vm5, %v9468_v5, %v9469_v6  ;;  %v14904_v5 = vld [vmem:[%s19972_s11 + $0x3a8] sm:$0x3]  ;;  %v14920_v6 = vrot.slane %v14902_v0, 10  ;;  %v19594_v32 = vld [vmem:[%s19972_s11 + $0xfc] sm:$0xff]  }
 0x137   : > { %17574 = vmatmul.mubr.bf16.gmra.mrb[4].mxu1 %v14940_v3  ;;  %v2559_v3 = vsel %vm20305_vm8, %v2557_v45, %v2558_v46  ;;  %v16136_v35 = vcombine.low %v9467_v23, %v9470_v24  ;;  %v2585_v45 = vrot.slane %v2583_v29, 4  ;;  %v14917_v46 = vrot.slane %v14893_v30, 10  ;;  %v19586_v30 = vld [vmem:[%s19972_s11 + $0xa8] sm:$0xff]  }
 0x138   : > { %17577 = vmatprep.mubr.bf16.mxu1 %v14941_v16  ;;  %17606 = vmatpush3.bf16.msra.mxu1 %v19570_v37  ;;  %v14885_v37 = vld [vmem:[%s19972_s11 + $0x2fc] sm:$0xf]  ;;  %v14915_v16 = vrot.slane %v14887_v31, 10  ;;  %v14944_v22 = vcombine.low %v2556_v48, %v2559_v3  ;;  %v19585_v31 = vld [vmem:[%s24527_s1 + $0x488] sm:$0xff]   ;;  %v14903_v3 = vld [vmem:[%s19972_s11 + $0x3a4] sm:$0xf] }
 0x139   : > { %17607 = vmatprep.subr.bf16.mxu1 %v19572_v14  ;;  %18166 = vmatmul.mubr.bf16.gmra.mrb[20].mxu0 %v16132_v9  ;;  %v2569_v62 = vrot.slane %v14885_v37, 6  ;;  %v2563_v9 = vsel %vm20305_vm8, %v14913_v53, %v2562_v49  ;;  %v2580_v49 = vsel %vm20305_vm8, %v2578_v27, %v2579_v17  ;;  %v14899_v37 = vld [vmem:[%s19972_s11 + $0x384] sm:$0xc]  ;;  %v2611_v8 = vrot.slane %v14903_v3, 6 }
 0x13a   : > { %18169 = vmatprep.mubr.bf16.mxu0 %v16133_v33  ;;  %v14945_v26 = vcombine.low %v2563_v9, %v2566_v13  ;;  %v14894_v33 = vld [vmem:[%s19972_s11 + $0x350] sm:$0xf]  ;;  %v2577_v47 = vsel %vm20305_vm8, %v14915_v16, %v2576_v12  ;;  %v14919_v48 = vrot.slane %v14899_v37, 10  ;;  %v2584_v9 = vsel %vm20305_vm8, %v14916_v38, %v2583_v29  ;;  %v19617_v37 = vld [vmem:[%s24527_s1 + $0x1a0] sm:$0xff]  }
 0x13b   : > { %v2570_v43 = vsel %vm20305_vm8, %v14914_v10, %v2569_v62  ;;  %v14947_v58 = vcombine.low %v2577_v47, %v2580_v49  ;;  %v2587_v10 = vsel %vm20305_vm8, %v2585_v45, %v2586_v4  ;;  %v2613_v13 = vrot.slane %v2611_v8, 4  ;;  %v19589_v16 = vld [vmem:[%s24527_s1 + $0x490] sm:$0xff]   ;;  %v19588_v4 = vld [vmem:[%s19972_s11 + $0xc4] sm:$0xff]   ;;  %v19597_v47 = vld [vmem:[%s19972_s11 + $0x118] sm:$0xff]  }
 0x13c   : > { %17608 = vmatpush3.bf16.msra.mxu1 %v19572_v14  ;;  %v2571_v14 = vrot.slane %v2569_v62, 4  ;;  %v19578_v62 = vld [vmem:[%s19972_s11 + $0x38] sm:$0xff]   ;;  %v14948_v17 = vcombine.low %v2584_v9, %v2587_v10  ;;  %v2612_v34 = vsel %vm20305_vm8, %v14920_v6, %v2611_v8  ;;  %v19613_v38 = vld [vmem:[%s24527_s1 + $0x4b0] sm:$0xff]   ;;  %v19599_v45 = vld [vmem:[%s24527_s1 + $0x188] sm:$0xff]  }
 0x13d   : > { %17609 = vmatprep.subr.bf16.mxu1 %v19576_v63  ;;  %v19605_v49 = vld [vmem:[%s24527_s1 + $0x190] sm:$0xff]   ;;  %v21405_v3 = vld [vmem:[%s19972_s11 + $0x44] sm:$0xf]  ;;  %v10315_v6 = vld [vmem:[%s19972_s11 + $0x2c] sm:$0x1] }
 0x13e   : > { %v2573_v44 = vsel %vm20305_vm8, %v2571_v14, %v2572_v11  ;;  %v2614_v14 = vrot.slane %v14904_v5, 6  ;;  %v19610_v5 = vld [vmem:[%s19972_s11 + $0x2c8] sm:$0xff]   ;;  %v10316_v9 = vld [vmem:[%s19972_s11 + $0x40] sm:$0xe] }
 0x13f   : > { %17578 = vmatmul.mubr.bf16.gmra.mrb[8].mxu1 %v14942_v39  ;;  %v21287_v39 = vld [vmem:[%s19972_s11 + $0x368] sm:$0xc]  ;;  %v14946_v55 = vcombine.low %v2570_v43, %v2573_v44  ;;  %v19592_v43 = vld [vmem:[%s19972_s11 + $0x220] sm:$0xff]  }
 0x140   : > { %17581 = vmatprep.mubr.bf16.mxu1 %v14943_v57  ;;  %17610 = vmatpush3.bf16.msra.mxu1 %v19576_v63  ;;  %v2590_v63 = vrot.slane %v14894_v33, 6  ;;  %v14918_v54 = vrot.slane %v21287_v39, 10  ;;  %v19577_v57 = vld [vmem:[%s19972_s11 + $0x1c] sm:$0xff]   ;;  %v19607_v33 = vld [vmem:[%s24527_s1 + $0x4a8] sm:$0xff]  }
 0x141   : > { %17611 = vmatprep.subr.bf16.mxu1 %v19579_v56  ;;  %18170 = vmatmul.mubr.bf16.gmra.mrb[24].mxu0 %v16134_v7  ;;  %v2599_v7 = vrot.slane %v2597_v51, 4  ;;  %v19591_v39 = vld [vmem:[%s19972_s11 + $0xe0] sm:$0xff]  }
 0x142   : > { %18173 = vmatprep.mubr.bf16.mxu0 %v16135_v2  ;;  %v2592_v53 = vrot.slane %v2590_v63, 4  ;;  %v2607_v2 = vrot.slane %v14901_v60, 6  ;;  %v2591_v11 = vsel %vm20305_vm8, %v14917_v46, %v2590_v63  ;;  %v2598_v23 = vsel %vm20305_vm8, %v14918_v54, %v2597_v51  ;;  %v19590_v63 = vld [vmem:[%s19972_s11 + $0x204] sm:$0xff]   ;;  %v19596_v44 = vld [vmem:[%s19972_s11 + $0x23c] sm:$0xff]   ;;  %v19602_v51 = vld [vmem:[%s19972_s11 + $0x274] sm:$0xff]  }
 0x143   : > { %v2601_v24 = vsel %vm20305_vm8, %v2599_v7, %v2600_v59  ;;  %v21371_v46 = vld [vmem:[%s24527_s1 + $0x4c0] sm:$0xff]   ;;  %v19603_v54 = vld [vmem:[%s19972_s11 + $0x150] sm:$0xff]   ;;  %v21400_v7 = vld [vmem:[%s19972_s11 + $0x28] sm:$0xf] }
 0x144   : > { %17612 = vmatpush3.bf16.msra.mxu1 %v19579_v56  ;;  %v14900_v56 = vld [vmem:[%s19972_s11 + $0x388] sm:$0xf]  ;;  %v2594_v12 = vsel %vm20305_vm8, %v2592_v53, %v2593_v50  ;;  %v14950_v27 = vcombine.low %v2598_v23, %v2601_v24  ;;  %v19598_v50 = vld [vmem:[%s19972_s11 + $0x258] sm:$0xff]   ;;  %v10312_v60 = vld [vmem:[%s19972_s11 + $0x10] sm:$0x1]  ;;  %v10415_v8 = vrot.slane %v21400_v7, 5 }
 0x145   : > { %17613 = vmatprep.subr.bf16.mxu1 %v19583_v19  ;;  %v2604_v61 = vrot.slane %v14900_v56, 6  ;;  %v19600_v53 = vld [vmem:[%s19972_s11 + $0x134] sm:$0xff]   ;;  %v21412_v10 = vld [vmem:[%s19972_s11 + $0x60] sm:$0xf]  ;;  %v21432_v23 = vld [vmem:[%s19972_s11 + $0x64] sm:$0x1] }
 0x146   : > { %v19604_v56 = vld [vmem:[%s19972_s11 + $0x290] sm:$0xff]   ;;  %v10429_v24 = vrot.slane %v21412_v10, 5  ;;  %v21698_v10 = vld [vmem:[%s19972_s11 + $0x318] sm:$0xf] }
 0x147   : > { %17582 = vmatmul.mubr.bf16.gmra.mrb[12].mxu1 %v14944_v22  ;;  %v2606_v1 = vrot.slane %v2604_v61, 4  ;;  %v19595_v22 = vld [vmem:[%s24527_s1 + $0x498] sm:$0xff]  }
 0x148   : > { %17585 = vmatprep.mubr.bf16.mxu1 %v14945_v26  ;;  %17614 = vmatpush3.bf16.msra.mxu1 %v19583_v19  ;;  %v14949_v19 = vcombine.low %v2591_v11, %v2594_v12  ;;  %v19601_v26 = vld [vmem:[%s24527_s1 + $0x4a0] sm:$0xff]   ;;  %v19624_v11 = vld [vmem:[%s24527_s1 + $0x1b0] sm:$0xff]   ;;  %v10318_v12 = vld [vmem:[%s19972_s11 + $0x48] sm:$0x1] }
 0x149   : > { %17615 = vmatprep.subr.bf16.mxu1 %v19587_v25  ;;  %18174 = vmatmul.mubr.bf16.gmra.mrb[28].mxu0 %v16136_v35  ;;  %v2615_v35 = vsel %vm20305_vm8, %v2613_v13, %v2614_v14  ;;  %v21419_v13 = vld [vmem:[%s19972_s11 + $0x7c] sm:$0xf]  ;;  %v19615_v14 = vld [vmem:[%s19972_s11 + $0x2e4] sm:$0xff]  }
 0x14a   : > { %18193 = vmatprep.mubr.bf16.mxu0 %v19575_v36  ;;  %v14952_v36 = vcombine.low %v2612_v34, %v2615_v35 }
 0x14c   : > { %17616 = vmatpush3.bf16.msra.mxu1 %v19587_v25  ;;  %v2608_v25 = vsel %vm20305_vm8, %v2606_v1, %v2607_v2  ;;  %v10411_v1 = vrot.slane %v10312_v60, 5  ;;  %v10313_v2 = vld [vmem:[%s19972_s11 + $0x24] sm:$0xe] }
 0x14d   : > { %17649 = vmatprep.subr.bf16.mxu1 %v21293_v42 }
 0x14f   : > { %17586 = vmatmul.mubr.bf16.gmra.mrb[16].mxu1 %v14946_v55  ;;  %v10311_v55 = vld [vmem:[%s19972_s11 + $0xc] sm:$0xf] }
 0x150   : > { %17589 = vmatprep.mubr.bf16.mxu1 %v14947_v58  ;;  %v10310_v58 = vld [vmem:[%s19972_s11 + $0x8] sm:$0xe]  ;;  %v10408_v59 = vrot.slane %v10311_v55, 5 }
 0x151   : > { %18194 = vmatmul.mubr.bf16.vlgmr.msra.gmra.mrb[0].mxu0 %v19577_v57  ;;  %v19608_v57 = vld [vmem:[%s19972_s11 + $0x2ac] sm:$0xff]   ;;  %v16185_v0 = vrot.slane %v10310_v58, 9  ;;  %v21495_v58 = vld [vmem:[%s19972_s11 + $0xd4] sm:$0x1] }
 0x152   : > { %18197 = vmatprep.mubr.bf16.mxu0 %v19578_v62  ;;  %18226 = vmatpush3.bf16.msra.mxu0 %v21165_v40  ;;  %v2605_v40 = vsel %vm20305_vm8, %v14919_v48, %v2604_v61  ;;  %v19620_v61 = vld [vmem:[%s24527_s1 + $0x1a8] sm:$0xff]  }
 0x153   : > { %18227 = vmatprep.subr.bf16.mxu0 %v19585_v31  ;;  %v14951_v29 = vcombine.low %v2605_v40, %v2608_v25  ;;  %v19606_v62 = vld [vmem:[%s19972_s11 + $0x16c] sm:$0xff]   ;;  %v21436_v40 = vld [vmem:[%s19972_s11 + $0x78] sm:$0xe]  ;;  %v21439_v25 = vld [vmem:[%s19972_s11 + $0x80] sm:$0x1] }
 0x154   : > { %v19609_v48 = vld [vmem:[%s19972_s11 + $0x188] sm:$0xff]  }
 0x156   : > { %18228 = vmatpush3.bf16.msra.mxu0 %v19585_v31  ;;  %v10410_v31 = vrot.slane %v10408_v59, 4 }
 0x157   : > { %17590 = vmatmul.mubr.bf16.gmra.mrb[20].mxu1 %v14948_v17  ;;  %18229 = vmatprep.subr.bf16.mxu0 %v19589_v16  ;;  %v21424_v17 = vld [vmem:[%s19972_s11 + $0x5c] sm:$0xe] }
 0x158   : > { %17593 = vmatprep.mubr.bf16.mxu1 %v14949_v19  ;;  %v10409_v19 = vsel %vm19983_vm4, %v16185_v0, %v10408_v59  ;;  %v21498_v59 = vld [vmem:[%s19972_s11 + $0x2a8] sm:$0xf]  ;;  %v21510_v0 = vld [vmem:[%s19972_s11 + $0x2a4] sm:$0xc] }
 0x159   : > { %18198 = vmatmul.mubr.bf16.gmra.mrb[4].mxu0 %v19580_v18  ;;  %v19612_v18 = vld [vmem:[%s19972_s11 + $0x1a4] sm:$0xff]  }
 0x15a   : > { %18201 = vmatprep.mubr.bf16.mxu0 %v19582_v21  ;;  %18230 = vmatpush3.bf16.msra.mxu0 %v19589_v16  ;;  %v10422_v16 = vrot.slane %v21405_v3, 5  ;;  %v10412_v21 = vsel %vm19983_vm4, %v10410_v31, %v10411_v1  ;;  %v21513_v31 = vld [vmem:[%s19972_s11 + $0x2ac] sm:$0x3]  ;;  %v3554_v3 = vrot.slane %v21498_v59, 6 }
 0x15b   : > { %18231 = vmatprep.subr.bf16.mxu0 %v19595_v22  ;;  %v16217_v34 = vcombine.low %v10409_v19, %v10412_v21  ;;  %v10460_v21 = vrot.slane %v21495_v58, 5 }
 0x15c   : > { %v10424_v35 = vrot.slane %v10422_v16, 4 }
 0x15e   : > { %18232 = vmatpush3.bf16.msra.mxu0 %v19595_v22  ;;  %v16186_v22 = vrot.slane %v10313_v2, 9 }
 0x15f   : > { %17594 = vmatmul.mubr.bf16.gmra.mrb[24].mxu1 %v14950_v27  ;;  %18233 = vmatprep.subr.bf16.mxu0 %v19601_v26  ;;  %v19628_v27 = vld [vmem:[%s24527_s1 + $0x1b8] sm:$0xff]  }
 0x160   : > { %17597 = vmatprep.mubr.bf16.mxu1 %v14951_v29  ;;  %v10418_v29 = vrot.slane %v10315_v6, 5  ;;  %v10416_v55 = vsel %vm19983_vm4, %v16186_v22, %v10415_v8  ;;  %v21537_v22 = vld [vmem:[%s19972_s11 + $0x2c0] sm:$0xc] }
 0x161   : > { %18202 = vmatmul.mubr.bf16.gmra.mrb[8].mxu0 %v19584_v28  ;;  %v10417_v28 = vrot.slane %v10415_v8, 4 }
 0x162   : > { %18205 = vmatprep.mubr.bf16.mxu0 %v19586_v30  ;;  %18234 = vmatpush3.bf16.msra.mxu0 %v19601_v26  ;;  %v10436_v26 = vrot.slane %v21419_v13, 5  ;;  %v16187_v30 = vrot.slane %v10316_v9, 9  ;;  %v19625_v9 = vld [vmem:[%s24527_s1 + $0x4c8] sm:$0xff]  }
 0x163   : > { %18235 = vmatprep.subr.bf16.mxu0 %v19607_v33 }
 0x164   : > { %v10423_v60 = vsel %vm19983_vm4, %v16187_v30, %v10422_v16  ;;  %v3557_v30 = vrot.slane %v21513_v31, 6  ;;  %v19627_v31 = vld [vmem:[%s19972_s11 + $0x3a8] sm:$0xff]  }
 0x166   : > { %18236 = vmatpush3.bf16.msra.mxu0 %v19607_v33  ;;  %v10425_v33 = vrot.slane %v10318_v12, 5  ;;  %v21528_v12 = vld [vmem:[%s19972_s11 + $0xf0] sm:$0x1] }
 0x167   : > { %17598 = vmatmul.mubr.bf16.gmra.mrb[28].mxu1 %v14952_v36  ;;  %18237 = vmatprep.subr.bf16.mxu0 %v19613_v38  ;;  %v16188_v36 = vrot.slane %v21424_v17, 9 }
 0x168   : > { %17617 = vmatprep.mubr.bf16.mxu1 %v19590_v63  ;;  %v21447_v63 = vld [vmem:[%s19972_s11 + $0x94] sm:$0xe] }
 0x169   : > { %18206 = vmatmul.mubr.bf16.gmra.mrb[12].mxu0 %v19588_v4  ;;  %v21454_v4 = vrot.slane %v10429_v24, 4 }
 0x16a   : > { %18209 = vmatprep.mubr.bf16.mxu0 %v19591_v39  ;;  %18238 = vmatpush3.bf16.msra.mxu0 %v19613_v38  ;;  %v21450_v38 = vld [vmem:[%s19972_s11 + $0x98] sm:$0xf]  ;;  %v10432_v39 = vrot.slane %v21432_v23, 5  ;;  %v21594_v23 = vld [vmem:[%s19972_s11 + $0x104] sm:$0xe] }
 0x16b   : > { %18239 = vmatprep.subr.bf16.mxu0 %v19614_v41 }
 0x16e   : > { %18240 = vmatpush3.bf16.msra.mxu0 %v19614_v41  ;;  %v16189_v41 = vrot.slane %v21436_v40, 9 }
 0x16f   : > { %17618 = vmatmul.mubr.bf16.vlgmr.msra.gmra.mrb[0].mxu1 %v19592_v43  ;;  %18273 = vmatprep.subr.bf16.mxu0 %v21371_v46  ;;  %v10439_v43 = vrot.slane %v21439_v25, 5 }
 0x170   : > { %17650 = vmatpush3.bf16.msra.mxu1 %v21293_v42  ;;  %17621 = vmatprep.mubr.bf16.mxu1 %v19596_v44  ;;  %v19611_v42 = vld [vmem:[%s24527_s1 + $0x198] sm:$0xff]   ;;  %v19616_v44 = vld [vmem:[%s19972_s11 + $0x300] sm:$0xff]   ;;  %v10437_v17 = vsel %vm19983_vm4, %v16189_v41, %v10436_v26 }
 0x171   : > { %17651 = vmatprep.subr.bf16.mxu1 %v19599_v45  ;;  %18210 = vmatmul.mubr.bf16.gmra.mrb[16].mxu0 %v19594_v32  ;;  %v21465_v32 = vld [vmem:[%s19972_s11 + $0xb4] sm:$0xf]  ;;  %v19631_v41 = vld [vmem:[%s24527_s1 + $0x4d8] sm:$0xff]  }
 0x172   : > { %18213 = vmatprep.mubr.bf16.mxu0 %v19597_v47  ;;  %v21468_v47 = vld [vmem:[%s19972_s11 + $0xd0] sm:$0xf] }
 0x173   : > { %v10457_v7 = vrot.slane %v21468_v47, 5 }
 0x174   : > { %17652 = vmatpush3.bf16.msra.mxu1 %v19599_v45  ;;  %v21462_v45 = vrot.slane %v10436_v26, 4  ;;  %v21605_v26 = vld [vmem:[%s19972_s11 + $0x124] sm:$0xf] }
 0x175   : > { %17653 = vmatprep.subr.bf16.mxu1 %v19605_v49 }
 0x177   : > { %17622 = vmatmul.mubr.bf16.gmra.mrb[4].mxu1 %v19598_v50  ;;  %v19618_v50 = vld [vmem:[%s19972_s11 + $0x31c] sm:$0xff]  }
 0x178   : > { %17625 = vmatprep.mubr.bf16.mxu1 %v19602_v51  ;;  %17654 = vmatpush3.bf16.msra.mxu1 %v19605_v49  ;;  %v21473_v49 = vld [vmem:[%s24527_s1 + $0x1c0] sm:$0xff]   ;;  %v21477_v51 = vld [vmem:[%s19972_s11 + $0x9c] sm:$0x1] }
 0x179   : > { %17655 = vmatprep.subr.bf16.mxu1 %v19611_v42  ;;  %18214 = vmatmul.mubr.bf16.gmra.mrb[20].mxu0 %v19600_v53  ;;  %v10443_v53 = vrot.slane %v21450_v38, 5  ;;  %v10446_v2 = vrot.slane %v21477_v51, 5  ;;  %v21557_v51 = vld [vmem:[%s19972_s11 + $0x2c4] sm:$0xf]  ;;  %v19623_v38 = vld [vmem:[%s19972_s11 + $0x370] sm:$0xff]  }
 0x17a   : > { %18217 = vmatprep.mubr.bf16.mxu0 %v19603_v54  ;;  %v21482_v54 = vld [vmem:[%s19972_s11 + $0xb0] sm:$0xe]  ;;  %v3561_v13 = vrot.slane %v21557_v51, 6 }
 0x17b   : > { %v10445_v8 = vrot.slane %v10443_v53, 4  ;;  %v19637_v51 = vld [vmem:[%s24527_s1 + $0x4f0] sm:$0xff]  }
 0x17c   : > { %17656 = vmatpush3.bf16.msra.mxu1 %v19611_v42  ;;  %v16190_v42 = vrot.slane %v21447_v63, 9  ;;  %v3563_v63 = vrot.slane %v3561_v13, 4 }
 0x17d   : > { %17657 = vmatprep.subr.bf16.mxu1 %v19617_v37 }
 0x17f   : > { %17626 = vmatmul.mubr.bf16.gmra.mrb[8].mxu1 %v19604_v56  ;;  %v21489_v56 = vld [vmem:[%s19972_s11 + $0xb8] sm:$0x1] }
 0x180   : > { %17629 = vmatprep.mubr.bf16.mxu1 %v19608_v57  ;;  %17658 = vmatpush3.bf16.msra.mxu1 %v19617_v37  ;;  %v10419_v37 = vsel %vm19983_vm4, %v10417_v28, %v10418_v29  ;;  %v21492_v57 = vld [vmem:[%s19972_s11 + $0xcc] sm:$0xe]  ;;  %v21542_v28 = vrot.slane %v10457_v7, 4  ;;  %v15081_v29 = vrot.slane %v21510_v0, 10 }
 0x181   : > { %17659 = vmatprep.subr.bf16.mxu1 %v19620_v61  ;;  %18218 = vmatmul.mubr.bf16.gmra.mrb[24].mxu0 %v19606_v62  ;;  %v10450_v62 = vrot.slane %v21465_v32, 5  ;;  %v16218_v1 = vcombine.low %v10416_v55, %v10419_v37  ;;  %v16192_v19 = vrot.slane %v21492_v57, 9  ;;  %v10430_v55 = vsel %vm19983_vm4, %v16188_v36, %v10429_v24  ;;  %v21597_v24 = vld [vmem:[%s19972_s11 + $0x2e0] sm:$0xf]  ;;  %v21601_v36 = vld [vmem:[%s19972_s11 + $0x10c] sm:$0x1] }
 0x182   : > { %18221 = vmatprep.mubr.bf16.mxu0 %v19609_v48  ;;  %v21507_v48 = vld [vmem:[%s19972_s11 + $0xec] sm:$0xf]  ;;  %v10433_v37 = vsel %vm19983_vm4, %v21454_v4, %v10432_v39  ;;  %v21608_v4 = vld [vmem:[%s19972_s11 + $0x2dc] sm:$0xc]  ;;  %v21711_v47 = vsel %vm19983_vm4, %v21542_v28, %v10460_v21  ;;  %v3555_v57 = vsel %vm20305_vm8, %v15081_v29, %v3554_v3 }
 0x183   : > { %v10452_v16 = vrot.slane %v10450_v62, 4  ;;  %v16220_v25 = vcombine.low %v10430_v55, %v10433_v37  ;;  %v24532_v55 = vrot.slane %v21605_v26, 5  ;;  %v21766_v28 = vld [vmem:[%s19972_s11 + $0x15c] sm:$0xf] }
 0x184   : > { %17660 = vmatpush3.bf16.msra.mxu1 %v19620_v61  ;;  %v10426_v61 = vsel %vm19983_vm4, %v10424_v35, %v10425_v33  ;;  %v19629_v35 = vld [vmem:[%s24527_s1 + $0x4d0] sm:$0xff]  }
 0x185   : > { %17661 = vmatprep.subr.bf16.mxu1 %v19624_v11  ;;  %v16219_v6 = vcombine.low %v10423_v60, %v10426_v61  ;;  %v21579_v60 = vld [vmem:[%s19972_s11 + $0x2c8] sm:$0x3]  ;;  %v21618_v61 = vld [vmem:[%s19972_s11 + $0x120] sm:$0xe] }
 0x187   : > { %17630 = vmatmul.mubr.bf16.gmra.mrb[12].mxu1 %v19610_v5  ;;  %v21519_v5 = vld [vmem:[%s19972_s11 + $0xe8] sm:$0xe] }
 0x188   : > { %17633 = vmatprep.mubr.bf16.mxu1 %v19615_v14  ;;  %17662 = vmatpush3.bf16.msra.mxu1 %v19624_v11  ;;  %v16191_v11 = vrot.slane %v21482_v54, 9  ;;  %v10464_v14 = vrot.slane %v21507_v48, 5  ;;  %v16193_v33 = vrot.slane %v21519_v5, 9  ;;  %v21560_v54 = vld [vmem:[%s19972_s11 + $0x108] sm:$0xf]  ;;  %v24556_v5 = vrot.slane %v21537_v22, 10 }
 0x189   : > { %17663 = vmatprep.subr.bf16.mxu1 %v19628_v27  ;;  %18222 = vmatmul.mubr.bf16.gmra.mrb[28].mxu0 %v19612_v18  ;;  %v10453_v18 = vrot.slane %v21489_v56, 5  ;;  %v24533_v40 = vrot.slane %v21560_v54, 5  ;;  %v21769_v22 = vld [vmem:[%s19972_s11 + $0x334] sm:$0xf] }
 0x18a   : > { %18241 = vmatprep.mubr.bf16.mxu0 %v16217_v34  ;;  %v19622_v34 = vld [vmem:[%s19972_s11 + $0x354] sm:$0xff]   ;;  %v21576_v56 = vrot.slane %v10464_v14, 4  ;;  %v10451_v37 = vsel %vm19983_vm4, %v16191_v11, %v10450_v62  ;;  %v21701_v62 = vld [vmem:[%s19972_s11 + $0x31c] sm:$0x3]  ;;  %v21725_v58 = vsel %vm19983_vm4, %v16193_v33, %v10464_v14 }
 0x18c   : > { %17664 = vmatpush3.bf16.msra.mxu1 %v19628_v27  ;;  %v19619_v27 = vld [vmem:[%s19972_s11 + $0x338] sm:$0xff]  }
 0x18d   : > { %17697 = vmatprep.subr.bf16.mxu1 %v21473_v49 }
 0x18f   : > { %17634 = vmatmul.mubr.bf16.gmra.mrb[16].mxu1 %v19616_v44  ;;  %v21553_v44 = vrot.slane %v3554_v3, 4 }
 0x190   : > { %17637 = vmatprep.mubr.bf16.mxu1 %v19618_v50  ;;  %v10467_v50 = vrot.slane %v21528_v12, 5  ;;  %v21754_v12 = vsel %vm20305_vm8, %v24556_v5, %v3561_v13  ;;  %v21785_v13 = vld [vmem:[%s19972_s11 + $0x178] sm:$0xf]  ;;  %v24558_v5 = vrot.slane %v21594_v23, 9  ;;  %v24561_v23 = vrot.slane %v21608_v4, 10 }
 0x191   : > { %18242 = vmatmul.mubr.bf16.vlgmr.msra.gmra.mrb[0].mxu0 %v16218_v1  ;;  %v10444_v1 = vsel %vm19983_vm4, %v16190_v42, %v10443_v53  ;;  %v21642_v53 = vrot.slane %v24533_v40, 4  ;;  %v21657_v42 = vld [vmem:[%s19972_s11 + $0x300] sm:$0x3]  ;;  %v21695_v40 = vld [vmem:[%s19972_s11 + $0x314] sm:$0xc]  ;;  %v3558_v59 = vsel %vm20305_vm8, %v21553_v44, %v3557_v30  ;;  %v3582_v30 = vrot.slane %v21698_v10, 6 }
 0x192   : > { %18245 = vmatprep.mubr.bf16.mxu0 %v16219_v6  ;;  %18274 = vmatpush3.bf16.msra.mxu0 %v21371_v46  ;;  %v10440_v46 = vsel %vm19983_vm4, %v21462_v45, %v10439_v43  ;;  %v21614_v43 = vld [vmem:[%s19972_s11 + $0x2e4] sm:$0x3]  ;;  %v24531_v45 = vrot.slane %v21597_v24, 6  ;;  %v10447_v6 = vsel %vm19983_vm4, %v10445_v8, %v10446_v2  ;;  %v21646_v8 = vld [vmem:[%s19972_s11 + $0x2fc] sm:$0xf]  ;;  %v21740_v48 = vsel %vm19983_vm4, %v21576_v56, %v10467_v50 }
 0x193   : > { %18275 = vmatprep.subr.bf16.mxu0 %v19625_v9  ;;  %v16221_v39 = vcombine.low %v10437_v17, %v10440_v46  ;;  %v21660_v2 = vld [vmem:[%s19972_s11 + $0x140] sm:$0xf]  ;;  %v21679_v46 = vld [vmem:[%s19972_s11 + $0x13c] sm:$0xe]  ;;  %v21683_v17 = vld [vmem:[%s19972_s11 + $0x144] sm:$0x1]  ;;  %v16222_v11 = vcombine.low %v10444_v1, %v10447_v6  ;;  %v15113_v6 = vcombine.low %v3555_v57, %v3558_v59 }
 0x194   : > { %v21665_v32 = vrot.slane %v24531_v45, 4  ;;  %v19635_v1 = vld [vmem:[%s24527_s1 + $0x4e8] sm:$0xff]   ;;  %v16196_v3 = vrot.slane %v21679_v46, 9  ;;  %v10488_v21 = vrot.slane %v21683_v17, 5  ;;  %v15085_v29 = vrot.slane %v21695_v40, 10 }
 0x195   : > { %v21775_v44 = vld [vmem:[%s19972_s11 + $0x160] sm:$0x1]  ;;  %v21782_v56 = vld [vmem:[%s19972_s11 + $0x330] sm:$0xc]  ;;  %v21811_v57 = vld [vmem:[%s19972_s11 + $0x194] sm:$0xf] }
 0x196   : > { %18276 = vmatpush3.bf16.msra.mxu0 %v19625_v9  ;;  %v3564_v9 = vrot.slane %v21579_v60, 6  ;;  %v10454_v60 = vsel %vm19983_vm4, %v10452_v16, %v10453_v18  ;;  %v19633_v18 = vld [vmem:[%s24527_s1 + $0x4e0] sm:$0xff]   ;;  %v10485_v16 = vrot.slane %v21660_v2, 5  ;;  %v24557_v59 = vrot.slane %v21560_v54, 5  ;;  %v21850_v4 = vld [vmem:[%s19972_s11 + $0x190] sm:$0xe] }
 0x197   : > { %17638 = vmatmul.mubr.bf16.gmra.mrb[20].mxu1 %v19619_v27  ;;  %18277 = vmatprep.subr.bf16.mxu0 %v19629_v35  ;;  %v21630_v27 = vld [vmem:[%s19972_s11 + $0x128] sm:$0x1]  ;;  %v16223_v45 = vcombine.low %v10451_v37, %v10454_v60  ;;  %v21796_v37 = vld [vmem:[%s19972_s11 + $0x174] sm:$0xe]  ;;  %v16225_v60 = vcombine.low %v21725_v58, %v21740_v48  ;;  %v24535_v48 = vrot.slane %v21785_v13, 5  ;;  %v24560_v54 = vrot.slane %v21597_v24, 6 }
 0x198   : > { %17641 = vmatprep.mubr.bf16.mxu1 %v19622_v34  ;;  %v21634_v34 = vld [vmem:[%s19972_s11 + $0x2f8] sm:$0xc]  ;;  %v21758_v14 = vsel %vm20305_vm8, %v3563_v63, %v3564_v9  ;;  %v10492_v9 = vrot.slane %v21766_v28, 5  ;;  %v24534_v63 = vrot.slane %v21769_v22, 6  ;;  %v21847_v24 = vld [vmem:[%s19972_s11 + $0x354] sm:$0x3] }
 0x199   : > { %18246 = vmatmul.mubr.bf16.gmra.mrb[4].mxu0 %v16220_v25  ;;  %v19626_v25 = vld [vmem:[%s19972_s11 + $0x38c] sm:$0xff]   ;;  %v24565_v33 = vrot.slane %v21630_v27, 5  ;;  %v21906_v27 = vld [vmem:[%s24527_s1 + $0x500] sm:$0xff]   ;;  %v24569_v40 = vrot.slane %v21775_v44, 5 }
 0x19a   : > { %18249 = vmatprep.mubr.bf16.mxu0 %v16221_v39  ;;  %18278 = vmatpush3.bf16.msra.mxu0 %v19629_v35  ;;  %v21675_v35 = vrot.slane %v24532_v55, 4  ;;  %v3575_v39 = vrot.slane %v21646_v8, 6  ;;  %v21692_v55 = vsel %vm19983_vm4, %v16192_v19, %v10457_v7  ;;  %v21728_v7 = vld [vmem:[%s19972_s11 + $0x158] sm:$0xe]  ;;  %v21762_v19 = vrot.slane %v10485_v16, 4 }
 0x19b   : > { %18279 = vmatprep.subr.bf16.mxu0 %v19631_v41  ;;  %v16197_v50 = vrot.slane %v21728_v7, 9  ;;  %v21929_v8 = vld [vmem:[%s19972_s11 + $0x370] sm:$0x3]  ;;  %v21989_v17 = vld [vmem:[%s19972_s11 + $0x10] sm:$0xc] }
 0x19c   : > { %v21744_v0 = vrot.slane %v3575_v39, 4  ;;  %v10489_v46 = vsel %vm19983_vm4, %v21762_v19, %v10488_v21  ;;  %v3606_v7 = vrot.slane %v21929_v8, 6  ;;  %v22002_v21 = vld [vmem:[%s19972_s11 + $0x18] sm:$0x3] }
 0x19e   : > { %18280 = vmatpush3.bf16.msra.mxu0 %v19631_v41  ;;  %v21788_v41 = vld [vmem:[%s19972_s11 + $0x350] sm:$0xf] }
 0x19f   : > { %17642 = vmatmul.mubr.bf16.gmra.mrb[24].mxu1 %v19623_v38  ;;  %18281 = vmatprep.subr.bf16.mxu0 %v19633_v18  ;;  %v21792_v38 = vld [vmem:[%s19972_s11 + $0x338] sm:$0x3] }
 0x1a0   : > { %17645 = vmatprep.mubr.bf16.mxu1 %v19626_v25  ;;  %v15114_v25 = vcombine.low %v21754_v12, %v21758_v14  ;;  %v24537_v12 = vrot.slane %v21788_v41, 6  ;;  %v3569_v14 = vsel %vm20305_vm8, %v24561_v23, %v24560_v54  ;;  %v19638_v54 = vld [vmem:[%s24527_s1 + $0x4f8] sm:$0xff]  }
 0x1a1   : > { %18250 = vmatmul.mubr.bf16.gmra.mrb[8].mxu0 %v16222_v11  ;;  %v21805_v11 = vld [vmem:[%s19972_s11 + $0x17c] sm:$0x1] }
 0x1a2   : > { %18253 = vmatprep.mubr.bf16.mxu0 %v16223_v45  ;;  %18282 = vmatpush3.bf16.msra.mxu0 %v19633_v18  ;;  %v16224_v45 = vcombine.low %v21692_v55, %v21711_v47  ;;  %v21808_v18 = vld [vmem:[%s19972_s11 + $0x34c] sm:$0xc]  ;;  %v21819_v55 = vsel %vm19983_vm4, %v24558_v5, %v24557_v59  ;;  %v24559_v47 = vrot.slane %v21601_v36, 5  ;;  %v24562_v59 = vrot.slane %v21614_v43, 6 }
 0x1a3   : > { %18283 = vmatprep.subr.bf16.mxu0 %v19635_v1  ;;  %v10494_v43 = vrot.slane %v10492_v9, 4  ;;  %v21872_v5 = vrot.slane %v24535_v48, 4 }
 0x1a4   : > { %v21826_v58 = vsel %vm19983_vm4, %v21642_v53, %v24559_v47  ;;  %v3572_v36 = vsel %vm20305_vm8, %v21665_v32, %v24562_v59  ;;  %v21843_v53 = vrot.slane %v3582_v30, 4  ;;  %v24536_v47 = vrot.slane %v21811_v57, 5  ;;  %v21868_v32 = vld [vmem:[%s19972_s11 + $0x198] sm:$0x1] }
 0x1a5   : > { %v15115_v23 = vcombine.low %v3569_v14, %v3572_v36  ;;  %v24563_v59 = vrot.slane %v21605_v26, 5  ;;  %v21895_v14 = vld [vmem:[%s19972_s11 + $0x368] sm:$0xc]  ;;  %v21898_v26 = vld [vmem:[%s19972_s11 + $0x36c] sm:$0xf]  ;;  %v24567_v36 = vrot.slane %v21657_v42, 6  ;;  %v10496_v19 = vsel %vm19983_vm4, %v10494_v43, %v24569_v40 }
 0x1a6   : > { %18284 = vmatpush3.bf16.msra.mxu0 %v19635_v1  ;;  %v21862_v1 = vrot.slane %v24534_v63, 4  ;;  %v10482_v63 = vsel %vm19983_vm4, %v21675_v35, %v24565_v33  ;;  %v24566_v35 = vrot.slane %v21634_v34, 10  ;;  %v21932_v34 = vld [vmem:[%s19972_s11 + $0x388] sm:$0xf]  ;;  %v21938_v42 = vld [vmem:[%s19972_s11 + $0x1b4] sm:$0x1] }
 0x1a7   : > { %17646 = vmatmul.mubr.bf16.gmra.mrb[28].mxu1 %v19627_v31  ;;  %18285 = vmatprep.subr.bf16.mxu0 %v19637_v51  ;;  %v21876_v31 = vrot.slane %v24537_v12, 4  ;;  %v21955_v12 = vsel %vm19983_vm4, %v16196_v3, %v10485_v16  ;;  %v3610_v2 = vrot.slane %v21932_v34, 6  ;;  %v3583_v16 = vsel %vm20305_vm8, %v15085_v29, %v3582_v30  ;;  %v22006_v29 = vld [vmem:[%s19972_s11 + $0x3a4] sm:$0xf]  ;;  %v19642_v34 = vld [vmem:[%s24527_s1 + $0x1f0] sm:$0xff]  }
 0x1a8   : > { %17665 = vmatprep.mubr.bf16.mxu1 %v15113_v6  ;;  %v21914_v33 = vsel %vm20305_vm8, %v24566_v35, %v3575_v39  ;;  %v21935_v39 = vld [vmem:[%s19972_s11 + $0x1ac] sm:$0xe]  ;;  %v24568_v3 = vrot.slane %v21701_v62, 6  ;;  %v24571_v30 = vrot.slane %v21782_v56, 10 }
 0x1a9   : > { %18254 = vmatmul.mubr.bf16.gmra.mrb[12].mxu0 %v16224_v45  ;;  %v24564_v45 = vrot.slane %v21618_v61, 9  ;;  %v21901_v61 = vld [vmem:[%s19972_s11 + $0x1b0] sm:$0xf]  ;;  %v22026_v43 = vrot.slane %v3610_v2, 4 }
 0x1aa   : > { %18257 = vmatprep.mubr.bf16.mxu0 %v16225_v60  ;;  %v19632_v60 = vld [vmem:[%s24527_s1 + $0x1c8] sm:$0xff]   ;;  %18286 = vmatpush3.bf16.msra.mxu0 %v19637_v51  ;;  %v21925_v51 = vrot.slane %v24536_v47, 4  ;;  %v24539_v6 = vrot.slane %v21901_v61, 5  ;;  %v3586_v10 = vsel %vm20305_vm8, %v21843_v53, %v24568_v3  ;;  %v22036_v3 = vld [vmem:[%s19972_s11 + $0x30] sm:$0xf] }
 0x1ab   : > { %v10479_v48 = vsel %vm19983_vm4, %v24564_v45, %v24563_v59  ;;  %v21921_v59 = vsel %vm20305_vm8, %v21744_v0, %v24567_v36  ;;  %18287 = vmatprep.subr.bf16.mxu0 %v19638_v54  ;;  %v16226_v0 = vcombine.low %v21819_v55, %v21826_v58  ;;  %v3603_v36 = vrot.slane %v21898_v26, 6  ;;  %v21945_v45 = vld [vmem:[%s19972_s11 + $0x14] sm:$0xf]  ;;  %v21965_v58 = vld [vmem:[%s19972_s11 + $0x38c] sm:$0x3] }
 0x1ac   : > { %v16227_v35 = vcombine.low %v10479_v48, %v10482_v63  ;;  %v15116_v47 = vcombine.low %v21914_v33, %v21921_v59  ;;  %v19634_v63 = vld [vmem:[%s24527_s1 + $0x1d0] sm:$0xff]   ;;  %v15088_v55 = vrot.slane %v21895_v14, 10  ;;  %v24538_v28 = vrot.slane %v21945_v45, 6  ;;  %v19636_v48 = vld [vmem:[%s24527_s1 + $0x1d8] sm:$0xff]   ;;  %v22066_v53 = vld [vmem:[%s19972_s11 + $0x4c] sm:$0xf] }
 0x1ad   : > { %v3605_v62 = vrot.slane %v3603_v36, 4  ;;  %v22014_v44 = vrot.slane %v24539_v6, 4  ;;  %v15117_v33 = vcombine.low %v3583_v16, %v3586_v10  ;;  %v16228_v16 = vcombine.low %v21955_v12, %v10489_v46  ;;  %v22161_v26 = vld [vmem:[%s19972_s11 + $0x3e0] sm:$0x3]  ;;  %v22180_v14 = vld [vmem:[%s19972_s11 + $0x3f8] sm:$0xf] }
 0x1ae   : > { %18288 = vmatpush3.bf16.msra.mxu0 %v19638_v54  ;;  %v22040_v40 = vrot.slane %v24538_v28, 4  ;;  %v24570_v59 = vrot.slane %v21769_v22, 6  ;;  %v24572_v6 = vrot.slane %v21792_v38, 6  ;;  %v22063_v54 = vld [vmem:[%s19972_s11 + $0x34] sm:$0x3]  ;;  %v24573_v12 = vrot.slane %v21788_v41, 6 }
 0x1af   : > { %17666 = vmatmul.mubr.bf16.vlgmr.msra.gmra.mrb[0].mxu1 %v15114_v25  ;;  %v21962_v25 = vld [vmem:[%s19972_s11 + $0x384] sm:$0xc]  ;;  %18321 = vmatprep.subr.bf16.mxu0 %v21906_v27  ;;  %v24574_v22 = vrot.slane %v21808_v18, 10  ;;  %v24575_v46 = vrot.slane %v21847_v24, 6  ;;  %v11009_v41 = vrot.slane %v22036_v3, 6 }
 0x1b0   : > { %17698 = vmatpush3.bf16.msra.mxu1 %v21473_v49  ;;  %17669 = vmatprep.mubr.bf16.mxu1 %v15115_v23  ;;  %v21986_v49 = vsel %vm19983_vm4, %v16197_v50, %v10492_v9  ;;  %v22018_v9 = vld [vmem:[%s19972_s11 + $0x3a0] sm:$0xc]  ;;  %v22044_v50 = vld [vmem:[%s19972_s11 + $0x2c] sm:$0xc]  ;;  %v3590_v28 = vsel %vm20305_vm8, %v24571_v30, %v24570_v59  ;;  %v3593_v23 = vsel %vm20305_vm8, %v21862_v1, %v24572_v6  ;;  %v22085_v6 = vld [vmem:[%s19972_s11 + $0x3bc] sm:$0xc] }
 0x1b1   : > { %17699 = vmatprep.subr.bf16.mxu1 %v19632_v60  ;;  %18258 = vmatmul.mubr.bf16.gmra.mrb[16].mxu0 %v16226_v0  ;;  %v22032_v0 = vld [vmem:[%s19972_s11 + $0x3a8] sm:$0x3]  ;;  %v16229_v10 = vcombine.low %v21986_v49, %v10496_v19  ;;  %v3597_v56 = vsel %vm20305_vm8, %v24574_v22, %v24573_v12  ;;  %v3600_v38 = vsel %vm20305_vm8, %v21876_v31, %v24575_v46  ;;  %v22092_v31 = vld [vmem:[%s19972_s11 + $0x3c4] sm:$0x3]  ;;  %v24576_v19 = vrot.slane %v21785_v13, 5 }
 0x1b2   : > { %18261 = vmatprep.mubr.bf16.mxu0 %v16227_v35  ;;  %v3617_v35 = vrot.slane %v22006_v29, 6  ;;  %v3620_v1 = vrot.slane %v22032_v0, 6  ;;  %v15118_v49 = vcombine.low %v3590_v28, %v3593_v23  ;;  %v24577_v30 = vrot.slane %v21796_v37, 9  ;;  %v22103_v59 = vld [vmem:[%s19972_s11 + $0x48] sm:$0xc] }
 0x1b3   : > { %v24540_v12 = vrot.slane %v22066_v53, 6  ;;  %v24578_v22 = vrot.slane %v21805_v11, 5  ;;  %v15119_v13 = vcombine.low %v3597_v56, %v3600_v38  ;;  %v24579_v37 = vrot.slane %v21811_v57, 5  ;;  %v22123_v11 = vld [vmem:[%s19972_s11 + $0x50] sm:$0x3] }
 0x1b4   : > { %17700 = vmatpush3.bf16.msra.mxu1 %v19632_v60  ;;  %v22047_v60 = vld [vmem:[%s19972_s11 + $0x3c0] sm:$0xf]  ;;  %v22089_v18 = vrot.slane %v3617_v35, 4  ;;  %v24580_v23 = vrot.slane %v21850_v4, 9  ;;  %v22133_v57 = vrot.slane %v11009_v41, 4  ;;  %v3627_v56 = vrot.slane %v22092_v31, 6 }
 0x1b5   : > { %17701 = vmatprep.subr.bf16.mxu1 %v19634_v63  ;;  %v3624_v24 = vrot.slane %v22047_v60, 6  ;;  %v10503_v28 = vsel %vm19983_vm4, %v21872_v5, %v24578_v22  ;;  %v22129_v5 = vld [vmem:[%s19972_s11 + $0x3dc] sm:$0xf]  ;;  %v22153_v38 = vsel %vm20305_vm8, %v3605_v62, %v3606_v7  ;;  %v22168_v8 = vrot.slane %v24540_v12, 4  ;;  %v22174_v62 = vld [vmem:[%s19972_s11 + $0x64] sm:$0xc] }
 0x1b6   : > { %v10507_v46 = vsel %vm19983_vm4, %v24580_v23, %v24579_v37  ;;  %v22164_v37 = vld [vmem:[%s19972_s11 + $0x68] sm:$0xf]  ;;  %v3631_v7 = vrot.slane %v22129_v5, 6  ;;  %v22183_v4 = vld [vmem:[%s19972_s11 + $0x84] sm:$0xf]  ;;  %v24591_v31 = vrot.slane %v22063_v54, 6 }
 0x1b7   : > { %17670 = vmatmul.mubr.bf16.gmra.mrb[4].mxu1 %v15116_v47  ;;  %v19639_v47 = vld [vmem:[%s24527_s1 + $0x1e0] sm:$0xff]   ;;  %v22157_v22 = vrot.slane %v3624_v24, 4  ;;  %v22199_v12 = vld [vmem:[%s19972_s11 + $0x3f4] sm:$0xc]  ;;  %v24594_v3 = vrot.slane %v22123_v11, 6 }
 0x1b8   : > { %17673 = vmatprep.mubr.bf16.mxu1 %v15117_v33  ;;  %17702 = vmatpush3.bf16.msra.mxu1 %v19634_v63  ;;  %v10500_v33 = vsel %vm19983_vm4, %v24577_v30, %v24576_v19  ;;  %v16242_v63 = vrot.slane %v22044_v50, 10  ;;  %v24581_v19 = vrot.slane %v21868_v32, 5  ;;  %v22126_v30 = vld [vmem:[%s19972_s11 + $0x3d8] sm:$0xc]  ;;  %v15091_v32 = vrot.slane %v22085_v6, 10 }
 0x1b9   : > { %17703 = vmatprep.subr.bf16.mxu1 %v19636_v48  ;;  %18262 = vmatmul.mubr.bf16.gmra.mrb[20].mxu0 %v16228_v16  ;;  %v11020_v50 = vsel %vm20305_vm8, %v22168_v8, %v24594_v3  ;;  %v22375_v11 = vld [vmem:[%s19972_s11 + $0x448] sm:$0xc]  ;;  %v22405_v8 = vld [vmem:[%s19972_s11 + $0x2ac] sm:$0xf] }
 0x1ba   : > { %v10510_v16 = vsel %vm19983_vm4, %v21925_v51, %v24581_v19  ;;  %18265 = vmatprep.mubr.bf16.mxu0 %v16229_v10  ;;  %v19640_v51 = vld [vmem:[%s24527_s1 + $0x1e8] sm:$0xff]   ;;  %v22147_v10 = vsel %vm20305_vm8, %v15088_v55, %v3603_v36  ;;  %v24582_v55 = vrot.slane %v21962_v25, 10  ;;  %v11010_v6 = vsel %vm20305_vm8, %v16242_v63, %v11009_v41 }
 0x1bb   : > { %v16231_v23 = vcombine.low %v10507_v46, %v10510_v16  ;;  %v22177_v19 = vld [vmem:[%s19972_s11 + $0x6c] sm:$0x3]  ;;  %v3634_v46 = vrot.slane %v22161_v26, 6  ;;  %v24542_v16 = vrot.slane %v22164_v37, 6  ;;  %v15120_v25 = vcombine.low %v22147_v10, %v22153_v38 }
 0x1bc   : > { %17704 = vmatpush3.bf16.msra.mxu1 %v19636_v48  ;;  %v16230_v48 = vcombine.low %v10500_v33, %v10503_v28  ;;  %v3611_v36 = vsel %vm20305_vm8, %v24582_v55, %v3610_v2  ;;  %v24583_v33 = vrot.slane %v21965_v58, 6  ;;  %v24584_v58 = vrot.slane %v21901_v61, 5  ;;  %v22216_v55 = vld [vmem:[%s19972_s11 + $0x80] sm:$0xc]  ;;  %v22362_v41 = vld [vmem:[%s19972_s11 + $0x44c] sm:$0xf] }
 0x1bd   : > { %17705 = vmatprep.subr.bf16.mxu1 %v19639_v47  ;;  %v24585_v2 = vrot.slane %v21935_v39, 9  ;;  %v24587_v39 = vrot.slane %v21945_v45, 6  ;;  %v24588_v10 = vrot.slane %v21989_v17, 10  ;;  %v22244_v17 = vrot.slane %v3631_v7, 4 }
 0x1be   : > { %v3614_v28 = vsel %vm20305_vm8, %v22026_v43, %v24583_v33  ;;  %v22219_v33 = vld [vmem:[%s19972_s11 + $0x88] sm:$0x3]  ;;  %v22255_v29 = vrot.slane %v24542_v16, 4  ;;  %v22304_v16 = vld [vmem:[%s19972_s11 + $0xa4] sm:$0x3] }
 0x1bf   : > { %17674 = vmatmul.mubr.bf16.gmra.mrb[8].mxu1 %v15118_v49  ;;  %v10514_v43 = vsel %vm19983_vm4, %v24585_v2, %v24584_v58  ;;  %v22213_v49 = vld [vmem:[%s19972_s11 + $0x3fc] sm:$0x3]  ;;  %v11003_v38 = vsel %vm20305_vm8, %v24588_v10, %v24587_v39  ;;  %v24541_v58 = vrot.slane %v22183_v4, 6  ;;  %v15121_v2 = vcombine.low %v3611_v36, %v3614_v28  ;;  %v22297_v10 = vld [vmem:[%s19972_s11 + $0x430] sm:$0xf] }
 0x1c0   : > { %17677 = vmatprep.mubr.bf16.mxu1 %v15119_v13  ;;  %17706 = vmatpush3.bf16.msra.mxu1 %v19639_v47  ;;  %v24586_v13 = vrot.slane %v21938_v42, 5  ;;  %v3638_v47 = vrot.slane %v22180_v14, 6  ;;  %v24589_v42 = vrot.slane %v22018_v9, 10  ;;  %v24590_v28 = vrot.slane %v22002_v21, 6  ;;  %v22275_v21 = vld [vmem:[%s19972_s11 + $0x418] sm:$0x3] }
 0x1c1   : > { %17707 = vmatprep.subr.bf16.mxu1 %v19640_v51  ;;  %18266 = vmatmul.mubr.bf16.gmra.mrb[24].mxu0 %v16230_v48  ;;  %v22251_v48 = vld [vmem:[%s19972_s11 + $0x414] sm:$0xf]  ;;  %v22278_v9 = vld [vmem:[%s19972_s11 + $0xa0] sm:$0xf]  ;;  %v22286_v0 = vrot.slane %v24541_v58, 4  ;;  %v3648_v58 = vrot.slane %v22275_v21, 6 }
 0x1c2   : > { %v10517_v61 = vsel %vm19983_vm4, %v22014_v44, %v24586_v13  ;;  %v22240_v45 = vsel %vm20305_vm8, %v24589_v42, %v3617_v35  ;;  %v22248_v13 = vld [vmem:[%s19972_s11 + $0x410] sm:$0xc]  ;;  %18269 = vmatprep.mubr.bf16.mxu0 %v16231_v23  ;;  %v11006_v39 = vsel %vm20305_vm8, %v22040_v40, %v24590_v28  ;;  %v22270_v23 = vsel %vm20305_vm8, %v22089_v18, %v3620_v1  ;;  %v22294_v42 = vld [vmem:[%s19972_s11 + $0x9c] sm:$0xc]  ;;  %v22315_v35 = vld [vmem:[%s19972_s11 + $0x42c] sm:$0xc] }
 0x1c3   : > { %v22282_v40 = vrot.slane %v3638_v47, 4  ;;  %v3645_v18 = vrot.slane %v22251_v48, 6  ;;  %v16232_v28 = vcombine.low %v10514_v43, %v10517_v61  ;;  %v22300_v44 = vld [vmem:[%s19972_s11 + $0xbc] sm:$0xf]  ;;  %v16273_v1 = vcombine.low %v11003_v38, %v11006_v39  ;;  %v22310_v43 = vld [vmem:[%s24527_s1 + $0x200] sm:$0xff]  }
 0x1c4   : > { %17708 = vmatpush3.bf16.msra.mxu1 %v19640_v51  ;;  %v19644_v51 = vld [vmem:[%s24527_s1 + $0x1f8] sm:$0xff]   ;;  %v11037_v36 = vrot.slane %v22278_v9, 6  ;;  %v15122_v61 = vcombine.low %v22240_v45, %v22270_v23  ;;  %v3625_v38 = vsel %vm20305_vm8, %v15091_v32, %v3624_v24  ;;  %v3652_v45 = vrot.slane %v22297_v10, 6  ;;  %v22336_v39 = vld [vmem:[%s19972_s11 + $0xc0] sm:$0x3] }
 0x1c5   : > { %17709 = vmatprep.subr.bf16.mxu1 %v19642_v34  ;;  %v24543_v60 = vrot.slane %v22300_v44, 6  ;;  %v11013_v24 = vsel %vm20305_vm8, %v22133_v57, %v24591_v31  ;;  %v24592_v32 = vrot.slane %v22066_v53, 6  ;;  %v22366_v54 = vrot.slane %v3645_v18, 4  ;;  %v22549_v21 = vld [vmem:[%s19972_s11 + $0x114] sm:$0x3] }
 0x1c6   : > { %v16246_v53 = vrot.slane %v22294_v42, 10  ;;  %v22371_v63 = vrot.slane %v11037_v36, 4  ;;  %v22387_v31 = vrot.slane %v3652_v45, 4  ;;  %v24597_v26 = vrot.slane %v22213_v49, 6 }
 0x1c7   : > { %17678 = vmatmul.mubr.bf16.gmra.mrb[12].mxu1 %v15120_v25  ;;  %v22318_v25 = vld [vmem:[%s19972_s11 + $0x434] sm:$0x3]  ;;  %v22398_v23 = vrot.slane %v24543_v60, 4  ;;  %v24544_v49 = vrot.slane %v22405_v8, 5  ;;  %v24609_v10 = vrot.slane %v22336_v39, 6  ;;  %v19649_v39 = vld [vmem:[%s24527_s1 + $0x520] sm:$0xff]  }
 0x1c8   : > { %17681 = vmatprep.mubr.bf16.mxu1 %v15121_v2  ;;  %17710 = vmatpush3.bf16.msra.mxu1 %v19642_v34  ;;  %v3628_v2 = vsel %vm20305_vm8, %v22157_v22, %v3627_v56  ;;  %v22333_v34 = vld [vmem:[%s19972_s11 + $0xb8] sm:$0xc]  ;;  %v24593_v56 = vrot.slane %v22103_v59, 10  ;;  %v11040_v59 = vrot.slane %v22304_v16, 6  ;;  %v22424_v60 = vld [vmem:[%s19972_s11 + $0xf4] sm:$0xf] }
 0x1c9   : > { %17711 = vmatprep.subr.bf16.mxu1 %v19644_v51  ;;  %18270 = vmatmul.mubr.bf16.gmra.mrb[28].mxu0 %v16232_v28  ;;  %v15123_v57 = vcombine.low %v3625_v38, %v3628_v2  ;;  %v22383_v28 = vld [vmem:[%s19972_s11 + $0xd8] sm:$0xf]  ;;  %v3659_v2 = vrot.slane %v22362_v41, 6  ;;  %v22402_v38 = vld [vmem:[%s19972_s11 + $0xd4] sm:$0xc]  ;;  %v24606_v42 = vrot.slane %v22318_v25, 6 }
 0x1ca   : > { %v11017_v22 = vsel %vm20305_vm8, %v24593_v56, %v24592_v32  ;;  %18289 = vmatprep.mubr.bf16.mxu0 %v16273_v1  ;;  %v22380_v1 = vld [vmem:[%s19972_s11 + $0x450] sm:$0x3]  ;;  %v16274_v56 = vcombine.low %v11010_v6, %v11013_v24  ;;  %v24595_v6 = vrot.slane %v22126_v30, 10  ;;  %v22420_v32 = vld [vmem:[%s19972_s11 + $0xdc] sm:$0x3]  ;;  %v24596_v30 = vrot.slane %v22199_v12, 10 }
 0x1cb   : > { %v16275_v3 = vcombine.low %v11017_v22, %v11020_v50  ;;  %v3635_v22 = vsel %vm20305_vm8, %v22244_v17, %v3634_v46  ;;  %v3662_v50 = vrot.slane %v22380_v1, 6  ;;  %v22438_v46 = vld [vmem:[%s19972_s11 + $0x2a8] sm:$0xe]  ;;  %v22441_v17 = vld [vmem:[%s19972_s11 + $0x2b0] sm:$0x1]  ;;  %v22451_v14 = vrot.slane %v3659_v2, 4 }
 0x1cc   : > { %17712 = vmatpush3.bf16.msra.mxu1 %v19644_v51  ;;  %v19643_v51 = vld [vmem:[%s24527_s1 + $0x508] sm:$0xff]   ;;  %v3632_v24 = vsel %vm20305_vm8, %v24595_v6, %v3631_v7  ;;  %v3639_v5 = vsel %vm20305_vm8, %v24596_v30, %v3638_v47  ;;  %v3642_v7 = vsel %vm20305_vm8, %v22282_v40, %v24597_v26  ;;  %v24598_v6 = vrot.slane %v22164_v37, 6  ;;  %v22455_v47 = vld [vmem:[%s19972_s11 + $0xf0] sm:$0xc]  ;;  %v22464_v26 = vld [vmem:[%s19972_s11 + $0xf8] sm:$0x3] }
 0x1cd   : > { %17745 = vmatprep.subr.bf16.mxu1 %v22310_v43  ;;  %v15124_v40 = vcombine.low %v3632_v24, %v3635_v22  ;;  %v24600_v30 = vrot.slane %v22177_v19, 6  ;;  %v24602_v19 = vrot.slane %v22216_v55, 10  ;;  %v19645_v55 = vld [vmem:[%s24527_s1 + $0x510] sm:$0xff]   ;;  %v22581_v25 = vld [vmem:[%s19972_s11 + $0x300] sm:$0xf] }
 0x1ce   : > { %v22651_v41 = vld [vmem:[%s19972_s11 + $0x31c] sm:$0xf] }
 0x1cf   : > { %17682 = vmatmul.mubr.bf16.gmra.mrb[16].mxu1 %v15122_v61  ;;  %v11051_v61 = vrot.slane %v22383_v28, 6  ;;  %v11027_v37 = vsel %vm20305_vm8, %v22255_v29, %v24600_v30  ;;  %v24603_v29 = vrot.slane %v22219_v33, 6  ;;  %v22480_v30 = vld [vmem:[%s19972_s11 + $0x2c4] sm:$0xe]  ;;  %v19647_v33 = vld [vmem:[%s24527_s1 + $0x518] sm:$0xff]   ;;  %v24614_v28 = vrot.slane %v22441_v17, 5 }
 0x1d0   : > { %17685 = vmatprep.mubr.bf16.mxu1 %v15123_v57  ;;  %v24599_v57 = vrot.slane %v22174_v62, 10  ;;  %v16248_v62 = vrot.slane %v22402_v38, 10  ;;  %v24617_v17 = vrot.slane %v22464_v26, 6  ;;  %v4176_v26 = vrot.slane %v22651_v41, 5 }
 0x1d1   : > { %18290 = vmatmul.mubr.bf16.vlgmr.msra.gmra.mrb[0].mxu0 %v16274_v56  ;;  %v24601_v56 = vrot.slane %v22183_v4, 6  ;;  %v11034_v22 = vsel %vm20305_vm8, %v22286_v0, %v24603_v29  ;;  %v22504_v29 = vld [vmem:[%s19972_s11 + $0x110] sm:$0xf] }
 0x1d2   : > { %v11024_v12 = vsel %vm20305_vm8, %v24599_v57, %v24598_v6  ;;  %v24545_v6 = vrot.slane %v22424_v60, 6  ;;  %18293 = vmatprep.mubr.bf16.mxu0 %v16275_v3  ;;  %18322 = vmatpush3.bf16.msra.mxu0 %v21906_v27  ;;  %v15125_v57 = vcombine.low %v3639_v5, %v3642_v7  ;;  %v22483_v3 = vld [vmem:[%s19972_s11 + $0x2c8] sm:$0xf]  ;;  %v22487_v27 = vrot.slane %v11051_v61, 4  ;;  %v22528_v5 = vld [vmem:[%s19972_s11 + $0x10c] sm:$0xc] }
 0x1d3   : > { %v11031_v24 = vsel %vm20305_vm8, %v24602_v19, %v24601_v56  ;;  %18323 = vmatprep.subr.bf16.mxu0 %v19643_v51  ;;  %v16276_v0 = vcombine.low %v11024_v12, %v11027_v37  ;;  %v22497_v7 = vrot.slane %v24544_v49, 4  ;;  %v22501_v19 = vld [vmem:[%s19972_s11 + $0x2cc] sm:$0x1]  ;;  %v4155_v37 = vrot.slane %v22483_v3, 5 }
 0x1d4   : > { %v22508_v4 = vrot.slane %v24545_v6, 4  ;;  %v16277_v56 = vcombine.low %v11031_v24, %v11034_v22  ;;  %v24604_v49 = vrot.slane %v22248_v13, 10  ;;  %v3649_v12 = vsel %vm20305_vm8, %v22366_v54, %v3648_v58  ;;  %v22534_v24 = vld [vmem:[%s19972_s11 + $0x12c] sm:$0xf] }
 0x1d5   : > { %v11038_v13 = vsel %vm20305_vm8, %v16246_v53, %v11037_v36  ;;  %v11041_v58 = vsel %vm20305_vm8, %v22371_v63, %v11040_v59  ;;  %v4158_v48 = vrot.slane %v22501_v19, 5  ;;  %v11065_v9 = vrot.slane %v22504_v29, 6 }
 0x1d6   : > { %v3646_v6 = vsel %vm20305_vm8, %v24604_v49, %v3645_v18  ;;  %18324 = vmatpush3.bf16.msra.mxu0 %v19643_v51  ;;  %v22553_v18 = vld [vmem:[%s19972_s11 + $0x2e0] sm:$0xe]  ;;  %v24605_v36 = vrot.slane %v22315_v35, 10  ;;  %v3656_v54 = vsel %vm20305_vm8, %v22387_v31, %v24606_v42  ;;  %v24607_v53 = vrot.slane %v22300_v44, 6  ;;  %v22585_v31 = vld [vmem:[%s19972_s11 + $0x128] sm:$0xc] }
 0x1d7   : > { %17686 = vmatmul.mubr.bf16.gmra.mrb[20].mxu1 %v15124_v40  ;;  %v22531_v40 = vld [vmem:[%s19972_s11 + $0x2e4] sm:$0xf]  ;;  %18325 = vmatprep.subr.bf16.mxu0 %v19645_v55  ;;  %v24608_v63 = vrot.slane %v22333_v34, 10  ;;  %v11048_v35 = vsel %vm20305_vm8, %v22398_v23, %v24609_v10  ;;  %v22588_v34 = vld [vmem:[%s19972_s11 + $0x130] sm:$0x3]  ;;  %v24546_v51 = vrot.slane %v22534_v24, 6  ;;  %v15126_v23 = vcombine.low %v3646_v6, %v3649_v12 }
 0x1d8   : > { %17689 = vmatprep.mubr.bf16.mxu1 %v15125_v57  ;;  %v3653_v16 = vsel %vm20305_vm8, %v24605_v36, %v3652_v45  ;;  %v22578_v45 = vld [vmem:[%s19972_s11 + $0x2e8] sm:$0x1]  ;;  %v4162_v44 = vrot.slane %v22531_v40, 5  ;;  %v16278_v49 = vcombine.low %v11038_v13, %v11041_v58  ;;  %v22599_v42 = vld [vmem:[%s19972_s11 + $0x2fc] sm:$0xe]  ;;  %v22609_v6 = vrot.slane %v11065_v9, 4 }
 0x1d9   : > { %v11045_v59 = vsel %vm20305_vm8, %v24608_v63, %v24607_v53  ;;  %18294 = vmatmul.mubr.bf16.gmra.mrb[4].mxu0 %v16276_v0  ;;  %v22595_v57 = vld [vmem:[%s19972_s11 + $0x148] sm:$0xf]  ;;  %v15127_v22 = vcombine.low %v3653_v16, %v3656_v54  ;;  %v22602_v53 = vld [vmem:[%s19972_s11 + $0x304] sm:$0x1]  ;;  %v4169_v63 = vrot.slane %v22581_v25, 5  ;;  %v15187_v12 = vrot.slane %v22553_v18, 9 }
 0x1da   : > { %18297 = vmatprep.mubr.bf16.mxu0 %v16277_v56  ;;  %18326 = vmatpush3.bf16.msra.mxu0 %v19645_v55  ;;  %v16279_v0 = vcombine.low %v11045_v59, %v11048_v35  ;;  %v4157_v56 = vrot.slane %v4155_v37, 4  ;;  %v22614_v13 = vld [vmem:[%s19972_s11 + $0x144] sm:$0xc]  ;;  %v4165_v58 = vrot.slane %v22578_v45, 5  ;;  %v11079_v59 = vrot.slane %v22595_v57, 6  ;;  %v19651_v10 = vld [vmem:[%s24527_s1 + $0x528] sm:$0xff]  }
 0x1db   : > { %18327 = vmatprep.subr.bf16.mxu0 %v19647_v33  ;;  %v4164_v35 = vrot.slane %v4162_v44, 4  ;;  %v22627_v55 = vrot.slane %v24546_v51, 4  ;;  %v4172_v16 = vrot.slane %v22602_v53, 5  ;;  %v22632_v36 = vld [vmem:[%s19972_s11 + $0x14c] sm:$0x3]  ;;  %v3663_v51 = vsel %vm20305_vm8, %v22451_v14, %v3662_v50  ;;  %v19650_v53 = vld [vmem:[%s24527_s1 + $0x210] sm:$0xff]  }
 0x1dc   : > { %v22647_v54 = vrot.slane %v4169_v63, 4  ;;  %v11052_v1 = vsel %vm20305_vm8, %v16248_v62, %v11051_v61  ;;  %v24612_v14 = vrot.slane %v22405_v8, 5  ;;  %v4152_v38 = vsel %vm19983_vm4, %v22497_v7, %v24614_v28  ;;  %v22682_v61 = vld [vmem:[%s19972_s11 + $0x320] sm:$0x1]  ;;  %v22770_v18 = vld [vmem:[%s19972_s11 + $0x354] sm:$0xf] }
 0x1dd   : > { %v24615_v8 = vrot.slane %v22424_v60, 6  ;;  %v22697_v7 = vrot.slane %v11079_v59, 4  ;;  %v19653_v60 = vld [vmem:[%s24527_s1 + $0x530] sm:$0xff]   ;;  %v4178_v3 = vrot.slane %v4176_v26, 4  ;;  %v24619_v45 = vrot.slane %v22528_v5, 10 }
 0x1de   : > { %18328 = vmatpush3.bf16.msra.mxu0 %v19647_v33  ;;  %v24610_v33 = vrot.slane %v22375_v11, 10  ;;  %v22654_v11 = vld [vmem:[%s19972_s11 + $0x164] sm:$0xf]  ;;  %v24623_v29 = vrot.slane %v22588_v34, 6 }
 0x1df   : > { %17690 = vmatmul.mubr.bf16.gmra.mrb[24].mxu1 %v15126_v23  ;;  %18329 = vmatprep.subr.bf16.mxu0 %v19649_v39 }
 0x1e0   : > { %17693 = vmatprep.mubr.bf16.mxu1 %v15127_v22  ;;  %v3660_v23 = vsel %vm20305_vm8, %v24610_v33, %v3659_v2  ;;  %v24611_v2 = vrot.slane %v22420_v32, 6  ;;  %v24613_v33 = vrot.slane %v22438_v46, 9  ;;  %v22679_v32 = vld [vmem:[%s19972_s11 + $0x318] sm:$0xe]  ;;  %v24616_v46 = vrot.slane %v22455_v47, 10 }
 0x1e1   : > { %18298 = vmatmul.mubr.bf16.gmra.mrb[8].mxu0 %v16278_v49  ;;  %v22701_v49 = vld [vmem:[%s19972_s11 + $0x160] sm:$0xc]  ;;  %v15128_v47 = vcombine.low %v3660_v23, %v3663_v51  ;;  %v4179_v51 = vrot.slane %v22682_v61, 5  ;;  %v4166_v61 = vsel %vm19983_vm4, %v4164_v35, %v4165_v58  ;;  %v24620_v58 = vrot.slane %v22549_v21, 6 }
 0x1e2   : > { %v11055_v50 = vsel %vm20305_vm8, %v22487_v27, %v24611_v2  ;;  %v4149_v22 = vsel %vm19983_vm4, %v24613_v33, %v24612_v14  ;;  %v11059_v62 = vsel %vm20305_vm8, %v24616_v46, %v24615_v8  ;;  %v11062_v27 = vsel %vm20305_vm8, %v22508_v4, %v24617_v17  ;;  %18301 = vmatprep.mubr.bf16.mxu0 %v16279_v0  ;;  %v22708_v4 = vld [vmem:[%s19972_s11 + $0x168] sm:$0x3]  ;;  %v22712_v33 = vld [vmem:[%s19972_s11 + $0x334] sm:$0xe]  ;;  %v22715_v8 = vld [vmem:[%s19972_s11 + $0x338] sm:$0xf] }
 0x1e3   : > { %v11082_v2 = vrot.slane %v22632_v36, 6  ;;  %18330 = vmatpush3.bf16.msra.mxu0 %v19649_v39  ;;  %v11086_v14 = vrot.slane %v22654_v11, 6  ;;  %v15217_v28 = vcombine.low %v4149_v22, %v4152_v38  ;;  %v16280_v46 = vcombine.low %v11052_v1, %v11055_v50  ;;  %v22732_v38 = vld [vmem:[%s19972_s11 + $0x33c] sm:$0x1] }
 0x1e4   : > { %18331 = vmatprep.subr.bf16.mxu0 %v19651_v10  ;;  %v16281_v17 = vcombine.low %v11059_v62, %v11062_v27  ;;  %v15189_v0 = vrot.slane %v22679_v32, 9  ;;  %v24618_v39 = vrot.slane %v22480_v30, 9  ;;  %v4159_v22 = vsel %vm19983_vm4, %v4157_v56, %v4158_v48  ;;  %v22735_v32 = vld [vmem:[%s19972_s11 + $0x180] sm:$0xf]  ;;  %v19654_v30 = vld [vmem:[%s24527_s1 + $0x538] sm:$0xff]  }
 0x1e5   : > { %v16253_v1 = vrot.slane %v22701_v49, 10  ;;  %v11089_v50 = vrot.slane %v22708_v4, 6  ;;  %v22744_v19 = vrot.slane %v11086_v14, 4  ;;  %v4183_v48 = vrot.slane %v22715_v8, 5  ;;  %v22759_v62 = vld [vmem:[%s19972_s11 + $0x17c] sm:$0xc] }
 0x1e6   : > { %v4156_v23 = vsel %vm19983_vm4, %v24618_v39, %v4155_v37  ;;  %v15190_v37 = vrot.slane %v22712_v33, 9  ;;  %v4163_v56 = vsel %vm19983_vm4, %v15187_v12, %v4162_v44  ;;  %v22762_v27 = vld [vmem:[%s19972_s11 + $0x184] sm:$0x3]  ;;  %v11093_v40 = vrot.slane %v22735_v32, 6  ;;  %v19652_v36 = vld [vmem:[%s24527_s1 + $0x218] sm:$0xff]   ;;  %v19659_v32 = vld [vmem:[%s24527_s1 + $0x228] sm:$0xff]  }
 0x1e7   : > { %17694 = vmatmul.mubr.bf16.gmra.mrb[28].mxu1 %v15128_v47  ;;  %18332 = vmatpush3.bf16.msra.mxu0 %v19651_v10  ;;  %v4186_v10 = vrot.slane %v22732_v38, 5  ;;  %v22767_v47 = vld [vmem:[%s19972_s11 + $0x350] sm:$0xe]  ;;  %v15218_v44 = vcombine.low %v4156_v23, %v4159_v22  ;;  %v11066_v12 = vsel %vm20305_vm8, %v24619_v45, %v11065_v9  ;;  %v11069_v35 = vsel %vm20305_vm8, %v22609_v6, %v24620_v58  ;;  %v22798_v9 = vld [vmem:[%s19972_s11 + $0x19c] sm:$0xf]  ;;  %v19656_v38 = vld [vmem:[%s24527_s1 + $0x220] sm:$0xff]  }
 0x1e8   : > { %17713 = vmatprep.mubr.bf16.mxu1 %v15217_v28  ;;  %18333 = vmatprep.subr.bf16.mxu0 %v19653_v60  ;;  %v22784_v28 = vld [vmem:[%s19972_s11 + $0x358] sm:$0x1]  ;;  %v15219_v39 = vcombine.low %v4163_v56, %v4166_v61  ;;  %v24622_v23 = vrot.slane %v22585_v31, 10  ;;  %v11076_v21 = vsel %vm20305_vm8, %v22627_v55, %v24623_v29  ;;  %v4185_v31 = vrot.slane %v4183_v48, 4  ;;  %v22811_v55 = vld [vmem:[%s24527_s1 + $0x540] sm:$0xff]  }
 0x1e9   : > { %18302 = vmatmul.mubr.bf16.gmra.mrb[12].mxu0 %v16280_v46  ;;  %v24621_v46 = vrot.slane %v22534_v24, 6  ;;  %v19648_v24 = vld [vmem:[%s24527_s1 + $0x208] sm:$0xff]   ;;  %v16254_v6 = vrot.slane %v22759_v62, 10  ;;  %v11096_v34 = vrot.slane %v22762_v27, 6  ;;  %v22815_v22 = vrot.slane %v11093_v40, 4 }
 0x1ea   : > { %18305 = vmatprep.mubr.bf16.mxu0 %v16281_v17  ;;  %v15191_v17 = vrot.slane %v22767_v47, 9  ;;  %v4190_v56 = vrot.slane %v22770_v18, 5  ;;  %v24624_v61 = vrot.slane %v22599_v42, 9  ;;  %v4193_v58 = vrot.slane %v22784_v28, 5  ;;  %v22844_v18 = vld [vmem:[%s19972_s11 + $0x370] sm:$0xf] }
 0x1eb   : > { %v11073_v5 = vsel %vm20305_vm8, %v24622_v23, %v24621_v46  ;;  %18334 = vmatpush3.bf16.msra.mxu0 %v19653_v60  ;;  %v16282_v60 = vcombine.low %v11066_v12, %v11069_v35  ;;  %v4173_v12 = vsel %vm19983_vm4, %v22647_v54, %v4172_v16  ;;  %v22831_v35 = vld [vmem:[%s19972_s11 + $0x198] sm:$0xc]  ;;  %v22834_v46 = vld [vmem:[%s19972_s11 + $0x1a0] sm:$0x3]  ;;  %v11100_v25 = vrot.slane %v22798_v9, 6 }
 0x1ec   : > { %18335 = vmatprep.subr.bf16.mxu0 %v19654_v30  ;;  %v4170_v45 = vsel %vm19983_vm4, %v24624_v61, %v4169_v63  ;;  %v16283_v42 = vcombine.low %v11073_v5, %v11076_v21  ;;  %v22841_v63 = vld [vmem:[%s19972_s11 + $0x36c] sm:$0xe]  ;;  %v4177_v16 = vsel %vm19983_vm4, %v15189_v0, %v4176_v26  ;;  %v4180_v54 = vsel %vm19983_vm4, %v4178_v3, %v4179_v51  ;;  %v22897_v49 = vld [vmem:[%s19972_s11 + $0x1bc] sm:$0x3] }
 0x1ed   : > { %v15220_v28 = vcombine.low %v4170_v45, %v4173_v12  ;;  %v4192_v41 = vrot.slane %v4190_v56, 4  ;;  %v16255_v26 = vrot.slane %v22831_v35, 10  ;;  %v11102_v0 = vrot.slane %v11100_v25, 4  ;;  %v15162_v5 = vld [vmem:[%s19972_s11 + $0x38c] sm:$0xf] }
 0x1ee   : > { %v11103_v57 = vrot.slane %v22834_v46, 6  ;;  %v15221_v51 = vcombine.low %v4177_v16, %v4180_v54  ;;  %v11087_v3 = vsel %vm20305_vm8, %v16253_v1, %v11086_v14  ;;  %v11090_v23 = vsel %vm20305_vm8, %v22744_v19, %v11089_v50  ;;  %v15161_v14 = vld [vmem:[%s19972_s11 + $0x388] sm:$0xe]  ;;  %v15163_v1 = vld [vmem:[%s19972_s11 + $0x390] sm:$0x1] }
 0x1ef   : > { %17714 = vmatmul.mubr.bf16.vlgmr.msra.gmra.mrb[0].mxu1 %v15218_v44  ;;  %18336 = vmatpush3.bf16.msra.mxu0 %v19654_v30  ;;  %v22854_v44 = vld [vmem:[%s19972_s11 + $0x374] sm:$0x1]  ;;  %v24625_v30 = vrot.slane %v22614_v13, 10  ;;  %v22871_v13 = vld [vmem:[%s19972_s11 + $0x1b4] sm:$0xc]  ;;  %v4197_v11 = vrot.slane %v22844_v18, 5  ;;  %v4187_v61 = vsel %vm19983_vm4, %v4185_v31, %v4186_v10  ;;  %v11094_v47 = vsel %vm20305_vm8, %v16254_v6, %v11093_v40 }
 0x1f0   : > { %17746 = vmatpush3.bf16.msra.mxu1 %v22310_v43  ;;  %17717 = vmatprep.mubr.bf16.mxu1 %v15219_v39  ;;  %v22863_v39 = vld [vmem:[%s19972_s11 + $0x1b8] sm:$0xf]  ;;  %v22903_v50 = vld [vmem:[%s19972_s11 + $0x3a8] sm:$0xf]  ;;  %v16256_v29 = vrot.slane %v22871_v13, 10  ;;  %v4204_v21 = vrot.slane %v15162_v5, 5  ;;  %v11104_v40 = vsel %vm20305_vm8, %v11102_v0, %v11103_v57 }
 0x1f1   : > { %17747 = vmatprep.subr.bf16.mxu1 %v19648_v24  ;;  %v11080_v43 = vsel %vm20305_vm8, %v24625_v30, %v11079_v59  ;;  %18369 = vmatprep.subr.bf16.mxu0 %v22811_v55  ;;  %v11083_v59 = vsel %vm20305_vm8, %v22697_v7, %v11082_v2  ;;  %v15192_v7 = vrot.slane %v22841_v63, 9  ;;  %v4200_v2 = vrot.slane %v22854_v44, 5  ;;  %v22917_v45 = vld [vmem:[%s19972_s11 + $0x3a4] sm:$0xe]  ;;  %v15166_v10 = vld [vmem:[%s19972_s11 + $0x3ac] sm:$0x1] }
 0x1f2   : > { %18306 = vmatmul.mubr.bf16.gmra.mrb[16].mxu0 %v16282_v60  ;;  %v11107_v4 = vrot.slane %v22863_v39, 6  ;;  %v16284_v19 = vcombine.low %v11080_v43, %v11083_v59  ;;  %v4184_v60 = vsel %vm19983_vm4, %v15190_v37, %v4183_v48  ;;  %v4199_v12 = vrot.slane %v4197_v11, 4  ;;  %v15167_v63 = vld [vmem:[%s19972_s11 + $0x3c0] sm:$0xe]  ;;  %v19663_v16 = vld [vmem:[%s24527_s1 + $0x230] sm:$0xff]   ;;  %v19667_v59 = vld [vmem:[%s24527_s1 + $0x238] sm:$0xff]  }
 0x1f3   : > { %18309 = vmatprep.mubr.bf16.mxu0 %v16283_v42  ;;  %v11110_v8 = vrot.slane %v22897_v49, 6  ;;  %v4211_v33 = vrot.slane %v22903_v50, 5  ;;  %v4191_v37 = vsel %vm19983_vm4, %v15191_v17, %v4190_v56  ;;  %v4194_v48 = vsel %vm19983_vm4, %v4192_v41, %v4193_v58  ;;  %v15168_v58 = vld [vmem:[%s19972_s11 + $0x3c4] sm:$0xf]  ;;  %v15170_v41 = vld [vmem:[%s19972_s11 + $0x3dc] sm:$0xe] }
 0x1f4   : > { %17748 = vmatpush3.bf16.msra.mxu1 %v19648_v24  ;;  %v16285_v24 = vcombine.low %v11087_v3, %v11090_v23  ;;  %v11109_v35 = vrot.slane %v11107_v4, 4  ;;  %v15193_v31 = vrot.slane %v15161_v14, 9  ;;  %v4206_v46 = vrot.slane %v4204_v21, 4  ;;  %v15172_v3 = vld [vmem:[%s19972_s11 + $0x3e4] sm:$0x1]  ;;  %v19655_v23 = vld [vmem:[%s19972_s11 + $0x1f8] sm:$0xff]  }
 0x1f5   : > { %17749 = vmatprep.subr.bf16.mxu1 %v19650_v53  ;;  %v4207_v42 = vrot.slane %v15163_v1, 5  ;;  %v15222_v18 = vcombine.low %v4184_v60, %v4187_v61  ;;  %v11097_v17 = vsel %vm20305_vm8, %v22815_v22, %v11096_v34  ;;  %v11101_v56 = vsel %vm20305_vm8, %v16255_v26, %v11100_v25  ;;  %v15171_v26 = vld [vmem:[%s19972_s11 + $0x3e0] sm:$0xf]  ;;  %v15174_v39 = vld [vmem:[%s19972_s11 + $0x3fc] sm:$0xf] }
 0x1f6   : > { %v15223_v62 = vcombine.low %v4191_v37, %v4194_v48  ;;  %v4213_v27 = vrot.slane %v4211_v33, 4  ;;  %v4214_v6 = vrot.slane %v15166_v10, 5  ;;  %v16286_v34 = vcombine.low %v11094_v47, %v11097_v17  ;;  %v22985_v49 = vld [vmem:[%s24527_s1 + $0x240] sm:$0xff]   ;;  %v15173_v1 = vld [vmem:[%s19972_s11 + $0x3f8] sm:$0xe] }
 0x1f7   : > { %17718 = vmatmul.mubr.bf16.gmra.mrb[4].mxu1 %v15220_v28  ;;  %v15195_v9 = vrot.slane %v15167_v63, 9  ;;  %v4218_v22 = vrot.slane %v15168_v58, 5  ;;  %v16287_v25 = vcombine.low %v11101_v56, %v11104_v40  ;;  %v4198_v54 = vsel %vm19983_vm4, %v15192_v7, %v4197_v11  ;;  %v15169_v28 = vld [vmem:[%s19972_s11 + $0x3c8] sm:$0x1]  ;;  %v15180_v48 = vld [vmem:[%s19972_s11 + $0x434] sm:$0xf] }
 0x1f8   : > { %17721 = vmatprep.mubr.bf16.mxu1 %v15221_v51  ;;  %17750 = vmatpush3.bf16.msra.mxu1 %v19650_v53  ;;  %v15194_v53 = vrot.slane %v22917_v45, 9  ;;  %v4201_v44 = vsel %vm19983_vm4, %v4199_v12, %v4200_v2  ;;  %v4205_v30 = vsel %vm19983_vm4, %v15193_v31, %v4204_v21  ;;  %v4208_v43 = vsel %vm19983_vm4, %v4206_v46, %v4207_v42  ;;  %v19657_v12 = vld [vmem:[%s19972_s11 + $0x214] sm:$0xff]   ;;  %v15178_v31 = vld [vmem:[%s19972_s11 + $0x41c] sm:$0x1]  ;;  %v19665_v42 = vld [vmem:[%s24527_s1 + $0x548] sm:$0xff]  }
 0x1f9   : > { %17751 = vmatprep.subr.bf16.mxu1 %v19652_v36  ;;  %v15224_v0 = vcombine.low %v4198_v54, %v4201_v44  ;;  %v11108_v57 = vsel %vm20305_vm8, %v16256_v29, %v11107_v4  ;;  %v11111_v13 = vsel %vm20305_vm8, %v11109_v35, %v11110_v8  ;;  %v15225_v51 = vcombine.low %v4205_v30, %v4208_v43  ;;  %v15177_v8 = vld [vmem:[%s19972_s11 + $0x418] sm:$0xf]  ;;  %v15176_v10 = vld [vmem:[%s19972_s11 + $0x414] sm:$0xe]  ;;  %v19660_v54 = vld [vmem:[%s19972_s11 + $0x24c] sm:$0xff]  }
 0x1fa   : > { %18310 = vmatmul.mubr.bf16.gmra.mrb[20].mxu0 %v16284_v19  ;;  %v4221_v5 = vrot.slane %v15169_v28, 5  ;;  %v16288_v7 = vcombine.low %v11108_v57, %v11111_v13  ;;  %v15196_v11 = vrot.slane %v15170_v41, 9  ;;  %v4225_v2 = vrot.slane %v15171_v26, 5  ;;  %v15181_v58 = vld [vmem:[%s19972_s11 + $0x438] sm:$0x1]  ;;  %v19662_v44 = vld [vmem:[%s19972_s11 + $0x268] sm:$0xff]  }
 0x1fb   : > { %18313 = vmatprep.mubr.bf16.mxu0 %v16285_v24  ;;  %v4212_v4 = vsel %vm19983_vm4, %v15194_v53, %v4211_v33  ;;  %v4215_v14 = vsel %vm19983_vm4, %v4213_v27, %v4214_v6  ;;  %v4219_v50 = vsel %vm19983_vm4, %v15195_v9, %v4218_v22  ;;  %v4228_v29 = vrot.slane %v15172_v3, 5  ;;  %v15175_v24 = vld [vmem:[%s19972_s11 + $0x400] sm:$0x1]  ;;  %v19658_v33 = vld [vmem:[%s19972_s11 + $0x230] sm:$0xff]   ;;  %v15182_v30 = vld [vmem:[%s19972_s11 + $0x44c] sm:$0xe] }
 0x1fc   : > { %17752 = vmatpush3.bf16.msra.mxu1 %v19652_v36  ;;  %v4220_v36 = vrot.slane %v4218_v22, 4  ;;  %v4232_v21 = vrot.slane %v15174_v39, 5  ;;  %v15226_v60 = vcombine.low %v4212_v4, %v4215_v14  ;;  %v4227_v61 = vrot.slane %v4225_v2, 4  ;;  %v15184_v43 = vld [vmem:[%s19972_s11 + $0x454] sm:$0x1]  ;;  %v19675_v26 = vld [vmem:[%s24527_s1 + $0x558] sm:$0xff]  }
 0x1fd   : > { %17753 = vmatprep.subr.bf16.mxu1 %v19656_v38  ;;  %v15197_v45 = vrot.slane %v15173_v1, 9  ;;  %v4235_v37 = vrot.slane %v15175_v24, 5  ;;  %v4239_v46 = vrot.slane %v15177_v8, 5  ;;  %v4226_v53 = vsel %vm19983_vm4, %v15196_v11, %v4225_v2  ;;  %v19687_v2 = vld [vmem:[%s24527_s1 + $0x568] sm:$0xff]   ;;  %v19693_v1 = vld [vmem:[%s24527_s1 + $0x570] sm:$0xff]   ;;  %v19678_v8 = vld [vmem:[%s19972_s11 + $0x300] sm:$0xff]  }
 0x1fe   : > { %v4222_v19 = vsel %vm19983_vm4, %v4220_v36, %v4221_v5  ;;  %v4229_v63 = vsel %vm19983_vm4, %v4227_v61, %v4228_v29  ;;  %v4246_v56 = vrot.slane %v15180_v48, 5  ;;  %v15198_v40 = vrot.slane %v15176_v10, 9  ;;  %v19681_v36 = vld [vmem:[%s24527_s1 + $0x560] sm:$0xff]   ;;  %v19670_v14 = vld [vmem:[%s19972_s11 + $0x2ac] sm:$0xff]   ;;  %v19694_v29 = vld [vmem:[%s24527_s1 + $0x578] sm:$0xff]  }
 0x1ff   : > { %17722 = vmatmul.mubr.bf16.gmra.mrb[8].mxu1 %v15222_v18  ;;  %v15227_v35 = vcombine.low %v4219_v50, %v4222_v19  ;;  %v15179_v18 = vld [vmem:[%s19972_s11 + $0x430] sm:$0xe]  ;;  %v4233_v47 = vsel %vm19983_vm4, %v15197_v45, %v4232_v21  ;;  %v4241_v27 = vrot.slane %v4239_v46, 4  ;;  %v4242_v6 = vrot.slane %v15178_v31, 5  ;;  %v19664_v5 = vld [vmem:[%s19972_s11 + $0x284] sm:$0xff]   ;;  %v19668_v50 = vld [vmem:[%s19972_s11 + $0x2bc] sm:$0xff]  }
 0x200   : > { %17725 = vmatprep.mubr.bf16.mxu1 %v15223_v62  ;;  %17754 = vmatpush3.bf16.msra.mxu1 %v19656_v38  ;;  %v4234_v38 = vrot.slane %v4232_v21, 4  ;;  %v15199_v9 = vrot.slane %v15179_v18, 9  ;;  %v4248_v22 = vrot.slane %v4246_v56, 4  ;;  %v19671_v19 = vld [vmem:[%s19972_s11 + $0x2d8] sm:$0xff]   ;;  %v19672_v21 = vld [vmem:[%s19972_s11 + $0x2c8] sm:$0xff]   ;;  %v23066_v61 = vld [vmem:[%s24527_s1 + $0x580] sm:$0xff]  }
 0x201   : > { %17755 = vmatprep.subr.bf16.mxu1 %v19659_v32  ;;  %v4243_v28 = vsel %vm19983_vm4, %v4241_v27, %v4242_v6  ;;  %v19676_v24 = vld [vmem:[%s19972_s11 + $0x2e4] sm:$0xff]   ;;  %v19674_v45 = vld [vmem:[%s19972_s11 + $0x2f4] sm:$0xff]   ;;  %v16370_v48 = vld [vmem:[%s19972_s11 + $0x20c] sm:$0xf] }
 0x202   : > { %18314 = vmatmul.mubr.bf16.gmra.mrb[24].mxu0 %v16286_v34  ;;  %v4236_v17 = vsel %vm19983_vm4, %v4234_v38, %v4235_v37  ;;  %v19669_v34 = vld [vmem:[%s24527_s1 + $0x550] sm:$0xff]   ;;  %v19683_v37 = vld [vmem:[%s19972_s11 + $0x348] sm:$0xff]   ;;  %v19697_v10 = vld [vmem:[%s24527_s1 + $0x260] sm:$0xff]  }
 0x203   : > { %18317 = vmatprep.mubr.bf16.mxu0 %v16287_v25  ;;  %v15229_v62 = vcombine.low %v4233_v47, %v4236_v17  ;;  %v4249_v25 = vrot.slane %v15181_v58, 5  ;;  %v19680_v38 = vld [vmem:[%s19972_s11 + $0x32c] sm:$0xff]   ;;  %v16369_v31 = vld [vmem:[%s19972_s11 + $0x208] sm:$0xc]  ;;  %v19689_v17 = vld [vmem:[%s19972_s11 + $0x380] sm:$0xff]  }
 0x204   : > { %17756 = vmatpush3.bf16.msra.mxu1 %v19659_v32  ;;  %v15228_v32 = vcombine.low %v4226_v53, %v4229_v63  ;;  %v12046_v53 = vrot.slane %v16370_v48, 6  ;;  %v19688_v63 = vld [vmem:[%s19972_s11 + $0x354] sm:$0xff]   ;;  %v23091_v18 = vld [vmem:[%s19972_s11 + $0x228] sm:$0xf]  ;;  %v23172_v48 = vld [vmem:[%s19972_s11 + $0x2cc] sm:$0xc] }
 0x205   : > { %17757 = vmatprep.subr.bf16.mxu1 %v19663_v16  ;;  %v4250_v57 = vsel %vm19983_vm4, %v4248_v22, %v4249_v25  ;;  %v19686_v47 = vld [vmem:[%s19972_s11 + $0x364] sm:$0xff]   ;;  %v12053_v6 = vrot.slane %v23091_v18, 6  ;;  %v19690_v22 = vld [vmem:[%s19972_s11 + $0x370] sm:$0xff]   ;;  %v23185_v18 = vld [vmem:[%s19972_s11 + $0xac] sm:$0xf] }
 0x206   : > { %v12048_v27 = vrot.slane %v12046_v53, 4 }
 0x207   : > { %17726 = vmatmul.mubr.bf16.gmra.mrb[12].mxu1 %v15224_v0  ;;  %v4247_v0 = vsel %vm19983_vm4, %v15199_v9, %v4246_v56  ;;  %v16417_v56 = vrot.slane %v16369_v31, 10  ;;  %v23103_v9 = vld [vmem:[%s19972_s11 + $0x260] sm:$0xf] }
 0x208   : > { %17729 = vmatprep.mubr.bf16.mxu1 %v15225_v51  ;;  %17758 = vmatpush3.bf16.msra.mxu1 %v19663_v16  ;;  %v15183_v16 = vld [vmem:[%s19972_s11 + $0x450] sm:$0xf]  ;;  %v4256_v51 = vrot.slane %v15184_v43, 5  ;;  %v15231_v3 = vcombine.low %v4247_v0, %v4250_v57  ;;  %v23117_v0 = vld [vmem:[%s19972_s11 + $0x25c] sm:$0xc] }
 0x209   : > { %17759 = vmatprep.subr.bf16.mxu1 %v19667_v59  ;;  %v4253_v41 = vrot.slane %v15183_v16, 5  ;;  %v19704_v16 = vld [vmem:[%s24527_s1 + $0x270] sm:$0xff]   ;;  %v12047_v43 = vsel %vm20305_vm8, %v16417_v56, %v12046_v53  ;;  %v23120_v57 = vld [vmem:[%s19972_s11 + $0x264] sm:$0x3] }
 0x20a   : > { %18318 = vmatmul.mubr.bf16.gmra.mrb[28].mxu0 %v16288_v7  ;;  %v19666_v7 = vld [vmem:[%s19972_s11 + $0x2a0] sm:$0xff]  }
 0x20b   : > { %18337 = vmatprep.mubr.bf16.mxu0 %v19655_v23  ;;  %v4255_v23 = vrot.slane %v4253_v41, 4 }
 0x20c   : > { %17760 = vmatpush3.bf16.msra.mxu1 %v19667_v59  ;;  %v15200_v59 = vrot.slane %v15182_v30, 9 }
 0x20d   : > { %17793 = vmatprep.subr.bf16.mxu1 %v22985_v49  ;;  %v4257_v11 = vsel %vm19983_vm4, %v4255_v23, %v4256_v51  ;;  %v23125_v51 = vld [vmem:[%s19972_s11 + $0x278] sm:$0xc] }
 0x20e   : > { %v4254_v39 = vsel %vm19983_vm4, %v15200_v59, %v4253_v41  ;;  %v19692_v59 = vld [vmem:[%s19972_s11 + $0x39c] sm:$0xff]  }
 0x20f   : > { %17730 = vmatmul.mubr.bf16.gmra.mrb[16].mxu1 %v15226_v60  ;;  %v15232_v4 = vcombine.low %v4254_v39, %v4257_v11  ;;  %v19679_v60 = vld [vmem:[%s24527_s1 + $0x248] sm:$0xff]  }
 0x210   : > { %17733 = vmatprep.mubr.bf16.mxu1 %v15227_v35  ;;  %v19685_v35 = vld [vmem:[%s24527_s1 + $0x250] sm:$0xff]  }
 0x212   : > { %18338 = vmatmul.mubr.bf16.vlgmr.msra.gmra.mrb[0].mxu0 %v19657_v12  ;;  %v19677_v12 = vld [vmem:[%s19972_s11 + $0x310] sm:$0xff]  }
 0x213   : > { %18341 = vmatprep.mubr.bf16.mxu0 %v19658_v33  ;;  %18370 = vmatpush3.bf16.msra.mxu0 %v22811_v55  ;;  %v4240_v55 = vsel %vm19983_vm4, %v15198_v40, %v4239_v46  ;;  %v19682_v33 = vld [vmem:[%s19972_s11 + $0x31c] sm:$0xff]   ;;  %v16371_v46 = vld [vmem:[%s19972_s11 + $0x210] sm:$0x3]  ;;  %v16374_v40 = vld [vmem:[%s19972_s11 + $0x22c] sm:$0x3] }
 0x214   : > { %18371 = vmatprep.subr.bf16.mxu0 %v19665_v42  ;;  %v15230_v13 = vcombine.low %v4240_v55, %v4243_v28  ;;  %v12049_v58 = vrot.slane %v16371_v46, 6  ;;  %v16375_v55 = vld [vmem:[%s19972_s11 + $0x240] sm:$0xc]  ;;  %v16377_v28 = vld [vmem:[%s19972_s11 + $0x248] sm:$0x3] }
 0x215   : > { %v16419_v23 = vrot.slane %v16375_v55, 10  ;;  %v12063_v11 = vrot.slane %v16377_v28, 6  ;;  %v23214_v55 = vld [vmem:[%s19972_s11 + $0x2e8] sm:$0xc]  ;;  %v23217_v28 = vld [vmem:[%s19972_s11 + $0x2ec] sm:$0xf] }
 0x216   : > { %v12050_v41 = vsel %vm20305_vm8, %v12048_v27, %v12049_v58 }
 0x217   : > { %17734 = vmatmul.mubr.bf16.gmra.mrb[20].mxu1 %v15228_v32  ;;  %18372 = vmatpush3.bf16.msra.mxu0 %v19665_v42  ;;  %v19684_v42 = vld [vmem:[%s19972_s11 + $0x338] sm:$0xff]   ;;  %v19700_v32 = vld [vmem:[%s24527_s1 + $0x268] sm:$0xff]  }
 0x218   : > { %17737 = vmatprep.mubr.bf16.mxu1 %v15229_v62  ;;  %18373 = vmatprep.subr.bf16.mxu0 %v19669_v34  ;;  %v16372_v62 = vld [vmem:[%s19972_s11 + $0x224] sm:$0xc] }
 0x219   : > { %v16418_v25 = vrot.slane %v16372_v62, 10 }
 0x21a   : > { %18342 = vmatmul.mubr.bf16.gmra.mrb[4].mxu0 %v19660_v54  ;;  %v19695_v54 = vld [vmem:[%s19972_s11 + $0x38c] sm:$0xff]  }
 0x21b   : > { %18345 = vmatprep.mubr.bf16.mxu0 %v19662_v44  ;;  %18374 = vmatpush3.bf16.msra.mxu0 %v19669_v34  ;;  %v16376_v34 = vld [vmem:[%s19972_s11 + $0x244] sm:$0xf]  ;;  %v12056_v44 = vrot.slane %v16374_v40, 6  ;;  %v16424_v40 = vrot.slane %v23172_v48, 10 }
 0x21c   : > { %18375 = vmatprep.subr.bf16.mxu0 %v19675_v26  ;;  %v12060_v30 = vrot.slane %v16376_v34, 6  ;;  %v19705_v34 = vld [vmem:[%s24527_s1 + $0x588] sm:$0xff]  }
 0x21e   : > { %v12062_v39 = vrot.slane %v12060_v30, 4  ;;  %v12061_v31 = vsel %vm20305_vm8, %v16419_v23, %v12060_v30  ;;  %v23220_v30 = vld [vmem:[%s19972_s11 + $0xc8] sm:$0xf] }
 0x21f   : > { %17738 = vmatmul.mubr.bf16.gmra.mrb[24].mxu1 %v15230_v13  ;;  %18376 = vmatpush3.bf16.msra.mxu0 %v19675_v26  ;;  %v12055_v26 = vrot.slane %v12053_v6, 4  ;;  %v12067_v13 = vrot.slane %v23103_v9, 6  ;;  %v23246_v9 = vld [vmem:[%s19972_s11 + $0xc4] sm:$0x8] }
 0x220   : > { %17741 = vmatprep.mubr.bf16.mxu1 %v15231_v3  ;;  %18377 = vmatprep.subr.bf16.mxu0 %v19681_v36  ;;  %v23128_v3 = vld [vmem:[%s19972_s11 + $0x27c] sm:$0xf]  ;;  %v12064_v46 = vsel %vm20305_vm8, %v12062_v39, %v12063_v11  ;;  %v16425_v39 = vrot.slane %v23214_v55, 10  ;;  %v12102_v11 = vrot.slane %v23217_v28, 6  ;;  %v19717_v55 = vld [vmem:[%s24527_s1 + $0x5b0] sm:$0xff]  }
 0x222   : > { %18346 = vmatmul.mubr.bf16.gmra.mrb[8].mxu0 %v19664_v5  ;;  %v19708_v5 = vld [vmem:[%s24527_s1 + $0x278] sm:$0xff]  }
 0x223   : > { %18349 = vmatprep.mubr.bf16.mxu0 %v19666_v7  ;;  %18378 = vmatpush3.bf16.msra.mxu0 %v19681_v36  ;;  %v23131_v36 = vld [vmem:[%s19972_s11 + $0x298] sm:$0xf]  ;;  %v16449_v7 = vcombine.low %v12047_v43, %v12050_v41  ;;  %v19699_v43 = vld [vmem:[%s19972_s11 + $0x3e0] sm:$0xff]  }
 0x224   : > { %18379 = vmatprep.subr.bf16.mxu0 %v19687_v2 }
 0x227   : > { %17742 = vmatmul.mubr.bf16.gmra.mrb[28].mxu1 %v15232_v4  ;;  %18380 = vmatpush3.bf16.msra.mxu0 %v19687_v2  ;;  %v23137_v2 = vld [vmem:[%s19972_s11 + $0x2b4] sm:$0xf]  ;;  %v16420_v4 = vrot.slane %v23117_v0, 10  ;;  %v23229_v0 = vld [vmem:[%s19972_s11 + $0x2f0] sm:$0x3] }
 0x228   : > { %17761 = vmatprep.mubr.bf16.mxu1 %v19670_v14  ;;  %18381 = vmatprep.subr.bf16.mxu0 %v19693_v1  ;;  %v12069_v14 = vrot.slane %v12067_v13, 4 }
 0x22a   : > { %18350 = vmatmul.mubr.bf16.gmra.mrb[12].mxu0 %v19668_v50  ;;  %v12074_v50 = vrot.slane %v23128_v3, 6 }
 0x22b   : > { %18353 = vmatprep.mubr.bf16.mxu0 %v19671_v19  ;;  %18382 = vmatpush3.bf16.msra.mxu0 %v19693_v1  ;;  %v12070_v1 = vrot.slane %v23120_v57, 6  ;;  %v16383_v19 = vld [vmem:[%s19972_s11 + $0x280] sm:$0x3]  ;;  %v12068_v57 = vsel %vm20305_vm8, %v16420_v4, %v12067_v13  ;;  %v5206_v4 = vrot.slane %v23220_v30, 7 }
 0x22c   : > { %18383 = vmatprep.subr.bf16.mxu0 %v19694_v29  ;;  %v12077_v53 = vrot.slane %v16383_v19, 6  ;;  %v23263_v19 = vld [vmem:[%s19972_s11 + $0x304] sm:$0xc] }
 0x22f   : > { %17762 = vmatmul.mubr.bf16.vlgmr.msra.gmra.mrb[0].mxu1 %v19672_v21  ;;  %18384 = vmatpush3.bf16.msra.mxu0 %v19694_v29  ;;  %v16421_v29 = vrot.slane %v23125_v51, 10  ;;  %v23147_v21 = vld [vmem:[%s19972_s11 + $0x294] sm:$0xc]  ;;  %v19702_v51 = vld [vmem:[%s19972_s11 + $0x3fc] sm:$0xff]  }
 0x230   : > { %17794 = vmatpush3.bf16.msra.mxu1 %v22985_v49  ;;  %17765 = vmatprep.mubr.bf16.mxu1 %v19676_v24  ;;  %v19691_v49 = vld [vmem:[%s24527_s1 + $0x258] sm:$0xff]   ;;  %v12081_v24 = vrot.slane %v23131_v36, 6 }
 0x231   : > { %17795 = vmatprep.subr.bf16.mxu1 %v19679_v60  ;;  %18417 = vmatprep.subr.bf16.mxu0 %v23066_v61  ;;  %v12075_v3 = vsel %vm20305_vm8, %v16421_v29, %v12074_v50 }
 0x232   : > { %18354 = vmatmul.mubr.bf16.gmra.mrb[16].mxu0 %v19674_v45  ;;  %v23152_v45 = vld [vmem:[%s19972_s11 + $0x29c] sm:$0x3] }
 0x233   : > { %18357 = vmatprep.mubr.bf16.mxu0 %v19677_v12  ;;  %v23155_v12 = vld [vmem:[%s19972_s11 + $0x2b0] sm:$0xc]  ;;  %v12084_v56 = vrot.slane %v23152_v45, 6 }
 0x234   : > { %17796 = vmatpush3.bf16.msra.mxu1 %v19679_v60  ;;  %v19696_v60 = vld [vmem:[%s19972_s11 + $0x3a8] sm:$0xff]   ;;  %v16423_v58 = vrot.slane %v23155_v12, 10 }
 0x235   : > { %17797 = vmatprep.subr.bf16.mxu1 %v19685_v35 }
 0x237   : > { %17766 = vmatmul.mubr.bf16.gmra.mrb[4].mxu1 %v19678_v8  ;;  %v23161_v8 = vld [vmem:[%s24527_s1 + $0x280] sm:$0xff]  }
 0x238   : > { %17769 = vmatprep.mubr.bf16.mxu1 %v19682_v33  ;;  %17798 = vmatpush3.bf16.msra.mxu1 %v19685_v35  ;;  %v12088_v35 = vrot.slane %v23137_v2, 6  ;;  %v12054_v33 = vsel %vm20305_vm8, %v16418_v25, %v12053_v6  ;;  %v23207_v25 = vld [vmem:[%s19972_s11 + $0xa8] sm:$0x8] }
 0x239   : > { %17799 = vmatprep.subr.bf16.mxu1 %v19691_v49 }
 0x23a   : > { %18358 = vmatmul.mubr.bf16.gmra.mrb[20].mxu0 %v19680_v38  ;;  %v19698_v38 = vld [vmem:[%s19972_s11 + $0x3c4] sm:$0xff]  }
 0x23b   : > { %18361 = vmatprep.mubr.bf16.mxu0 %v19683_v37  ;;  %v23169_v37 = vld [vmem:[%s19972_s11 + $0x2b8] sm:$0x3] }
 0x23c   : > { %17800 = vmatpush3.bf16.msra.mxu1 %v19691_v49  ;;  %v12057_v49 = vsel %vm20305_vm8, %v12055_v26, %v12056_v44  ;;  %v12091_v62 = vrot.slane %v23169_v37, 6  ;;  %v16451_v44 = vcombine.low %v12061_v31, %v12064_v46  ;;  %v15361_v26 = vrot.slane %v23207_v25, 11  ;;  %v19713_v46 = vld [vmem:[%s24527_s1 + $0x5a0] sm:$0xff]   ;;  %v23349_v37 = vld [vmem:[%s19972_s11 + $0x33c] sm:$0xc] }
 0x23d   : > { %17801 = vmatprep.subr.bf16.mxu1 %v19697_v10  ;;  %v16450_v6 = vcombine.low %v12054_v33, %v12057_v49  ;;  %v23268_v49 = vld [vmem:[%s19972_s11 + $0x30c] sm:$0x3]  ;;  %v23276_v31 = vrot.slane %v5206_v4, 4 }
 0x23f   : > { %17770 = vmatmul.mubr.bf16.gmra.mrb[8].mxu1 %v19684_v42  ;;  %v12076_v42 = vrot.slane %v12074_v50, 4  ;;  %v23260_v50 = vld [vmem:[%s19972_s11 + $0xcc] sm:$0x7] }
 0x240   : > { %17773 = vmatprep.mubr.bf16.mxu1 %v19688_v63  ;;  %17802 = vmatpush3.bf16.msra.mxu1 %v19697_v10  ;;  %v23175_v10 = vld [vmem:[%s19972_s11 + $0x2d0] sm:$0xf]  ;;  %v23182_v63 = vld [vmem:[%s19972_s11 + $0x2d4] sm:$0x3] }
 0x241   : > { %17803 = vmatprep.subr.bf16.mxu1 %v19700_v32  ;;  %v12095_v27 = vrot.slane %v23175_v10, 6  ;;  %v12078_v23 = vsel %vm20305_vm8, %v12076_v42, %v12077_v53  ;;  %v19711_v53 = vld [vmem:[%s24527_s1 + $0x598] sm:$0xff]   ;;  %v23306_v42 = vld [vmem:[%s19972_s11 + $0x100] sm:$0xf] }
 0x242   : > { %18362 = vmatmul.mubr.bf16.gmra.mrb[24].mxu0 %v19686_v47  ;;  %v16422_v47 = vrot.slane %v23147_v21, 10  ;;  %v16453_v33 = vcombine.low %v12075_v3, %v12078_v23  ;;  %v19706_v3 = vld [vmem:[%s19972_s11 + $0x434] sm:$0xff]   ;;  %v23300_v23 = vld [vmem:[%s19972_s11 + $0xe8] sm:$0x7]  ;;  %v12089_v21 = vsel %vm20305_vm8, %v16423_v58, %v12088_v35  ;;  %v23398_v10 = vld [vmem:[%s19972_s11 + $0x11c] sm:$0xf] }
 0x243   : > { %18365 = vmatprep.mubr.bf16.mxu0 %v19689_v17  ;;  %v23190_v17 = vrot.slane %v12081_v24, 4  ;;  %v23225_v41 = vrot.slane %v12095_v27, 4  ;;  %v5216_v2 = vrot.slane %v23300_v23, 7 }
 0x244   : > { %17804 = vmatpush3.bf16.msra.mxu1 %v19700_v32  ;;  %v23196_v32 = vrot.slane %v12088_v35, 4  ;;  %v23346_v35 = vld [vmem:[%s19972_s11 + $0x104] sm:$0x7] }
 0x245   : > { %17805 = vmatprep.subr.bf16.mxu1 %v19704_v16  ;;  %v5223_v23 = vrot.slane %v23346_v35, 7 }
 0x247   : > { %17774 = vmatmul.mubr.bf16.gmra.mrb[12].mxu1 %v19690_v22  ;;  %v12098_v22 = vrot.slane %v23182_v63, 6  ;;  %v12103_v63 = vsel %vm20305_vm8, %v16425_v39, %v12102_v11  ;;  %v24627_v39 = vrot.slane %v23260_v50, 7  ;;  %v23444_v50 = vld [vmem:[%s19972_s11 + $0x134] sm:$0x8] }
 0x248   : > { %17777 = vmatprep.mubr.bf16.mxu1 %v19695_v54  ;;  %17806 = vmatpush3.bf16.msra.mxu1 %v19704_v16  ;;  %v23210_v16 = vld [vmem:[%s19972_s11 + $0xb0] sm:$0x7]  ;;  %v5199_v54 = vrot.slane %v23185_v18, 7  ;;  %v12096_v18 = vsel %vm20305_vm8, %v16424_v40, %v12095_v27 }
 0x249   : > { %17807 = vmatprep.subr.bf16.mxu1 %v19708_v5  ;;  %v5202_v13 = vrot.slane %v23210_v16, 7  ;;  %v12099_v25 = vsel %vm20305_vm8, %v23225_v41, %v12098_v22  ;;  %v16428_v16 = vrot.slane %v23349_v37, 10  ;;  %v23413_v22 = vld [vmem:[%s19972_s11 + $0x35c] sm:$0xf]  ;;  %v15325_v41 = vld [vmem:[%s19972_s11 + $0x118] sm:$0x8] }
 0x24a   : > { %18366 = vmatmul.mubr.bf16.gmra.mrb[28].mxu0 %v19692_v59  ;;  %v12071_v59 = vsel %vm20305_vm8, %v12069_v14, %v12070_v1  ;;  %v5201_v14 = vrot.slane %v5199_v54, 4  ;;  %v12105_v1 = vrot.slane %v23229_v0, 6  ;;  %v16456_v28 = vcombine.low %v12096_v18, %v12099_v25  ;;  %v23490_v25 = vld [vmem:[%s19972_s11 + $0x374] sm:$0xc] }
 0x24b   : > { %18385 = vmatprep.mubr.bf16.mxu0 %v16449_v7  ;;  %v23249_v7 = vld [vmem:[%s19972_s11 + $0x308] sm:$0xf]  ;;  %v24626_v0 = vrot.slane %v23246_v9, 11  ;;  %v23440_v9 = vld [vmem:[%s19972_s11 + $0x360] sm:$0x3] }
 0x24c   : > { %17808 = vmatpush3.bf16.msra.mxu1 %v19708_v5  ;;  %v19709_v5 = vld [vmem:[%s24527_s1 + $0x590] sm:$0xff]   ;;  %v24547_v29 = vrot.slane %v23249_v7, 6 }
 0x24d   : > { %17841 = vmatprep.subr.bf16.mxu1 %v23161_v8 }
 0x24f   : > { %17778 = vmatmul.mubr.bf16.gmra.mrb[16].mxu1 %v19696_v60  ;;  %v16452_v60 = vcombine.low %v12068_v57, %v12071_v59  ;;  %v23296_v59 = vld [vmem:[%s19972_s11 + $0xe0] sm:$0x8]  ;;  %v12085_v57 = vsel %vm20305_vm8, %v23190_v17, %v12084_v56  ;;  %v5220_v17 = vrot.slane %v23306_v42, 7  ;;  %v19714_v42 = vld [vmem:[%s24527_s1 + $0x290] sm:$0xff]  }
 0x250   : > { %17781 = vmatprep.mubr.bf16.mxu1 %v19698_v38  ;;  %v23272_v38 = vrot.slane %v12102_v11, 4  ;;  %v15363_v45 = vrot.slane %v23296_v59, 11  ;;  %v5200_v59 = vsel %vm19989_vm5, %v15361_v26, %v5199_v54  ;;  %v15327_v26 = vld [vmem:[%s19972_s11 + $0x120] sm:$0x7]  ;;  %v5210_v11 = vsel %vm19989_vm5, %v23276_v31, %v24627_v39  ;;  %v19718_v31 = vld [vmem:[%s24527_s1 + $0x5b8] sm:$0xff]  }
 0x252   : > { %18386 = vmatmul.mubr.bf16.vlgmr.msra.gmra.mrb[0].mxu0 %v16450_v6  ;;  %v23284_v6 = vld [vmem:[%s19972_s11 + $0xe4] sm:$0xf]  ;;  %v12106_v40 = vsel %vm20305_vm8, %v23272_v38, %v12105_v1  ;;  %v5227_v1 = vrot.slane %v23398_v10, 7  ;;  %v23437_v38 = vld [vmem:[%s19972_s11 + $0x358] sm:$0xc] }
 0x253   : > { %18389 = vmatprep.mubr.bf16.mxu0 %v16451_v44  ;;  %18418 = vmatpush3.bf16.msra.mxu0 %v23066_v61  ;;  %v19703_v44 = vld [vmem:[%s19972_s11 + $0x418] sm:$0xff]   ;;  %v23324_v61 = vld [vmem:[%s19972_s11 + $0x328] sm:$0x3]  ;;  %v16457_v30 = vcombine.low %v12103_v63, %v12106_v40  ;;  %v23499_v63 = vld [vmem:[%s24527_s1 + $0x5c0] sm:$0xff]  }
 0x254   : > { %18419 = vmatprep.subr.bf16.mxu0 %v19705_v34  ;;  %v23493_v10 = vld [vmem:[%s19972_s11 + $0x378] sm:$0xf] }
 0x255   : > { %v12137_v39 = vrot.slane %v23493_v10, 6 }
 0x257   : > { %17782 = vmatmul.mubr.bf16.gmra.mrb[20].mxu1 %v19699_v43  ;;  %18420 = vmatpush3.bf16.msra.mxu0 %v19705_v34  ;;  %v23287_v34 = vld [vmem:[%s19972_s11 + $0x324] sm:$0xf]  ;;  %v23292_v43 = vrot.slane %v24547_v29, 4  ;;  %v5213_v29 = vrot.slane %v23284_v6, 7  ;;  %v5230_v6 = vrot.slane %v15327_v26, 7 }
 0x258   : > { %17785 = vmatprep.mubr.bf16.mxu1 %v19702_v51  ;;  %18421 = vmatprep.subr.bf16.mxu0 %v19709_v5  ;;  %v23303_v51 = vld [vmem:[%s19972_s11 + $0x320] sm:$0xc]  ;;  %v12116_v36 = vrot.slane %v23287_v34, 6  ;;  %v12133_v34 = vrot.slane %v23440_v9, 6  ;;  %v16412_v26 = vld [vmem:[%s19972_s11 + $0x394] sm:$0xf] }
 0x259   : > { %v16427_v12 = vrot.slane %v23303_v51, 10  ;;  %v23382_v51 = vld [vmem:[%s19972_s11 + $0x344] sm:$0x3]  ;;  %v19716_v9 = vld [vmem:[%s24527_s1 + $0x298] sm:$0xff]  }
 0x25a   : > { %18390 = vmatmul.mubr.bf16.gmra.mrb[4].mxu0 %v16452_v60  ;;  %v12082_v60 = vsel %vm20305_vm8, %v16422_v47, %v12081_v24  ;;  %v12092_v24 = vsel %vm20305_vm8, %v23196_v32, %v12091_v62  ;;  %v23340_v47 = vld [vmem:[%s19972_s11 + $0xfc] sm:$0x8]  ;;  %v23352_v32 = vld [vmem:[%s19972_s11 + $0x340] sm:$0xf]  ;;  %v5215_v62 = vrot.slane %v5213_v29, 4  ;;  %v12126_v27 = vrot.slane %v23382_v51, 6 }
 0x25b   : > { %18393 = vmatprep.mubr.bf16.mxu0 %v16453_v33  ;;  %18422 = vmatpush3.bf16.msra.mxu0 %v19709_v5  ;;  %v16454_v56 = vcombine.low %v12082_v60, %v12085_v57  ;;  %v16455_v58 = vcombine.low %v12089_v21, %v12092_v24  ;;  %v23358_v5 = vrot.slane %v12116_v36, 4  ;;  %v12119_v33 = vrot.slane %v23324_v61, 6 }
 0x25c   : > { %18423 = vmatprep.subr.bf16.mxu0 %v19711_v53  ;;  %v15364_v57 = vrot.slane %v23340_v47, 11  ;;  %v5203_v61 = vsel %vm19989_vm5, %v5201_v14, %v5202_v13  ;;  %v12123_v54 = vrot.slane %v23352_v32, 6  ;;  %v5207_v13 = vsel %vm19989_vm5, %v24626_v0, %v5206_v4  ;;  %v15333_v47 = vld [vmem:[%s19972_s11 + $0x158] sm:$0x7]  ;;  %v23533_v0 = vld [vmem:[%s19972_s11 + $0x170] sm:$0xf] }
 0x25d   : > { %v15393_v48 = vcombine.low %v5200_v59, %v5203_v61  ;;  %v12130_v4 = vrot.slane %v23413_v22, 6  ;;  %v15394_v60 = vcombine.low %v5207_v13, %v5210_v11  ;;  %v24628_v21 = vrot.slane %v23249_v7, 6 }
 0x25e   : > { %v23433_v14 = vrot.slane %v12123_v54, 4  ;;  %v24629_v24 = vrot.slane %v23263_v19, 10  ;;  %v12117_v19 = vsel %vm20305_vm8, %v16427_v12, %v12116_v36  ;;  %v15365_v59 = vrot.slane %v15325_v41, 11 }
 0x25f   : > { %17786 = vmatmul.mubr.bf16.gmra.mrb[24].mxu1 %v19703_v44  ;;  %18424 = vmatpush3.bf16.msra.mxu0 %v19711_v53  ;;  %v19715_v53 = vld [vmem:[%s24527_s1 + $0x5a8] sm:$0xff]   ;;  %v19707_v44 = vld [vmem:[%s19972_s11 + $0x450] sm:$0xff]   ;;  %v15366_v36 = vrot.slane %v23444_v50, 11  ;;  %v12120_v12 = vsel %vm20305_vm8, %v23358_v5, %v12119_v33  ;;  %v5221_v33 = vsel %vm19989_vm5, %v15364_v57, %v5220_v17  ;;  %v16430_v13 = vrot.slane %v23490_v25, 10 }
 0x260   : > { %17789 = vmatprep.mubr.bf16.mxu1 %v19706_v3  ;;  %18425 = vmatprep.subr.bf16.mxu0 %v19713_v46  ;;  %v23378_v3 = vrot.slane %v5220_v17, 4  ;;  %v16459_v41 = vcombine.low %v12117_v19, %v12120_v12  ;;  %v5228_v17 = vsel %vm19989_vm5, %v15365_v59, %v5227_v1  ;;  %v12127_v37 = vsel %vm20305_vm8, %v23433_v14, %v12126_v27  ;;  %v15334_v14 = vld [vmem:[%s19972_s11 + $0x16c] sm:$0x8]  ;;  %v16415_v19 = vld [vmem:[%s19972_s11 + $0x3b0] sm:$0xf] }
 0x261   : > { %v5244_v50 = vrot.slane %v15333_v47, 7  ;;  %v12144_v27 = vrot.slane %v16412_v26, 6  ;;  %v5248_v22 = vrot.slane %v23533_v0, 7  ;;  %v15337_v59 = vld [vmem:[%s19972_s11 + $0x188] sm:$0x8]  ;;  %v12151_v25 = vrot.slane %v16415_v19, 6 }
 0x262   : > { %18394 = vmatmul.mubr.bf16.gmra.mrb[8].mxu0 %v16454_v56  ;;  %v12110_v56 = vsel %vm20305_vm8, %v24629_v24, %v24628_v21  ;;  %v5224_v40 = vsel %vm19989_vm5, %v23378_v3, %v5223_v23  ;;  %v12139_v24 = vrot.slane %v12137_v39, 4  ;;  %v16416_v12 = vld [vmem:[%s19972_s11 + $0x3b4] sm:$0x3]  ;;  %v15369_v10 = vrot.slane %v15337_v59, 11  ;;  %v15346_v19 = vld [vmem:[%s19972_s11 + $0x1dc] sm:$0x8] }
 0x263   : > { %18397 = vmatprep.mubr.bf16.mxu0 %v16455_v58  ;;  %18426 = vmatpush3.bf16.msra.mxu0 %v19713_v46  ;;  %v23450_v46 = vld [vmem:[%s19972_s11 + $0x138] sm:$0xf]  ;;  %v5214_v58 = vsel %vm19989_vm5, %v15363_v45, %v5213_v29  ;;  %v23474_v29 = vld [vmem:[%s19972_s11 + $0x13c] sm:$0x7]  ;;  %v5229_v45 = vrot.slane %v5227_v1, 4  ;;  %v15396_v23 = vcombine.low %v5221_v33, %v5224_v40  ;;  %v12153_v26 = vrot.slane %v12151_v25, 4 }
 0x264   : > { %18427 = vmatprep.subr.bf16.mxu0 %v19715_v53  ;;  %v5234_v61 = vrot.slane %v23450_v46, 7  ;;  %v5237_v18 = vrot.slane %v23474_v29, 7  ;;  %v12154_v0 = vrot.slane %v16416_v12, 6  ;;  %v15348_v59 = vld [vmem:[%s19972_s11 + $0x1e4] sm:$0x7] }
 0x265   : > { %v5231_v35 = vsel %vm19989_vm5, %v5229_v45, %v5230_v6  ;;  %v16414_v45 = vld [vmem:[%s19972_s11 + $0x3ac] sm:$0xc]  ;;  %v5279_v12 = vrot.slane %v15348_v59, 7  ;;  %v15421_v59 = vld [vmem:[%s19972_s11 + $0xd0] sm:$0xf] }
 0x266   : > { %v5236_v57 = vrot.slane %v5234_v61, 4  ;;  %v5235_v46 = vsel %vm19989_vm5, %v15366_v36, %v5234_v61  ;;  %v5250_v36 = vrot.slane %v5248_v22, 4  ;;  %v12138_v61 = vsel %vm20305_vm8, %v16430_v13, %v12137_v39  ;;  %v15342_v13 = vld [vmem:[%s19972_s11 + $0x1ac] sm:$0x7]  ;;  %v15343_v39 = vld [vmem:[%s19972_s11 + $0x1c0] sm:$0x8] }
 0x267   : > { %17790 = vmatmul.mubr.bf16.gmra.mrb[28].mxu1 %v19707_v44  ;;  %18428 = vmatpush3.bf16.msra.mxu0 %v19715_v53  ;;  %v5217_v53 = vsel %vm19989_vm5, %v5215_v62, %v5216_v2  ;;  %v24630_v44 = vrot.slane %v23268_v49, 6  ;;  %v19712_v49 = vld [vmem:[%s24527_s1 + $0x288] sm:$0xff]   ;;  %v12132_v62 = vrot.slane %v12130_v4, 4 }
 0x268   : > { %17809 = vmatprep.mubr.bf16.mxu1 %v15393_v48  ;;  %18429 = vmatprep.subr.bf16.mxu0 %v19717_v55  ;;  %v15395_v2 = vcombine.low %v5214_v58, %v5217_v53  ;;  %v15332_v48 = vld [vmem:[%s19972_s11 + $0x154] sm:$0xf]  ;;  %v5238_v21 = vsel %vm19989_vm5, %v5236_v57, %v5237_v18  ;;  %v19720_v53 = vld [vmem:[%s24527_s1 + $0x2a0] sm:$0xff]  }
 0x269   : > { %v12113_v7 = vsel %vm20305_vm8, %v23292_v43, %v24630_v44  ;;  %v16429_v43 = vrot.slane %v23437_v38, 10  ;;  %v5241_v3 = vrot.slane %v15332_v48, 7  ;;  %v12134_v1 = vsel %vm20305_vm8, %v12132_v62, %v12133_v34  ;;  %v16411_v38 = vld [vmem:[%s19972_s11 + $0x390] sm:$0xc]  ;;  %v15336_v58 = vld [vmem:[%s19972_s11 + $0x174] sm:$0x7] }
 0x26a   : > { %18398 = vmatmul.mubr.bf16.gmra.mrb[12].mxu0 %v16456_v28  ;;  %v16458_v5 = vcombine.low %v12110_v56, %v12113_v7  ;;  %v15331_v28 = vld [vmem:[%s19972_s11 + $0x150] sm:$0x8]  ;;  %v16431_v56 = vrot.slane %v16411_v38, 10  ;;  %v12146_v44 = vrot.slane %v12144_v27, 4  ;;  %v15398_v34 = vcombine.low %v5235_v46, %v5238_v21  ;;  %v15339_v62 = vld [vmem:[%s19972_s11 + $0x190] sm:$0x7] }
 0x26b   : > { %18401 = vmatprep.mubr.bf16.mxu0 %v16457_v30  ;;  %18430 = vmatpush3.bf16.msra.mxu0 %v19717_v55  ;;  %v23513_v55 = vld [vmem:[%s19972_s11 + $0x37c] sm:$0x3]  ;;  %v15367_v32 = vrot.slane %v15331_v28, 11  ;;  %v16413_v30 = vld [vmem:[%s19972_s11 + $0x398] sm:$0x3]  ;;  %v5243_v51 = vrot.slane %v5241_v3, 4 }
 0x26c   : > { %18431 = vmatprep.subr.bf16.mxu0 %v19718_v31  ;;  %v12140_v11 = vrot.slane %v23513_v55, 6  ;;  %v12147_v7 = vrot.slane %v16413_v30, 6  ;;  %v15341_v48 = vld [vmem:[%s19972_s11 + $0x1a8] sm:$0xf]  ;;  %v12145_v40 = vsel %vm20305_vm8, %v16431_v56, %v12144_v27  ;;  %v15340_v28 = vld [vmem:[%s19972_s11 + $0x1a4] sm:$0x8] }
 0x26d   : > { %v5242_v6 = vsel %vm19989_vm5, %v15367_v32, %v5241_v3  ;;  %v5245_v29 = vsel %vm19989_vm5, %v5243_v51, %v5244_v50  ;;  %v5262_v57 = vrot.slane %v15341_v48, 7  ;;  %v15344_v3 = vld [vmem:[%s19972_s11 + $0x1c4] sm:$0xf]  ;;  %v12155_v50 = vsel %vm20305_vm8, %v12153_v26, %v12154_v0  ;;  %v19731_v46 = vld [vmem:[%s24527_s1 + $0x2b8] sm:$0xff]   ;;  %v15356_v48 = vld [vmem:[%s19972_s11 + $0x234] sm:$0xf] }
 0x26e   : > { %v12141_v18 = vsel %vm20305_vm8, %v12139_v24, %v12140_v11  ;;  %v15399_v33 = vcombine.low %v5242_v6, %v5245_v29  ;;  %v12148_v55 = vsel %vm20305_vm8, %v12146_v44, %v12147_v7  ;;  %v15345_v11 = vld [vmem:[%s19972_s11 + $0x1c8] sm:$0x7]  ;;  %v15371_v27 = vrot.slane %v15343_v39, 11  ;;  %v15350_v21 = vld [vmem:[%s19972_s11 + $0x1fc] sm:$0xf]  ;;  %v19719_v24 = vld [vmem:[%s19972_s11 + $0x3f0] sm:$0xff]  }
 0x26f   : > { %17810 = vmatmul.mubr.bf16.vlgmr.msra.gmra.mrb[0].mxu1 %v15394_v60  ;;  %18432 = vmatpush3.bf16.msra.mxu0 %v19718_v31  ;;  %v16462_v47 = vcombine.low %v12138_v61, %v12141_v18  ;;  %v5264_v30 = vrot.slane %v5262_v57, 4  ;;  %v5283_v6 = vrot.slane %v15350_v21, 7  ;;  %v23626_v29 = vld [vmem:[%s24527_s1 + $0x2c0] sm:$0xff]  }
 0x270   : > { %17842 = vmatpush3.bf16.msra.mxu1 %v23161_v8  ;;  %17813 = vmatprep.mubr.bf16.mxu1 %v15395_v2  ;;  %v12124_v8 = vsel %vm20305_vm8, %v16428_v16, %v12123_v54  ;;  %v15397_v16 = vcombine.low %v5228_v17, %v5231_v35  ;;  %v12131_v54 = vsel %vm20305_vm8, %v16429_v43, %v12130_v4  ;;  %v15338_v4 = vld [vmem:[%s19972_s11 + $0x18c] sm:$0xf]  ;;  %v5251_v2 = vrot.slane %v15336_v58, 7 }
 0x271   : > { %17843 = vmatprep.subr.bf16.mxu1 %v19712_v49  ;;  %18465 = vmatprep.subr.bf16.mxu0 %v23499_v63  ;;  %v16460_v31 = vcombine.low %v12124_v8, %v12127_v37  ;;  %v16461_v60 = vcombine.low %v12131_v54, %v12134_v1  ;;  %v5255_v43 = vrot.slane %v15338_v4, 7  ;;  %v16432_v35 = vrot.slane %v16414_v45, 10  ;;  %v19727_v1 = vld [vmem:[%s24527_s1 + $0x2b0] sm:$0xff]   ;;  %v15347_v4 = vld [vmem:[%s19972_s11 + $0x1e0] sm:$0xf] }
 0x272   : > { %18402 = vmatmul.mubr.bf16.gmra.mrb[16].mxu0 %v16458_v5  ;;  %v19723_v5 = vld [vmem:[%s24527_s1 + $0x2a8] sm:$0xff]   ;;  %v5252_v8 = vsel %vm19989_vm5, %v5250_v36, %v5251_v2  ;;  %v5269_v54 = vrot.slane %v15344_v3, 7  ;;  %v15351_v45 = vld [vmem:[%s19972_s11 + $0x200] sm:$0x7]  ;;  %v15372_v36 = vrot.slane %v15346_v19, 11  ;;  %v5285_v61 = vrot.slane %v5283_v6, 4 }
 0x273   : > { %18405 = vmatprep.mubr.bf16.mxu0 %v16459_v41  ;;  %v5257_v41 = vrot.slane %v5255_v43, 4  ;;  %v5256_v32 = vsel %vm19989_vm5, %v15369_v10, %v5255_v43  ;;  %v12152_v51 = vsel %vm20305_vm8, %v16432_v35, %v12151_v25  ;;  %v5286_v18 = vrot.slane %v15351_v45, 7  ;;  %v15353_v25 = vld [vmem:[%s19972_s11 + $0x218] sm:$0xf]  ;;  %v19721_v10 = vld [vmem:[%s19972_s11 + $0x40c] sm:$0xff]  }
 0x274   : > { %17844 = vmatpush3.bf16.msra.mxu1 %v19712_v49  ;;  %v15368_v49 = vrot.slane %v15334_v14, 11  ;;  %v5272_v14 = vrot.slane %v15345_v11, 7  ;;  %v5270_v44 = vsel %vm19989_vm5, %v15371_v27, %v5269_v54  ;;  %v15355_v35 = vld [vmem:[%s19972_s11 + $0x230] sm:$0x8]  ;;  %v15357_v3 = vld [vmem:[%s19972_s11 + $0x238] sm:$0x7] }
 0x275   : > { %17845 = vmatprep.subr.bf16.mxu1 %v19714_v42  ;;  %v15375_v39 = vrot.slane %v15355_v35, 11  ;;  %v19733_v11 = vld [vmem:[%s24527_s1 + $0x5d0] sm:$0xff]   ;;  %v19730_v45 = vld [vmem:[%s19972_s11 + $0x498] sm:$0xff]   ;;  %v15427_v35 = vld [vmem:[%s19972_s11 + $0x108] sm:$0xf] }
 0x276   : > { %v5249_v17 = vsel %vm19989_vm5, %v15368_v49, %v5248_v22  ;;  %v15349_v49 = vld [vmem:[%s19972_s11 + $0x1f8] sm:$0x8] }
 0x277   : > { %17814 = vmatmul.mubr.bf16.gmra.mrb[4].mxu1 %v15396_v23  ;;  %v16463_v23 = vcombine.low %v12145_v40, %v12148_v55  ;;  %v15400_v38 = vcombine.low %v5249_v17, %v5252_v8  ;;  %v15352_v55 = vld [vmem:[%s19972_s11 + $0x214] sm:$0x8]  ;;  %v15354_v17 = vld [vmem:[%s19972_s11 + $0x21c] sm:$0x7] }
 0x278   : > { %17817 = vmatprep.mubr.bf16.mxu1 %v15397_v16  ;;  %17846 = vmatpush3.bf16.msra.mxu1 %v19714_v42  ;;  %v5258_v42 = vrot.slane %v15339_v62, 7  ;;  %v15370_v16 = vrot.slane %v15340_v28, 11  ;;  %v15373_v62 = vrot.slane %v15349_v49, 11  ;;  %v5290_v28 = vrot.slane %v15353_v25, 7  ;;  %v15424_v49 = vld [vmem:[%s19972_s11 + $0xec] sm:$0xf] }
 0x279   : > { %17847 = vmatprep.subr.bf16.mxu1 %v19716_v9  ;;  %v15374_v8 = vrot.slane %v15352_v55, 11  ;;  %v15423_v25 = vld [vmem:[%s19972_s11 + $0xe8] sm:$0xe] }
 0x27a   : > { %18406 = vmatmul.mubr.bf16.gmra.mrb[20].mxu0 %v16460_v31  ;;  %v5259_v37 = vsel %vm19989_vm5, %v5257_v41, %v5258_v42  ;;  %v5271_v31 = vrot.slane %v5269_v54, 4  ;;  %v5263_v56 = vsel %vm19989_vm5, %v15370_v16, %v5262_v57  ;;  %v19729_v41 = vld [vmem:[%s24527_s1 + $0x5c8] sm:$0xff]   ;;  %v5284_v42 = vsel %vm19989_vm5, %v15373_v62, %v5283_v6  ;;  %v15359_v16 = vld [vmem:[%s19972_s11 + $0x250] sm:$0xf]  ;;  %v19728_v6 = vld [vmem:[%s19972_s11 + $0x47c] sm:$0xff]  }
 0x27b   : > { %18409 = vmatprep.mubr.bf16.mxu0 %v16461_v60  ;;  %v15401_v22 = vcombine.low %v5256_v32, %v5259_v37  ;;  %v16464_v60 = vcombine.low %v12152_v51, %v12155_v50  ;;  %v5297_v57 = vrot.slane %v15356_v48, 7  ;;  %v5292_v0 = vrot.slane %v5290_v28, 4  ;;  %v19724_v54 = vld [vmem:[%s19972_s11 + $0x444] sm:$0xff]   ;;  %v19737_v51 = vld [vmem:[%s24527_s1 + $0x5d8] sm:$0xff]   ;;  %v15425_v48 = vld [vmem:[%s19972_s11 + $0xf0] sm:$0x1] }
 0x27c   : > { %17848 = vmatpush3.bf16.msra.mxu1 %v19716_v9  ;;  %v5265_v9 = vrot.slane %v15342_v13, 7  ;;  %v5273_v7 = vsel %vm19989_vm5, %v5271_v31, %v5272_v14  ;;  %v5293_v13 = vrot.slane %v15354_v17, 7  ;;  %v5300_v37 = vrot.slane %v15357_v3, 7  ;;  %v15358_v14 = vld [vmem:[%s19972_s11 + $0x24c] sm:$0x8] }
 0x27d   : > { %17849 = vmatprep.subr.bf16.mxu1 %v19720_v53  ;;  %v5299_v32 = vrot.slane %v5297_v57, 4  ;;  %v5298_v50 = vsel %vm19989_vm5, %v15375_v39, %v5297_v57  ;;  %v15417_v31 = vld [vmem:[%s19972_s11 + $0xb0] sm:$0xe]  ;;  %v5810_v17 = vrot.slane %v15425_v48, 5  ;;  %v19732_v57 = vld [vmem:[%s19972_s11 + $0x4b4] sm:$0xff]   ;;  %v19740_v48 = vld [vmem:[%s19972_s11 + $0x524] sm:$0xff]  }
 0x27e   : > { %v5266_v58 = vsel %vm19989_vm5, %v5264_v30, %v5265_v9  ;;  %v5294_v30 = vsel %vm19989_vm5, %v5292_v0, %v5293_v13  ;;  %v5304_v9 = vrot.slane %v15359_v16, 7  ;;  %v15430_v3 = vld [vmem:[%s19972_s11 + $0x124] sm:$0xf]  ;;  %v5814_v0 = vrot.slane %v15427_v35, 5  ;;  %v19750_v13 = vld [vmem:[%s24527_s1 + $0x5f8] sm:$0xff]  }
 0x27f   : > { %17818 = vmatmul.mubr.bf16.gmra.mrb[8].mxu1 %v15398_v34  ;;  %v15402_v43 = vcombine.low %v5263_v56, %v5266_v58  ;;  %v15403_v34 = vcombine.low %v5270_v44, %v5273_v7  ;;  %v5301_v27 = vsel %vm19989_vm5, %v5299_v32, %v5300_v37  ;;  %v15465_v44 = vrot.slane %v15417_v31, 9  ;;  %v15426_v32 = vld [vmem:[%s19972_s11 + $0x104] sm:$0xe]  ;;  %v15428_v37 = vld [vmem:[%s19972_s11 + $0x10c] sm:$0x1] }
 0x280   : > { %17821 = vmatprep.mubr.bf16.mxu1 %v15399_v33  ;;  %17850 = vmatpush3.bf16.msra.mxu1 %v19720_v53  ;;  %v5276_v53 = vrot.slane %v15347_v4, 7  ;;  %v15407_v21 = vcombine.low %v5298_v50, %v5301_v27  ;;  %v5306_v56 = vrot.slane %v5304_v9, 4  ;;  %v5821_v16 = vrot.slane %v15430_v3, 5  ;;  %v15433_v50 = vld [vmem:[%s19972_s11 + $0x140] sm:$0xf]  ;;  %v19739_v27 = vld [vmem:[%s24527_s1 + $0x2c8] sm:$0xff]  }
 0x281   : > { %17851 = vmatprep.subr.bf16.mxu1 %v19723_v5  ;;  %v23724_v31 = vld [vmem:[%s24527_s1 + $0x600] sm:$0xff]   ;;  %v16546_v35 = vld [vmem:[%s19972_s11 + $0x3fc] sm:$0xf] }
 0x282   : > { %18410 = vmatmul.mubr.bf16.gmra.mrb[24].mxu0 %v16462_v47  ;;  %v5278_v2 = vrot.slane %v5276_v53, 4  ;;  %v5277_v33 = vsel %vm19989_vm5, %v15372_v36, %v5276_v53  ;;  %v5287_v47 = vsel %vm19989_vm5, %v5285_v61, %v5286_v18  ;;  %v19741_v53 = vld [vmem:[%s24527_s1 + $0x5e0] sm:$0xff]   ;;  %v15420_v36 = vld [vmem:[%s19972_s11 + $0xcc] sm:$0xe]  ;;  %v15422_v18 = vld [vmem:[%s19972_s11 + $0xd4] sm:$0x1] }
 0x283   : > { %18413 = vmatprep.mubr.bf16.mxu0 %v16463_v23  ;;  %v15405_v26 = vcombine.low %v5284_v42, %v5287_v47  ;;  %v19749_v42 = vld [vmem:[%s24527_s1 + $0x5f0] sm:$0xff]  }
 0x284   : > { %17852 = vmatpush3.bf16.msra.mxu1 %v19723_v5  ;;  %v19722_v5 = vld [vmem:[%s19972_s11 + $0x428] sm:$0xff]   ;;  %v5280_v40 = vsel %vm19989_vm5, %v5278_v2, %v5279_v12  ;;  %v5800_v2 = vrot.slane %v15421_v59, 5 }
 0x285   : > { %17853 = vmatprep.subr.bf16.mxu1 %v19727_v1  ;;  %v15404_v23 = vcombine.low %v5277_v33, %v5280_v40  ;;  %v19745_v12 = vld [vmem:[%s24527_s1 + $0x5e8] sm:$0xff]   ;;  %v15466_v33 = vrot.slane %v15420_v36, 9 }
 0x286   : > { %v5802_v55 = vrot.slane %v5800_v2, 4 }
 0x287   : > { %17822 = vmatmul.mubr.bf16.gmra.mrb[12].mxu1 %v15400_v38  ;;  %v5291_v38 = vsel %vm19989_vm5, %v15374_v8, %v5290_v28  ;;  %v5803_v28 = vrot.slane %v15422_v18, 5  ;;  %v5801_v8 = vsel %vm19983_vm4, %v15466_v33, %v5800_v2  ;;  %v15439_v2 = vld [vmem:[%s19972_s11 + $0x178] sm:$0xf] }
 0x288   : > { %17825 = vmatprep.mubr.bf16.mxu1 %v15401_v22  ;;  %17854 = vmatpush3.bf16.msra.mxu1 %v19727_v1  ;;  %v15418_v1 = vld [vmem:[%s19972_s11 + $0xb4] sm:$0xf]  ;;  %v5842_v33 = vrot.slane %v15439_v2, 5 }
 0x289   : > { %17855 = vmatprep.subr.bf16.mxu1 %v19731_v46  ;;  %v15360_v22 = vld [vmem:[%s19972_s11 + $0x254] sm:$0x7]  ;;  %v5793_v4 = vrot.slane %v15418_v1, 5  ;;  %v15431_v1 = vld [vmem:[%s19972_s11 + $0x128] sm:$0x1] }
 0x28a   : > { %18414 = vmatmul.mubr.bf16.gmra.mrb[28].mxu0 %v16464_v60  ;;  %v15406_v60 = vcombine.low %v5291_v38, %v5294_v30  ;;  %v5307_v58 = vrot.slane %v15360_v22, 7  ;;  %v15468_v30 = vrot.slane %v15426_v32, 9  ;;  %v5823_v22 = vrot.slane %v5821_v16, 4 }
 0x28b   : > { %18433 = vmatprep.mubr.bf16.mxu0 %v19719_v24  ;;  %v15376_v24 = vrot.slane %v15358_v14, 11  ;;  %v5795_v7 = vrot.slane %v5793_v4, 4  ;;  %v5794_v62 = vsel %vm19983_vm4, %v15465_v44, %v5793_v4  ;;  %v5824_v4 = vrot.slane %v15431_v1, 5  ;;  %v15434_v44 = vld [vmem:[%s19972_s11 + $0x144] sm:$0x1]  ;;  %v19744_v1 = vld [vmem:[%s19972_s11 + $0x55c] sm:$0xff]  }
 0x28c   : > { %17856 = vmatpush3.bf16.msra.mxu1 %v19731_v46  ;;  %v15419_v46 = vld [vmem:[%s19972_s11 + $0xb8] sm:$0x1]  ;;  %v5831_v36 = vrot.slane %v15434_v44, 5  ;;  %v16552_v44 = vld [vmem:[%s19972_s11 + $0x434] sm:$0xf] }
 0x28d   : > { %17889 = vmatprep.subr.bf16.mxu1 %v23626_v29  ;;  %v5796_v19 = vrot.slane %v15419_v46, 5  ;;  %v19736_v46 = vld [vmem:[%s19972_s11 + $0x4ec] sm:$0xff]  }
 0x28f   : > { %17826 = vmatmul.mubr.bf16.gmra.mrb[16].mxu1 %v15402_v43  ;;  %v5305_v43 = vsel %vm19989_vm5, %v15376_v24, %v5304_v9  ;;  %v5797_v61 = vsel %vm19983_vm4, %v5795_v7, %v5796_v19  ;;  %v5816_v9 = vrot.slane %v5814_v0, 4  ;;  %v5828_v24 = vrot.slane %v15433_v50, 5  ;;  %v19746_v50 = vld [vmem:[%s19972_s11 + $0x578] sm:$0xff]  }
 0x290   : > { %17829 = vmatprep.mubr.bf16.mxu1 %v15403_v34  ;;  %v5308_v34 = vsel %vm19989_vm5, %v5306_v56, %v5307_v58  ;;  %v15497_v40 = vcombine.low %v5794_v62, %v5797_v61  ;;  %v5815_v56 = vsel %vm19983_vm4, %v15468_v30, %v5814_v0  ;;  %v5825_v19 = vsel %vm19983_vm4, %v5823_v22, %v5824_v4  ;;  %v15442_v62 = vld [vmem:[%s19972_s11 + $0x194] sm:$0xf]  ;;  %v16549_v22 = vld [vmem:[%s19972_s11 + $0x418] sm:$0xf] }
 0x292   : > { %18434 = vmatmul.mubr.bf16.vlgmr.msra.gmra.mrb[0].mxu0 %v19721_v10  ;;  %v5807_v10 = vrot.slane %v15424_v49, 5  ;;  %v15437_v49 = vld [vmem:[%s19972_s11 + $0x160] sm:$0x1] }
 0x293   : > { %18437 = vmatprep.mubr.bf16.mxu0 %v19722_v5  ;;  %18466 = vmatpush3.bf16.msra.mxu0 %v23499_v63  ;;  %v19726_v63 = vld [vmem:[%s19972_s11 + $0x460] sm:$0xff]   ;;  %v15408_v5 = vcombine.low %v5305_v43, %v5308_v34  ;;  %v5830_v34 = vrot.slane %v5828_v24, 4 }
 0x294   : > { %18467 = vmatprep.subr.bf16.mxu0 %v19729_v41  ;;  %v5809_v47 = vrot.slane %v5807_v10, 4 }
 0x297   : > { %17830 = vmatmul.mubr.bf16.gmra.mrb[20].mxu1 %v15404_v23  ;;  %18468 = vmatpush3.bf16.msra.mxu0 %v19729_v41  ;;  %v15467_v41 = vrot.slane %v15423_v25, 9  ;;  %v19734_v23 = vld [vmem:[%s19972_s11 + $0x4d0] sm:$0xff]   ;;  %v5838_v25 = vrot.slane %v15437_v49, 5 }
 0x298   : > { %17833 = vmatprep.mubr.bf16.mxu1 %v15405_v26  ;;  %18469 = vmatprep.subr.bf16.mxu0 %v19733_v11  ;;  %v5804_v26 = vsel %vm19983_vm4, %v5802_v55, %v5803_v28  ;;  %v5832_v28 = vsel %vm19983_vm4, %v5830_v34, %v5831_v36  ;;  %v15449_v49 = vld [vmem:[%s19972_s11 + $0x1d0] sm:$0x1] }
 0x299   : > { %v5808_v39 = vsel %vm19983_vm4, %v15467_v41, %v5807_v10  ;;  %v19747_v10 = vld [vmem:[%s24527_s1 + $0x2d8] sm:$0xff]   ;;  %v19754_v34 = vld [vmem:[%s24527_s1 + $0x2f0] sm:$0xff]  }
 0x29a   : > { %18438 = vmatmul.mubr.bf16.gmra.mrb[4].mxu0 %v19724_v54  ;;  %v15429_v54 = vld [vmem:[%s19972_s11 + $0x120] sm:$0xe]  ;;  %v15440_v41 = vld [vmem:[%s19972_s11 + $0x17c] sm:$0x1] }
 0x29b   : > { %18441 = vmatprep.mubr.bf16.mxu0 %v19726_v63  ;;  %18470 = vmatpush3.bf16.msra.mxu0 %v19733_v11  ;;  %v5811_v11 = vsel %vm19983_vm4, %v5809_v47, %v5810_v17  ;;  %v15498_v63 = vcombine.low %v5801_v8, %v5804_v26  ;;  %v15469_v14 = vrot.slane %v15429_v54, 9  ;;  %v15441_v47 = vld [vmem:[%s19972_s11 + $0x190] sm:$0xe]  ;;  %v15443_v17 = vld [vmem:[%s19972_s11 + $0x198] sm:$0x1]  ;;  %v19751_v26 = vld [vmem:[%s24527_s1 + $0x2e0] sm:$0xff]  }
 0x29c   : > { %18471 = vmatprep.subr.bf16.mxu0 %v19737_v51  ;;  %v15499_v38 = vcombine.low %v5808_v39, %v5811_v11  ;;  %v16547_v8 = vld [vmem:[%s19972_s11 + $0x400] sm:$0x1]  ;;  %v5844_v39 = vrot.slane %v5842_v33, 4  ;;  %v5845_v11 = vrot.slane %v15440_v41, 5  ;;  %v15473_v32 = vrot.slane %v15441_v47, 9 }
 0x29d   : > { %v5822_v7 = vsel %vm19983_vm4, %v15469_v14, %v5821_v16  ;;  %v5852_v16 = vrot.slane %v15443_v17, 5  ;;  %v13094_v54 = vrot.slane %v16546_v35, 5  ;;  %v13097_v30 = vrot.slane %v16547_v8, 5  ;;  %v15446_v14 = vld [vmem:[%s19972_s11 + $0x1b4] sm:$0x1] }
 0x29e   : > { %v15450_v35 = vld [vmem:[%s19972_s11 + $0x1e4] sm:$0xe] }
 0x29f   : > { %17834 = vmatmul.mubr.bf16.gmra.mrb[24].mxu1 %v15406_v60  ;;  %18472 = vmatpush3.bf16.msra.mxu0 %v19737_v51  ;;  %v5817_v51 = vrot.slane %v15428_v37, 5  ;;  %v15436_v60 = vld [vmem:[%s19972_s11 + $0x15c] sm:$0xf]  ;;  %v15454_v8 = vld [vmem:[%s19972_s11 + $0x204] sm:$0xf] }
 0x2a0   : > { %17837 = vmatprep.mubr.bf16.mxu1 %v15407_v21  ;;  %18473 = vmatprep.subr.bf16.mxu0 %v19741_v53  ;;  %v19738_v21 = vld [vmem:[%s19972_s11 + $0x508] sm:$0xff]   ;;  %v5835_v59 = vrot.slane %v15436_v60, 5 }
 0x2a1   : > { %v5818_v58 = vsel %vm19983_vm4, %v5816_v9, %v5817_v51  ;;  %v15445_v9 = vld [vmem:[%s19972_s11 + $0x1b0] sm:$0xf]  ;;  %v19752_v51 = vld [vmem:[%s24527_s1 + $0x2e8] sm:$0xff]  }
 0x2a2   : > { %18442 = vmatmul.mubr.bf16.gmra.mrb[8].mxu0 %v19728_v6  ;;  %v15435_v6 = vld [vmem:[%s19972_s11 + $0x158] sm:$0xe]  ;;  %v5837_v18 = vrot.slane %v5835_v59, 4  ;;  %v15448_v60 = vld [vmem:[%s19972_s11 + $0x1cc] sm:$0xf] }
 0x2a3   : > { %18445 = vmatprep.mubr.bf16.mxu0 %v19730_v45  ;;  %18474 = vmatpush3.bf16.msra.mxu0 %v19741_v53  ;;  %v15432_v53 = vld [vmem:[%s19972_s11 + $0x13c] sm:$0xe]  ;;  %v15500_v45 = vcombine.low %v5815_v56, %v5818_v58  ;;  %v15471_v61 = vrot.slane %v15435_v6, 9  ;;  %v13096_v56 = vrot.slane %v13094_v54, 4  ;;  %v5856_v58 = vrot.slane %v15445_v9, 5 }
 0x2a4   : > { %18475 = vmatprep.subr.bf16.mxu0 %v19745_v12  ;;  %v15470_v43 = vrot.slane %v15432_v53, 9  ;;  %v5839_v3 = vsel %vm19983_vm4, %v5837_v18, %v5838_v25  ;;  %v16548_v53 = vld [vmem:[%s19972_s11 + $0x414] sm:$0xe] }
 0x2a5   : > { %v13098_v18 = vsel %vm19983_vm4, %v13096_v56, %v13097_v30  ;;  %v5858_v25 = vrot.slane %v5856_v58, 4  ;;  %v5877_v30 = vrot.slane %v15454_v8, 5 }
 0x2a6   : > { %v5829_v55 = vsel %vm19983_vm4, %v15470_v43, %v5828_v24  ;;  %v16551_v43 = vld [vmem:[%s19972_s11 + $0x430] sm:$0xe] }
 0x2a7   : > { %17838 = vmatmul.mubr.bf16.gmra.mrb[28].mxu1 %v15408_v5  ;;  %18476 = vmatpush3.bf16.msra.mxu0 %v19745_v12  ;;  %v15501_v12 = vcombine.low %v5822_v7, %v5825_v19  ;;  %v15438_v5 = vld [vmem:[%s19972_s11 + $0x174] sm:$0xe]  ;;  %v15502_v0 = vcombine.low %v5829_v55, %v5832_v28  ;;  %v16550_v19 = vld [vmem:[%s19972_s11 + $0x41c] sm:$0x1]  ;;  %v5866_v28 = vrot.slane %v15449_v49, 5  ;;  %v16595_v41 = vrot.slane %v16551_v43, 9 }
 0x2a8   : > { %17857 = vmatprep.mubr.bf16.mxu1 %v15497_v40  ;;  %18477 = vmatprep.subr.bf16.mxu0 %v19749_v42  ;;  %v19742_v40 = vld [vmem:[%s19972_s11 + $0x540] sm:$0xff]  }
 0x2aa   : > { %18446 = vmatmul.mubr.bf16.gmra.mrb[12].mxu0 %v19732_v57  ;;  %v5836_v57 = vsel %vm19983_vm4, %v15471_v61, %v5835_v59  ;;  %v15447_v59 = vld [vmem:[%s19972_s11 + $0x1c8] sm:$0xe]  ;;  %v13108_v61 = vrot.slane %v16552_v44, 5  ;;  %v15457_v44 = vld [vmem:[%s19972_s11 + $0x220] sm:$0xf] }
 0x2ab   : > { %18449 = vmatprep.mubr.bf16.mxu0 %v19734_v23  ;;  %18478 = vmatpush3.bf16.msra.mxu0 %v19749_v42  ;;  %v5849_v42 = vrot.slane %v15442_v62, 5  ;;  %v16545_v23 = vld [vmem:[%s19972_s11 + $0x3f8] sm:$0xe]  ;;  %v16553_v62 = vld [vmem:[%s19972_s11 + $0x438] sm:$0x1]  ;;  %v15475_v55 = vrot.slane %v15447_v59, 9 }
 0x2ac   : > { %18479 = vmatprep.subr.bf16.mxu0 %v19750_v13  ;;  %v13111_v17 = vrot.slane %v16553_v62, 5  ;;  %v13109_v9 = vsel %vm19983_vm4, %v16595_v41, %v13108_v61 }
 0x2ad   : > { %v5851_v37 = vrot.slane %v5849_v42, 4 }
 0x2af   : > { %17858 = vmatmul.mubr.bf16.vlgmr.msra.gmra.mrb[0].mxu1 %v15498_v63  ;;  %18480 = vmatpush3.bf16.msra.mxu0 %v19750_v13  ;;  %v15472_v13 = vrot.slane %v15438_v5, 9  ;;  %v15503_v63 = vcombine.low %v5836_v57, %v5839_v3  ;;  %v5853_v24 = vsel %vm19983_vm4, %v5851_v37, %v5852_v16  ;;  %v15451_v5 = vld [vmem:[%s19972_s11 + $0x1e8] sm:$0xf]  ;;  %v15452_v57 = vld [vmem:[%s19972_s11 + $0x1ec] sm:$0x1]  ;;  %v13110_v3 = vrot.slane %v13108_v61, 4 }
 0x2b0   : > { %17890 = vmatpush3.bf16.msra.mxu1 %v23626_v29  ;;  %17861 = vmatprep.mubr.bf16.mxu1 %v15499_v38  ;;  %v19743_v29 = vld [vmem:[%s24527_s1 + $0x2d0] sm:$0xff]   ;;  %v16593_v38 = vrot.slane %v16545_v23, 9  ;;  %v5870_v23 = vrot.slane %v15451_v5, 5  ;;  %v16554_v16 = vld [vmem:[%s19972_s11 + $0x44c] sm:$0xe] }
 0x2b1   : > { %17891 = vmatprep.subr.bf16.mxu1 %v19739_v27  ;;  %18513 = vmatprep.subr.bf16.mxu0 %v23724_v31  ;;  %v5843_v4 = vsel %vm19983_vm4, %v15472_v13, %v5842_v33  ;;  %v19748_v33 = vld [vmem:[%s19972_s11 + $0x594] sm:$0xff]  }
 0x2b2   : > { %18450 = vmatmul.mubr.bf16.gmra.mrb[16].mxu0 %v19736_v46  ;;  %v5846_v46 = vsel %vm19983_vm4, %v5844_v39, %v5845_v11  ;;  %v13095_v2 = vsel %vm19983_vm4, %v16593_v38, %v13094_v54  ;;  %v16555_v39 = vld [vmem:[%s19972_s11 + $0x450] sm:$0xf]  ;;  %v16558_v54 = vld [vmem:[%s19972_s11 + $0x46c] sm:$0xf]  ;;  %v5873_v38 = vrot.slane %v15452_v57, 5 }
 0x2b3   : > { %18453 = vmatprep.mubr.bf16.mxu0 %v19738_v21  ;;  %v5850_v21 = vsel %vm19983_vm4, %v15473_v32, %v5849_v42  ;;  %v15504_v6 = vcombine.low %v5843_v4, %v5846_v46  ;;  %v19756_v42 = vld [vmem:[%s24527_s1 + $0x2f8] sm:$0xff]   ;;  %v16556_v46 = vld [vmem:[%s19972_s11 + $0x454] sm:$0x1]  ;;  %v15461_v57 = vld [vmem:[%s19972_s11 + $0x240] sm:$0x1] }
 0x2b4   : > { %17892 = vmatpush3.bf16.msra.mxu1 %v19739_v27  ;;  %v15444_v27 = vld [vmem:[%s19972_s11 + $0x1ac] sm:$0xe]  ;;  %v15505_v36 = vcombine.low %v5850_v21, %v5853_v24  ;;  %v13122_v21 = vrot.slane %v16558_v54, 5 }
 0x2b5   : > { %17893 = vmatprep.subr.bf16.mxu1 %v19743_v29  ;;  %v15474_v7 = vrot.slane %v15444_v27, 9  ;;  %v13115_v27 = vrot.slane %v16555_v39, 5 }
 0x2b6   : > { %v13124_v62 = vrot.slane %v13122_v21, 4 }
 0x2b7   : > { %17862 = vmatmul.mubr.bf16.gmra.mrb[4].mxu1 %v15500_v45  ;;  %v5863_v45 = vrot.slane %v15448_v60, 5  ;;  %v16596_v60 = vrot.slane %v16554_v16, 9  ;;  %v13117_v43 = vrot.slane %v13115_v27, 4 }
 0x2b8   : > { %17865 = vmatprep.mubr.bf16.mxu1 %v15501_v12  ;;  %17894 = vmatpush3.bf16.msra.mxu1 %v19743_v29  ;;  %v13101_v29 = vrot.slane %v16549_v22, 5  ;;  %v5859_v12 = vrot.slane %v15446_v14, 5  ;;  %v15453_v14 = vld [vmem:[%s19972_s11 + $0x200] sm:$0xe]  ;;  %v15455_v22 = vld [vmem:[%s19972_s11 + $0x208] sm:$0x1] }
 0x2b9   : > { %17895 = vmatprep.subr.bf16.mxu1 %v19747_v10  ;;  %v5865_v47 = vrot.slane %v5863_v45, 4  ;;  %v5864_v37 = vsel %vm19983_vm4, %v15475_v55, %v5863_v45  ;;  %v5880_v59 = vrot.slane %v15455_v22, 5  ;;  %v13116_v5 = vsel %vm19983_vm4, %v16596_v60, %v13115_v27  ;;  %v23882_v27 = vld [vmem:[%s19972_s11 + $0xb8] sm:$0xf]  ;;  %v23887_v60 = vld [vmem:[%s19972_s11 + $0x4c0] sm:$0xf] }
 0x2ba   : > { %18454 = vmatmul.mubr.bf16.gmra.mrb[20].mxu0 %v19740_v48  ;;  %v13104_v48 = vrot.slane %v16550_v19, 5  ;;  %v5860_v13 = vsel %vm19983_vm4, %v5858_v25, %v5859_v12  ;;  %v15477_v19 = vrot.slane %v15453_v14, 9  ;;  %v5884_v25 = vrot.slane %v15457_v44, 5 }
 0x2bb   : > { %18457 = vmatprep.mubr.bf16.mxu0 %v19742_v40  ;;  %v13103_v40 = vrot.slane %v13101_v29, 4 }
 0x2bc   : > { %17896 = vmatpush3.bf16.msra.mxu1 %v19747_v10  ;;  %v16594_v10 = vrot.slane %v16548_v53, 9  ;;  %v16559_v53 = vld [vmem:[%s19972_s11 + $0x470] sm:$0x1]  ;;  %v5886_v8 = vrot.slane %v5884_v25, 4 }
 0x2bd   : > { %17897 = vmatprep.subr.bf16.mxu1 %v19751_v26  ;;  %v13105_v32 = vsel %vm19983_vm4, %v13103_v40, %v13104_v48  ;;  %v13125_v61 = vrot.slane %v16559_v53, 5  ;;  %v19755_v48 = vld [vmem:[%s24527_s1 + $0x608] sm:$0xff]  }
 0x2be   : > { %v13102_v11 = vsel %vm19983_vm4, %v16594_v10, %v13101_v29  ;;  %v5879_v29 = vrot.slane %v5877_v30, 4  ;;  %v16561_v10 = vld [vmem:[%s19972_s11 + $0x488] sm:$0xf] }
 0x2bf   : > { %17866 = vmatmul.mubr.bf16.gmra.mrb[8].mxu1 %v15502_v0  ;;  %v5857_v0 = vsel %vm19983_vm4, %v15474_v7, %v5856_v58  ;;  %v16626_v24 = vcombine.low %v13102_v11, %v13105_v32  ;;  %v16557_v58 = vld [vmem:[%s19972_s11 + $0x468] sm:$0xe]  ;;  %v16563_v11 = vld [vmem:[%s19972_s11 + $0x4a0] sm:$0xe]  ;;  %v16565_v32 = vld [vmem:[%s19972_s11 + $0x4a8] sm:$0x1] }
 0x2c0   : > { %17869 = vmatprep.mubr.bf16.mxu1 %v15503_v63  ;;  %17898 = vmatpush3.bf16.msra.mxu1 %v19751_v26  ;;  %v16625_v26 = vcombine.low %v13095_v2, %v13098_v18  ;;  %v15476_v63 = vrot.slane %v15450_v35, 9  ;;  %v15506_v4 = vcombine.low %v5857_v0, %v5860_v13  ;;  %v15460_v2 = vld [vmem:[%s19972_s11 + $0x23c] sm:$0xf]  ;;  %v16597_v12 = vrot.slane %v16557_v58, 9  ;;  %v15458_v18 = vld [vmem:[%s19972_s11 + $0x224] sm:$0x1] }
 0x2c1   : > { %17899 = vmatprep.subr.bf16.mxu1 %v19752_v51  ;;  %v5881_v40 = vsel %vm19983_vm4, %v5879_v29, %v5880_v59  ;;  %v5891_v55 = vrot.slane %v15460_v2, 5  ;;  %v15459_v35 = vld [vmem:[%s19972_s11 + $0x238] sm:$0xe]  ;;  %v16562_v0 = vld [vmem:[%s19972_s11 + $0x48c] sm:$0x1]  ;;  %v13129_v13 = vrot.slane %v16561_v10, 5 }
 0x2c2   : > { %18458 = vmatmul.mubr.bf16.gmra.mrb[24].mxu0 %v19744_v1  ;;  %v5867_v1 = vsel %vm19983_vm4, %v5865_v47, %v5866_v28  ;;  %v5871_v49 = vsel %vm19983_vm4, %v15476_v63, %v5870_v23  ;;  %v16564_v28 = vld [vmem:[%s19972_s11 + $0x4a4] sm:$0xf]  ;;  %v15479_v54 = vrot.slane %v15459_v35, 9  ;;  %v5894_v63 = vrot.slane %v15461_v57, 5  ;;  %v15464_v58 = vld [vmem:[%s19972_s11 + $0x25c] sm:$0x1] }
 0x2c3   : > { %18461 = vmatprep.mubr.bf16.mxu0 %v19746_v50  ;;  %v5872_v50 = vrot.slane %v5870_v23, 4  ;;  %v15507_v56 = vcombine.low %v5864_v37, %v5867_v1  ;;  %v13126_v23 = vsel %vm19983_vm4, %v13124_v62, %v13125_v61  ;;  %v13136_v37 = vrot.slane %v16564_v28, 5  ;;  %v23902_v59 = vld [vmem:[%s19972_s11 + $0x4dc] sm:$0xf]  ;;  %v19759_v2 = vld [vmem:[%s24527_s1 + $0x620] sm:$0xff]  }
 0x2c4   : > { %17900 = vmatpush3.bf16.msra.mxu1 %v19752_v51  ;;  %v13112_v51 = vsel %vm19983_vm4, %v13110_v3, %v13111_v17  ;;  %v5887_v17 = vrot.slane %v15458_v18, 5  ;;  %v13123_v3 = vsel %vm19983_vm4, %v16597_v12, %v13122_v21  ;;  %v5893_v1 = vrot.slane %v5891_v55, 4  ;;  %v19758_v21 = vld [vmem:[%s24527_s1 + $0x618] sm:$0xff]   ;;  %v23918_v10 = vld [vmem:[%s19972_s11 + $0xd4] sm:$0xf] }
 0x2c5   : > { %17901 = vmatprep.subr.bf16.mxu1 %v19754_v34  ;;  %v16627_v7 = vcombine.low %v13109_v9, %v13112_v51  ;;  %v5874_v45 = vsel %vm19983_vm4, %v5872_v50, %v5873_v38  ;;  %v23877_v38 = vld [vmem:[%s19972_s11 + $0x258] sm:$0xf]  ;;  %v13132_v50 = vrot.slane %v16562_v0, 5  ;;  %v13131_v22 = vrot.slane %v13129_v13, 4  ;;  %v23926_v35 = vld [vmem:[%s19972_s11 + $0xf0] sm:$0xf] }
 0x2c6   : > { %v15508_v41 = vcombine.low %v5871_v49, %v5874_v45  ;;  %v5888_v14 = vsel %vm19983_vm4, %v5886_v8, %v5887_v17  ;;  %v5898_v53 = vrot.slane %v23877_v38, 5  ;;  %v5892_v44 = vsel %vm19983_vm4, %v15479_v54, %v5891_v55  ;;  %v16571_v55 = vld [vmem:[%s19972_s11 + $0x4e0] sm:$0x1]  ;;  %v15524_v8 = vld [vmem:[%s19972_s11 + $0xd0] sm:$0x8]  ;;  %v19760_v0 = vld [vmem:[%s24527_s1 + $0x628] sm:$0xff]  }
 0x2c7   : > { %17870 = vmatmul.mubr.bf16.gmra.mrb[12].mxu1 %v15504_v6  ;;  %v23839_v6 = vld [vmem:[%s24527_s1 + $0x300] sm:$0xff]   ;;  %v6387_v29 = vrot.slane %v23882_v27, 7  ;;  %v13133_v12 = vsel %vm19983_vm4, %v13131_v22, %v13132_v50  ;;  %v5901_v18 = vrot.slane %v15464_v58, 5  ;;  %v13150_v28 = vrot.slane %v23902_v59, 5  ;;  %v16576_v38 = vld [vmem:[%s19972_s11 + $0x514] sm:$0xf] }
 0x2c8   : > { %17873 = vmatprep.mubr.bf16.mxu1 %v15505_v36  ;;  %17902 = vmatpush3.bf16.msra.mxu1 %v19754_v34  ;;  %v13118_v34 = vrot.slane %v16556_v46, 5  ;;  %v15456_v36 = vld [vmem:[%s19972_s11 + $0x21c] sm:$0xe]  ;;  %v13139_v46 = vrot.slane %v16565_v32, 5  ;;  %v15526_v32 = vld [vmem:[%s19972_s11 + $0xd8] sm:$0x7] }
 0x2c9   : > { %17903 = vmatprep.subr.bf16.mxu1 %v19756_v42  ;;  %v15478_v47 = vrot.slane %v15456_v36, 9  ;;  %v15523_v36 = vld [vmem:[%s19972_s11 + $0xbc] sm:$0x7]  ;;  %v13152_v54 = vrot.slane %v13150_v28, 4  ;;  %v15570_v50 = vrot.slane %v15524_v8, 11 }
 0x2ca   : > { %18462 = vmatmul.mubr.bf16.gmra.mrb[28].mxu0 %v19748_v33  ;;  %v5878_v33 = vsel %vm19983_vm4, %v15477_v19, %v5877_v30  ;;  %v16629_v30 = vcombine.low %v13123_v3, %v13126_v23  ;;  %v16566_v19 = vld [vmem:[%s19972_s11 + $0x4bc] sm:$0xe]  ;;  %v6390_v17 = vrot.slane %v15523_v36, 7  ;;  %v15529_v27 = vld [vmem:[%s19972_s11 + $0xf4] sm:$0x7] }
 0x2cb   : > { %18481 = vmatprep.mubr.bf16.mxu0 %v16625_v26  ;;  %v16560_v26 = vld [vmem:[%s19972_s11 + $0x484] sm:$0xe]  ;;  %v15509_v39 = vcombine.low %v5878_v33, %v5881_v40  ;;  %v5885_v9 = vsel %vm19983_vm4, %v15478_v47, %v5884_v25  ;;  %v16568_v25 = vld [vmem:[%s19972_s11 + $0x4c4] sm:$0x1]  ;;  %v5900_v33 = vrot.slane %v5898_v53, 4  ;;  %v6389_v47 = vrot.slane %v6387_v29, 4 }
 0x2cc   : > { %17904 = vmatpush3.bf16.msra.mxu1 %v19756_v42  ;;  %v13119_v42 = vsel %vm19983_vm4, %v13117_v43, %v13118_v34  ;;  %v16598_v51 = vrot.slane %v16560_v26, 9  ;;  %v15510_v49 = vcombine.low %v5885_v9, %v5888_v14  ;;  %v13143_v43 = vrot.slane %v23887_v60, 5  ;;  %v15521_v34 = vld [vmem:[%s19972_s11 + $0xb4] sm:$0x8]  ;;  %v16569_v40 = vld [vmem:[%s19972_s11 + $0x4d8] sm:$0xe] }
 0x2cd   : > { %18561 = vmatprep.subr.bf16.mxu1 %v23839_v6  ;;  %v16628_v16 = vcombine.low %v13116_v5, %v13119_v42  ;;  %v15569_v42 = vrot.slane %v15521_v34, 11  ;;  %v13146_v23 = vrot.slane %v16568_v25, 5  ;;  %v6394_v26 = vrot.slane %v23918_v10, 7  ;;  %v16574_v58 = vld [vmem:[%s19972_s11 + $0x4fc] sm:$0x1] }
 0x2ce   : > { %v13130_v45 = vsel %vm19983_vm4, %v16598_v51, %v13129_v13  ;;  %v13145_v3 = vrot.slane %v13143_v43, 4  ;;  %v6391_v51 = vsel %vm19989_vm5, %v6389_v47, %v6390_v17  ;;  %v15530_v10 = vld [vmem:[%s19972_s11 + $0x108] sm:$0x8]  ;;  %v19762_v17 = vld [vmem:[%s24527_s1 + $0x638] sm:$0xff]   ;;  %v16582_v8 = vld [vmem:[%s19972_s11 + $0x54c] sm:$0xf] }
 0x2cf   : > { %17874 = vmatmul.mubr.bf16.gmra.mrb[16].mxu1 %v15506_v4  ;;  %v16599_v4 = vrot.slane %v16563_v11, 9  ;;  %v16630_v57 = vcombine.low %v13130_v45, %v13133_v12  ;;  %v13153_v11 = vrot.slane %v16571_v55, 5  ;;  %v6388_v9 = vsel %vm19989_vm5, %v15569_v42, %v6387_v29  ;;  %v16577_v45 = vld [vmem:[%s19972_s11 + $0x518] sm:$0x1]  ;;  %v23975_v55 = vld [vmem:[%s19972_s11 + $0x530] sm:$0xf] }
 0x2d0   : > { %17877 = vmatprep.mubr.bf16.mxu1 %v15507_v56  ;;  %v15462_v56 = vld [vmem:[%s19972_s11 + $0x254] sm:$0xe]  ;;  %v13147_v14 = vsel %vm19983_vm4, %v13145_v3, %v13146_v23  ;;  %v6396_v22 = vrot.slane %v6394_v26, 4  ;;  %v6395_v36 = vsel %vm19989_vm5, %v15570_v50, %v6394_v26  ;;  %v15532_v42 = vld [vmem:[%s19972_s11 + $0x110] sm:$0x7] }
 0x2d1   : > { %v13137_v62 = vsel %vm19983_vm4, %v16599_v4, %v13136_v37  ;;  %v15480_v61 = vrot.slane %v15462_v56, 9  ;;  %v6397_v4 = vrot.slane %v15526_v32, 7  ;;  %v13154_v29 = vsel %vm19983_vm4, %v13152_v54, %v13153_v11  ;;  %v15533_v3 = vld [vmem:[%s19972_s11 + $0x124] sm:$0x8]  ;;  %v15535_v23 = vld [vmem:[%s19972_s11 + $0x12c] sm:$0x7] }
 0x2d2   : > { %18482 = vmatmul.mubr.bf16.vlgmr.msra.gmra.mrb[0].mxu0 %v16626_v24  ;;  %v13138_v24 = vrot.slane %v13136_v37, 4  ;;  %v23935_v37 = vld [vmem:[%s19972_s11 + $0x4f8] sm:$0xf]  ;;  %v13171_v11 = vrot.slane %v23975_v55, 5  ;;  %v16580_v54 = vld [vmem:[%s19972_s11 + $0x534] sm:$0x1] }
 0x2d3   : > { %18485 = vmatprep.mubr.bf16.mxu0 %v16627_v7  ;;  %18514 = vmatpush3.bf16.msra.mxu0 %v23724_v31  ;;  %v19757_v31 = vld [vmem:[%s24527_s1 + $0x610] sm:$0xff]   ;;  %v5895_v7 = vsel %vm19983_vm4, %v5893_v1, %v5894_v63  ;;  %v15527_v1 = vld [vmem:[%s19972_s11 + $0xec] sm:$0x8]  ;;  %v6401_v63 = vrot.slane %v23926_v35, 7  ;;  %v13157_v60 = vrot.slane %v23935_v37, 5 }
 0x2d4   : > { %18515 = vmatprep.subr.bf16.mxu0 %v19755_v48  ;;  %v13140_v5 = vsel %vm19983_vm4, %v13138_v24, %v13139_v46  ;;  %v16572_v46 = vld [vmem:[%s19972_s11 + $0x4f4] sm:$0xe] }
 0x2d5   : > { %v16631_v13 = vcombine.low %v13137_v62, %v13140_v5  ;;  %v6403_v59 = vrot.slane %v6401_v63, 4  ;;  %v16602_v12 = vrot.slane %v16572_v46, 9  ;;  %v23969_v62 = vld [vmem:[%s19972_s11 + $0x128] sm:$0xf]  ;;  %v13174_v46 = vrot.slane %v16580_v54, 5 }
 0x2d6   : > { %v6415_v47 = vrot.slane %v23969_v62, 7 }
 0x2d7   : > { %17878 = vmatmul.mubr.bf16.gmra.mrb[20].mxu1 %v15508_v41  ;;  %18516 = vmatpush3.bf16.msra.mxu0 %v19755_v48  ;;  %v15511_v48 = vcombine.low %v5892_v44, %v5895_v7  ;;  %v16600_v41 = vrot.slane %v16566_v19, 9  ;;  %v16575_v44 = vld [vmem:[%s19972_s11 + $0x510] sm:$0xe]  ;;  %v13164_v7 = vrot.slane %v16576_v38, 5  ;;  %v15601_v19 = vcombine.low %v6388_v9, %v6391_v51  ;;  %v16583_v9 = vld [vmem:[%s19972_s11 + $0x550] sm:$0x1] }
 0x2d8   : > { %17881 = vmatprep.mubr.bf16.mxu1 %v15509_v39  ;;  %18517 = vmatprep.subr.bf16.mxu0 %v19757_v31  ;;  %v16601_v39 = vrot.slane %v16569_v40, 9  ;;  %v16603_v25 = vrot.slane %v16575_v44, 9  ;;  %v6417_v38 = vrot.slane %v6415_v47, 4  ;;  %v13178_v51 = vrot.slane %v16582_v8, 5 }
 0x2d9   : > { %v13166_v5 = vrot.slane %v13164_v7, 4 }
 0x2da   : > { %18486 = vmatmul.mubr.bf16.gmra.mrb[4].mxu0 %v16628_v16  ;;  %v5902_v16 = vsel %vm19983_vm4, %v5900_v33, %v5901_v18  ;;  %v13151_v56 = vsel %vm19983_vm4, %v16601_v39, %v13150_v28  ;;  %v13160_v18 = vrot.slane %v16574_v58, 5  ;;  %v13167_v33 = vrot.slane %v16577_v45, 5  ;;  %v16578_v39 = vld [vmem:[%s19972_s11 + $0x52c] sm:$0xe] }
 0x2db   : > { %18489 = vmatprep.mubr.bf16.mxu0 %v16629_v30  ;;  %18518 = vmatpush3.bf16.msra.mxu0 %v19757_v31  ;;  %v5899_v31 = vsel %vm19983_vm4, %v15480_v61, %v5898_v53  ;;  %v13144_v30 = vsel %vm19983_vm4, %v16600_v41, %v13143_v43  ;;  %v15571_v53 = vrot.slane %v15527_v1, 11  ;;  %v15531_v43 = vld [vmem:[%s19972_s11 + $0x10c] sm:$0xf]  ;;  %v13159_v61 = vrot.slane %v13157_v60, 4  ;;  %v16581_v1 = vld [vmem:[%s19972_s11 + $0x548] sm:$0xe] }
 0x2dc   : > { %18519 = vmatprep.subr.bf16.mxu0 %v19758_v21  ;;  %v15512_v24 = vcombine.low %v5899_v31, %v5902_v16  ;;  %v16632_v34 = vcombine.low %v13144_v30, %v13147_v14  ;;  %v6408_v40 = vrot.slane %v15531_v43, 7  ;;  %v13168_v37 = vsel %vm19983_vm4, %v13166_v5, %v13167_v33  ;;  %v19764_v45 = vld [vmem:[%s24527_s1 + $0x308] sm:$0xff]   ;;  %v16584_v5 = vld [vmem:[%s19972_s11 + $0x564] sm:$0xe] }
 0x2dd   : > { %v6402_v28 = vsel %vm19989_vm5, %v15571_v53, %v6401_v63  ;;  %v13161_v26 = vsel %vm19983_vm4, %v13159_v61, %v13160_v18  ;;  %v6411_v16 = vrot.slane %v15532_v42, 7  ;;  %v15573_v63 = vrot.slane %v15533_v3, 11  ;;  %v24011_v53 = vld [vmem:[%s19972_s11 + $0x568] sm:$0xf]  ;;  %v15541_v61 = vld [vmem:[%s19972_s11 + $0x164] sm:$0x7] }
 0x2de   : > { %v6410_v31 = vrot.slane %v6408_v40, 4  ;;  %v6418_v30 = vrot.slane %v15535_v23, 7  ;;  %v13181_v58 = vrot.slane %v16583_v9, 5  ;;  %v16586_v33 = vld [vmem:[%s19972_s11 + $0x56c] sm:$0x1]  ;;  %v16606_v8 = vrot.slane %v16584_v5, 9 }
 0x2df   : > { %17882 = vmatmul.mubr.bf16.gmra.mrb[24].mxu1 %v15510_v49  ;;  %18520 = vmatpush3.bf16.msra.mxu0 %v19758_v21  ;;  %v19761_v21 = vld [vmem:[%s24527_s1 + $0x630] sm:$0xff]   ;;  %v6404_v49 = vrot.slane %v15529_v27, 7  ;;  %v15537_v27 = vld [vmem:[%s19972_s11 + $0x144] sm:$0xf]  ;;  %v6416_v44 = vsel %vm19989_vm5, %v15573_v63, %v6415_v47  ;;  %v15543_v42 = vld [vmem:[%s19972_s11 + $0x17c] sm:$0xf] }
 0x2e0   : > { %17885 = vmatprep.mubr.bf16.mxu1 %v15511_v48  ;;  %18521 = vmatprep.subr.bf16.mxu0 %v19759_v2  ;;  %v16633_v48 = vcombine.low %v13151_v56, %v13154_v29  ;;  %v16605_v56 = vrot.slane %v16581_v1, 9  ;;  %v15536_v29 = vld [vmem:[%s19972_s11 + $0x140] sm:$0x8]  ;;  %v19765_v47 = vld [vmem:[%s24527_s1 + $0x310] sm:$0xff]   ;;  %v16589_v3 = vld [vmem:[%s19972_s11 + $0x588] sm:$0x1] }
 0x2e1   : > { %v6405_v41 = vsel %vm19989_vm5, %v6403_v59, %v6404_v49  ;;  %v15538_v59 = vld [vmem:[%s19972_s11 + $0x148] sm:$0x7]  ;;  %v6422_v49 = vrot.slane %v15537_v27, 7  ;;  %v13195_v63 = vrot.slane %v16589_v3, 5  ;;  %v16650_v27 = vld [vmem:[%s19972_s11 + $0x404] sm:$0xf] }
 0x2e2   : > { %18490 = vmatmul.mubr.bf16.gmra.mrb[8].mxu0 %v16630_v57  ;;  %v13158_v57 = vsel %vm19983_vm4, %v16602_v12, %v13157_v60  ;;  %v15603_v32 = vcombine.low %v6402_v28, %v6405_v41  ;;  %v24006_v60 = vld [vmem:[%s19972_s11 + $0x160] sm:$0xf] }
 0x2e3   : > { %18493 = vmatprep.mubr.bf16.mxu0 %v16631_v13  ;;  %18522 = vmatpush3.bf16.msra.mxu0 %v19759_v2  ;;  %v6398_v2 = vsel %vm19989_vm5, %v6396_v22, %v6397_v4  ;;  %v15572_v13 = vrot.slane %v15530_v10, 11  ;;  %v16634_v50 = vcombine.low %v13158_v57, %v13161_v26  ;;  %v16604_v22 = vrot.slane %v16578_v39, 9  ;;  %v16587_v57 = vld [vmem:[%s19972_s11 + $0x580] sm:$0xe] }
 0x2e4   : > { %18523 = vmatprep.subr.bf16.mxu0 %v19760_v0  ;;  %v15602_v35 = vcombine.low %v6395_v36, %v6398_v2  ;;  %v13173_v4 = vrot.slane %v13171_v11, 4  ;;  %v6429_v43 = vrot.slane %v24006_v60, 7  ;;  %v13185_v2 = vrot.slane %v24011_v53, 5  ;;  %v15545_v60 = vld [vmem:[%s19972_s11 + $0x194] sm:$0x8] }
 0x2e5   : > { %v6409_v14 = vsel %vm19989_vm5, %v15572_v13, %v6408_v40  ;;  %v13172_v12 = vsel %vm19983_vm4, %v16604_v22, %v13171_v11  ;;  %v15574_v10 = vrot.slane %v15536_v29, 11  ;;  %v6424_v55 = vrot.slane %v6422_v49, 4  ;;  %v24048_v13 = vld [vmem:[%s19972_s11 + $0x198] sm:$0xf]  ;;  %v16590_v53 = vld [vmem:[%s19972_s11 + $0x59c] sm:$0xe] }
 0x2e6   : > { %v13175_v62 = vsel %vm19983_vm4, %v13173_v4, %v13174_v46  ;;  %v13187_v26 = vrot.slane %v13185_v2, 4  ;;  %v16607_v54 = vrot.slane %v16587_v57, 9  ;;  %v15551_v57 = vld [vmem:[%s19972_s11 + $0x1cc] sm:$0x8] }
 0x2e7   : > { %17886 = vmatmul.mubr.bf16.gmra.mrb[28].mxu1 %v15512_v24  ;;  %18524 = vmatpush3.bf16.msra.mxu0 %v19760_v0  ;;  %v13165_v0 = vsel %vm19983_vm4, %v16603_v25, %v13164_v7  ;;  %v6412_v24 = vsel %vm19989_vm5, %v6410_v31, %v6411_v16  ;;  %v6419_v7 = vsel %vm19989_vm5, %v6417_v38, %v6418_v30  ;;  %v24054_v31 = vld [vmem:[%s19972_s11 + $0x5a0] sm:$0xf] }
 0x2e8   : > { %17905 = vmatprep.mubr.bf16.mxu1 %v15601_v19  ;;  %18525 = vmatprep.subr.bf16.mxu0 %v19761_v21  ;;  %v13180_v19 = vrot.slane %v13178_v51, 4  ;;  %v15604_v36 = vcombine.low %v6409_v14, %v6412_v24  ;;  %v15605_v18 = vcombine.low %v6416_v44, %v6419_v7  ;;  %v13179_v25 = vsel %vm19983_vm4, %v16605_v56, %v13178_v51  ;;  %v15544_v38 = vld [vmem:[%s19972_s11 + $0x180] sm:$0x7]  ;;  %v19766_v51 = vld [vmem:[%s24527_s1 + $0x318] sm:$0xff]   ;;  %v16592_v44 = vld [vmem:[%s19972_s11 + $0x5a4] sm:$0x1] }
 0x2e9   : > { %v16636_v23 = vcombine.low %v13172_v12, %v13175_v62  ;;  %v6423_v11 = vsel %vm19989_vm5, %v15574_v10, %v6422_v49  ;;  %v13186_v14 = vsel %vm19983_vm4, %v16606_v8, %v13185_v2  ;;  %v13199_v46 = vrot.slane %v24054_v31, 5  ;;  %v16651_v12 = vld [vmem:[%s19972_s11 + $0x408] sm:$0x3]  ;;  %v19767_v62 = vld [vmem:[%s24527_s1 + $0x320] sm:$0xff]   ;;  %v24090_v10 = vld [vmem:[%s19972_s11 + $0x1d0] sm:$0xf] }
 0x2ea   : > { %18494 = vmatmul.mubr.bf16.gmra.mrb[12].mxu0 %v16632_v34  ;;  %v24026_v34 = vld [vmem:[%s19972_s11 + $0x584] sm:$0xf]  ;;  %v13182_v40 = vsel %vm19983_vm4, %v13180_v19, %v13181_v58  ;;  %v6439_v58 = vrot.slane %v15544_v38, 7  ;;  %v13688_v49 = vrot.slane %v16650_v27, 6  ;;  %v6457_v3 = vrot.slane %v24090_v10, 7  ;;  %v19768_v8 = vld [vmem:[%s24527_s1 + $0x328] sm:$0xff]  }
 0x2eb   : > { %18497 = vmatprep.mubr.bf16.mxu0 %v16633_v48  ;;  %18526 = vmatpush3.bf16.msra.mxu0 %v19761_v21  ;;  %v16635_v21 = vcombine.low %v13165_v0, %v13168_v37  ;;  %v6425_v48 = vrot.slane %v15538_v59, 7  ;;  %v13192_v41 = vrot.slane %v24026_v34, 5  ;;  %v13188_v0 = vrot.slane %v16586_v33, 5  ;;  %v16649_v59 = vld [vmem:[%s19972_s11 + $0x400] sm:$0xc] }
 0x2ec   : > { %18527 = vmatprep.subr.bf16.mxu0 %v19762_v17  ;;  %v16637_v39 = vcombine.low %v13179_v25, %v13182_v40  ;;  %v6436_v37 = vrot.slane %v15543_v42, 7  ;;  %v13202_v25 = vrot.slane %v16592_v44, 5  ;;  %v16697_v33 = vrot.slane %v16649_v59, 10  ;;  %v15548_v40 = vld [vmem:[%s19972_s11 + $0x1b0] sm:$0x8] }
 0x2ed   : > { %v6426_v16 = vsel %vm19989_vm5, %v6424_v55, %v6425_v48  ;;  %v13194_v1 = vrot.slane %v13192_v41, 4  ;;  %v13189_v22 = vsel %vm19983_vm4, %v13187_v26, %v13188_v0  ;;  %v13193_v19 = vsel %vm19983_vm4, %v16607_v54, %v13192_v41  ;;  %v15550_v42 = vld [vmem:[%s19972_s11 + $0x1b8] sm:$0x7]  ;;  %v16654_v54 = vld [vmem:[%s19972_s11 + $0x424] sm:$0x3] }
 0x2ee   : > { %v15606_v24 = vcombine.low %v6423_v11, %v6426_v16  ;;  %v6438_v56 = vrot.slane %v6436_v37, 4  ;;  %v13691_v41 = vrot.slane %v16651_v12, 6  ;;  %v16652_v11 = vld [vmem:[%s19972_s11 + $0x41c] sm:$0xc]  ;;  %v6453_v16 = vrot.slane %v15550_v42, 7 }
 0x2ef   : > { %17906 = vmatmul.mubr.bf16.vlgmr.msra.gmra.mrb[0].mxu1 %v15602_v35  ;;  %18528 = vmatpush3.bf16.msra.mxu0 %v19762_v17  ;;  %v6431_v17 = vrot.slane %v6429_v43, 4  ;;  %v6432_v35 = vrot.slane %v15541_v61, 7  ;;  %v13196_v29 = vsel %vm19983_vm4, %v13194_v1, %v13195_v63  ;;  %v16608_v61 = vrot.slane %v16590_v53, 9  ;;  %v16655_v27 = vld [vmem:[%s19972_s11 + $0x438] sm:$0xc] }
 0x2f0   : > { %18569 = vmatpush3.bf16.msra.mxu1 %v23839_v6  ;;  %17909 = vmatprep.mubr.bf16.mxu1 %v15603_v32  ;;  %v15539_v6 = vld [vmem:[%s19972_s11 + $0x15c] sm:$0x8]  ;;  %v15542_v32 = vld [vmem:[%s19972_s11 + $0x178] sm:$0x8]  ;;  %v16639_v48 = vcombine.low %v13193_v19, %v13196_v29  ;;  %v6440_v5 = vsel %vm19989_vm5, %v6438_v56, %v6439_v58  ;;  %v15579_v38 = vrot.slane %v15551_v57, 11  ;;  %v16699_v29 = vrot.slane %v16655_v27, 10 }
 0x2f1   : > { %18562 = vmatprep.subr.bf16.mxu1 %v19764_v45  ;;  %v15575_v28 = vrot.slane %v15539_v6, 11  ;;  %v6433_v9 = vsel %vm19989_vm5, %v6431_v17, %v6432_v35  ;;  %v15576_v4 = vrot.slane %v15542_v32, 11  ;;  %v16638_v6 = vcombine.low %v13186_v14, %v13189_v22  ;;  %v15553_v32 = vld [vmem:[%s19972_s11 + $0x1d4] sm:$0x7]  ;;  %v16657_v14 = vld [vmem:[%s19972_s11 + $0x440] sm:$0x3] }
 0x2f2   : > { %18498 = vmatmul.mubr.bf16.gmra.mrb[16].mxu0 %v16634_v50  ;;  %v6443_v50 = vrot.slane %v24048_v13, 7  ;;  %v13200_v0 = vsel %vm19983_vm4, %v16608_v61, %v13199_v46  ;;  %v19769_v22 = vld [vmem:[%s24527_s1 + $0x330] sm:$0xff]   ;;  %v15554_v44 = vld [vmem:[%s19972_s11 + $0x1e8] sm:$0x8]  ;;  %v24139_v19 = vld [vmem:[%s19972_s11 + $0x458] sm:$0xf] }
 0x2f3   : > { %18501 = vmatprep.mubr.bf16.mxu0 %v16635_v21  ;;  %v6430_v30 = vsel %vm19989_vm5, %v15575_v28, %v6429_v43  ;;  %v15547_v21 = vld [vmem:[%s19972_s11 + $0x19c] sm:$0x7]  ;;  %v15577_v43 = vrot.slane %v15545_v60, 11  ;;  %v6437_v2 = vsel %vm19989_vm5, %v15576_v4, %v6436_v37  ;;  %v13690_v28 = vrot.slane %v13688_v49, 4  ;;  %v16662_v12 = vld [vmem:[%s19972_s11 + $0x474] sm:$0xf] }
 0x2f4   : > { %18570 = vmatpush3.bf16.msra.mxu1 %v19764_v45  ;;  %v15607_v7 = vcombine.low %v6430_v30, %v6433_v9  ;;  %v15549_v45 = vld [vmem:[%s19972_s11 + $0x1b4] sm:$0xf]  ;;  %v6445_v34 = vrot.slane %v6443_v50, 4  ;;  %v15608_v26 = vcombine.low %v6437_v2, %v6440_v5  ;;  %v13689_v37 = vsel %vm20305_vm8, %v16697_v33, %v13688_v49  ;;  %v15555_v9 = vld [vmem:[%s19972_s11 + $0x1ec] sm:$0xf] }
 0x2f5   : > { %18563 = vmatprep.subr.bf16.mxu1 %v19765_v47  ;;  %v6450_v55 = vrot.slane %v15549_v45, 7  ;;  %v6444_v17 = vsel %vm19989_vm5, %v15577_v43, %v6443_v50  ;;  %v13692_v15 = vsel %vm20305_vm8, %v13690_v28, %v13691_v41  ;;  %v6460_v50 = vrot.slane %v15553_v32, 7  ;;  %v15556_v45 = vld [vmem:[%s19972_s11 + $0x1f0] sm:$0x7]  ;;  %v15559_v10 = vld [vmem:[%s19972_s11 + $0x20c] sm:$0x7] }
 0x2f6   : > { %v16698_v60 = vrot.slane %v16652_v11, 10  ;;  %v16729_v56 = vcombine.low %v13689_v37, %v13692_v15  ;;  %v13705_v49 = vrot.slane %v16657_v14, 6  ;;  %v15580_v61 = vrot.slane %v15554_v44, 11  ;;  %v16665_v32 = vld [vmem:[%s19972_s11 + $0x490] sm:$0xf] }
 0x2f7   : > { %17910 = vmatmul.mubr.bf16.gmra.mrb[4].mxu1 %v15604_v36  ;;  %v6446_v36 = vrot.slane %v15547_v21, 7  ;;  %v6452_v31 = vrot.slane %v6450_v55, 4  ;;  %v13698_v21 = vrot.slane %v16654_v54, 6  ;;  %v15564_v37 = vld [vmem:[%s19972_s11 + $0x240] sm:$0xf]  ;;  %v13723_v14 = vrot.slane %v16665_v32, 6 }
 0x2f8   : > { %17913 = vmatprep.mubr.bf16.mxu1 %v15605_v18  ;;  %18571 = vmatpush3.bf16.msra.mxu1 %v19765_v47  ;;  %v13201_v18 = vrot.slane %v13199_v46, 4  ;;  %v24097_v47 = vld [vmem:[%s19972_s11 + $0x420] sm:$0xf]  ;;  %v16666_v27 = vld [vmem:[%s19972_s11 + $0x494] sm:$0x3] }
 0x2f9   : > { %18564 = vmatprep.subr.bf16.mxu1 %v19766_v51  ;;  %v6447_v35 = vsel %vm19989_vm5, %v6445_v34, %v6446_v36  ;;  %v13695_v1 = vrot.slane %v24097_v47, 6  ;;  %v6454_v58 = vsel %vm19989_vm5, %v6452_v31, %v6453_v16  ;;  %v16658_v34 = vld [vmem:[%s19972_s11 + $0x454] sm:$0xc]  ;;  %v16661_v47 = vld [vmem:[%s19972_s11 + $0x470] sm:$0xc] }
 0x2fa   : > { %18502 = vmatmul.mubr.bf16.gmra.mrb[20].mxu0 %v16636_v23  ;;  %v24106_v23 = vld [vmem:[%s19972_s11 + $0x43c] sm:$0xf]  ;;  %v13203_v13 = vsel %vm19983_vm4, %v13201_v18, %v13202_v25  ;;  %v15609_v63 = vcombine.low %v6444_v17, %v6447_v35  ;;  %v13709_v18 = vrot.slane %v24139_v19, 6  ;;  %v15557_v25 = vld [vmem:[%s19972_s11 + $0x204] sm:$0x8]  ;;  %v13716_v17 = vrot.slane %v16662_v12, 6 }
 0x2fb   : > { %18505 = vmatprep.mubr.bf16.mxu0 %v16637_v39  ;;  %v15578_v39 = vrot.slane %v15548_v40, 11  ;;  %v13702_v30 = vrot.slane %v24106_v23, 6  ;;  %v16640_v4 = vcombine.low %v13200_v0, %v13203_v13  ;;  %v13697_v53 = vrot.slane %v13695_v1, 4  ;;  %v24166_v35 = vld [vmem:[%s19972_s11 + $0x224] sm:$0xf] }
 0x2fc   : > { %18572 = vmatpush3.bf16.msra.mxu1 %v19766_v51  ;;  %v6459_v51 = vrot.slane %v6457_v3, 4  ;;  %v6467_v40 = vrot.slane %v15556_v45, 7  ;;  %v16700_v57 = vrot.slane %v16658_v34, 10  ;;  %v16701_v54 = vrot.slane %v16661_v47, 10  ;;  %v15649_v47 = vld [vmem:[%s19972_s11 + $0x2d8] sm:$0x8] }
 0x2fd   : > { %18565 = vmatprep.subr.bf16.mxu1 %v19767_v62  ;;  %v6451_v46 = vsel %vm19989_vm5, %v15578_v39, %v6450_v55  ;;  %v13704_v59 = vrot.slane %v13702_v30, 4  ;;  %v13699_v5 = vsel %vm20305_vm8, %v13697_v53, %v13698_v21  ;;  %v16660_v55 = vld [vmem:[%s19972_s11 + $0x45c] sm:$0x3]  ;;  %v13703_v41 = vsel %vm20305_vm8, %v16699_v29, %v13702_v30  ;;  %v15562_v30 = vld [vmem:[%s19972_s11 + $0x228] sm:$0x7] }
 0x2fe   : > { %v6461_v43 = vsel %vm19989_vm5, %v6459_v51, %v6460_v50  ;;  %v15610_v2 = vcombine.low %v6451_v46, %v6454_v58  ;;  %v13711_v39 = vrot.slane %v13709_v18, 4  ;;  %v13712_v11 = vrot.slane %v16660_v55, 6  ;;  %v15565_v58 = vld [vmem:[%s19972_s11 + $0x244] sm:$0x7]  ;;  %v15567_v29 = vld [vmem:[%s19972_s11 + $0x25c] sm:$0xf] }
 0x2ff   : > { %17914 = vmatmul.mubr.bf16.gmra.mrb[8].mxu1 %v15606_v24  ;;  %v24133_v24 = vld [vmem:[%s19972_s11 + $0x208] sm:$0xf]  ;;  %v13706_v42 = vsel %vm20305_vm8, %v13704_v59, %v13705_v49  ;;  %v13718_v15 = vrot.slane %v13716_v17, 4  ;;  %v13717_v53 = vsel %vm20305_vm8, %v16701_v54, %v13716_v17  ;;  %v13726_v45 = vrot.slane %v16666_v27, 6  ;;  %v16672_v32 = vld [vmem:[%s19972_s11 + $0x4cc] sm:$0x3] }
 0x300   : > { %17917 = vmatprep.mubr.bf16.mxu1 %v15607_v7  ;;  %18573 = vmatpush3.bf16.msra.mxu1 %v19767_v62  ;;  %v6464_v7 = vrot.slane %v15555_v9, 7  ;;  %v6471_v36 = vrot.slane %v24133_v24, 7  ;;  %v19770_v62 = vld [vmem:[%s24527_s1 + $0x338] sm:$0xff]   ;;  %v16731_v31 = vcombine.low %v13703_v41, %v13706_v42  ;;  %v16664_v9 = vld [vmem:[%s19972_s11 + $0x48c] sm:$0xc]  ;;  %v13713_v21 = vsel %vm20305_vm8, %v13711_v39, %v13712_v11 }
 0x301   : > { %18566 = vmatprep.subr.bf16.mxu1 %v19768_v8  ;;  %v16702_v19 = vrot.slane %v16664_v9, 10  ;;  %v16671_v55 = vld [vmem:[%s19972_s11 + $0x4c8] sm:$0xf]  ;;  %v15681_v54 = vrot.slane %v15649_v47, 11 }
 0x302   : > { %18506 = vmatmul.mubr.bf16.gmra.mrb[24].mxu0 %v16638_v6  ;;  %v6458_v6 = vsel %vm19989_vm5, %v15579_v38, %v6457_v3  ;;  %v6466_v33 = vrot.slane %v6464_v7, 4  ;;  %v15581_v3 = vrot.slane %v15557_v25, 11  ;;  %v6473_v23 = vrot.slane %v6471_v36, 4  ;;  %v15566_v25 = vld [vmem:[%s19972_s11 + $0x258] sm:$0x8] }
 0x303   : > { %18509 = vmatprep.mubr.bf16.mxu0 %v16639_v48  ;;  %v13696_v48 = vsel %vm20305_vm8, %v16698_v60, %v13695_v1  ;;  %v15611_v28 = vcombine.low %v6458_v6, %v6461_v43  ;;  %v6465_v13 = vsel %vm19989_vm5, %v15580_v61, %v6464_v7  ;;  %v15560_v1 = vld [vmem:[%s19972_s11 + $0x220] sm:$0x8]  ;;  %v13710_v60 = vsel %vm20305_vm8, %v16700_v57, %v13709_v18  ;;  %v16667_v6 = vld [vmem:[%s19972_s11 + $0x4a8] sm:$0xc]  ;;  %v16669_v43 = vld [vmem:[%s19972_s11 + $0x4b0] sm:$0x3] }
 0x304   : > { %18574 = vmatpush3.bf16.msra.mxu1 %v19768_v8  ;;  %v6474_v8 = vrot.slane %v15559_v10, 7  ;;  %v16730_v0 = vcombine.low %v13696_v48, %v13699_v5  ;;  %v6468_v16 = vsel %vm19989_vm5, %v6466_v33, %v6467_v40  ;;  %v6472_v51 = vsel %vm19989_vm5, %v15581_v3, %v6471_v36  ;;  %v15650_v61 = vld [vmem:[%s19972_s11 + $0x2dc] sm:$0xf]  ;;  %v15568_v40 = vld [vmem:[%s19972_s11 + $0x260] sm:$0x7] }
 0x305   : > { %18567 = vmatprep.subr.bf16.mxu1 %v19769_v22  ;;  %v15612_v46 = vcombine.low %v6465_v13, %v6468_v16  ;;  %v15582_v24 = vrot.slane %v15560_v1, 11  ;;  %v6481_v7 = vrot.slane %v15562_v30, 7  ;;  %v13725_v36 = vrot.slane %v13723_v14, 4  ;;  %v16673_v1 = vld [vmem:[%s19972_s11 + $0x4e0] sm:$0xc] }
 0x306   : > { %v6475_v50 = vsel %vm19989_vm5, %v6473_v23, %v6474_v8  ;;  %v16732_v18 = vcombine.low %v13710_v60, %v13713_v21  ;;  %v6492_v10 = vrot.slane %v15567_v29, 7  ;;  %v16703_v5 = vrot.slane %v16667_v6, 10  ;;  %v16678_v6 = vld [vmem:[%s19972_s11 + $0x504] sm:$0x3] }
 0x307   : > { %17918 = vmatmul.mubr.bf16.gmra.mrb[12].mxu1 %v15608_v26  ;;  %v16663_v26 = vld [vmem:[%s19972_s11 + $0x478] sm:$0x3]  ;;  %v15613_v59 = vcombine.low %v6472_v51, %v6475_v50  ;;  %v13733_v33 = vrot.slane %v16669_v43, 6  ;;  %v7037_v17 = vrot.slane %v15650_v61, 7  ;;  %v13724_v57 = vsel %vm20305_vm8, %v16702_v19, %v13723_v14  ;;  %v16675_v51 = vld [vmem:[%s19972_s11 + $0x4e8] sm:$0x3] }
 0x308   : > { %17921 = vmatprep.mubr.bf16.mxu1 %v15609_v63  ;;  %18575 = vmatpush3.bf16.msra.mxu1 %v19769_v22  ;;  %v6478_v63 = vrot.slane %v24166_v35, 7  ;;  %v13719_v38 = vrot.slane %v16663_v26, 6  ;;  %v6485_v22 = vrot.slane %v15564_v37, 7  ;;  %v16674_v35 = vld [vmem:[%s19972_s11 + $0x4e4] sm:$0xf]  ;;  %v13727_v3 = vsel %vm20305_vm8, %v13725_v36, %v13726_v45 }
 0x309   : > { %18568 = vmatprep.subr.bf16.mxu1 %v19770_v62  ;;  %v16670_v26 = vld [vmem:[%s19972_s11 + $0x4c4] sm:$0xc]  ;;  %v15584_v13 = vrot.slane %v15566_v25, 11  ;;  %v6494_v39 = vrot.slane %v6492_v10, 4  ;;  %v6495_v11 = vrot.slane %v15568_v40, 7  ;;  %v13737_v37 = vrot.slane %v16671_v55, 6 }
 0x30a   : > { %18510 = vmatmul.mubr.bf16.gmra.mrb[28].mxu0 %v16640_v4  ;;  %v16668_v4 = vld [vmem:[%s19972_s11 + $0x4ac] sm:$0xf]  ;;  %v6480_v44 = vrot.slane %v6478_v63, 4  ;;  %v13720_v49 = vsel %vm20305_vm8, %v13718_v15, %v13719_v38  ;;  %v7039_v30 = vrot.slane %v7037_v17, 4  ;;  %v15653_v50 = vld [vmem:[%s19972_s11 + $0x2f8] sm:$0xf]  ;;  %v16734_v27 = vcombine.low %v13724_v57, %v13727_v3 }
 0x30b   : > { %18529 = vmatprep.mubr.bf16.mxu0 %v16729_v56  ;;  %v15563_v56 = vld [vmem:[%s19972_s11 + $0x23c] sm:$0x8]  ;;  %v13730_v34 = vrot.slane %v16668_v4, 6  ;;  %v16733_v48 = vcombine.low %v13717_v53, %v13720_v49  ;;  %v16704_v14 = vrot.slane %v16670_v26, 10  ;;  %v16677_v4 = vld [vmem:[%s19972_s11 + $0x500] sm:$0xf]  ;;  %v6496_v60 = vsel %vm19989_vm5, %v6494_v39, %v6495_v11 }
 0x30c   : > { %18576 = vmatpush3.bf16.msra.mxu1 %v19770_v62  ;;  %v15583_v12 = vrot.slane %v15563_v56, 11  ;;  %v6487_v62 = vrot.slane %v6485_v22, 4  ;;  %v6482_v41 = vsel %vm19989_vm5, %v6480_v44, %v6481_v7  ;;  %v13739_v21 = vrot.slane %v13737_v37, 4  ;;  %v15652_v56 = vld [vmem:[%s19972_s11 + $0x2f4] sm:$0x8] }
 0x30d   : > { %v13732_v42 = vrot.slane %v13730_v34, 4  ;;  %v13731_v16 = vsel %vm20305_vm8, %v16703_v5, %v13730_v34  ;;  %v13747_v7 = vrot.slane %v16675_v51, 6  ;;  %v15654_v19 = vld [vmem:[%s19972_s11 + $0x2fc] sm:$0x7]  ;;  %v7044_v29 = vrot.slane %v15653_v50, 7 }
 0x30e   : > { %v6486_v23 = vsel %vm19989_vm5, %v15583_v12, %v6485_v22  ;;  %v13740_v22 = vrot.slane %v16672_v32, 6  ;;  %v16676_v45 = vld [vmem:[%s19972_s11 + $0x4fc] sm:$0xc]  ;;  %v13751_v43 = vrot.slane %v16677_v4, 6  ;;  %v13738_v36 = vsel %vm20305_vm8, %v16704_v14, %v13737_v37  ;;  %v15655_v12 = vld [vmem:[%s19972_s11 + $0x310] sm:$0x8] }
 0x30f   : > { %17922 = vmatmul.mubr.bf16.gmra.mrb[16].mxu1 %v15610_v2  ;;  %v6488_v2 = vrot.slane %v15565_v58, 7  ;;  %v13734_v38 = vsel %vm20305_vm8, %v13732_v42, %v13733_v33  ;;  %v15656_v58 = vld [vmem:[%s19972_s11 + $0x314] sm:$0xf]  ;;  %v15682_v25 = vrot.slane %v15652_v56, 11  ;;  %v7046_v40 = vrot.slane %v7044_v29, 4 }
 0x310   : > { %17925 = vmatprep.mubr.bf16.mxu1 %v15611_v28  ;;  %v6479_v28 = vsel %vm19989_vm5, %v15582_v24, %v6478_v63  ;;  %v13744_v63 = vrot.slane %v16674_v35, 6  ;;  %v16705_v24 = vrot.slane %v16673_v1, 10  ;;  %v16735_v53 = vcombine.low %v13731_v16, %v13734_v38  ;;  %v15662_v11 = vld [vmem:[%s19972_s11 + $0x34c] sm:$0xf]  ;;  %v16684_v56 = vld [vmem:[%s19972_s11 + $0x53c] sm:$0x3] }
 0x311   : > { %v6489_v8 = vsel %vm19989_vm5, %v6487_v62, %v6488_v2  ;;  %v7051_v62 = vrot.slane %v15656_v58, 7  ;;  %v16680_v2 = vld [vmem:[%s19972_s11 + $0x51c] sm:$0xf]  ;;  %v13741_v61 = vsel %vm20305_vm8, %v13739_v21, %v13740_v22  ;;  %v16706_v55 = vrot.slane %v16676_v45, 10  ;;  %v16685_v58 = vld [vmem:[%s19972_s11 + $0x550] sm:$0xc] }
 0x312   : > { %18530 = vmatmul.mubr.bf16.vlgmr.msra.gmra.mrb[0].mxu0 %v16730_v0  ;;  %v15651_v0 = vld [vmem:[%s19972_s11 + $0x2e0] sm:$0x7]  ;;  %v15615_v15 = vcombine.low %v6486_v23, %v6489_v8  ;;  %v13746_v44 = vrot.slane %v13744_v63, 4  ;;  %v13754_v42 = vrot.slane %v16678_v6, 6  ;;  %v15683_v47 = vrot.slane %v15655_v12, 11 }
 0x313   : > { %18533 = vmatprep.mubr.bf16.mxu0 %v16731_v31  ;;  %v15614_v31 = vcombine.low %v6479_v28, %v6482_v41  ;;  %v7040_v9 = vrot.slane %v15651_v0, 7  ;;  %v15659_v28 = vld [vmem:[%s19972_s11 + $0x330] sm:$0xf]  ;;  %v13753_v41 = vrot.slane %v13751_v43, 4  ;;  %v13758_v35 = vrot.slane %v16680_v2, 6 }
 0x314   : > { %v13748_v33 = vsel %vm20305_vm8, %v13746_v44, %v13747_v7  ;;  %v7053_v57 = vrot.slane %v7051_v62, 4  ;;  %v16681_v23 = vld [vmem:[%s19972_s11 + $0x520] sm:$0x3]  ;;  %v15658_v8 = vld [vmem:[%s19972_s11 + $0x32c] sm:$0x8]  ;;  %v16736_v26 = vcombine.low %v13738_v36, %v13741_v61  ;;  %v7058_v39 = vrot.slane %v15659_v28, 7 }
 0x315   : > { %v7041_v49 = vsel %vm19989_vm5, %v7039_v30, %v7040_v9  ;;  %v7045_v32 = vsel %vm19989_vm5, %v15682_v25, %v7044_v29  ;;  %v13755_v1 = vsel %vm20305_vm8, %v13753_v41, %v13754_v42  ;;  %v13761_v38 = vrot.slane %v16681_v23, 6  ;;  %v16686_v30 = vld [vmem:[%s19972_s11 + $0x554] sm:$0xf]  ;;  %v15668_v36 = vld [vmem:[%s19972_s11 + $0x384] sm:$0xf] }
 0x316   : > { %v15684_v51 = vrot.slane %v15658_v8, 11  ;;  %v7065_v14 = vrot.slane %v15662_v11, 7  ;;  %v7060_v22 = vrot.slane %v7058_v39, 4  ;;  %v13768_v2 = vrot.slane %v16684_v56, 6  ;;  %v16690_v11 = vld [vmem:[%s19972_s11 + $0x574] sm:$0x3] }
 0x317   : > { %17926 = vmatmul.mubr.bf16.gmra.mrb[20].mxu1 %v15612_v46  ;;  %v6493_v46 = vsel %vm19989_vm5, %v15584_v13, %v6492_v10  ;;  %v7047_v10 = vrot.slane %v15654_v19, 7  ;;  %v15660_v13 = vld [vmem:[%s19972_s11 + $0x334] sm:$0x7]  ;;  %v16709_v61 = vrot.slane %v16685_v58, 10  ;;  %v7079_v28 = vrot.slane %v15668_v36, 7 }
 0x318   : > { %17929 = vmatprep.mubr.bf16.mxu1 %v15613_v59  ;;  %v7038_v59 = vsel %vm19989_vm5, %v15681_v54, %v7037_v17  ;;  %v15616_v34 = vcombine.low %v6493_v46, %v6496_v60  ;;  %v16679_v17 = vld [vmem:[%s19972_s11 + $0x518] sm:$0xc]  ;;  %v7061_v50 = vrot.slane %v15660_v13, 7  ;;  %v15661_v46 = vld [vmem:[%s19972_s11 + $0x348] sm:$0x8]  ;;  %v7059_v45 = vsel %vm19989_vm5, %v15684_v51, %v7058_v39 }
 0x319   : > { %v15713_v5 = vcombine.low %v7038_v59, %v7041_v49  ;;  %v7048_v37 = vsel %vm19989_vm5, %v7046_v40, %v7047_v10  ;;  %v16707_v16 = vrot.slane %v16679_v17, 10  ;;  %v16683_v54 = vld [vmem:[%s19972_s11 + $0x538] sm:$0xf]  ;;  %v15663_v60 = vld [vmem:[%s19972_s11 + $0x350] sm:$0x7]  ;;  %v15685_v6 = vrot.slane %v15661_v46, 11 }
 0x31a   : > { %18534 = vmatmul.mubr.bf16.gmra.mrb[4].mxu0 %v16732_v18  ;;  %v13745_v18 = vsel %vm20305_vm8, %v16705_v24, %v13744_v63  ;;  %v7052_v63 = vsel %vm19989_vm5, %v15683_v47, %v7051_v62  ;;  %v13765_v4 = vrot.slane %v16683_v54, 6  ;;  %v15714_v21 = vcombine.low %v7045_v32, %v7048_v37  ;;  %v16687_v59 = vld [vmem:[%s19972_s11 + $0x558] sm:$0x3]  ;;  %v15665_v49 = vld [vmem:[%s19972_s11 + $0x368] sm:$0xf] }
 0x31b   : > { %18537 = vmatprep.mubr.bf16.mxu0 %v16733_v48  ;;  %v15657_v48 = vld [vmem:[%s19972_s11 + $0x318] sm:$0x7]  ;;  %v16737_v0 = vcombine.low %v13745_v18, %v13748_v33  ;;  %v13759_v7 = vsel %vm20305_vm8, %v16707_v16, %v13758_v35  ;;  %v7062_v12 = vsel %vm19989_vm5, %v7060_v22, %v7061_v50  ;;  %v15664_v18 = vld [vmem:[%s19972_s11 + $0x364] sm:$0x8]  ;;  %v7072_v33 = vrot.slane %v15665_v49, 7 }
 0x31c   : > { %v7054_v3 = vrot.slane %v15657_v48, 7  ;;  %v13767_v62 = vrot.slane %v13765_v4, 4  ;;  %v13775_v48 = vrot.slane %v16687_v59, 6  ;;  %v16689_v40 = vld [vmem:[%s19972_s11 + $0x570] sm:$0xf]  ;;  %v15716_v41 = vcombine.low %v7059_v45, %v7062_v12 }
 0x31d   : > { %v7066_v47 = vsel %vm19989_vm5, %v15685_v6, %v7065_v14  ;;  %v15686_v8 = vrot.slane %v15664_v18, 11  ;;  %v7074_v39 = vrot.slane %v7072_v33, 4  ;;  %v13779_v32 = vrot.slane %v16689_v40, 6  ;;  %v16694_v12 = vld [vmem:[%s19972_s11 + $0x5a4] sm:$0xc] }
 0x31e   : > { %v7055_v9 = vsel %vm19989_vm5, %v7053_v57, %v7054_v3  ;;  %v16692_v57 = vld [vmem:[%s19972_s11 + $0x58c] sm:$0xf]  ;;  %v13769_v3 = vsel %vm20305_vm8, %v13767_v62, %v13768_v2  ;;  %v7081_v16 = vrot.slane %v7079_v28, 4  ;;  %v16712_v18 = vrot.slane %v16694_v12, 10 }
 0x31f   : > { %17930 = vmatmul.mubr.bf16.gmra.mrb[24].mxu1 %v15614_v31  ;;  %v13752_v31 = vsel %vm20305_vm8, %v16706_v55, %v13751_v43  ;;  %v15715_v44 = vcombine.low %v7052_v63, %v7055_v9  ;;  %v7067_v43 = vrot.slane %v7065_v14, 4  ;;  %v15667_v55 = vld [vmem:[%s19972_s11 + $0x380] sm:$0x8]  ;;  %v13786_v63 = vrot.slane %v16692_v57, 6  ;;  %v16696_v62 = vld [vmem:[%s19972_s11 + $0x5ac] sm:$0x3] }
 0x320   : > { %17933 = vmatprep.mubr.bf16.mxu1 %v15615_v15  ;;  %v13760_v15 = vrot.slane %v13758_v35, 4  ;;  %v16738_v24 = vcombine.low %v13752_v31, %v13755_v1  ;;  %v15669_v35 = vld [vmem:[%s19972_s11 + $0x388] sm:$0x7]  ;;  %v15687_v37 = vrot.slane %v15667_v55, 11  ;;  %v7073_v51 = vsel %vm19989_vm5, %v15686_v8, %v7072_v33 }
 0x321   : > { %v7082_v54 = vrot.slane %v15669_v35, 7  ;;  %v16691_v1 = vld [vmem:[%s19972_s11 + $0x588] sm:$0xc]  ;;  %v13781_v22 = vrot.slane %v13779_v32, 4 }
 0x322   : > { %18538 = vmatmul.mubr.bf16.gmra.mrb[8].mxu0 %v16734_v27  ;;  %v16682_v27 = vld [vmem:[%s19972_s11 + $0x534] sm:$0xc]  ;;  %v13762_v19 = vsel %vm20305_vm8, %v13760_v15, %v13761_v38  ;;  %v16693_v38 = vld [vmem:[%s19972_s11 + $0x590] sm:$0x3]  ;;  %v16711_v46 = vrot.slane %v16691_v1, 10 }
 0x323   : > { %18541 = vmatprep.mubr.bf16.mxu0 %v16735_v53  ;;  %v13772_v53 = vrot.slane %v16686_v30, 6  ;;  %v16708_v29 = vrot.slane %v16682_v27, 10  ;;  %v16739_v25 = vcombine.low %v13759_v7, %v13762_v19  ;;  %v15671_v30 = vld [vmem:[%s19972_s11 + $0x3a0] sm:$0xf]  ;;  %v13782_v27 = vrot.slane %v16690_v11, 6 }
 0x324   : > { %v13789_v56 = vrot.slane %v16693_v38, 6  ;;  %v7086_v58 = vrot.slane %v15671_v30, 7  ;;  %v13787_v6 = vsel %vm20305_vm8, %v16711_v46, %v13786_v63 }
 0x325   : > { %v13774_v10 = vrot.slane %v13772_v53, 4  ;;  %v13766_v42 = vsel %vm20305_vm8, %v16708_v29, %v13765_v4  ;;  %v13773_v23 = vsel %vm20305_vm8, %v16709_v61, %v13772_v53  ;;  %v7080_v4 = vsel %vm19989_vm5, %v15687_v37, %v7079_v28  ;;  %v16695_v53 = vld [vmem:[%s19972_s11 + $0x5a8] sm:$0xf]  ;;  %v24359_v37 = vld [vmem:[%s24528_s2] ss:$0 sm:$0xff] }
 0x326   : > { %v16740_v15 = vcombine.low %v13766_v42, %v13769_v3  ;;  %v13783_v29 = vsel %vm20305_vm8, %v13781_v22, %v13782_v27  ;;  %v13793_v45 = vrot.slane %v16695_v53, 6 }
 0x327   : > { %17934 = vmatmul.mubr.bf16.gmra.mrb[28].mxu1 %v15616_v34  ;;  %v7068_v34 = vrot.slane %v15663_v60, 7  ;;  %v13776_v13 = vsel %vm20305_vm8, %v13774_v10, %v13775_v48  ;;  %v15670_v60 = vld [vmem:[%s19972_s11 + $0x39c] sm:$0x8]  ;;  %v13796_v10 = vrot.slane %v16696_v62, 6 }
 0x328   : > { %17969 = vmatprep.mubr.bf16.mxu1 %v15713_v5  ;;  %v15666_v5 = vld [vmem:[%s19972_s11 + $0x36c] sm:$0x7]  ;;  %v16741_v9 = vcombine.low %v13773_v23, %v13776_v13  ;;  %v15688_v49 = vrot.slane %v15670_v60, 11  ;;  %v13794_v40 = vsel %vm20305_vm8, %v16712_v18, %v13793_v45 }
 0x329   : > { %v7069_v17 = vsel %vm19989_vm5, %v7067_v43, %v7068_v34  ;;  %v7088_v34 = vrot.slane %v7086_v58, 4 }
 0x32a   : > { %18542 = vmatmul.mubr.bf16.gmra.mrb[12].mxu0 %v16736_v26  ;;  %v7075_v26 = vrot.slane %v15666_v5, 7  ;;  %v15717_v31 = vcombine.low %v7066_v47, %v7069_v17  ;;  %v7087_v48 = vsel %vm19989_vm5, %v15688_v49, %v7086_v58 }
 0x32b   : > { %18545 = vmatprep.mubr.bf16.mxu0 %v16737_v0  ;;  %v16688_v0 = vld [vmem:[%s19972_s11 + $0x56c] sm:$0xc] }
 0x32c   : > { %v16710_v50 = vrot.slane %v16688_v0, 10  ;;  %v7076_v14 = vsel %vm19989_vm5, %v7074_v39, %v7075_v26 }
 0x32d   : > { %v15718_v7 = vcombine.low %v7073_v51, %v7076_v14 }
 0x32e   : > { %v13780_v19 = vsel %vm20305_vm8, %v16710_v50, %v13779_v32 }
 0x32f   : > { %17970 = vmatmul.mubr.bf16.vlgmr.msra.gmra.mrb[16].mxu1 %v15714_v21  ;;  %v7083_v21 = vsel %vm19989_vm5, %v7081_v16, %v7082_v54  ;;  %v16742_v2 = vcombine.low %v13780_v19, %v13783_v29  ;;  %v24361_v54 = vld [vmem:[%s223_s26] ss:$0 sm:$0xff] }
 0x330   : > { %17973 = vmatprep.mubr.bf16.mxu1 %v15715_v44  ;;  %v15672_v44 = vld [vmem:[%s19972_s11 + $0x3a4] sm:$0x7]  ;;  %v15719_v59 = vcombine.low %v7080_v4, %v7083_v21  ;;  %s19777_s11 = scalar_lea.vmem %s19776_s22, 8192 }
 0x331   : > { %v7089_v36 = vrot.slane %v15672_v44, 7  ;;  %p19779_p2 = scmp.lt.s32.totalorder %s19777_s11, %s19771_s13 }
 0x332   : > { %18546 = vmatmul.mubr.bf16.gmra.mrb[16].mxu0 %v16738_v24  ;;  %v13788_v24 = vrot.slane %v13786_v63, 4 }
 0x333   : > { %18549 = vmatprep.mubr.bf16.mxu0 %v16739_v25  ;;  %v13795_v25 = vrot.slane %v13793_v45, 4  ;;  %v7090_v5 = vsel %vm19989_vm5, %v7088_v34, %v7089_v36  ;;  %p19780_p3 = por %p19779_p2, %p19778_p1 }
 0x334   : > { %v13790_v43 = vsel %vm20305_vm8, %v13788_v24, %v13789_v56  ;;  %v15720_v33 = vcombine.low %v7087_v48, %v7090_v5 }
 0x335   : > { %v16743_v61 = vcombine.low %v13787_v6, %v13790_v43  ;;  %v13797_v55 = vsel %vm20305_vm8, %v13795_v25, %v13796_v10  ;;  %p19781_p5 = pnand %p19780_p3, %p19774_p0 }
 0x336   : > { %v16744_v28 = vcombine.low %v13794_v40, %v13797_v55 }
 0x337   : > { %17974 = vmatmul.mubr.bf16.gmra.mrb[20].mxu1 %v15716_v41 }
 0x338   : > { %17977 = vmatprep.mubr.bf16.mxu1 %v15717_v31 }
 0x33a   : > { %18550 = vmatmul.mubr.bf16.gmra.mrb[20].mxu0 %v16740_v15 }
 0x33b   : > { %18553 = vmatprep.mubr.bf16.mxu0 %v16741_v9 }
 0x33f   : > { %17978 = vmatmul.mubr.bf16.gmra.mrb[24].mxu1 %v15718_v7 }
 0x340   : > { %17981 = vmatprep.mubr.bf16.mxu1 %v15719_v59 }
 0x342   : > { %18554 = vmatmul.mubr.bf16.gmra.mrb[24].mxu0 %v16742_v2 }
 0x343   : > { %18557 = vmatprep.mubr.bf16.mxu0 %v16743_v61 }
 0x347   : > { %17982 = vmatmul.mubr.bf16.gmra.mrb[28].mxu1 %v15720_v33 }
 0x34a   : > { %18558 = vmatmul.mubr.bf16.gmra.mrb[28].mxu0 %v16744_v28 }
 0x3c2   : > { %v17907_v41 = vpop.f32.mrb[0].mxu1 }
 0x3c3   : > { %v6660_v42 = vpop.f32.mrb[1].mxu1 }
 0x3c4   : > { %v17908_v47 = vpop.f32.mrb[2].mxu1 }
 0x3c5   : > { %v6663_v17 = vpop.f32.mrb[3].mxu1 }
 0x3ca   : > { %v17911_v20 = vpop.f32.mrb[4].mxu1 }
 0x3cb   : > { %v6676_v35 = vpop.f32.mrb[5].mxu1 }
 0x3cc   : > { %v17912_v57 = vpop.f32.mrb[6].mxu1 }
 0x3cd   : > { %v6679_v3 = vpop.f32.mrb[7].mxu1 }
 0x3d2   : > { %v17915_v23 = vpop.f32.mrb[8].mxu1 }
 0x3d3   : > { %v6692_v8 = vpop.f32.mrb[9].mxu1 }
 0x3d4   : > { %v24339_v26 = vpop.f32.mrb[10].mxu1 }
 0x3d5   : > { %v24341_v52 = vpop.f32.mrb[11].mxu1 }
 0x3da   : > { %v24343_v0 = vpop.f32.mrb[12].mxu1 }
 0x3db   : > { %v24345_v13 = vpop.f32.mrb[13].mxu1 }
 0x3dc   : > { %v24347_v39 = vpop.f32.mrb[14].mxu1 }
 0x3dd   : > { %v24349_v11 = vpop.f32.mrb[15].mxu1 }
 0x3e5   : > { %v18531_v32 = vpop.f32.mrb[0].mxu0 }
 0x3e6   : > { %v18579_v31 = vadd.f32 %v18531_v32, %v17907_v41  ;;  %v13961_v16 = vpop.f32.mrb[1].mxu0 }
 0x3e7   : > { %v18582_v1 = vadd.f32 %v13961_v16, %v6660_v42  ;;  %v18532_v63 = vpop.f32.mrb[2].mxu0 }
 0x3e8   : > { %v14225_v15 = vmul.f32 %v18579_v31, %v24359_v37  ;;  %v18585_v38 = vadd.f32 %v18532_v63, %v17908_v47  ;;  %v13964_v30 = vpop.f32.mrb[3].mxu0 }
 0x3e9   : > { %v14223_v9 = vmul.f32 %v18582_v1, %v24359_v37  ;;  %v18588_v51 = vadd.f32 %v13964_v30, %v6663_v17 }
 0x3ea   : > { %v14264_v50 = vadd.f32 %v24361_v54, %v14225_v15  ;;  %v14226_v27 = vmul.f32 %v18585_v38, %v24359_v37 }
 0x3eb   : > { %v14262_v14 = vadd.f32 %v24361_v54, %v14223_v9  ;;  %v14224_v22 = vmul.f32 %v18588_v51, %v24359_v37 }
 0x3ec   : > { %v14296_v4 = vmax.f32 %v14264_v50, 0.0  ;;  %v14265_v46 = vadd.f32 %v24361_v54, %v14226_v27 }
 0x3ed   : > { %v14294_v60 = vmax.f32 %v14262_v14, 0.0  ;;  %v14263_v21 = vadd.f32 %v24361_v54, %v14224_v22  ;;  %v18535_v24 = vpop.f32.mrb[4].mxu0 }
 0x3ee   : > { %14328 = vst [vmem:[%s24373_s21 + $0x10] sm:$0xff] %v14296_v4  ;;  %v14297_v56 = vmax.f32 %v14265_v46, 0.0  ;;  %v18591_v58 = vadd.f32 %v18535_v24, %v17911_v20  ;;  %v13977_v53 = vpop.f32.mrb[5].mxu0 }
 0x3ef   : > { %14326 = vst [vmem:[%s24373_s21] sm:$0xff] %v14294_v60  ;;  %v14295_v44 = vmax.f32 %v14263_v21, 0.0  ;;  %v18594_v7 = vadd.f32 %v13977_v53, %v6676_v35  ;;  %v18536_v19 = vpop.f32.mrb[6].mxu0 }
 0x3f0   : > { %14329 = vst [vmem:[%s24373_s21 + $0x18] sm:$0xff] %v14297_v56  ;;  %v14229_v29 = vmul.f32 %v18591_v58, %v24359_v37  ;;  %v18597_v59 = vadd.f32 %v18536_v19, %v17912_v57  ;;  %v13980_v49 = vpop.f32.mrb[7].mxu0 }
 0x3f1   : > { %14327 = vst [vmem:[%s24373_s21 + $0x8] sm:$0xff] %v14295_v44  ;;  %v14227_v45 = vmul.f32 %v18594_v7, %v24359_v37  ;;  %v18600_v6 = vadd.f32 %v13980_v49, %v6679_v3 }
 0x3f2   : > { %v14268_v43 = vadd.f32 %v24361_v54, %v14229_v29  ;;  %v14230_v34 = vmul.f32 %v18597_v59, %v24359_v37 }
 0x3f3   : > { %v14266_v36 = vadd.f32 %v24361_v54, %v14227_v45  ;;  %v14228_v12 = vmul.f32 %v18600_v6, %v24359_v37 }
 0x3f4   : > { %v14300_v62 = vmax.f32 %v14268_v43, 0.0  ;;  %v14269_v2 = vadd.f32 %v24361_v54, %v14230_v34 }
 0x3f5   : > { %v14298_v61 = vmax.f32 %v14266_v36, 0.0  ;;  %v14267_v18 = vadd.f32 %v24361_v54, %v14228_v12  ;;  %v18539_v25 = vpop.f32.mrb[8].mxu0 }
 0x3f6   : > { %14332 = vst [vmem:[%s24373_s21 + $0x30] sm:$0xff] %v14300_v62  ;;  %v14301_v10 = vmax.f32 %v14269_v2, 0.0  ;;  %v18603_v48 = vadd.f32 %v18539_v25, %v17915_v23  ;;  %v13993_v5 = vpop.f32.mrb[9].mxu0 }
 0x3f7   : > { %14330 = vst [vmem:[%s24373_s21 + $0x20] sm:$0xff] %v14298_v61  ;;  %v14299_v33 = vmax.f32 %v14267_v18, 0.0  ;;  %v18606_v40 = vadd.f32 %v13993_v5, %v6692_v8  ;;  %v18540_v55 = vpop.f32.mrb[10].mxu0 }
 0x3f8   : > { %14333 = vst [vmem:[%s24373_s21 + $0x38] sm:$0xff] %v14301_v10  ;;  %v14233_v28 = vmul.f32 %v18603_v48, %v24359_v37  ;;  %v18609_v41 = vadd.f32 %v18540_v55, %v24339_v26  ;;  %v13996_v42 = vpop.f32.mrb[11].mxu0 }
 0x3f9   : > { %14331 = vst [vmem:[%s24373_s21 + $0x28] sm:$0xff] %v14299_v33  ;;  %v14231_v47 = vmul.f32 %v18606_v40, %v24359_v37  ;;  %v18612_v17 = vadd.f32 %v13996_v42, %v24341_v52 }
 0x3fa   : > { %v14272_v20 = vadd.f32 %v24361_v54, %v14233_v28  ;;  %v14234_v35 = vmul.f32 %v18609_v41, %v24359_v37 }
 0x3fb   : > { %v14270_v57 = vadd.f32 %v24361_v54, %v14231_v47  ;;  %v14232_v3 = vmul.f32 %v18612_v17, %v24359_v37 }
 0x3fc   : > { %v14304_v23 = vmax.f32 %v14272_v20, 0.0  ;;  %v14273_v8 = vadd.f32 %v24361_v54, %v14234_v35 }
 0x3fd   : > { %v14302_v26 = vmax.f32 %v14270_v57, 0.0  ;;  %v14271_v32 = vadd.f32 %v24361_v54, %v14232_v3  ;;  %v18543_v31 = vpop.f32.mrb[12].mxu0 }
 0x3fe   : > { %14336 = vst [vmem:[%s24373_s21 + $0x50] sm:$0xff] %v14304_v23  ;;  %v14305_v16 = vmax.f32 %v14273_v8, 0.0  ;;  %v18615_v52 = vadd.f32 %v18543_v31, %v24343_v0  ;;  %v14009_v1 = vpop.f32.mrb[13].mxu0 }
 0x3ff   : > { %14334 = vst [vmem:[%s24373_s21 + $0x40] sm:$0xff] %v14302_v26  ;;  %v14303_v63 = vmax.f32 %v14271_v32, 0.0  ;;  %v18618_v15 = vadd.f32 %v14009_v1, %v24345_v13  ;;  %v18544_v38 = vpop.f32.mrb[14].mxu0 }
 0x400   : > { %14337 = vst [vmem:[%s24373_s21 + $0x58] sm:$0xff] %v14305_v16  ;;  %v14237_v30 = vmul.f32 %v18615_v52, %v24359_v37  ;;  %v18621_v9 = vadd.f32 %v18544_v38, %v24347_v39  ;;  %v14012_v51 = vpop.f32.mrb[15].mxu0 }
 0x401   : > { %14335 = vst [vmem:[%s24373_s21 + $0x48] sm:$0xff] %v14303_v63  ;;  %v14235_v50 = vmul.f32 %v18618_v15, %v24359_v37  ;;  %v18624_v27 = vadd.f32 %v14012_v51, %v24349_v11 }
 0x402   : > { %v14276_v0 = vadd.f32 %v24361_v54, %v14237_v30  ;;  %v14238_v14 = vmul.f32 %v18621_v9, %v24359_v37  ;;  %v17971_v22 = vpop.f32.mrb[16].mxu1 }
 0x403   : > { %v14274_v13 = vadd.f32 %v24361_v54, %v14235_v50  ;;  %v14236_v4 = vmul.f32 %v18624_v27, %v24359_v37  ;;  %v7318_v46 = vpop.f32.mrb[17].mxu1 }
 0x404   : > { %v14308_v39 = vmax.f32 %v14276_v0, 0.0  ;;  %v14277_v60 = vadd.f32 %v24361_v54, %v14238_v14  ;;  %v17972_v21 = vpop.f32.mrb[18].mxu1 }
 0x405   : > { %v14306_v24 = vmax.f32 %v14274_v13, 0.0  ;;  %v14275_v11 = vadd.f32 %v24361_v54, %v14236_v4  ;;  %v18547_v56 = vpop.f32.mrb[16].mxu0  ;;  %v7321_v58 = vpop.f32.mrb[19].mxu1 }
 0x406   : > { %14340 = vst [vmem:[%s24373_s21 + $0x70] sm:$0xff] %v14308_v39  ;;  %v14309_v53 = vmax.f32 %v14277_v60, 0.0  ;;  %v18627_v44 = vadd.f32 %v18547_v56, %v17971_v22  ;;  %v14025_v7 = vpop.f32.mrb[17].mxu0 }
 0x407   : > { %14338 = vst [vmem:[%s24373_s21 + $0x60] sm:$0xff] %v14306_v24  ;;  %v14307_v19 = vmax.f32 %v14275_v11, 0.0  ;;  %v18630_v29 = vadd.f32 %v14025_v7, %v7318_v46  ;;  %v18548_v59 = vpop.f32.mrb[18].mxu0 }
 0x408   : > { %14341 = vst [vmem:[%s24373_s21 + $0x78] sm:$0xff] %v14309_v53  ;;  %v14241_v49 = vmul.f32 %v18627_v44, %v24359_v37  ;;  %v18633_v45 = vadd.f32 %v18548_v59, %v17972_v21  ;;  %v14028_v6 = vpop.f32.mrb[19].mxu0 }
 0x409   : > { %14339 = vst [vmem:[%s24373_s21 + $0x68] sm:$0xff] %v14307_v19  ;;  %v14239_v43 = vmul.f32 %v18630_v29, %v24359_v37  ;;  %v18636_v34 = vadd.f32 %v14028_v6, %v7321_v58 }
 0x40a   : > { %v14280_v36 = vadd.f32 %v24361_v54, %v14241_v49  ;;  %v14242_v12 = vmul.f32 %v18633_v45, %v24359_v37  ;;  %v17975_v62 = vpop.f32.mrb[20].mxu1 }
 0x40b   : > { %v14278_v2 = vadd.f32 %v24361_v54, %v14239_v43  ;;  %v14240_v61 = vmul.f32 %v18636_v34, %v24359_v37  ;;  %v7334_v18 = vpop.f32.mrb[21].mxu1 }
 0x40c   : > { %v14312_v25 = vmax.f32 %v14280_v36, 0.0  ;;  %v14281_v10 = vadd.f32 %v24361_v54, %v14242_v12  ;;  %v17976_v48 = vpop.f32.mrb[22].mxu1 }
 0x40d   : > { %v14310_v5 = vmax.f32 %v14278_v2, 0.0  ;;  %v14279_v33 = vadd.f32 %v24361_v54, %v14240_v61  ;;  %v18551_v40 = vpop.f32.mrb[20].mxu0  ;;  %v7337_v55 = vpop.f32.mrb[23].mxu1 }
 0x40e   : > { %14344 = vst [vmem:[%s24373_s21 + $0x90] sm:$0xff] %v14312_v25  ;;  %v14313_v28 = vmax.f32 %v14281_v10, 0.0  ;;  %v18639_v41 = vadd.f32 %v18551_v40, %v17975_v62  ;;  %v14041_v42 = vpop.f32.mrb[21].mxu0 }
 0x40f   : > { %14342 = vst [vmem:[%s24373_s21 + $0x80] sm:$0xff] %v14310_v5  ;;  %v14311_v47 = vmax.f32 %v14279_v33, 0.0  ;;  %v18642_v17 = vadd.f32 %v14041_v42, %v7334_v18  ;;  %v18552_v20 = vpop.f32.mrb[22].mxu0 }
 0x410   : > { %14345 = vst [vmem:[%s24373_s21 + $0x98] sm:$0xff] %v14313_v28  ;;  %v14245_v35 = vmul.f32 %v18639_v41, %v24359_v37  ;;  %v18645_v57 = vadd.f32 %v18552_v20, %v17976_v48  ;;  %v14044_v3 = vpop.f32.mrb[23].mxu0 }
 0x411   : > { %14343 = vst [vmem:[%s24373_s21 + $0x88] sm:$0xff] %v14311_v47  ;;  %v14243_v23 = vmul.f32 %v18642_v17, %v24359_v37  ;;  %v18648_v8 = vadd.f32 %v14044_v3, %v7337_v55 }
 0x412   : > { %v14284_v26 = vadd.f32 %v24361_v54, %v14245_v35  ;;  %v14246_v32 = vmul.f32 %v18645_v57, %v24359_v37  ;;  %v17979_v31 = vpop.f32.mrb[24].mxu1 }
 0x413   : > { %v14282_v16 = vadd.f32 %v24361_v54, %v14243_v23  ;;  %v14244_v52 = vmul.f32 %v18648_v8, %v24359_v37  ;;  %v7350_v1 = vpop.f32.mrb[25].mxu1 }
 0x414   : > { %v14316_v63 = vmax.f32 %v14284_v26, 0.0  ;;  %v14285_v15 = vadd.f32 %v24361_v54, %v14246_v32  ;;  %v17980_v38 = vpop.f32.mrb[26].mxu1 }
 0x415   : > { %v14314_v30 = vmax.f32 %v14282_v16, 0.0  ;;  %v14283_v9 = vadd.f32 %v24361_v54, %v14244_v52  ;;  %v18555_v51 = vpop.f32.mrb[24].mxu0  ;;  %v7353_v50 = vpop.f32.mrb[27].mxu1 }
 0x416   : > { %14348 = vst [vmem:[%s24373_s21 + $0xb0] sm:$0xff] %v14316_v63  ;;  %v14317_v27 = vmax.f32 %v14285_v15, 0.0  ;;  %v18651_v0 = vadd.f32 %v18555_v51, %v17979_v31  ;;  %v14057_v14 = vpop.f32.mrb[25].mxu0 }
 0x417   : > { %14346 = vst [vmem:[%s24373_s21 + $0xa0] sm:$0xff] %v14314_v30  ;;  %v14315_v22 = vmax.f32 %v14283_v9, 0.0  ;;  %v18654_v13 = vadd.f32 %v14057_v14, %v7350_v1  ;;  %v18556_v4 = vpop.f32.mrb[26].mxu0 }
 0x418   : > { %14349 = vst [vmem:[%s24373_s21 + $0xb8] sm:$0xff] %v14317_v27  ;;  %v14249_v46 = vmul.f32 %v18651_v0, %v24359_v37  ;;  %v18657_v39 = vadd.f32 %v18556_v4, %v17980_v38  ;;  %v14060_v60 = vpop.f32.mrb[27].mxu0 }
 0x419   : > { %14347 = vst [vmem:[%s24373_s21 + $0xa8] sm:$0xff] %v14315_v22  ;;  %v14247_v21 = vmul.f32 %v18654_v13, %v24359_v37  ;;  %v18660_v24 = vadd.f32 %v14060_v60, %v7353_v50 }
 0x41a   : > { %v14288_v11 = vadd.f32 %v24361_v54, %v14249_v46  ;;  %v14250_v56 = vmul.f32 %v18657_v39, %v24359_v37  ;;  %v17983_v58 = vpop.f32.mrb[28].mxu1 }
 0x41b   : > { %v14286_v53 = vadd.f32 %v24361_v54, %v14247_v21  ;;  %v14248_v44 = vmul.f32 %v18660_v24, %v24359_v37  ;;  %v7366_v7 = vpop.f32.mrb[29].mxu1 }
 0x41c   : > { %v14320_v19 = vmax.f32 %v14288_v11, 0.0  ;;  %v14289_v29 = vadd.f32 %v24361_v54, %v14250_v56  ;;  %v17984_v59 = vpop.f32.mrb[30].mxu1 }
 0x41d   : > { %v14318_v49 = vmax.f32 %v14286_v53, 0.0  ;;  %v14287_v45 = vadd.f32 %v24361_v54, %v14248_v44  ;;  %v18559_v6 = vpop.f32.mrb[28].mxu0  ;;  %v7369_v43 = vpop.f32.mrb[31].mxu1 }
 0x41e   : > { %14352 = vst [vmem:[%s24373_s21 + $0xd0] sm:$0xff] %v14320_v19  ;;  %v14321_v34 = vmax.f32 %v14289_v29, 0.0  ;;  %v18663_v36 = vadd.f32 %v18559_v6, %v17983_v58  ;;  %v14073_v12 = vpop.f32.mrb[29].mxu0 }
 0x41f   : > { %14350 = vst [vmem:[%s24373_s21 + $0xc0] sm:$0xff] %v14318_v49  ;;  %v14319_v62 = vmax.f32 %v14287_v45, 0.0  ;;  %v18666_v2 = vadd.f32 %v14073_v12, %v7366_v7  ;;  %v18560_v61 = vpop.f32.mrb[30].mxu0 }
 0x420   : > { %14353 = vst [vmem:[%s24373_s21 + $0xd8] sm:$0xff] %v14321_v34  ;;  %v14253_v18 = vmul.f32 %v18663_v36, %v24359_v37  ;;  %v18669_v25 = vadd.f32 %v18560_v61, %v17984_v59  ;;  %v14076_v10 = vpop.f32.mrb[31].mxu0 }
 0x421   : > { %14351 = vst [vmem:[%s24373_s21 + $0xc8] sm:$0xff] %v14319_v62  ;;  %v14251_v48 = vmul.f32 %v18666_v2, %v24359_v37  ;;  %v18672_v5 = vadd.f32 %v14076_v10, %v7369_v43 }
 0x422   : > { %v14292_v33 = vadd.f32 %v24361_v54, %v14253_v18  ;;  %v14254_v40 = vmul.f32 %v18669_v25, %v24359_v37 }
 0x423   : > { %v14290_v55 = vadd.f32 %v24361_v54, %v14251_v48  ;;  %v14252_v28 = vmul.f32 %v18672_v5, %v24359_v37 }
 0x424   : > { %v14324_v41 = vmax.f32 %v14292_v33, 0.0  ;;  %v14293_v42 = vadd.f32 %v24361_v54, %v14254_v40 }
 0x425   : > { %v14322_v47 = vmax.f32 %v14290_v55, 0.0  ;;  %v14291_v17 = vadd.f32 %v24361_v54, %v14252_v28 }
 0x426   : > { %14356 = vst [vmem:[%s24373_s21 + $0xf0] sm:$0xff] %v14324_v41  ;;  %v14325_v20 = vmax.f32 %v14293_v42, 0.0 }
 0x427   : > { %14354 = vst [vmem:[%s24373_s21 + $0xe0] sm:$0xff] %v14322_v47  ;;  %v14323_v37 = vmax.f32 %v14291_v17, 0.0 }
 0x428   : > { %14357 = vst [vmem:[%s24373_s21 + $0xf8] sm:$0xff] %v14325_v20 }
 0x429   : > { %14355 = vst [vmem:[%s24373_s21 + $0xe8] sm:$0xff] %v14323_v37 }
 0x42a   : > { %19784 = shalt.err (!%p19781_p5)
}
 0x42b   : > { %s19785_s24 = scalar_lea.hbm %s24471_s12, 4096  ;;  %s19789_s30 = scalar_lea.hbm %s24530_s4, 8192 }
 0x42c   : > { %p19786_p6 = scmp.ne.s32.totalorder %s24471_s12, %s19785_s24  ;;  %p19790_p10 = scmp.lt.u32.totalorder %s24471_s12, %s24530_s4 }
 0x42d   : > { %p19791_p11 = scmp.lt.u32.totalorder %s19789_s30, %s19785_s24  ;;  %p19793_p13 = scmp.lt.u32.totalorder %s19785_s24, %s24471_s12 }
 0x42e   : > { %p19787_p7 = pnand %p19786_p6, %p19919_p4 }
 0x42f   : > { %p19792_p12 = por %p19791_p11, %p19790_p10 }
 0x430   : > { %p19788_p9 = pneg %p19787_p7 }
 0x431   : > { %p19794_p0 = por %p19793_p13, %p19792_p12 }
 0x433   : > { %p19795_p1 = pnand %p19794_p0, %p19788_p9 }
 0x435   : > { %19798 = shalt.err (!%p19795_p1)
}
 0x436   : > { %s19852_s21 = smov 128   ;;  %s19853_s7 = smov 8  }
 0x437   : > { %19410 = dma.vmem_to_hbm [thread:$0]  (%p19919_p4), %s24473_s8, 4096, %s24471_s12, %s24480_s18, %s19852_s21, %s19852_s21, %s19853_s7  }
 0x438 PF: > { %p19416_p2 = scmp.ge.s32.totalorder %s19849_s20, 2  ;;  %s14389_s9 = sand.u32 1, %s19829_s15  }
 0x439   : > { %s14390_s10 = scalar_lea.sflag [#allocation3], %s14389_s9 }
 0x43a   : > { %p19413_p3 = pnand %p19416_p2, %p19926_p8 }
 0x43c   : > { %19824 = dma.done.wait (!%p19413_p3), %s14390_s10, 4096  }
 0x43d   : > { %19826 = vsyncadd (!%p19413_p3), %s14390_s10, 4294963200  ;;  %s17_s20 = sadd.s32 1, %s19849_s20   ;;  %s24631_s15 = smov %s19833_s16 }
 0x43e   : > { %p14_p5 = scmp.ge.s32.totalorder %s17_s20, 4   ;;  %s24632_s16 = smov %s19837_s17 }
 0x43f   : > { %s24633_s17 = smov %s19932_s28  ;;  %s24634_s18 = smov %s19845_s19 }
 0x440   : > { %s24635_s19 = smov %s24637_s23  ;;  %16 = sbr.rel (!%p14_p5) target bundleno = 4 (0x4), region = 105 }
 0x447   :  { %14395 = vsyncpa [#allocation3], 1 }
 0x448   :  { %14397 = vsyncpa [#allocation3 + $0x1], 1 }

</bundles_post_ra>
